<compile_context>
chip_gen: v5e
topology: v5e:2x2
jax: 0.10.0
libtpu: 0.0.40
codegen_flags: <defaults>
</compile_context>

<pallas_src>
import functools
import math

import jax
import jax.numpy as jnp
from jax.experimental import pallas as pl
from jax.experimental.pallas import tpu as pltpu

# ---- model hyper-parameters (PyTorch defaults) ------------------------------
EMB_DIMS = 64                      # d_model of the SelfAttention blocks
NUM_HEADS = 4
HEAD_DIM = EMB_DIMS // NUM_HEADS   # 16  (also GCN embedding dims / conv width)
OBS_LEN = 8
PRED_LEN = 12
N_TCN = 5
OUT_DIMS = 5

_NEG_BIG = 1e30                    # additive block-mask value (off-block = -_NEG_BIG)
_ATT_SCALE = 1.0 / math.sqrt(EMB_DIMS)


# =============================================================================
# Fused Pallas kernel: the whole forward pass in one invocation
# =============================================================================
def _fused_forward_kernel(
        xs_nt_ref, xs_tn_ref, xt_nt_ref,
        msim_s_ref, madd_s_ref, msim_t_ref, madd_t_ref,
        we_s_ref, be_s_ref, wq_s_ref, bq_s_ref, wk_s_ref, bk_s_ref,
        we_t_ref, be_t_ref, wq_t_ref, bq_t_ref, wk_t_ref, bk_t_ref,
        wg_s_ref, wg_t_ref, fus_ref, gcn_alpha_ref,
        tcn_w_ref, tcn_b_ref, tap_mask_ref,
        wout_ref, bout_ref, alphas_ref,
        out_ref):
    f32 = jnp.float32
    NT = xs_nt_ref.shape[0]                       # N*T node count (rows)
    n_ped = NT // OBS_LEN
    L = n_ped * NUM_HEADS * HEAD_DIM              # TCN lane width (n, head, feat)

    def softmax_last(x):
        m = jnp.max(x, axis=-1, keepdims=True)
        e = jnp.exp(x - m)
        denom = jnp.sum(e, axis=-1, keepdims=True)
        return e * pl.reciprocal(denom, approx=True)      # EUP, off the VPU path

    # ---- batched projections over all 48 nodes (single matmuls) -------------
    emb_qs = jnp.dot(xs_nt_ref[...], we_s_ref[...], preferred_element_type=f32) + be_s_ref[...]
    emb_ks = jnp.dot(xs_tn_ref[...], we_s_ref[...], preferred_element_type=f32) + be_s_ref[...]
    emb_t = jnp.dot(xt_nt_ref[...], we_t_ref[...], preferred_element_type=f32) + be_t_ref[...]

    # GraphConvolution re-associated: (adj @ g) @ W  ==  adj @ (g @ W)
    gw_s = jnp.dot(xs_tn_ref[...], wg_s_ref[...], preferred_element_type=f32)   # (NT, 16)
    gw_t = jnp.dot(xs_nt_ref[...], wg_t_ref[...], preferred_element_type=f32)   # (NT, 16)

    def attention_gcn_heads(emb_q, emb_k, wq_ref, bq_ref, wk_ref, bk_ref,
                            msim, madd, gw):
        """Per-head: block-diagonal attention (softmax, mask, softmax) + GCN."""
        outs = []
        for h in range(NUM_HEADS):
            q = jnp.dot(emb_q, wq_ref[h], preferred_element_type=f32) + bq_ref[h]   # (NT,16)
            k = jnp.dot(emb_k, wk_ref[h], preferred_element_type=f32) + bk_ref[h]   # (NT,16)
            s = jax.lax.dot_general(q, k, (((1,), (1,)), ((), ())),
                                    preferred_element_type=f32) * _ATT_SCALE        # (NT,NT)
            p = softmax_last(s + madd)                 # first softmax (block-restricted)
            adj = softmax_last(p * msim + madd)        # similarity mask + second softmax
            outs.append(jnp.dot(adj, gw, preferred_element_type=f32))               # (NT,16)
        return outs

    heads_s = attention_gcn_heads(emb_qs, emb_ks, wq_s_ref, bq_s_ref, wk_s_ref, bk_s_ref,
                                  msim_s_ref[...], madd_s_ref[...], gw_s)
    heads_t = attention_gcn_heads(emb_t, emb_t, wq_t_ref, bq_t_ref, wk_t_ref, bk_t_ref,
                                  msim_t_ref[...], madd_t_ref[...], gw_t)

    # ---- both GCN PReLUs + both 1x1 fusion convs as ONE lane-dense matmul ----
    g = jnp.concatenate(heads_s + heads_t, axis=-1)                                  # (NT,128)
    alpha_vec = gcn_alpha_ref[...]                                                    # (1,128)
    g = jnp.where(g >= 0.0, g, alpha_vec * g)                                         # PReLU x2
    fused = jnp.dot(g, fus_ref[...], preferred_element_type=f32)                      # (NT,64)

    # ---- relayout to TCN layout: rows = time channel, lanes = (ped, head, feat)
    x0 = jnp.concatenate(
        [fused[n * OBS_LEN:(n + 1) * OBS_LEN, :] for n in range(n_ped)], axis=1)      # (8, L)
    feats = jnp.concatenate([x0, jnp.zeros((PRED_LEN - OBS_LEN, L), f32)], axis=0)    # (12, L)

    def conv3x3_prelu(x, layer):
        """Conv2d(3x3, padding=1) over the (4 heads, 16 feat) map + PReLU.
        Taps are lane rolls + boundary masks, one (12,12)@(12,L) matmul per tap."""
        acc = None
        for tap in range(9):
            dh, dw = divmod(tap, 3)
            shift = (dh - 1) * HEAD_DIM + (dw - 1)
            xt = x if shift == 0 else pltpu.roll(x, (-shift) % L, axis=1)
            xt = xt * tap_mask_ref[tap]                                               # (1,L) mask
            part = jnp.dot(tcn_w_ref[layer, tap], xt, preferred_element_type=f32)     # (12,L)
            acc = part if acc is None else acc + part
        acc = acc + tcn_b_ref[layer]                                                  # (12,1) bias
        alpha = alphas_ref[0, layer]
        return jnp.where(acc >= 0.0, acc, alpha * acc)                                # PReLU

    feats = conv3x3_prelu(feats, 0)
    for layer in range(1, N_TCN):
        feats = conv3x3_prelu(feats, layer) + feats        # residual (dropout p=0)

    # ---- output head: Linear(16->5) + mean over heads, folded into one matmul
    out_ref[...] = jnp.dot(feats, wout_ref[...], preferred_element_type=f32) + bout_ref[...]


# =============================================================================
# Plain-JAX glue: similarity masks (cosine / arccos preprocessing)
# =============================================================================
def _cosine_similarity(a, b, eps=1e-8):
    num = jnp.sum(a * b, axis=-1)
    na = jnp.sqrt(jnp.sum(a * a, axis=-1))
    nb = jnp.sqrt(jnp.sum(b * b, axis=-1))
    return num / jnp.maximum(na * nb, eps)


def _compute_similarity_masks(graph_sq, obs_sq, identity_temporal):
    # graph_sq: (T, N, 3); obs_sq: (N, 2, T); identity_temporal: (N, T, T)
    T, N, _ = graph_sq.shape
    spatial_graph = graph_sq[:, :, 1:]                                        # (T, N, 2)

    dis_graph = obs_sq[None, :, :, :] - obs_sq[:, None, :, :]                 # (N, N, 2, T)
    dis_graph = jnp.transpose(dis_graph, (3, 0, 1, 2))                        # (T, N, N, 2)
    distance = jnp.sqrt(jnp.sum(dis_graph * dis_graph, axis=3))               # (T, N, N)
    spatial_distance = jnp.where(distance < 5.0, 1.0, 0.0)

    spa_cos = _cosine_similarity(spatial_graph[:, :, None, :], dis_graph)     # (T, N, N)
    spa_cos = spa_cos + jnp.eye(N, dtype=jnp.float32)[None]
    angles = jnp.arccos(jnp.clip(spa_cos, -1.0, 1.0)) * (180.0 / math.pi)
    spa_mask = jnp.where(angles * spatial_distance < 10.0, 1.0, 0.0)          # (T, N, N)

    temporal_sgraph = jnp.transpose(spatial_graph, (1, 0, 2))                 # (N, T, 2)
    tv = temporal_sgraph[:, 1:, :]
    tem_cos = _cosine_similarity(tv[:, :, None, :], tv[:, None, :, :])        # (N, T-1, T-1)
    tem_deg = jnp.arccos(jnp.clip(tem_cos, -1.0, 1.0)) * (180.0 / math.pi)
    tem_sim = jnp.where(tem_deg > 10.0, 1.0, 0.0)
    temporal_similarity = jnp.zeros((N, T, T), jnp.float32).at[:, 1:, 1:].set(tem_sim)
    tem_mask = temporal_similarity + identity_temporal                        # (N, T, T)
    # NOTE: identity[0] is unused — exactly as in the PyTorch reference.
    return spa_mask, tem_mask


def _make_tap_masks(n_ped):
    """Validity masks of the 9 conv taps in the (ped, head, feat) lane layout."""
    L = n_ped * NUM_HEADS * HEAD_DIM
    lane = jnp.arange(L)
    hh = (lane // HEAD_DIM) % NUM_HEADS
    ww = lane % HEAD_DIM
    masks = []
    for dh in range(3):
        for dw in range(3):
            h2 = hh + (dh - 1)
            w2 = ww + (dw - 1)
            valid = (h2 >= 0) & (h2 < NUM_HEADS) & (w2 >= 0) & (w2 < HEAD_DIM)
            masks.append(valid.astype(jnp.float32))
    return jnp.stack(masks)[:, None, :]                                       # (9, 1, L)


# =============================================================================
# Full forward pass (one pallas_call)
# =============================================================================
def trajectory_model_forward(kp, graph, identity, obs_traj):
    # graph: (1, T, N, 3); identity: ((T,N,N), (N,T,T)); obs_traj: (1, N, 2, T)
    graph_sq = graph[0]                                                       # (T, N, 3)
    obs_sq = obs_traj[0]                                                      # (N, 2, T)
    T, n_ped, _ = graph_sq.shape
    NT = n_ped * T

    spatial_graph = graph_sq[:, :, 1:]                                        # (T, N, 2)
    temporal_graph = jnp.transpose(graph_sq, (1, 0, 2))                       # (N, T, 3)

    spa_mask, tem_mask = _compute_similarity_masks(graph_sq, obs_sq, identity[1])

    # Block-diagonal (NT, NT) expansions of the masks.
    #   spatial: rows (n, t)  [n-major],  cols (t', m)  [t-major], block iff t == t'
    #   temporal: rows (n, t) [n-major],  cols (m, t')  [n-major], block iff n == m
    eye_t = jnp.eye(T, dtype=jnp.float32)
    eye_n = jnp.eye(n_ped, dtype=jnp.float32)
    msim_s = (jnp.transpose(spa_mask, (1, 0, 2))[:, :, None, :] *
              eye_t[None, :, :, None]).reshape(NT, NT)
    msim_t = (tem_mask[:, :, None, :] * eye_n[:, None, :, None]).reshape(NT, NT)
    madd_s = jnp.broadcast_to((eye_t - 1.0)[None, :, :, None] * _NEG_BIG,
                              (n_ped, T, T, n_ped)).reshape(NT, NT)
    madd_t = jnp.broadcast_to((eye_n - 1.0)[:, None, :, None] * _NEG_BIG,
                              (n_ped, T, n_ped, T)).reshape(NT, NT)

    # Flattened node feature lists (layout glue only).
    xs_tn = spatial_graph.reshape(NT, 2)                                      # rows t*N + n
    xs_nt = jnp.transpose(spatial_graph, (1, 0, 2)).reshape(NT, 2)            # rows n*T + t
    xt_nt = temporal_graph.reshape(NT, 3)                                     # rows n*T + t
    tap_masks = _make_tap_masks(n_ped)                                        # (9, 1, L)

    vmem = pl.BlockSpec(memory_space=pltpu.MemorySpace.VMEM)
    smem = pl.BlockSpec(memory_space=pltpu.MemorySpace.SMEM)

    pred_flat = pl.pallas_call(
        _fused_forward_kernel,
        out_shape=jax.ShapeDtypeStruct((PRED_LEN, n_ped * OUT_DIMS), jnp.float32),
        in_specs=[vmem] * 28 + [smem],
        out_specs=vmem,
    )(xs_nt, xs_tn, xt_nt, msim_s, madd_s, msim_t, madd_t,
      kp['we_s'], kp['be_s'], kp['wq_s'], kp['bq_s'], kp['wk_s'], kp['bk_s'],
      kp['we_t'], kp['be_t'], kp['wq_t'], kp['bq_t'], kp['wk_t'], kp['bk_t'],
      kp['wg_s'], kp['wg_t'], kp['fus_cat'], kp['gcn_alpha_vec'],
      kp['tcn_w'], kp['tcn_b'], tap_masks, kp['wout_big'], kp['bout_big'],
      kp['alphas'])

    return pred_flat.reshape(PRED_LEN, n_ped, OUT_DIMS)                       # (12, N, 5)


# =============================================================================
# Parameters: synthetic torch-layout weights + kernel-ready re-layout
# =============================================================================
def init_params(key):
    keys = jax.random.split(key, 32)

    def nrm(k, shape, scale=0.1):
        return jax.random.normal(k, shape, dtype=jnp.float32) * scale

    p = {}
    # SelfAttention (spatial in=2 / temporal in=3) — torch nn.Linear layout (out, in)
    p['spa_emb_w'] = nrm(keys[0], (EMB_DIMS, 2));        p['spa_emb_b'] = nrm(keys[1], (EMB_DIMS,), 0.05)
    p['spa_q_w'] = nrm(keys[2], (EMB_DIMS, EMB_DIMS));   p['spa_q_b'] = nrm(keys[3], (EMB_DIMS,), 0.05)
    p['spa_k_w'] = nrm(keys[4], (EMB_DIMS, EMB_DIMS));   p['spa_k_b'] = nrm(keys[5], (EMB_DIMS,), 0.05)
    p['tem_emb_w'] = nrm(keys[6], (EMB_DIMS, 3));        p['tem_emb_b'] = nrm(keys[7], (EMB_DIMS,), 0.05)
    p['tem_q_w'] = nrm(keys[8], (EMB_DIMS, EMB_DIMS));   p['tem_q_b'] = nrm(keys[9], (EMB_DIMS,), 0.05)
    p['tem_k_w'] = nrm(keys[10], (EMB_DIMS, EMB_DIMS));  p['tem_k_b'] = nrm(keys[11], (EMB_DIMS,), 0.05)
    # GraphConvolution: Linear(2,16,bias=False) + PReLU(init=0.25)
    p['gcn_s_w'] = nrm(keys[12], (HEAD_DIM, 2));         p['gcn_s_a'] = jnp.full((1,), 0.25, jnp.float32)
    p['gcn_t_w'] = nrm(keys[13], (HEAD_DIM, 2));         p['gcn_t_a'] = jnp.full((1,), 0.25, jnp.float32)
    # head-fusion 1x1 convs (no bias)
    p['fus_s_w'] = nrm(keys[14], (NUM_HEADS, NUM_HEADS))
    p['fus_t_w'] = nrm(keys[15], (NUM_HEADS, NUM_HEADS))
    # TCN: Conv2d(3x3, padding=1) + PReLU, torch layout (Cout, Cin, 3, 3)
    p['tcn_w'] = [nrm(keys[16], (PRED_LEN, OBS_LEN, 3, 3))] + \
                 [nrm(keys[17 + j], (PRED_LEN, PRED_LEN, 3, 3)) for j in range(N_TCN - 1)]
    p['tcn_b'] = [nrm(keys[21 + j], (PRED_LEN,), 0.05) for j in range(N_TCN)]
    p['tcn_a'] = [jnp.full((1,), 0.25, jnp.float32) for _ in range(N_TCN)]
    # output Linear(16, 5)
    p['out_w'] = nrm(keys[26], (OUT_DIMS, HEAD_DIM));    p['out_b'] = nrm(keys[27], (OUT_DIMS,), 0.05)
    return p


def prepare_kernel_params(p, n_ped):
    """Re-layout torch-style weights into kernel-ready form (done once, off the hot path)."""
    H, Dh = NUM_HEADS, HEAD_DIM

    def head_split_w(w):   # torch (out, in) -> (H, in, Dh)
        return jnp.transpose(jnp.transpose(w, (1, 0)).reshape(w.shape[1], H, Dh), (1, 0, 2))

    def head_split_b(b):   # (out,) -> (H, 1, Dh)
        return b.reshape(H, Dh)[:, None, :]

    kp = {}
    kp['we_s'] = p['spa_emb_w'].T;  kp['be_s'] = p['spa_emb_b'][None, :]
    kp['wq_s'] = head_split_w(p['spa_q_w']); kp['bq_s'] = head_split_b(p['spa_q_b'])
    kp['wk_s'] = head_split_w(p['spa_k_w']); kp['bk_s'] = head_split_b(p['spa_k_b'])
    kp['we_t'] = p['tem_emb_w'].T;  kp['be_t'] = p['tem_emb_b'][None, :]
    kp['wq_t'] = head_split_w(p['tem_q_w']); kp['bq_t'] = head_split_b(p['tem_q_b'])
    kp['wk_t'] = head_split_w(p['tem_k_w']); kp['bk_t'] = head_split_b(p['tem_k_b'])
    kp['wg_s'] = p['gcn_s_w'].T
    kp['wg_t'] = p['gcn_t_w'].T

    # Both 1x1 head-fusion convs as ONE stacked Kronecker-expanded (128,64) matrix
    # (left half of the (48,128) GCN slab = spatial heads, right half = temporal).
    eye_dh = jnp.eye(Dh, dtype=jnp.float32)
    kp['fus_cat'] = jnp.concatenate(
        [jnp.kron(p['fus_s_w'].T, eye_dh), jnp.kron(p['fus_t_w'].T, eye_dh)], axis=0)

    # Per-lane PReLU alphas for the two GCN branches (applied on the (48,128) slab).
    kp['gcn_alpha_vec'] = jnp.concatenate(
        [jnp.repeat(p['gcn_s_a'], EMB_DIMS), jnp.repeat(p['gcn_t_a'], EMB_DIMS)])[None, :]

    # TCN weights: (Cout, Cin, 3, 3) -> per-tap (9, Cout, Cin), Cin padded to PRED_LEN.
    taps_all = []
    for w in p['tcn_w']:
        taps = jnp.transpose(w, (2, 3, 0, 1)).reshape(9, w.shape[0], w.shape[1])
        if w.shape[1] < PRED_LEN:
            taps = jnp.pad(taps, ((0, 0), (0, 0), (0, PRED_LEN - w.shape[1])))
        taps_all.append(taps)
    kp['tcn_w'] = jnp.stack(taps_all)                                   # (5, 9, 12, 12)
    kp['tcn_b'] = jnp.stack([b[:, None] for b in p['tcn_b']])           # (5, 12, 1)

    # Output Linear(16,5): fold the mean-over-heads and the per-ped blocking in.
    w_out = p['out_w'].T / float(H)                                     # (16, 5)
    kp['wout_big'] = jnp.kron(jnp.eye(n_ped, dtype=jnp.float32), jnp.tile(w_out, (H, 1)))
    kp['bout_big'] = jnp.tile(p['out_b'], (n_ped,))[None, :]            # (1, N*5)

    # PReLU alphas for the 5 TCN layers (SMEM scalars).
    kp['alphas'] = jnp.concatenate(list(p['tcn_a'])
                                   + [jnp.zeros((3,), jnp.float32)]).reshape(1, 8)
    return kp


# =============================================================================
if __name__ == "__main__":
    key = jax.random.PRNGKey(0)
    N_PED = 6
    T = OBS_LEN

    k1, k2, k3 = jax.random.split(key, 3)
    graph = jax.random.normal(k1, (1, T, N_PED, 3), dtype=jnp.float32)
    obs_traj = jax.random.normal(k2, (1, N_PED, 2, T), dtype=jnp.float32)
    identity = (
        jnp.ones((T, N_PED, N_PED), jnp.float32) * jnp.eye(N_PED, dtype=jnp.float32),
        jnp.ones((N_PED, T, T), jnp.float32) * jnp.eye(T, dtype=jnp.float32),
    )
    params = init_params(k3)
    kparams = prepare_kernel_params(params, N_PED)      # one-time weight re-layout

    fwd = jax.jit(functools.partial(trajectory_model_forward, kparams))
    prediction = jax.block_until_ready(fwd(graph, identity, obs_traj))

    assert prediction.shape == (PRED_LEN, N_PED, OUT_DIMS), prediction.shape
    assert bool(jnp.all(jnp.isfinite(prediction)))
    print("KERNEL_OK")
</pallas_src>

<mosaic_0001>
module attributes {stable_mosaic.version = 11 : i64} {
  func.func @_fused_forward_kernel(%arg0: memref<48x2xf32, #tpu.memory_space<vmem>>, %arg1: memref<48x2xf32, #tpu.memory_space<vmem>>, %arg2: memref<48x3xf32, #tpu.memory_space<vmem>>, %arg3: memref<48x48xf32, #tpu.memory_space<vmem>>, %arg4: memref<48x48xf32, #tpu.memory_space<vmem>>, %arg5: memref<48x48xf32, #tpu.memory_space<vmem>>, %arg6: memref<48x48xf32, #tpu.memory_space<vmem>>, %arg7: memref<2x64xf32, #tpu.memory_space<vmem>>, %arg8: memref<1x64xf32, #tpu.memory_space<vmem>>, %arg9: memref<4x64x16xf32, #tpu.memory_space<vmem>>, %arg10: memref<4x1x16xf32, #tpu.memory_space<vmem>>, %arg11: memref<4x64x16xf32, #tpu.memory_space<vmem>>, %arg12: memref<4x1x16xf32, #tpu.memory_space<vmem>>, %arg13: memref<3x64xf32, #tpu.memory_space<vmem>>, %arg14: memref<1x64xf32, #tpu.memory_space<vmem>>, %arg15: memref<4x64x16xf32, #tpu.memory_space<vmem>>, %arg16: memref<4x1x16xf32, #tpu.memory_space<vmem>>, %arg17: memref<4x64x16xf32, #tpu.memory_space<vmem>>, %arg18: memref<4x1x16xf32, #tpu.memory_space<vmem>>, %arg19: memref<2x16xf32, #tpu.memory_space<vmem>>, %arg20: memref<2x16xf32, #tpu.memory_space<vmem>>, %arg21: memref<128x64xf32, #tpu.memory_space<vmem>>, %arg22: memref<1x128xf32, #tpu.memory_space<vmem>>, %arg23: memref<5x9x12x12xf32, #tpu.memory_space<vmem>>, %arg24: memref<5x12x1xf32, #tpu.memory_space<vmem>>, %arg25: memref<9x1x384xf32, #tpu.memory_space<vmem>>, %arg26: memref<384x30xf32, #tpu.memory_space<vmem>>, %arg27: memref<1x30xf32, #tpu.memory_space<vmem>>, %arg28: memref<1x8xf32, #tpu.memory_space<smem>>, %arg29: memref<12x30xf32, #tpu.memory_space<vmem>>) attributes {dimension_semantics = [], scalar_prefetch = 0 : i64, scratch_operands = 0 : i64, tpu.core_type = #tpu.core_type<tc>} {
    %c0 = arith.constant 0 : index
    %c0_0 = arith.constant 0 : index
    %0 = vector.load %arg0[%c0, %c0_0] : memref<48x2xf32, #tpu.memory_space<vmem>>, vector<48x2xf32>
    %c0_1 = arith.constant 0 : index
    %c0_2 = arith.constant 0 : index
    %1 = vector.load %arg7[%c0_1, %c0_2] : memref<2x64xf32, #tpu.memory_space<vmem>>, vector<2x64xf32>
    %cst = arith.constant dense<0.000000e+00> : vector<48x64xf32>
    %2 = tpu.matmul %0, %1, %cst {dimension_numbers = #tpu.dot_dimension_numbers<[1], [0], [0], [1], [0, 0, 1, 1], [], []>} : vector<48x2xf32>, vector<2x64xf32>, vector<48x64xf32> -> vector<48x64xf32>
    %c0_3 = arith.constant 0 : index
    %c0_4 = arith.constant 0 : index
    %3 = vector.load %arg8[%c0_3, %c0_4] : memref<1x64xf32, #tpu.memory_space<vmem>>, vector<1x64xf32>
    %4 = vector.broadcast %3 : vector<1x64xf32> to vector<48x64xf32>
    %5 = arith.addf %2, %4 : vector<48x64xf32>
    %c0_5 = arith.constant 0 : index
    %c0_6 = arith.constant 0 : index
    %6 = vector.load %arg1[%c0_5, %c0_6] : memref<48x2xf32, #tpu.memory_space<vmem>>, vector<48x2xf32>
    %c0_7 = arith.constant 0 : index
    %c0_8 = arith.constant 0 : index
    %7 = vector.load %arg7[%c0_7, %c0_8] : memref<2x64xf32, #tpu.memory_space<vmem>>, vector<2x64xf32>
    %cst_9 = arith.constant dense<0.000000e+00> : vector<48x64xf32>
    %8 = tpu.matmul %6, %7, %cst_9 {dimension_numbers = #tpu.dot_dimension_numbers<[1], [0], [0], [1], [0, 0, 1, 1], [], []>} : vector<48x2xf32>, vector<2x64xf32>, vector<48x64xf32> -> vector<48x64xf32>
    %c0_10 = arith.constant 0 : index
    %c0_11 = arith.constant 0 : index
    %9 = vector.load %arg8[%c0_10, %c0_11] : memref<1x64xf32, #tpu.memory_space<vmem>>, vector<1x64xf32>
    %10 = vector.broadcast %9 : vector<1x64xf32> to vector<48x64xf32>
    %11 = arith.addf %8, %10 : vector<48x64xf32>
    %c0_12 = arith.constant 0 : index
    %c0_13 = arith.constant 0 : index
    %12 = vector.load %arg2[%c0_12, %c0_13] : memref<48x3xf32, #tpu.memory_space<vmem>>, vector<48x3xf32>
    %c0_14 = arith.constant 0 : index
    %c0_15 = arith.constant 0 : index
    %13 = vector.load %arg13[%c0_14, %c0_15] : memref<3x64xf32, #tpu.memory_space<vmem>>, vector<3x64xf32>
    %cst_16 = arith.constant dense<0.000000e+00> : vector<48x64xf32>
    %14 = tpu.matmul %12, %13, %cst_16 {dimension_numbers = #tpu.dot_dimension_numbers<[1], [0], [0], [1], [0, 0, 1, 1], [], []>} : vector<48x3xf32>, vector<3x64xf32>, vector<48x64xf32> -> vector<48x64xf32>
    %c0_17 = arith.constant 0 : index
    %c0_18 = arith.constant 0 : index
    %15 = vector.load %arg14[%c0_17, %c0_18] : memref<1x64xf32, #tpu.memory_space<vmem>>, vector<1x64xf32>
    %16 = vector.broadcast %15 : vector<1x64xf32> to vector<48x64xf32>
    %17 = arith.addf %14, %16 : vector<48x64xf32>
    %c0_19 = arith.constant 0 : index
    %c0_20 = arith.constant 0 : index
    %18 = vector.load %arg1[%c0_19, %c0_20] : memref<48x2xf32, #tpu.memory_space<vmem>>, vector<48x2xf32>
    %c0_21 = arith.constant 0 : index
    %c0_22 = arith.constant 0 : index
    %19 = vector.load %arg19[%c0_21, %c0_22] : memref<2x16xf32, #tpu.memory_space<vmem>>, vector<2x16xf32>
    %cst_23 = arith.constant dense<0.000000e+00> : vector<48x16xf32>
    %20 = tpu.matmul %18, %19, %cst_23 {dimension_numbers = #tpu.dot_dimension_numbers<[1], [0], [0], [1], [0, 0, 1, 1], [], []>} : vector<48x2xf32>, vector<2x16xf32>, vector<48x16xf32> -> vector<48x16xf32>
    %c0_24 = arith.constant 0 : index
    %c0_25 = arith.constant 0 : index
    %21 = vector.load %arg0[%c0_24, %c0_25] : memref<48x2xf32, #tpu.memory_space<vmem>>, vector<48x2xf32>
    %c0_26 = arith.constant 0 : index
    %c0_27 = arith.constant 0 : index
    %22 = vector.load %arg20[%c0_26, %c0_27] : memref<2x16xf32, #tpu.memory_space<vmem>>, vector<2x16xf32>
    %cst_28 = arith.constant dense<0.000000e+00> : vector<48x16xf32>
    %23 = tpu.matmul %21, %22, %cst_28 {dimension_numbers = #tpu.dot_dimension_numbers<[1], [0], [0], [1], [0, 0, 1, 1], [], []>} : vector<48x2xf32>, vector<2x16xf32>, vector<48x16xf32> -> vector<48x16xf32>
    %c0_29 = arith.constant 0 : index
    %c0_30 = arith.constant 0 : index
    %24 = vector.load %arg3[%c0_29, %c0_30] : memref<48x48xf32, #tpu.memory_space<vmem>>, vector<48x48xf32>
    %c0_31 = arith.constant 0 : index
    %c0_32 = arith.constant 0 : index
    %25 = vector.load %arg4[%c0_31, %c0_32] : memref<48x48xf32, #tpu.memory_space<vmem>>, vector<48x48xf32>
    %c0_33 = arith.constant 0 : index
    %c0_34 = arith.constant 0 : index
    %c0_35 = arith.constant 0 : index
    %26 = vector.load %arg9[%c0_33, %c0_34, %c0_35] : memref<4x64x16xf32, #tpu.memory_space<vmem>>, vector<1x64x16xf32>
    %27 = vector.shape_cast %26 : vector<1x64x16xf32> to vector<64x16xf32>
    %cst_36 = arith.constant dense<0.000000e+00> : vector<48x16xf32>
    %28 = tpu.matmul %5, %27, %cst_36 {dimension_numbers = #tpu.dot_dimension_numbers<[1], [0], [0], [1], [0, 0, 1, 1], [], []>} : vector<48x64xf32>, vector<64x16xf32>, vector<48x16xf32> -> vector<48x16xf32>
    %c0_37 = arith.constant 0 : index
    %c0_38 = arith.constant 0 : index
    %c0_39 = arith.constant 0 : index
    %29 = vector.load %arg10[%c0_37, %c0_38, %c0_39] : memref<4x1x16xf32, #tpu.memory_space<vmem>>, vector<1x1x16xf32>
    %30 = vector.shape_cast %29 : vector<1x1x16xf32> to vector<1x16xf32>
    %31 = vector.broadcast %30 : vector<1x16xf32> to vector<48x16xf32>
    %32 = arith.addf %28, %31 : vector<48x16xf32>
    %c0_40 = arith.constant 0 : index
    %c0_41 = arith.constant 0 : index
    %c0_42 = arith.constant 0 : index
    %33 = vector.load %arg11[%c0_40, %c0_41, %c0_42] : memref<4x64x16xf32, #tpu.memory_space<vmem>>, vector<1x64x16xf32>
    %34 = vector.shape_cast %33 : vector<1x64x16xf32> to vector<64x16xf32>
    %cst_43 = arith.constant dense<0.000000e+00> : vector<48x16xf32>
    %35 = tpu.matmul %11, %34, %cst_43 {dimension_numbers = #tpu.dot_dimension_numbers<[1], [0], [0], [1], [0, 0, 1, 1], [], []>} : vector<48x64xf32>, vector<64x16xf32>, vector<48x16xf32> -> vector<48x16xf32>
    %c0_44 = arith.constant 0 : index
    %c0_45 = arith.constant 0 : index
    %c0_46 = arith.constant 0 : index
    %36 = vector.load %arg12[%c0_44, %c0_45, %c0_46] : memref<4x1x16xf32, #tpu.memory_space<vmem>>, vector<1x1x16xf32>
    %37 = vector.shape_cast %36 : vector<1x1x16xf32> to vector<1x16xf32>
    %38 = vector.broadcast %37 : vector<1x16xf32> to vector<48x16xf32>
    %39 = arith.addf %35, %38 : vector<48x16xf32>
    %cst_47 = arith.constant dense<0.000000e+00> : vector<48x48xf32>
    %40 = tpu.matmul %32, %39, %cst_47 {dimension_numbers = #tpu.dot_dimension_numbers<[1], [1], [0], [0], [0, 0, 1, 0], [], []>} : vector<48x16xf32>, vector<48x16xf32>, vector<48x48xf32> -> vector<48x48xf32>
    %cst_48 = arith.constant 1.250000e-01 : f32
    %41 = vector.broadcast %cst_48 : f32 to vector<48x48xf32>
    %42 = arith.mulf %40, %41 : vector<48x48xf32>
    %43 = arith.addf %42, %25 : vector<48x48xf32>
    %cst_49 = arith.constant dense<0xFF800000> : vector<48xf32>
    %44 = vector.multi_reduction <maximumf>, %43, %cst_49 [1] : vector<48x48xf32> to vector<48xf32>
    %45 = vector.shape_cast %44 : vector<48xf32> to vector<48x1xf32>
    %46 = vector.broadcast %45 : vector<48x1xf32> to vector<48x48xf32>
    %47 = arith.subf %43, %46 : vector<48x48xf32>
    %48 = math.exp %47 : vector<48x48xf32>
    %cst_50 = arith.constant dense<0.000000e+00> : vector<48xf32>
    %49 = vector.multi_reduction <add>, %48, %cst_50 [1] : vector<48x48xf32> to vector<48xf32>
    %50 = vector.shape_cast %49 : vector<48xf32> to vector<48x1xf32>
    %51 = tpu.reciprocal %50 {approx = true} : vector<48x1xf32> -> vector<48x1xf32>
    %52 = vector.broadcast %51 : vector<48x1xf32> to vector<48x48xf32>
    %53 = arith.mulf %48, %52 : vector<48x48xf32>
    %54 = arith.mulf %53, %24 : vector<48x48xf32>
    %55 = arith.addf %54, %25 : vector<48x48xf32>
    %cst_51 = arith.constant dense<0xFF800000> : vector<48xf32>
    %56 = vector.multi_reduction <maximumf>, %55, %cst_51 [1] : vector<48x48xf32> to vector<48xf32>
    %57 = vector.shape_cast %56 : vector<48xf32> to vector<48x1xf32>
    %58 = vector.broadcast %57 : vector<48x1xf32> to vector<48x48xf32>
    %59 = arith.subf %55, %58 : vector<48x48xf32>
    %60 = math.exp %59 : vector<48x48xf32>
    %cst_52 = arith.constant dense<0.000000e+00> : vector<48xf32>
    %61 = vector.multi_reduction <add>, %60, %cst_52 [1] : vector<48x48xf32> to vector<48xf32>
    %62 = vector.shape_cast %61 : vector<48xf32> to vector<48x1xf32>
    %63 = tpu.reciprocal %62 {approx = true} : vector<48x1xf32> -> vector<48x1xf32>
    %64 = vector.broadcast %63 : vector<48x1xf32> to vector<48x48xf32>
    %65 = arith.mulf %60, %64 : vector<48x48xf32>
    %cst_53 = arith.constant dense<0.000000e+00> : vector<48x16xf32>
    %66 = tpu.matmul %65, %20, %cst_53 {dimension_numbers = #tpu.dot_dimension_numbers<[1], [0], [0], [1], [0, 0, 1, 1], [], []>} : vector<48x48xf32>, vector<48x16xf32>, vector<48x16xf32> -> vector<48x16xf32>
    %c1 = arith.constant 1 : index
    %c0_54 = arith.constant 0 : index
    %c0_55 = arith.constant 0 : index
    %67 = vector.load %arg9[%c1, %c0_54, %c0_55] : memref<4x64x16xf32, #tpu.memory_space<vmem>>, vector<1x64x16xf32>
    %68 = vector.shape_cast %67 : vector<1x64x16xf32> to vector<64x16xf32>
    %cst_56 = arith.constant dense<0.000000e+00> : vector<48x16xf32>
    %69 = tpu.matmul %5, %68, %cst_56 {dimension_numbers = #tpu.dot_dimension_numbers<[1], [0], [0], [1], [0, 0, 1, 1], [], []>} : vector<48x64xf32>, vector<64x16xf32>, vector<48x16xf32> -> vector<48x16xf32>
    %c1_57 = arith.constant 1 : index
    %c0_58 = arith.constant 0 : index
    %c0_59 = arith.constant 0 : index
    %70 = vector.load %arg10[%c1_57, %c0_58, %c0_59] : memref<4x1x16xf32, #tpu.memory_space<vmem>>, vector<1x1x16xf32>
    %71 = vector.shape_cast %70 : vector<1x1x16xf32> to vector<1x16xf32>
    %72 = vector.broadcast %71 : vector<1x16xf32> to vector<48x16xf32>
    %73 = arith.addf %69, %72 : vector<48x16xf32>
    %c1_60 = arith.constant 1 : index
    %c0_61 = arith.constant 0 : index
    %c0_62 = arith.constant 0 : index
    %74 = vector.load %arg11[%c1_60, %c0_61, %c0_62] : memref<4x64x16xf32, #tpu.memory_space<vmem>>, vector<1x64x16xf32>
    %75 = vector.shape_cast %74 : vector<1x64x16xf32> to vector<64x16xf32>
    %cst_63 = arith.constant dense<0.000000e+00> : vector<48x16xf32>
    %76 = tpu.matmul %11, %75, %cst_63 {dimension_numbers = #tpu.dot_dimension_numbers<[1], [0], [0], [1], [0, 0, 1, 1], [], []>} : vector<48x64xf32>, vector<64x16xf32>, vector<48x16xf32> -> vector<48x16xf32>
    %c1_64 = arith.constant 1 : index
    %c0_65 = arith.constant 0 : index
    %c0_66 = arith.constant 0 : index
    %77 = vector.load %arg12[%c1_64, %c0_65, %c0_66] : memref<4x1x16xf32, #tpu.memory_space<vmem>>, vector<1x1x16xf32>
    %78 = vector.shape_cast %77 : vector<1x1x16xf32> to vector<1x16xf32>
    %79 = vector.broadcast %78 : vector<1x16xf32> to vector<48x16xf32>
    %80 = arith.addf %76, %79 : vector<48x16xf32>
    %cst_67 = arith.constant dense<0.000000e+00> : vector<48x48xf32>
    %81 = tpu.matmul %73, %80, %cst_67 {dimension_numbers = #tpu.dot_dimension_numbers<[1], [1], [0], [0], [0, 0, 1, 0], [], []>} : vector<48x16xf32>, vector<48x16xf32>, vector<48x48xf32> -> vector<48x48xf32>
    %cst_68 = arith.constant 1.250000e-01 : f32
    %82 = vector.broadcast %cst_68 : f32 to vector<48x48xf32>
    %83 = arith.mulf %81, %82 : vector<48x48xf32>
    %84 = arith.addf %83, %25 : vector<48x48xf32>
    %cst_69 = arith.constant dense<0xFF800000> : vector<48xf32>
    %85 = vector.multi_reduction <maximumf>, %84, %cst_69 [1] : vector<48x48xf32> to vector<48xf32>
    %86 = vector.shape_cast %85 : vector<48xf32> to vector<48x1xf32>
    %87 = vector.broadcast %86 : vector<48x1xf32> to vector<48x48xf32>
    %88 = arith.subf %84, %87 : vector<48x48xf32>
    %89 = math.exp %88 : vector<48x48xf32>
    %cst_70 = arith.constant dense<0.000000e+00> : vector<48xf32>
    %90 = vector.multi_reduction <add>, %89, %cst_70 [1] : vector<48x48xf32> to vector<48xf32>
    %91 = vector.shape_cast %90 : vector<48xf32> to vector<48x1xf32>
    %92 = tpu.reciprocal %91 {approx = true} : vector<48x1xf32> -> vector<48x1xf32>
    %93 = vector.broadcast %92 : vector<48x1xf32> to vector<48x48xf32>
    %94 = arith.mulf %89, %93 : vector<48x48xf32>
    %95 = arith.mulf %94, %24 : vector<48x48xf32>
    %96 = arith.addf %95, %25 : vector<48x48xf32>
    %cst_71 = arith.constant dense<0xFF800000> : vector<48xf32>
    %97 = vector.multi_reduction <maximumf>, %96, %cst_71 [1] : vector<48x48xf32> to vector<48xf32>
    %98 = vector.shape_cast %97 : vector<48xf32> to vector<48x1xf32>
    %99 = vector.broadcast %98 : vector<48x1xf32> to vector<48x48xf32>
    %100 = arith.subf %96, %99 : vector<48x48xf32>
    %101 = math.exp %100 : vector<48x48xf32>
    %cst_72 = arith.constant dense<0.000000e+00> : vector<48xf32>
    %102 = vector.multi_reduction <add>, %101, %cst_72 [1] : vector<48x48xf32> to vector<48xf32>
    %103 = vector.shape_cast %102 : vector<48xf32> to vector<48x1xf32>
    %104 = tpu.reciprocal %103 {approx = true} : vector<48x1xf32> -> vector<48x1xf32>
    %105 = vector.broadcast %104 : vector<48x1xf32> to vector<48x48xf32>
    %106 = arith.mulf %101, %105 : vector<48x48xf32>
    %cst_73 = arith.constant dense<0.000000e+00> : vector<48x16xf32>
    %107 = tpu.matmul %106, %20, %cst_73 {dimension_numbers = #tpu.dot_dimension_numbers<[1], [0], [0], [1], [0, 0, 1, 1], [], []>} : vector<48x48xf32>, vector<48x16xf32>, vector<48x16xf32> -> vector<48x16xf32>
    %c2 = arith.constant 2 : index
    %c0_74 = arith.constant 0 : index
    %c0_75 = arith.constant 0 : index
    %108 = vector.load %arg9[%c2, %c0_74, %c0_75] : memref<4x64x16xf32, #tpu.memory_space<vmem>>, vector<1x64x16xf32>
    %109 = vector.shape_cast %108 : vector<1x64x16xf32> to vector<64x16xf32>
    %cst_76 = arith.constant dense<0.000000e+00> : vector<48x16xf32>
    %110 = tpu.matmul %5, %109, %cst_76 {dimension_numbers = #tpu.dot_dimension_numbers<[1], [0], [0], [1], [0, 0, 1, 1], [], []>} : vector<48x64xf32>, vector<64x16xf32>, vector<48x16xf32> -> vector<48x16xf32>
    %c2_77 = arith.constant 2 : index
    %c0_78 = arith.constant 0 : index
    %c0_79 = arith.constant 0 : index
    %111 = vector.load %arg10[%c2_77, %c0_78, %c0_79] : memref<4x1x16xf32, #tpu.memory_space<vmem>>, vector<1x1x16xf32>
    %112 = vector.shape_cast %111 : vector<1x1x16xf32> to vector<1x16xf32>
    %113 = vector.broadcast %112 : vector<1x16xf32> to vector<48x16xf32>
    %114 = arith.addf %110, %113 : vector<48x16xf32>
    %c2_80 = arith.constant 2 : index
    %c0_81 = arith.constant 0 : index
    %c0_82 = arith.constant 0 : index
    %115 = vector.load %arg11[%c2_80, %c0_81, %c0_82] : memref<4x64x16xf32, #tpu.memory_space<vmem>>, vector<1x64x16xf32>
    %116 = vector.shape_cast %115 : vector<1x64x16xf32> to vector<64x16xf32>
    %cst_83 = arith.constant dense<0.000000e+00> : vector<48x16xf32>
    %117 = tpu.matmul %11, %116, %cst_83 {dimension_numbers = #tpu.dot_dimension_numbers<[1], [0], [0], [1], [0, 0, 1, 1], [], []>} : vector<48x64xf32>, vector<64x16xf32>, vector<48x16xf32> -> vector<48x16xf32>
    %c2_84 = arith.constant 2 : index
    %c0_85 = arith.constant 0 : index
    %c0_86 = arith.constant 0 : index
    %118 = vector.load %arg12[%c2_84, %c0_85, %c0_86] : memref<4x1x16xf32, #tpu.memory_space<vmem>>, vector<1x1x16xf32>
    %119 = vector.shape_cast %118 : vector<1x1x16xf32> to vector<1x16xf32>
    %120 = vector.broadcast %119 : vector<1x16xf32> to vector<48x16xf32>
    %121 = arith.addf %117, %120 : vector<48x16xf32>
    %cst_87 = arith.constant dense<0.000000e+00> : vector<48x48xf32>
    %122 = tpu.matmul %114, %121, %cst_87 {dimension_numbers = #tpu.dot_dimension_numbers<[1], [1], [0], [0], [0, 0, 1, 0], [], []>} : vector<48x16xf32>, vector<48x16xf32>, vector<48x48xf32> -> vector<48x48xf32>
    %cst_88 = arith.constant 1.250000e-01 : f32
    %123 = vector.broadcast %cst_88 : f32 to vector<48x48xf32>
    %124 = arith.mulf %122, %123 : vector<48x48xf32>
    %125 = arith.addf %124, %25 : vector<48x48xf32>
    %cst_89 = arith.constant dense<0xFF800000> : vector<48xf32>
    %126 = vector.multi_reduction <maximumf>, %125, %cst_89 [1] : vector<48x48xf32> to vector<48xf32>
    %127 = vector.shape_cast %126 : vector<48xf32> to vector<48x1xf32>
    %128 = vector.broadcast %127 : vector<48x1xf32> to vector<48x48xf32>
    %129 = arith.subf %125, %128 : vector<48x48xf32>
    %130 = math.exp %129 : vector<48x48xf32>
    %cst_90 = arith.constant dense<0.000000e+00> : vector<48xf32>
    %131 = vector.multi_reduction <add>, %130, %cst_90 [1] : vector<48x48xf32> to vector<48xf32>
    %132 = vector.shape_cast %131 : vector<48xf32> to vector<48x1xf32>
    %133 = tpu.reciprocal %132 {approx = true} : vector<48x1xf32> -> vector<48x1xf32>
    %134 = vector.broadcast %133 : vector<48x1xf32> to vector<48x48xf32>
    %135 = arith.mulf %130, %134 : vector<48x48xf32>
    %136 = arith.mulf %135, %24 : vector<48x48xf32>
    %137 = arith.addf %136, %25 : vector<48x48xf32>
    %cst_91 = arith.constant dense<0xFF800000> : vector<48xf32>
    %138 = vector.multi_reduction <maximumf>, %137, %cst_91 [1] : vector<48x48xf32> to vector<48xf32>
    %139 = vector.shape_cast %138 : vector<48xf32> to vector<48x1xf32>
    %140 = vector.broadcast %139 : vector<48x1xf32> to vector<48x48xf32>
    %141 = arith.subf %137, %140 : vector<48x48xf32>
    %142 = math.exp %141 : vector<48x48xf32>
    %cst_92 = arith.constant dense<0.000000e+00> : vector<48xf32>
    %143 = vector.multi_reduction <add>, %142, %cst_92 [1] : vector<48x48xf32> to vector<48xf32>
    %144 = vector.shape_cast %143 : vector<48xf32> to vector<48x1xf32>
    %145 = tpu.reciprocal %144 {approx = true} : vector<48x1xf32> -> vector<48x1xf32>
    %146 = vector.broadcast %145 : vector<48x1xf32> to vector<48x48xf32>
    %147 = arith.mulf %142, %146 : vector<48x48xf32>
    %cst_93 = arith.constant dense<0.000000e+00> : vector<48x16xf32>
    %148 = tpu.matmul %147, %20, %cst_93 {dimension_numbers = #tpu.dot_dimension_numbers<[1], [0], [0], [1], [0, 0, 1, 1], [], []>} : vector<48x48xf32>, vector<48x16xf32>, vector<48x16xf32> -> vector<48x16xf32>
    %c3 = arith.constant 3 : index
    %c0_94 = arith.constant 0 : index
    %c0_95 = arith.constant 0 : index
    %149 = vector.load %arg9[%c3, %c0_94, %c0_95] : memref<4x64x16xf32, #tpu.memory_space<vmem>>, vector<1x64x16xf32>
    %150 = vector.shape_cast %149 : vector<1x64x16xf32> to vector<64x16xf32>
    %cst_96 = arith.constant dense<0.000000e+00> : vector<48x16xf32>
    %151 = tpu.matmul %5, %150, %cst_96 {dimension_numbers = #tpu.dot_dimension_numbers<[1], [0], [0], [1], [0, 0, 1, 1], [], []>} : vector<48x64xf32>, vector<64x16xf32>, vector<48x16xf32> -> vector<48x16xf32>
    %c3_97 = arith.constant 3 : index
    %c0_98 = arith.constant 0 : index
    %c0_99 = arith.constant 0 : index
    %152 = vector.load %arg10[%c3_97, %c0_98, %c0_99] : memref<4x1x16xf32, #tpu.memory_space<vmem>>, vector<1x1x16xf32>
    %153 = vector.shape_cast %152 : vector<1x1x16xf32> to vector<1x16xf32>
    %154 = vector.broadcast %153 : vector<1x16xf32> to vector<48x16xf32>
    %155 = arith.addf %151, %154 : vector<48x16xf32>
    %c3_100 = arith.constant 3 : index
    %c0_101 = arith.constant 0 : index
    %c0_102 = arith.constant 0 : index
    %156 = vector.load %arg11[%c3_100, %c0_101, %c0_102] : memref<4x64x16xf32, #tpu.memory_space<vmem>>, vector<1x64x16xf32>
    %157 = vector.shape_cast %156 : vector<1x64x16xf32> to vector<64x16xf32>
    %cst_103 = arith.constant dense<0.000000e+00> : vector<48x16xf32>
    %158 = tpu.matmul %11, %157, %cst_103 {dimension_numbers = #tpu.dot_dimension_numbers<[1], [0], [0], [1], [0, 0, 1, 1], [], []>} : vector<48x64xf32>, vector<64x16xf32>, vector<48x16xf32> -> vector<48x16xf32>
    %c3_104 = arith.constant 3 : index
    %c0_105 = arith.constant 0 : index
    %c0_106 = arith.constant 0 : index
    %159 = vector.load %arg12[%c3_104, %c0_105, %c0_106] : memref<4x1x16xf32, #tpu.memory_space<vmem>>, vector<1x1x16xf32>
    %160 = vector.shape_cast %159 : vector<1x1x16xf32> to vector<1x16xf32>
    %161 = vector.broadcast %160 : vector<1x16xf32> to vector<48x16xf32>
    %162 = arith.addf %158, %161 : vector<48x16xf32>
    %cst_107 = arith.constant dense<0.000000e+00> : vector<48x48xf32>
    %163 = tpu.matmul %155, %162, %cst_107 {dimension_numbers = #tpu.dot_dimension_numbers<[1], [1], [0], [0], [0, 0, 1, 0], [], []>} : vector<48x16xf32>, vector<48x16xf32>, vector<48x48xf32> -> vector<48x48xf32>
    %cst_108 = arith.constant 1.250000e-01 : f32
    %164 = vector.broadcast %cst_108 : f32 to vector<48x48xf32>
    %165 = arith.mulf %163, %164 : vector<48x48xf32>
    %166 = arith.addf %165, %25 : vector<48x48xf32>
    %cst_109 = arith.constant dense<0xFF800000> : vector<48xf32>
    %167 = vector.multi_reduction <maximumf>, %166, %cst_109 [1] : vector<48x48xf32> to vector<48xf32>
    %168 = vector.shape_cast %167 : vector<48xf32> to vector<48x1xf32>
    %169 = vector.broadcast %168 : vector<48x1xf32> to vector<48x48xf32>
    %170 = arith.subf %166, %169 : vector<48x48xf32>
    %171 = math.exp %170 : vector<48x48xf32>
    %cst_110 = arith.constant dense<0.000000e+00> : vector<48xf32>
    %172 = vector.multi_reduction <add>, %171, %cst_110 [1] : vector<48x48xf32> to vector<48xf32>
    %173 = vector.shape_cast %172 : vector<48xf32> to vector<48x1xf32>
    %174 = tpu.reciprocal %173 {approx = true} : vector<48x1xf32> -> vector<48x1xf32>
    %175 = vector.broadcast %174 : vector<48x1xf32> to vector<48x48xf32>
    %176 = arith.mulf %171, %175 : vector<48x48xf32>
    %177 = arith.mulf %176, %24 : vector<48x48xf32>
    %178 = arith.addf %177, %25 : vector<48x48xf32>
    %cst_111 = arith.constant dense<0xFF800000> : vector<48xf32>
    %179 = vector.multi_reduction <maximumf>, %178, %cst_111 [1] : vector<48x48xf32> to vector<48xf32>
    %180 = vector.shape_cast %179 : vector<48xf32> to vector<48x1xf32>
    %181 = vector.broadcast %180 : vector<48x1xf32> to vector<48x48xf32>
    %182 = arith.subf %178, %181 : vector<48x48xf32>
    %183 = math.exp %182 : vector<48x48xf32>
    %cst_112 = arith.constant dense<0.000000e+00> : vector<48xf32>
    %184 = vector.multi_reduction <add>, %183, %cst_112 [1] : vector<48x48xf32> to vector<48xf32>
    %185 = vector.shape_cast %184 : vector<48xf32> to vector<48x1xf32>
    %186 = tpu.reciprocal %185 {approx = true} : vector<48x1xf32> -> vector<48x1xf32>
    %187 = vector.broadcast %186 : vector<48x1xf32> to vector<48x48xf32>
    %188 = arith.mulf %183, %187 : vector<48x48xf32>
    %cst_113 = arith.constant dense<0.000000e+00> : vector<48x16xf32>
    %189 = tpu.matmul %188, %20, %cst_113 {dimension_numbers = #tpu.dot_dimension_numbers<[1], [0], [0], [1], [0, 0, 1, 1], [], []>} : vector<48x48xf32>, vector<48x16xf32>, vector<48x16xf32> -> vector<48x16xf32>
    %c0_114 = arith.constant 0 : index
    %c0_115 = arith.constant 0 : index
    %190 = vector.load %arg5[%c0_114, %c0_115] : memref<48x48xf32, #tpu.memory_space<vmem>>, vector<48x48xf32>
    %c0_116 = arith.constant 0 : index
    %c0_117 = arith.constant 0 : index
    %191 = vector.load %arg6[%c0_116, %c0_117] : memref<48x48xf32, #tpu.memory_space<vmem>>, vector<48x48xf32>
    %c0_118 = arith.constant 0 : index
    %c0_119 = arith.constant 0 : index
    %c0_120 = arith.constant 0 : index
    %192 = vector.load %arg15[%c0_118, %c0_119, %c0_120] : memref<4x64x16xf32, #tpu.memory_space<vmem>>, vector<1x64x16xf32>
    %193 = vector.shape_cast %192 : vector<1x64x16xf32> to vector<64x16xf32>
    %cst_121 = arith.constant dense<0.000000e+00> : vector<48x16xf32>
    %194 = tpu.matmul %17, %193, %cst_121 {dimension_numbers = #tpu.dot_dimension_numbers<[1], [0], [0], [1], [0, 0, 1, 1], [], []>} : vector<48x64xf32>, vector<64x16xf32>, vector<48x16xf32> -> vector<48x16xf32>
    %c0_122 = arith.constant 0 : index
    %c0_123 = arith.constant 0 : index
    %c0_124 = arith.constant 0 : index
    %195 = vector.load %arg16[%c0_122, %c0_123, %c0_124] : memref<4x1x16xf32, #tpu.memory_space<vmem>>, vector<1x1x16xf32>
    %196 = vector.shape_cast %195 : vector<1x1x16xf32> to vector<1x16xf32>
    %197 = vector.broadcast %196 : vector<1x16xf32> to vector<48x16xf32>
    %198 = arith.addf %194, %197 : vector<48x16xf32>
    %c0_125 = arith.constant 0 : index
    %c0_126 = arith.constant 0 : index
    %c0_127 = arith.constant 0 : index
    %199 = vector.load %arg17[%c0_125, %c0_126, %c0_127] : memref<4x64x16xf32, #tpu.memory_space<vmem>>, vector<1x64x16xf32>
    %200 = vector.shape_cast %199 : vector<1x64x16xf32> to vector<64x16xf32>
    %cst_128 = arith.constant dense<0.000000e+00> : vector<48x16xf32>
    %201 = tpu.matmul %17, %200, %cst_128 {dimension_numbers = #tpu.dot_dimension_numbers<[1], [0], [0], [1], [0, 0, 1, 1], [], []>} : vector<48x64xf32>, vector<64x16xf32>, vector<48x16xf32> -> vector<48x16xf32>
    %c0_129 = arith.constant 0 : index
    %c0_130 = arith.constant 0 : index
    %c0_131 = arith.constant 0 : index
    %202 = vector.load %arg18[%c0_129, %c0_130, %c0_131] : memref<4x1x16xf32, #tpu.memory_space<vmem>>, vector<1x1x16xf32>
    %203 = vector.shape_cast %202 : vector<1x1x16xf32> to vector<1x16xf32>
    %204 = vector.broadcast %203 : vector<1x16xf32> to vector<48x16xf32>
    %205 = arith.addf %201, %204 : vector<48x16xf32>
    %cst_132 = arith.constant dense<0.000000e+00> : vector<48x48xf32>
    %206 = tpu.matmul %198, %205, %cst_132 {dimension_numbers = #tpu.dot_dimension_numbers<[1], [1], [0], [0], [0, 0, 1, 0], [], []>} : vector<48x16xf32>, vector<48x16xf32>, vector<48x48xf32> -> vector<48x48xf32>
    %cst_133 = arith.constant 1.250000e-01 : f32
    %207 = vector.broadcast %cst_133 : f32 to vector<48x48xf32>
    %208 = arith.mulf %206, %207 : vector<48x48xf32>
    %209 = arith.addf %208, %191 : vector<48x48xf32>
    %cst_134 = arith.constant dense<0xFF800000> : vector<48xf32>
    %210 = vector.multi_reduction <maximumf>, %209, %cst_134 [1] : vector<48x48xf32> to vector<48xf32>
    %211 = vector.shape_cast %210 : vector<48xf32> to vector<48x1xf32>
    %212 = vector.broadcast %211 : vector<48x1xf32> to vector<48x48xf32>
    %213 = arith.subf %209, %212 : vector<48x48xf32>
    %214 = math.exp %213 : vector<48x48xf32>
    %cst_135 = arith.constant dense<0.000000e+00> : vector<48xf32>
    %215 = vector.multi_reduction <add>, %214, %cst_135 [1] : vector<48x48xf32> to vector<48xf32>
    %216 = vector.shape_cast %215 : vector<48xf32> to vector<48x1xf32>
    %217 = tpu.reciprocal %216 {approx = true} : vector<48x1xf32> -> vector<48x1xf32>
    %218 = vector.broadcast %217 : vector<48x1xf32> to vector<48x48xf32>
    %219 = arith.mulf %214, %218 : vector<48x48xf32>
    %220 = arith.mulf %219, %190 : vector<48x48xf32>
    %221 = arith.addf %220, %191 : vector<48x48xf32>
    %cst_136 = arith.constant dense<0xFF800000> : vector<48xf32>
    %222 = vector.multi_reduction <maximumf>, %221, %cst_136 [1] : vector<48x48xf32> to vector<48xf32>
    %223 = vector.shape_cast %222 : vector<48xf32> to vector<48x1xf32>
    %224 = vector.broadcast %223 : vector<48x1xf32> to vector<48x48xf32>
    %225 = arith.subf %221, %224 : vector<48x48xf32>
    %226 = math.exp %225 : vector<48x48xf32>
    %cst_137 = arith.constant dense<0.000000e+00> : vector<48xf32>
    %227 = vector.multi_reduction <add>, %226, %cst_137 [1] : vector<48x48xf32> to vector<48xf32>
    %228 = vector.shape_cast %227 : vector<48xf32> to vector<48x1xf32>
    %229 = tpu.reciprocal %228 {approx = true} : vector<48x1xf32> -> vector<48x1xf32>
    %230 = vector.broadcast %229 : vector<48x1xf32> to vector<48x48xf32>
    %231 = arith.mulf %226, %230 : vector<48x48xf32>
    %cst_138 = arith.constant dense<0.000000e+00> : vector<48x16xf32>
    %232 = tpu.matmul %231, %23, %cst_138 {dimension_numbers = #tpu.dot_dimension_numbers<[1], [0], [0], [1], [0, 0, 1, 1], [], []>} : vector<48x48xf32>, vector<48x16xf32>, vector<48x16xf32> -> vector<48x16xf32>
    %c1_139 = arith.constant 1 : index
    %c0_140 = arith.constant 0 : index
    %c0_141 = arith.constant 0 : index
    %233 = vector.load %arg15[%c1_139, %c0_140, %c0_141] : memref<4x64x16xf32, #tpu.memory_space<vmem>>, vector<1x64x16xf32>
    %234 = vector.shape_cast %233 : vector<1x64x16xf32> to vector<64x16xf32>
    %cst_142 = arith.constant dense<0.000000e+00> : vector<48x16xf32>
    %235 = tpu.matmul %17, %234, %cst_142 {dimension_numbers = #tpu.dot_dimension_numbers<[1], [0], [0], [1], [0, 0, 1, 1], [], []>} : vector<48x64xf32>, vector<64x16xf32>, vector<48x16xf32> -> vector<48x16xf32>
    %c1_143 = arith.constant 1 : index
    %c0_144 = arith.constant 0 : index
    %c0_145 = arith.constant 0 : index
    %236 = vector.load %arg16[%c1_143, %c0_144, %c0_145] : memref<4x1x16xf32, #tpu.memory_space<vmem>>, vector<1x1x16xf32>
    %237 = vector.shape_cast %236 : vector<1x1x16xf32> to vector<1x16xf32>
    %238 = vector.broadcast %237 : vector<1x16xf32> to vector<48x16xf32>
    %239 = arith.addf %235, %238 : vector<48x16xf32>
    %c1_146 = arith.constant 1 : index
    %c0_147 = arith.constant 0 : index
    %c0_148 = arith.constant 0 : index
    %240 = vector.load %arg17[%c1_146, %c0_147, %c0_148] : memref<4x64x16xf32, #tpu.memory_space<vmem>>, vector<1x64x16xf32>
    %241 = vector.shape_cast %240 : vector<1x64x16xf32> to vector<64x16xf32>
    %cst_149 = arith.constant dense<0.000000e+00> : vector<48x16xf32>
    %242 = tpu.matmul %17, %241, %cst_149 {dimension_numbers = #tpu.dot_dimension_numbers<[1], [0], [0], [1], [0, 0, 1, 1], [], []>} : vector<48x64xf32>, vector<64x16xf32>, vector<48x16xf32> -> vector<48x16xf32>
    %c1_150 = arith.constant 1 : index
    %c0_151 = arith.constant 0 : index
    %c0_152 = arith.constant 0 : index
    %243 = vector.load %arg18[%c1_150, %c0_151, %c0_152] : memref<4x1x16xf32, #tpu.memory_space<vmem>>, vector<1x1x16xf32>
    %244 = vector.shape_cast %243 : vector<1x1x16xf32> to vector<1x16xf32>
    %245 = vector.broadcast %244 : vector<1x16xf32> to vector<48x16xf32>
    %246 = arith.addf %242, %245 : vector<48x16xf32>
    %cst_153 = arith.constant dense<0.000000e+00> : vector<48x48xf32>
    %247 = tpu.matmul %239, %246, %cst_153 {dimension_numbers = #tpu.dot_dimension_numbers<[1], [1], [0], [0], [0, 0, 1, 0], [], []>} : vector<48x16xf32>, vector<48x16xf32>, vector<48x48xf32> -> vector<48x48xf32>
    %cst_154 = arith.constant 1.250000e-01 : f32
    %248 = vector.broadcast %cst_154 : f32 to vector<48x48xf32>
    %249 = arith.mulf %247, %248 : vector<48x48xf32>
    %250 = arith.addf %249, %191 : vector<48x48xf32>
    %cst_155 = arith.constant dense<0xFF800000> : vector<48xf32>
    %251 = vector.multi_reduction <maximumf>, %250, %cst_155 [1] : vector<48x48xf32> to vector<48xf32>
    %252 = vector.shape_cast %251 : vector<48xf32> to vector<48x1xf32>
    %253 = vector.broadcast %252 : vector<48x1xf32> to vector<48x48xf32>
    %254 = arith.subf %250, %253 : vector<48x48xf32>
    %255 = math.exp %254 : vector<48x48xf32>
    %cst_156 = arith.constant dense<0.000000e+00> : vector<48xf32>
    %256 = vector.multi_reduction <add>, %255, %cst_156 [1] : vector<48x48xf32> to vector<48xf32>
    %257 = vector.shape_cast %256 : vector<48xf32> to vector<48x1xf32>
    %258 = tpu.reciprocal %257 {approx = true} : vector<48x1xf32> -> vector<48x1xf32>
    %259 = vector.broadcast %258 : vector<48x1xf32> to vector<48x48xf32>
    %260 = arith.mulf %255, %259 : vector<48x48xf32>
    %261 = arith.mulf %260, %190 : vector<48x48xf32>
    %262 = arith.addf %261, %191 : vector<48x48xf32>
    %cst_157 = arith.constant dense<0xFF800000> : vector<48xf32>
    %263 = vector.multi_reduction <maximumf>, %262, %cst_157 [1] : vector<48x48xf32> to vector<48xf32>
    %264 = vector.shape_cast %263 : vector<48xf32> to vector<48x1xf32>
    %265 = vector.broadcast %264 : vector<48x1xf32> to vector<48x48xf32>
    %266 = arith.subf %262, %265 : vector<48x48xf32>
    %267 = math.exp %266 : vector<48x48xf32>
    %cst_158 = arith.constant dense<0.000000e+00> : vector<48xf32>
    %268 = vector.multi_reduction <add>, %267, %cst_158 [1] : vector<48x48xf32> to vector<48xf32>
    %269 = vector.shape_cast %268 : vector<48xf32> to vector<48x1xf32>
    %270 = tpu.reciprocal %269 {approx = true} : vector<48x1xf32> -> vector<48x1xf32>
    %271 = vector.broadcast %270 : vector<48x1xf32> to vector<48x48xf32>
    %272 = arith.mulf %267, %271 : vector<48x48xf32>
    %cst_159 = arith.constant dense<0.000000e+00> : vector<48x16xf32>
    %273 = tpu.matmul %272, %23, %cst_159 {dimension_numbers = #tpu.dot_dimension_numbers<[1], [0], [0], [1], [0, 0, 1, 1], [], []>} : vector<48x48xf32>, vector<48x16xf32>, vector<48x16xf32> -> vector<48x16xf32>
    %c2_160 = arith.constant 2 : index
    %c0_161 = arith.constant 0 : index
    %c0_162 = arith.constant 0 : index
    %274 = vector.load %arg15[%c2_160, %c0_161, %c0_162] : memref<4x64x16xf32, #tpu.memory_space<vmem>>, vector<1x64x16xf32>
    %275 = vector.shape_cast %274 : vector<1x64x16xf32> to vector<64x16xf32>
    %cst_163 = arith.constant dense<0.000000e+00> : vector<48x16xf32>
    %276 = tpu.matmul %17, %275, %cst_163 {dimension_numbers = #tpu.dot_dimension_numbers<[1], [0], [0], [1], [0, 0, 1, 1], [], []>} : vector<48x64xf32>, vector<64x16xf32>, vector<48x16xf32> -> vector<48x16xf32>
    %c2_164 = arith.constant 2 : index
    %c0_165 = arith.constant 0 : index
    %c0_166 = arith.constant 0 : index
    %277 = vector.load %arg16[%c2_164, %c0_165, %c0_166] : memref<4x1x16xf32, #tpu.memory_space<vmem>>, vector<1x1x16xf32>
    %278 = vector.shape_cast %277 : vector<1x1x16xf32> to vector<1x16xf32>
    %279 = vector.broadcast %278 : vector<1x16xf32> to vector<48x16xf32>
    %280 = arith.addf %276, %279 : vector<48x16xf32>
    %c2_167 = arith.constant 2 : index
    %c0_168 = arith.constant 0 : index
    %c0_169 = arith.constant 0 : index
    %281 = vector.load %arg17[%c2_167, %c0_168, %c0_169] : memref<4x64x16xf32, #tpu.memory_space<vmem>>, vector<1x64x16xf32>
    %282 = vector.shape_cast %281 : vector<1x64x16xf32> to vector<64x16xf32>
    %cst_170 = arith.constant dense<0.000000e+00> : vector<48x16xf32>
    %283 = tpu.matmul %17, %282, %cst_170 {dimension_numbers = #tpu.dot_dimension_numbers<[1], [0], [0], [1], [0, 0, 1, 1], [], []>} : vector<48x64xf32>, vector<64x16xf32>, vector<48x16xf32> -> vector<48x16xf32>
    %c2_171 = arith.constant 2 : index
    %c0_172 = arith.constant 0 : index
    %c0_173 = arith.constant 0 : index
    %284 = vector.load %arg18[%c2_171, %c0_172, %c0_173] : memref<4x1x16xf32, #tpu.memory_space<vmem>>, vector<1x1x16xf32>
    %285 = vector.shape_cast %284 : vector<1x1x16xf32> to vector<1x16xf32>
    %286 = vector.broadcast %285 : vector<1x16xf32> to vector<48x16xf32>
    %287 = arith.addf %283, %286 : vector<48x16xf32>
    %cst_174 = arith.constant dense<0.000000e+00> : vector<48x48xf32>
    %288 = tpu.matmul %280, %287, %cst_174 {dimension_numbers = #tpu.dot_dimension_numbers<[1], [1], [0], [0], [0, 0, 1, 0], [], []>} : vector<48x16xf32>, vector<48x16xf32>, vector<48x48xf32> -> vector<48x48xf32>
    %cst_175 = arith.constant 1.250000e-01 : f32
    %289 = vector.broadcast %cst_175 : f32 to vector<48x48xf32>
    %290 = arith.mulf %288, %289 : vector<48x48xf32>
    %291 = arith.addf %290, %191 : vector<48x48xf32>
    %cst_176 = arith.constant dense<0xFF800000> : vector<48xf32>
    %292 = vector.multi_reduction <maximumf>, %291, %cst_176 [1] : vector<48x48xf32> to vector<48xf32>
    %293 = vector.shape_cast %292 : vector<48xf32> to vector<48x1xf32>
    %294 = vector.broadcast %293 : vector<48x1xf32> to vector<48x48xf32>
    %295 = arith.subf %291, %294 : vector<48x48xf32>
    %296 = math.exp %295 : vector<48x48xf32>
    %cst_177 = arith.constant dense<0.000000e+00> : vector<48xf32>
    %297 = vector.multi_reduction <add>, %296, %cst_177 [1] : vector<48x48xf32> to vector<48xf32>
    %298 = vector.shape_cast %297 : vector<48xf32> to vector<48x1xf32>
    %299 = tpu.reciprocal %298 {approx = true} : vector<48x1xf32> -> vector<48x1xf32>
    %300 = vector.broadcast %299 : vector<48x1xf32> to vector<48x48xf32>
    %301 = arith.mulf %296, %300 : vector<48x48xf32>
    %302 = arith.mulf %301, %190 : vector<48x48xf32>
    %303 = arith.addf %302, %191 : vector<48x48xf32>
    %cst_178 = arith.constant dense<0xFF800000> : vector<48xf32>
    %304 = vector.multi_reduction <maximumf>, %303, %cst_178 [1] : vector<48x48xf32> to vector<48xf32>
    %305 = vector.shape_cast %304 : vector<48xf32> to vector<48x1xf32>
    %306 = vector.broadcast %305 : vector<48x1xf32> to vector<48x48xf32>
    %307 = arith.subf %303, %306 : vector<48x48xf32>
    %308 = math.exp %307 : vector<48x48xf32>
    %cst_179 = arith.constant dense<0.000000e+00> : vector<48xf32>
    %309 = vector.multi_reduction <add>, %308, %cst_179 [1] : vector<48x48xf32> to vector<48xf32>
    %310 = vector.shape_cast %309 : vector<48xf32> to vector<48x1xf32>
    %311 = tpu.reciprocal %310 {approx = true} : vector<48x1xf32> -> vector<48x1xf32>
    %312 = vector.broadcast %311 : vector<48x1xf32> to vector<48x48xf32>
    %313 = arith.mulf %308, %312 : vector<48x48xf32>
    %cst_180 = arith.constant dense<0.000000e+00> : vector<48x16xf32>
    %314 = tpu.matmul %313, %23, %cst_180 {dimension_numbers = #tpu.dot_dimension_numbers<[1], [0], [0], [1], [0, 0, 1, 1], [], []>} : vector<48x48xf32>, vector<48x16xf32>, vector<48x16xf32> -> vector<48x16xf32>
    %c3_181 = arith.constant 3 : index
    %c0_182 = arith.constant 0 : index
    %c0_183 = arith.constant 0 : index
    %315 = vector.load %arg15[%c3_181, %c0_182, %c0_183] : memref<4x64x16xf32, #tpu.memory_space<vmem>>, vector<1x64x16xf32>
    %316 = vector.shape_cast %315 : vector<1x64x16xf32> to vector<64x16xf32>
    %cst_184 = arith.constant dense<0.000000e+00> : vector<48x16xf32>
    %317 = tpu.matmul %17, %316, %cst_184 {dimension_numbers = #tpu.dot_dimension_numbers<[1], [0], [0], [1], [0, 0, 1, 1], [], []>} : vector<48x64xf32>, vector<64x16xf32>, vector<48x16xf32> -> vector<48x16xf32>
    %c3_185 = arith.constant 3 : index
    %c0_186 = arith.constant 0 : index
    %c0_187 = arith.constant 0 : index
    %318 = vector.load %arg16[%c3_185, %c0_186, %c0_187] : memref<4x1x16xf32, #tpu.memory_space<vmem>>, vector<1x1x16xf32>
    %319 = vector.shape_cast %318 : vector<1x1x16xf32> to vector<1x16xf32>
    %320 = vector.broadcast %319 : vector<1x16xf32> to vector<48x16xf32>
    %321 = arith.addf %317, %320 : vector<48x16xf32>
    %c3_188 = arith.constant 3 : index
    %c0_189 = arith.constant 0 : index
    %c0_190 = arith.constant 0 : index
    %322 = vector.load %arg17[%c3_188, %c0_189, %c0_190] : memref<4x64x16xf32, #tpu.memory_space<vmem>>, vector<1x64x16xf32>
    %323 = vector.shape_cast %322 : vector<1x64x16xf32> to vector<64x16xf32>
    %cst_191 = arith.constant dense<0.000000e+00> : vector<48x16xf32>
    %324 = tpu.matmul %17, %323, %cst_191 {dimension_numbers = #tpu.dot_dimension_numbers<[1], [0], [0], [1], [0, 0, 1, 1], [], []>} : vector<48x64xf32>, vector<64x16xf32>, vector<48x16xf32> -> vector<48x16xf32>
    %c3_192 = arith.constant 3 : index
    %c0_193 = arith.constant 0 : index
    %c0_194 = arith.constant 0 : index
    %325 = vector.load %arg18[%c3_192, %c0_193, %c0_194] : memref<4x1x16xf32, #tpu.memory_space<vmem>>, vector<1x1x16xf32>
    %326 = vector.shape_cast %325 : vector<1x1x16xf32> to vector<1x16xf32>
    %327 = vector.broadcast %326 : vector<1x16xf32> to vector<48x16xf32>
    %328 = arith.addf %324, %327 : vector<48x16xf32>
    %cst_195 = arith.constant dense<0.000000e+00> : vector<48x48xf32>
    %329 = tpu.matmul %321, %328, %cst_195 {dimension_numbers = #tpu.dot_dimension_numbers<[1], [1], [0], [0], [0, 0, 1, 0], [], []>} : vector<48x16xf32>, vector<48x16xf32>, vector<48x48xf32> -> vector<48x48xf32>
    %cst_196 = arith.constant 1.250000e-01 : f32
    %330 = vector.broadcast %cst_196 : f32 to vector<48x48xf32>
    %331 = arith.mulf %329, %330 : vector<48x48xf32>
    %332 = arith.addf %331, %191 : vector<48x48xf32>
    %cst_197 = arith.constant dense<0xFF800000> : vector<48xf32>
    %333 = vector.multi_reduction <maximumf>, %332, %cst_197 [1] : vector<48x48xf32> to vector<48xf32>
    %334 = vector.shape_cast %333 : vector<48xf32> to vector<48x1xf32>
    %335 = vector.broadcast %334 : vector<48x1xf32> to vector<48x48xf32>
    %336 = arith.subf %332, %335 : vector<48x48xf32>
    %337 = math.exp %336 : vector<48x48xf32>
    %cst_198 = arith.constant dense<0.000000e+00> : vector<48xf32>
    %338 = vector.multi_reduction <add>, %337, %cst_198 [1] : vector<48x48xf32> to vector<48xf32>
    %339 = vector.shape_cast %338 : vector<48xf32> to vector<48x1xf32>
    %340 = tpu.reciprocal %339 {approx = true} : vector<48x1xf32> -> vector<48x1xf32>
    %341 = vector.broadcast %340 : vector<48x1xf32> to vector<48x48xf32>
    %342 = arith.mulf %337, %341 : vector<48x48xf32>
    %343 = arith.mulf %342, %190 : vector<48x48xf32>
    %344 = arith.addf %343, %191 : vector<48x48xf32>
    %cst_199 = arith.constant dense<0xFF800000> : vector<48xf32>
    %345 = vector.multi_reduction <maximumf>, %344, %cst_199 [1] : vector<48x48xf32> to vector<48xf32>
    %346 = vector.shape_cast %345 : vector<48xf32> to vector<48x1xf32>
    %347 = vector.broadcast %346 : vector<48x1xf32> to vector<48x48xf32>
    %348 = arith.subf %344, %347 : vector<48x48xf32>
    %349 = math.exp %348 : vector<48x48xf32>
    %cst_200 = arith.constant dense<0.000000e+00> : vector<48xf32>
    %350 = vector.multi_reduction <add>, %349, %cst_200 [1] : vector<48x48xf32> to vector<48xf32>
    %351 = vector.shape_cast %350 : vector<48xf32> to vector<48x1xf32>
    %352 = tpu.reciprocal %351 {approx = true} : vector<48x1xf32> -> vector<48x1xf32>
    %353 = vector.broadcast %352 : vector<48x1xf32> to vector<48x48xf32>
    %354 = arith.mulf %349, %353 : vector<48x48xf32>
    %cst_201 = arith.constant dense<0.000000e+00> : vector<48x16xf32>
    %355 = tpu.matmul %354, %23, %cst_201 {dimension_numbers = #tpu.dot_dimension_numbers<[1], [0], [0], [1], [0, 0, 1, 1], [], []>} : vector<48x48xf32>, vector<48x16xf32>, vector<48x16xf32> -> vector<48x16xf32>
    %356 = tpu.concatenate %66, %107, %148, %189, %232, %273, %314, %355 in 1 : vector<48x16xf32>, vector<48x16xf32>, vector<48x16xf32>, vector<48x16xf32>, vector<48x16xf32>, vector<48x16xf32>, vector<48x16xf32>, vector<48x16xf32> -> vector<48x128xf32>
    %c0_202 = arith.constant 0 : index
    %c0_203 = arith.constant 0 : index
    %357 = vector.load %arg22[%c0_202, %c0_203] : memref<1x128xf32, #tpu.memory_space<vmem>>, vector<1x128xf32>
    %cst_204 = arith.constant 0.000000e+00 : f32
    %358 = vector.broadcast %cst_204 : f32 to vector<48x128xf32>
    %359 = arith.cmpf oge, %356, %358 : vector<48x128xf32>
    %360 = vector.broadcast %357 : vector<1x128xf32> to vector<48x128xf32>
    %361 = arith.mulf %360, %356 : vector<48x128xf32>
    %362 = arith.select %359, %356, %361 : vector<48x128xi1>, vector<48x128xf32>
    %c0_205 = arith.constant 0 : index
    %c0_206 = arith.constant 0 : index
    %363 = vector.load %arg21[%c0_205, %c0_206] : memref<128x64xf32, #tpu.memory_space<vmem>>, vector<128x64xf32>
    %cst_207 = arith.constant dense<0.000000e+00> : vector<48x64xf32>
    %364 = tpu.matmul %362, %363, %cst_207 {dimension_numbers = #tpu.dot_dimension_numbers<[1], [0], [0], [1], [0, 0, 1, 1], [], []>} : vector<48x128xf32>, vector<128x64xf32>, vector<48x64xf32> -> vector<48x64xf32>
    %365 = vector.extract_strided_slice %364 {offsets = [0, 0], sizes = [8, 64], strides = [1, 1]} : vector<48x64xf32> to vector<8x64xf32>
    %366 = vector.extract_strided_slice %364 {offsets = [8, 0], sizes = [8, 64], strides = [1, 1]} : vector<48x64xf32> to vector<8x64xf32>
    %367 = vector.extract_strided_slice %364 {offsets = [16, 0], sizes = [8, 64], strides = [1, 1]} : vector<48x64xf32> to vector<8x64xf32>
    %368 = vector.extract_strided_slice %364 {offsets = [24, 0], sizes = [8, 64], strides = [1, 1]} : vector<48x64xf32> to vector<8x64xf32>
    %369 = vector.extract_strided_slice %364 {offsets = [32, 0], sizes = [8, 64], strides = [1, 1]} : vector<48x64xf32> to vector<8x64xf32>
    %370 = vector.extract_strided_slice %364 {offsets = [40, 0], sizes = [8, 64], strides = [1, 1]} : vector<48x64xf32> to vector<8x64xf32>
    %371 = tpu.concatenate %365, %366, %367, %368, %369, %370 in 1 : vector<8x64xf32>, vector<8x64xf32>, vector<8x64xf32>, vector<8x64xf32>, vector<8x64xf32>, vector<8x64xf32> -> vector<8x384xf32>
    %cst_208 = arith.constant 0.000000e+00 : f32
    %372 = vector.broadcast %cst_208 : f32 to vector<4x384xf32>
    %373 = tpu.concatenate %371, %372 in 0 : vector<8x384xf32>, vector<4x384xf32> -> vector<12x384xf32>
    %c17_i32 = arith.constant 17 : i32
    %374 = tpu.dynamic_rotate %373 by %c17_i32 dim 1 : vector<12x384xf32>, i32 -> vector<12x384xf32>
    %c0_209 = arith.constant 0 : index
    %c0_210 = arith.constant 0 : index
    %c0_211 = arith.constant 0 : index
    %375 = vector.load %arg25[%c0_209, %c0_210, %c0_211] : memref<9x1x384xf32, #tpu.memory_space<vmem>>, vector<1x1x384xf32>
    %376 = vector.shape_cast %375 : vector<1x1x384xf32> to vector<1x384xf32>
    %377 = vector.broadcast %376 : vector<1x384xf32> to vector<12x384xf32>
    %378 = arith.mulf %374, %377 : vector<12x384xf32>
    %c0_212 = arith.constant 0 : index
    %c0_213 = arith.constant 0 : index
    %c0_214 = arith.constant 0 : index
    %c0_215 = arith.constant 0 : index
    %379 = vector.load %arg23[%c0_212, %c0_213, %c0_214, %c0_215] : memref<5x9x12x12xf32, #tpu.memory_space<vmem>>, vector<1x1x12x12xf32>
    %380 = vector.shape_cast %379 : vector<1x1x12x12xf32> to vector<12x12xf32>
    %cst_216 = arith.constant dense<0.000000e+00> : vector<12x384xf32>
    %381 = tpu.matmul %380, %378, %cst_216 {dimension_numbers = #tpu.dot_dimension_numbers<[1], [0], [0], [1], [0, 0, 1, 1], [], []>} : vector<12x12xf32>, vector<12x384xf32>, vector<12x384xf32> -> vector<12x384xf32>
    %c16_i32 = arith.constant 16 : i32
    %382 = tpu.dynamic_rotate %373 by %c16_i32 dim 1 : vector<12x384xf32>, i32 -> vector<12x384xf32>
    %c1_217 = arith.constant 1 : index
    %c0_218 = arith.constant 0 : index
    %c0_219 = arith.constant 0 : index
    %383 = vector.load %arg25[%c1_217, %c0_218, %c0_219] : memref<9x1x384xf32, #tpu.memory_space<vmem>>, vector<1x1x384xf32>
    %384 = vector.shape_cast %383 : vector<1x1x384xf32> to vector<1x384xf32>
    %385 = vector.broadcast %384 : vector<1x384xf32> to vector<12x384xf32>
    %386 = arith.mulf %382, %385 : vector<12x384xf32>
    %c0_220 = arith.constant 0 : index
    %c1_221 = arith.constant 1 : index
    %c0_222 = arith.constant 0 : index
    %c0_223 = arith.constant 0 : index
    %387 = vector.load %arg23[%c0_220, %c1_221, %c0_222, %c0_223] : memref<5x9x12x12xf32, #tpu.memory_space<vmem>>, vector<1x1x12x12xf32>
    %388 = vector.shape_cast %387 : vector<1x1x12x12xf32> to vector<12x12xf32>
    %cst_224 = arith.constant dense<0.000000e+00> : vector<12x384xf32>
    %389 = tpu.matmul %388, %386, %cst_224 {dimension_numbers = #tpu.dot_dimension_numbers<[1], [0], [0], [1], [0, 0, 1, 1], [], []>} : vector<12x12xf32>, vector<12x384xf32>, vector<12x384xf32> -> vector<12x384xf32>
    %390 = arith.addf %381, %389 : vector<12x384xf32>
    %c15_i32 = arith.constant 15 : i32
    %391 = tpu.dynamic_rotate %373 by %c15_i32 dim 1 : vector<12x384xf32>, i32 -> vector<12x384xf32>
    %c2_225 = arith.constant 2 : index
    %c0_226 = arith.constant 0 : index
    %c0_227 = arith.constant 0 : index
    %392 = vector.load %arg25[%c2_225, %c0_226, %c0_227] : memref<9x1x384xf32, #tpu.memory_space<vmem>>, vector<1x1x384xf32>
    %393 = vector.shape_cast %392 : vector<1x1x384xf32> to vector<1x384xf32>
    %394 = vector.broadcast %393 : vector<1x384xf32> to vector<12x384xf32>
    %395 = arith.mulf %391, %394 : vector<12x384xf32>
    %c0_228 = arith.constant 0 : index
    %c2_229 = arith.constant 2 : index
    %c0_230 = arith.constant 0 : index
    %c0_231 = arith.constant 0 : index
    %396 = vector.load %arg23[%c0_228, %c2_229, %c0_230, %c0_231] : memref<5x9x12x12xf32, #tpu.memory_space<vmem>>, vector<1x1x12x12xf32>
    %397 = vector.shape_cast %396 : vector<1x1x12x12xf32> to vector<12x12xf32>
    %cst_232 = arith.constant dense<0.000000e+00> : vector<12x384xf32>
    %398 = tpu.matmul %397, %395, %cst_232 {dimension_numbers = #tpu.dot_dimension_numbers<[1], [0], [0], [1], [0, 0, 1, 1], [], []>} : vector<12x12xf32>, vector<12x384xf32>, vector<12x384xf32> -> vector<12x384xf32>
    %399 = arith.addf %390, %398 : vector<12x384xf32>
    %c1_i32 = arith.constant 1 : i32
    %400 = tpu.dynamic_rotate %373 by %c1_i32 dim 1 : vector<12x384xf32>, i32 -> vector<12x384xf32>
    %c3_233 = arith.constant 3 : index
    %c0_234 = arith.constant 0 : index
    %c0_235 = arith.constant 0 : index
    %401 = vector.load %arg25[%c3_233, %c0_234, %c0_235] : memref<9x1x384xf32, #tpu.memory_space<vmem>>, vector<1x1x384xf32>
    %402 = vector.shape_cast %401 : vector<1x1x384xf32> to vector<1x384xf32>
    %403 = vector.broadcast %402 : vector<1x384xf32> to vector<12x384xf32>
    %404 = arith.mulf %400, %403 : vector<12x384xf32>
    %c0_236 = arith.constant 0 : index
    %c3_237 = arith.constant 3 : index
    %c0_238 = arith.constant 0 : index
    %c0_239 = arith.constant 0 : index
    %405 = vector.load %arg23[%c0_236, %c3_237, %c0_238, %c0_239] : memref<5x9x12x12xf32, #tpu.memory_space<vmem>>, vector<1x1x12x12xf32>
    %406 = vector.shape_cast %405 : vector<1x1x12x12xf32> to vector<12x12xf32>
    %cst_240 = arith.constant dense<0.000000e+00> : vector<12x384xf32>
    %407 = tpu.matmul %406, %404, %cst_240 {dimension_numbers = #tpu.dot_dimension_numbers<[1], [0], [0], [1], [0, 0, 1, 1], [], []>} : vector<12x12xf32>, vector<12x384xf32>, vector<12x384xf32> -> vector<12x384xf32>
    %408 = arith.addf %399, %407 : vector<12x384xf32>
    %c4 = arith.constant 4 : index
    %c0_241 = arith.constant 0 : index
    %c0_242 = arith.constant 0 : index
    %409 = vector.load %arg25[%c4, %c0_241, %c0_242] : memref<9x1x384xf32, #tpu.memory_space<vmem>>, vector<1x1x384xf32>
    %410 = vector.shape_cast %409 : vector<1x1x384xf32> to vector<1x384xf32>
    %411 = vector.broadcast %410 : vector<1x384xf32> to vector<12x384xf32>
    %412 = arith.mulf %373, %411 : vector<12x384xf32>
    %c0_243 = arith.constant 0 : index
    %c4_244 = arith.constant 4 : index
    %c0_245 = arith.constant 0 : index
    %c0_246 = arith.constant 0 : index
    %413 = vector.load %arg23[%c0_243, %c4_244, %c0_245, %c0_246] : memref<5x9x12x12xf32, #tpu.memory_space<vmem>>, vector<1x1x12x12xf32>
    %414 = vector.shape_cast %413 : vector<1x1x12x12xf32> to vector<12x12xf32>
    %cst_247 = arith.constant dense<0.000000e+00> : vector<12x384xf32>
    %415 = tpu.matmul %414, %412, %cst_247 {dimension_numbers = #tpu.dot_dimension_numbers<[1], [0], [0], [1], [0, 0, 1, 1], [], []>} : vector<12x12xf32>, vector<12x384xf32>, vector<12x384xf32> -> vector<12x384xf32>
    %416 = arith.addf %408, %415 : vector<12x384xf32>
    %c383_i32 = arith.constant 383 : i32
    %417 = tpu.dynamic_rotate %373 by %c383_i32 dim 1 : vector<12x384xf32>, i32 -> vector<12x384xf32>
    %c5 = arith.constant 5 : index
    %c0_248 = arith.constant 0 : index
    %c0_249 = arith.constant 0 : index
    %418 = vector.load %arg25[%c5, %c0_248, %c0_249] : memref<9x1x384xf32, #tpu.memory_space<vmem>>, vector<1x1x384xf32>
    %419 = vector.shape_cast %418 : vector<1x1x384xf32> to vector<1x384xf32>
    %420 = vector.broadcast %419 : vector<1x384xf32> to vector<12x384xf32>
    %421 = arith.mulf %417, %420 : vector<12x384xf32>
    %c0_250 = arith.constant 0 : index
    %c5_251 = arith.constant 5 : index
    %c0_252 = arith.constant 0 : index
    %c0_253 = arith.constant 0 : index
    %422 = vector.load %arg23[%c0_250, %c5_251, %c0_252, %c0_253] : memref<5x9x12x12xf32, #tpu.memory_space<vmem>>, vector<1x1x12x12xf32>
    %423 = vector.shape_cast %422 : vector<1x1x12x12xf32> to vector<12x12xf32>
    %cst_254 = arith.constant dense<0.000000e+00> : vector<12x384xf32>
    %424 = tpu.matmul %423, %421, %cst_254 {dimension_numbers = #tpu.dot_dimension_numbers<[1], [0], [0], [1], [0, 0, 1, 1], [], []>} : vector<12x12xf32>, vector<12x384xf32>, vector<12x384xf32> -> vector<12x384xf32>
    %425 = arith.addf %416, %424 : vector<12x384xf32>
    %c369_i32 = arith.constant 369 : i32
    %426 = tpu.dynamic_rotate %373 by %c369_i32 dim 1 : vector<12x384xf32>, i32 -> vector<12x384xf32>
    %c6 = arith.constant 6 : index
    %c0_255 = arith.constant 0 : index
    %c0_256 = arith.constant 0 : index
    %427 = vector.load %arg25[%c6, %c0_255, %c0_256] : memref<9x1x384xf32, #tpu.memory_space<vmem>>, vector<1x1x384xf32>
    %428 = vector.shape_cast %427 : vector<1x1x384xf32> to vector<1x384xf32>
    %429 = vector.broadcast %428 : vector<1x384xf32> to vector<12x384xf32>
    %430 = arith.mulf %426, %429 : vector<12x384xf32>
    %c0_257 = arith.constant 0 : index
    %c6_258 = arith.constant 6 : index
    %c0_259 = arith.constant 0 : index
    %c0_260 = arith.constant 0 : index
    %431 = vector.load %arg23[%c0_257, %c6_258, %c0_259, %c0_260] : memref<5x9x12x12xf32, #tpu.memory_space<vmem>>, vector<1x1x12x12xf32>
    %432 = vector.shape_cast %431 : vector<1x1x12x12xf32> to vector<12x12xf32>
    %cst_261 = arith.constant dense<0.000000e+00> : vector<12x384xf32>
    %433 = tpu.matmul %432, %430, %cst_261 {dimension_numbers = #tpu.dot_dimension_numbers<[1], [0], [0], [1], [0, 0, 1, 1], [], []>} : vector<12x12xf32>, vector<12x384xf32>, vector<12x384xf32> -> vector<12x384xf32>
    %434 = arith.addf %425, %433 : vector<12x384xf32>
    %c368_i32 = arith.constant 368 : i32
    %435 = tpu.dynamic_rotate %373 by %c368_i32 dim 1 : vector<12x384xf32>, i32 -> vector<12x384xf32>
    %c7 = arith.constant 7 : index
    %c0_262 = arith.constant 0 : index
    %c0_263 = arith.constant 0 : index
    %436 = vector.load %arg25[%c7, %c0_262, %c0_263] : memref<9x1x384xf32, #tpu.memory_space<vmem>>, vector<1x1x384xf32>
    %437 = vector.shape_cast %436 : vector<1x1x384xf32> to vector<1x384xf32>
    %438 = vector.broadcast %437 : vector<1x384xf32> to vector<12x384xf32>
    %439 = arith.mulf %435, %438 : vector<12x384xf32>
    %c0_264 = arith.constant 0 : index
    %c7_265 = arith.constant 7 : index
    %c0_266 = arith.constant 0 : index
    %c0_267 = arith.constant 0 : index
    %440 = vector.load %arg23[%c0_264, %c7_265, %c0_266, %c0_267] : memref<5x9x12x12xf32, #tpu.memory_space<vmem>>, vector<1x1x12x12xf32>
    %441 = vector.shape_cast %440 : vector<1x1x12x12xf32> to vector<12x12xf32>
    %cst_268 = arith.constant dense<0.000000e+00> : vector<12x384xf32>
    %442 = tpu.matmul %441, %439, %cst_268 {dimension_numbers = #tpu.dot_dimension_numbers<[1], [0], [0], [1], [0, 0, 1, 1], [], []>} : vector<12x12xf32>, vector<12x384xf32>, vector<12x384xf32> -> vector<12x384xf32>
    %443 = arith.addf %434, %442 : vector<12x384xf32>
    %c367_i32 = arith.constant 367 : i32
    %444 = tpu.dynamic_rotate %373 by %c367_i32 dim 1 : vector<12x384xf32>, i32 -> vector<12x384xf32>
    %c8 = arith.constant 8 : index
    %c0_269 = arith.constant 0 : index
    %c0_270 = arith.constant 0 : index
    %445 = vector.load %arg25[%c8, %c0_269, %c0_270] : memref<9x1x384xf32, #tpu.memory_space<vmem>>, vector<1x1x384xf32>
    %446 = vector.shape_cast %445 : vector<1x1x384xf32> to vector<1x384xf32>
    %447 = vector.broadcast %446 : vector<1x384xf32> to vector<12x384xf32>
    %448 = arith.mulf %444, %447 : vector<12x384xf32>
    %c0_271 = arith.constant 0 : index
    %c8_272 = arith.constant 8 : index
    %c0_273 = arith.constant 0 : index
    %c0_274 = arith.constant 0 : index
    %449 = vector.load %arg23[%c0_271, %c8_272, %c0_273, %c0_274] : memref<5x9x12x12xf32, #tpu.memory_space<vmem>>, vector<1x1x12x12xf32>
    %450 = vector.shape_cast %449 : vector<1x1x12x12xf32> to vector<12x12xf32>
    %cst_275 = arith.constant dense<0.000000e+00> : vector<12x384xf32>
    %451 = tpu.matmul %450, %448, %cst_275 {dimension_numbers = #tpu.dot_dimension_numbers<[1], [0], [0], [1], [0, 0, 1, 1], [], []>} : vector<12x12xf32>, vector<12x384xf32>, vector<12x384xf32> -> vector<12x384xf32>
    %452 = arith.addf %443, %451 : vector<12x384xf32>
    %c0_276 = arith.constant 0 : index
    %c0_277 = arith.constant 0 : index
    %c0_278 = arith.constant 0 : index
    %453 = vector.load %arg24[%c0_276, %c0_277, %c0_278] : memref<5x12x1xf32, #tpu.memory_space<vmem>>, vector<1x12x1xf32>
    %454 = vector.shape_cast %453 : vector<1x12x1xf32> to vector<12x1xf32>
    %455 = vector.broadcast %454 : vector<12x1xf32> to vector<12x384xf32>
    %456 = arith.addf %452, %455 : vector<12x384xf32>
    %c0_279 = arith.constant 0 : index
    %c0_280 = arith.constant 0 : index
    %457 = memref.load %arg28[%c0_279, %c0_280] : memref<1x8xf32, #tpu.memory_space<smem>>
    %cst_281 = arith.constant 0.000000e+00 : f32
    %458 = vector.broadcast %cst_281 : f32 to vector<12x384xf32>
    %459 = arith.cmpf oge, %456, %458 : vector<12x384xf32>
    %460 = vector.broadcast %457 : f32 to vector<12x384xf32>
    %461 = arith.mulf %460, %456 : vector<12x384xf32>
    %462 = arith.select %459, %456, %461 : vector<12x384xi1>, vector<12x384xf32>
    %c17_i32_282 = arith.constant 17 : i32
    %463 = tpu.dynamic_rotate %462 by %c17_i32_282 dim 1 : vector<12x384xf32>, i32 -> vector<12x384xf32>
    %c0_283 = arith.constant 0 : index
    %c0_284 = arith.constant 0 : index
    %c0_285 = arith.constant 0 : index
    %464 = vector.load %arg25[%c0_283, %c0_284, %c0_285] : memref<9x1x384xf32, #tpu.memory_space<vmem>>, vector<1x1x384xf32>
    %465 = vector.shape_cast %464 : vector<1x1x384xf32> to vector<1x384xf32>
    %466 = vector.broadcast %465 : vector<1x384xf32> to vector<12x384xf32>
    %467 = arith.mulf %463, %466 : vector<12x384xf32>
    %c1_286 = arith.constant 1 : index
    %c0_287 = arith.constant 0 : index
    %c0_288 = arith.constant 0 : index
    %c0_289 = arith.constant 0 : index
    %468 = vector.load %arg23[%c1_286, %c0_287, %c0_288, %c0_289] : memref<5x9x12x12xf32, #tpu.memory_space<vmem>>, vector<1x1x12x12xf32>
    %469 = vector.shape_cast %468 : vector<1x1x12x12xf32> to vector<12x12xf32>
    %cst_290 = arith.constant dense<0.000000e+00> : vector<12x384xf32>
    %470 = tpu.matmul %469, %467, %cst_290 {dimension_numbers = #tpu.dot_dimension_numbers<[1], [0], [0], [1], [0, 0, 1, 1], [], []>} : vector<12x12xf32>, vector<12x384xf32>, vector<12x384xf32> -> vector<12x384xf32>
    %c16_i32_291 = arith.constant 16 : i32
    %471 = tpu.dynamic_rotate %462 by %c16_i32_291 dim 1 : vector<12x384xf32>, i32 -> vector<12x384xf32>
    %c1_292 = arith.constant 1 : index
    %c0_293 = arith.constant 0 : index
    %c0_294 = arith.constant 0 : index
    %472 = vector.load %arg25[%c1_292, %c0_293, %c0_294] : memref<9x1x384xf32, #tpu.memory_space<vmem>>, vector<1x1x384xf32>
    %473 = vector.shape_cast %472 : vector<1x1x384xf32> to vector<1x384xf32>
    %474 = vector.broadcast %473 : vector<1x384xf32> to vector<12x384xf32>
    %475 = arith.mulf %471, %474 : vector<12x384xf32>
    %c1_295 = arith.constant 1 : index
    %c1_296 = arith.constant 1 : index
    %c0_297 = arith.constant 0 : index
    %c0_298 = arith.constant 0 : index
    %476 = vector.load %arg23[%c1_295, %c1_296, %c0_297, %c0_298] : memref<5x9x12x12xf32, #tpu.memory_space<vmem>>, vector<1x1x12x12xf32>
    %477 = vector.shape_cast %476 : vector<1x1x12x12xf32> to vector<12x12xf32>
    %cst_299 = arith.constant dense<0.000000e+00> : vector<12x384xf32>
    %478 = tpu.matmul %477, %475, %cst_299 {dimension_numbers = #tpu.dot_dimension_numbers<[1], [0], [0], [1], [0, 0, 1, 1], [], []>} : vector<12x12xf32>, vector<12x384xf32>, vector<12x384xf32> -> vector<12x384xf32>
    %479 = arith.addf %470, %478 : vector<12x384xf32>
    %c15_i32_300 = arith.constant 15 : i32
    %480 = tpu.dynamic_rotate %462 by %c15_i32_300 dim 1 : vector<12x384xf32>, i32 -> vector<12x384xf32>
    %c2_301 = arith.constant 2 : index
    %c0_302 = arith.constant 0 : index
    %c0_303 = arith.constant 0 : index
    %481 = vector.load %arg25[%c2_301, %c0_302, %c0_303] : memref<9x1x384xf32, #tpu.memory_space<vmem>>, vector<1x1x384xf32>
    %482 = vector.shape_cast %481 : vector<1x1x384xf32> to vector<1x384xf32>
    %483 = vector.broadcast %482 : vector<1x384xf32> to vector<12x384xf32>
    %484 = arith.mulf %480, %483 : vector<12x384xf32>
    %c1_304 = arith.constant 1 : index
    %c2_305 = arith.constant 2 : index
    %c0_306 = arith.constant 0 : index
    %c0_307 = arith.constant 0 : index
    %485 = vector.load %arg23[%c1_304, %c2_305, %c0_306, %c0_307] : memref<5x9x12x12xf32, #tpu.memory_space<vmem>>, vector<1x1x12x12xf32>
    %486 = vector.shape_cast %485 : vector<1x1x12x12xf32> to vector<12x12xf32>
    %cst_308 = arith.constant dense<0.000000e+00> : vector<12x384xf32>
    %487 = tpu.matmul %486, %484, %cst_308 {dimension_numbers = #tpu.dot_dimension_numbers<[1], [0], [0], [1], [0, 0, 1, 1], [], []>} : vector<12x12xf32>, vector<12x384xf32>, vector<12x384xf32> -> vector<12x384xf32>
    %488 = arith.addf %479, %487 : vector<12x384xf32>
    %c1_i32_309 = arith.constant 1 : i32
    %489 = tpu.dynamic_rotate %462 by %c1_i32_309 dim 1 : vector<12x384xf32>, i32 -> vector<12x384xf32>
    %c3_310 = arith.constant 3 : index
    %c0_311 = arith.constant 0 : index
    %c0_312 = arith.constant 0 : index
    %490 = vector.load %arg25[%c3_310, %c0_311, %c0_312] : memref<9x1x384xf32, #tpu.memory_space<vmem>>, vector<1x1x384xf32>
    %491 = vector.shape_cast %490 : vector<1x1x384xf32> to vector<1x384xf32>
    %492 = vector.broadcast %491 : vector<1x384xf32> to vector<12x384xf32>
    %493 = arith.mulf %489, %492 : vector<12x384xf32>
    %c1_313 = arith.constant 1 : index
    %c3_314 = arith.constant 3 : index
    %c0_315 = arith.constant 0 : index
    %c0_316 = arith.constant 0 : index
    %494 = vector.load %arg23[%c1_313, %c3_314, %c0_315, %c0_316] : memref<5x9x12x12xf32, #tpu.memory_space<vmem>>, vector<1x1x12x12xf32>
    %495 = vector.shape_cast %494 : vector<1x1x12x12xf32> to vector<12x12xf32>
    %cst_317 = arith.constant dense<0.000000e+00> : vector<12x384xf32>
    %496 = tpu.matmul %495, %493, %cst_317 {dimension_numbers = #tpu.dot_dimension_numbers<[1], [0], [0], [1], [0, 0, 1, 1], [], []>} : vector<12x12xf32>, vector<12x384xf32>, vector<12x384xf32> -> vector<12x384xf32>
    %497 = arith.addf %488, %496 : vector<12x384xf32>
    %c4_318 = arith.constant 4 : index
    %c0_319 = arith.constant 0 : index
    %c0_320 = arith.constant 0 : index
    %498 = vector.load %arg25[%c4_318, %c0_319, %c0_320] : memref<9x1x384xf32, #tpu.memory_space<vmem>>, vector<1x1x384xf32>
    %499 = vector.shape_cast %498 : vector<1x1x384xf32> to vector<1x384xf32>
    %500 = vector.broadcast %499 : vector<1x384xf32> to vector<12x384xf32>
    %501 = arith.mulf %462, %500 : vector<12x384xf32>
    %c1_321 = arith.constant 1 : index
    %c4_322 = arith.constant 4 : index
    %c0_323 = arith.constant 0 : index
    %c0_324 = arith.constant 0 : index
    %502 = vector.load %arg23[%c1_321, %c4_322, %c0_323, %c0_324] : memref<5x9x12x12xf32, #tpu.memory_space<vmem>>, vector<1x1x12x12xf32>
    %503 = vector.shape_cast %502 : vector<1x1x12x12xf32> to vector<12x12xf32>
    %cst_325 = arith.constant dense<0.000000e+00> : vector<12x384xf32>
    %504 = tpu.matmul %503, %501, %cst_325 {dimension_numbers = #tpu.dot_dimension_numbers<[1], [0], [0], [1], [0, 0, 1, 1], [], []>} : vector<12x12xf32>, vector<12x384xf32>, vector<12x384xf32> -> vector<12x384xf32>
    %505 = arith.addf %497, %504 : vector<12x384xf32>
    %c383_i32_326 = arith.constant 383 : i32
    %506 = tpu.dynamic_rotate %462 by %c383_i32_326 dim 1 : vector<12x384xf32>, i32 -> vector<12x384xf32>
    %c5_327 = arith.constant 5 : index
    %c0_328 = arith.constant 0 : index
    %c0_329 = arith.constant 0 : index
    %507 = vector.load %arg25[%c5_327, %c0_328, %c0_329] : memref<9x1x384xf32, #tpu.memory_space<vmem>>, vector<1x1x384xf32>
    %508 = vector.shape_cast %507 : vector<1x1x384xf32> to vector<1x384xf32>
    %509 = vector.broadcast %508 : vector<1x384xf32> to vector<12x384xf32>
    %510 = arith.mulf %506, %509 : vector<12x384xf32>
    %c1_330 = arith.constant 1 : index
    %c5_331 = arith.constant 5 : index
    %c0_332 = arith.constant 0 : index
    %c0_333 = arith.constant 0 : index
    %511 = vector.load %arg23[%c1_330, %c5_331, %c0_332, %c0_333] : memref<5x9x12x12xf32, #tpu.memory_space<vmem>>, vector<1x1x12x12xf32>
    %512 = vector.shape_cast %511 : vector<1x1x12x12xf32> to vector<12x12xf32>
    %cst_334 = arith.constant dense<0.000000e+00> : vector<12x384xf32>
    %513 = tpu.matmul %512, %510, %cst_334 {dimension_numbers = #tpu.dot_dimension_numbers<[1], [0], [0], [1], [0, 0, 1, 1], [], []>} : vector<12x12xf32>, vector<12x384xf32>, vector<12x384xf32> -> vector<12x384xf32>
    %514 = arith.addf %505, %513 : vector<12x384xf32>
    %c369_i32_335 = arith.constant 369 : i32
    %515 = tpu.dynamic_rotate %462 by %c369_i32_335 dim 1 : vector<12x384xf32>, i32 -> vector<12x384xf32>
    %c6_336 = arith.constant 6 : index
    %c0_337 = arith.constant 0 : index
    %c0_338 = arith.constant 0 : index
    %516 = vector.load %arg25[%c6_336, %c0_337, %c0_338] : memref<9x1x384xf32, #tpu.memory_space<vmem>>, vector<1x1x384xf32>
    %517 = vector.shape_cast %516 : vector<1x1x384xf32> to vector<1x384xf32>
    %518 = vector.broadcast %517 : vector<1x384xf32> to vector<12x384xf32>
    %519 = arith.mulf %515, %518 : vector<12x384xf32>
    %c1_339 = arith.constant 1 : index
    %c6_340 = arith.constant 6 : index
    %c0_341 = arith.constant 0 : index
    %c0_342 = arith.constant 0 : index
    %520 = vector.load %arg23[%c1_339, %c6_340, %c0_341, %c0_342] : memref<5x9x12x12xf32, #tpu.memory_space<vmem>>, vector<1x1x12x12xf32>
    %521 = vector.shape_cast %520 : vector<1x1x12x12xf32> to vector<12x12xf32>
    %cst_343 = arith.constant dense<0.000000e+00> : vector<12x384xf32>
    %522 = tpu.matmul %521, %519, %cst_343 {dimension_numbers = #tpu.dot_dimension_numbers<[1], [0], [0], [1], [0, 0, 1, 1], [], []>} : vector<12x12xf32>, vector<12x384xf32>, vector<12x384xf32> -> vector<12x384xf32>
    %523 = arith.addf %514, %522 : vector<12x384xf32>
    %c368_i32_344 = arith.constant 368 : i32
    %524 = tpu.dynamic_rotate %462 by %c368_i32_344 dim 1 : vector<12x384xf32>, i32 -> vector<12x384xf32>
    %c7_345 = arith.constant 7 : index
    %c0_346 = arith.constant 0 : index
    %c0_347 = arith.constant 0 : index
    %525 = vector.load %arg25[%c7_345, %c0_346, %c0_347] : memref<9x1x384xf32, #tpu.memory_space<vmem>>, vector<1x1x384xf32>
    %526 = vector.shape_cast %525 : vector<1x1x384xf32> to vector<1x384xf32>
    %527 = vector.broadcast %526 : vector<1x384xf32> to vector<12x384xf32>
    %528 = arith.mulf %524, %527 : vector<12x384xf32>
    %c1_348 = arith.constant 1 : index
    %c7_349 = arith.constant 7 : index
    %c0_350 = arith.constant 0 : index
    %c0_351 = arith.constant 0 : index
    %529 = vector.load %arg23[%c1_348, %c7_349, %c0_350, %c0_351] : memref<5x9x12x12xf32, #tpu.memory_space<vmem>>, vector<1x1x12x12xf32>
    %530 = vector.shape_cast %529 : vector<1x1x12x12xf32> to vector<12x12xf32>
    %cst_352 = arith.constant dense<0.000000e+00> : vector<12x384xf32>
    %531 = tpu.matmul %530, %528, %cst_352 {dimension_numbers = #tpu.dot_dimension_numbers<[1], [0], [0], [1], [0, 0, 1, 1], [], []>} : vector<12x12xf32>, vector<12x384xf32>, vector<12x384xf32> -> vector<12x384xf32>
    %532 = arith.addf %523, %531 : vector<12x384xf32>
    %c367_i32_353 = arith.constant 367 : i32
    %533 = tpu.dynamic_rotate %462 by %c367_i32_353 dim 1 : vector<12x384xf32>, i32 -> vector<12x384xf32>
    %c8_354 = arith.constant 8 : index
    %c0_355 = arith.constant 0 : index
    %c0_356 = arith.constant 0 : index
    %534 = vector.load %arg25[%c8_354, %c0_355, %c0_356] : memref<9x1x384xf32, #tpu.memory_space<vmem>>, vector<1x1x384xf32>
    %535 = vector.shape_cast %534 : vector<1x1x384xf32> to vector<1x384xf32>
    %536 = vector.broadcast %535 : vector<1x384xf32> to vector<12x384xf32>
    %537 = arith.mulf %533, %536 : vector<12x384xf32>
    %c1_357 = arith.constant 1 : index
    %c8_358 = arith.constant 8 : index
    %c0_359 = arith.constant 0 : index
    %c0_360 = arith.constant 0 : index
    %538 = vector.load %arg23[%c1_357, %c8_358, %c0_359, %c0_360] : memref<5x9x12x12xf32, #tpu.memory_space<vmem>>, vector<1x1x12x12xf32>
    %539 = vector.shape_cast %538 : vector<1x1x12x12xf32> to vector<12x12xf32>
    %cst_361 = arith.constant dense<0.000000e+00> : vector<12x384xf32>
    %540 = tpu.matmul %539, %537, %cst_361 {dimension_numbers = #tpu.dot_dimension_numbers<[1], [0], [0], [1], [0, 0, 1, 1], [], []>} : vector<12x12xf32>, vector<12x384xf32>, vector<12x384xf32> -> vector<12x384xf32>
    %541 = arith.addf %532, %540 : vector<12x384xf32>
    %c1_362 = arith.constant 1 : index
    %c0_363 = arith.constant 0 : index
    %c0_364 = arith.constant 0 : index
    %542 = vector.load %arg24[%c1_362, %c0_363, %c0_364] : memref<5x12x1xf32, #tpu.memory_space<vmem>>, vector<1x12x1xf32>
    %543 = vector.shape_cast %542 : vector<1x12x1xf32> to vector<12x1xf32>
    %544 = vector.broadcast %543 : vector<12x1xf32> to vector<12x384xf32>
    %545 = arith.addf %541, %544 : vector<12x384xf32>
    %c0_365 = arith.constant 0 : index
    %c1_366 = arith.constant 1 : index
    %546 = memref.load %arg28[%c0_365, %c1_366] : memref<1x8xf32, #tpu.memory_space<smem>>
    %cst_367 = arith.constant 0.000000e+00 : f32
    %547 = vector.broadcast %cst_367 : f32 to vector<12x384xf32>
    %548 = arith.cmpf oge, %545, %547 : vector<12x384xf32>
    %549 = vector.broadcast %546 : f32 to vector<12x384xf32>
    %550 = arith.mulf %549, %545 : vector<12x384xf32>
    %551 = arith.select %548, %545, %550 : vector<12x384xi1>, vector<12x384xf32>
    %552 = arith.addf %551, %462 : vector<12x384xf32>
    %c17_i32_368 = arith.constant 17 : i32
    %553 = tpu.dynamic_rotate %552 by %c17_i32_368 dim 1 : vector<12x384xf32>, i32 -> vector<12x384xf32>
    %c0_369 = arith.constant 0 : index
    %c0_370 = arith.constant 0 : index
    %c0_371 = arith.constant 0 : index
    %554 = vector.load %arg25[%c0_369, %c0_370, %c0_371] : memref<9x1x384xf32, #tpu.memory_space<vmem>>, vector<1x1x384xf32>
    %555 = vector.shape_cast %554 : vector<1x1x384xf32> to vector<1x384xf32>
    %556 = vector.broadcast %555 : vector<1x384xf32> to vector<12x384xf32>
    %557 = arith.mulf %553, %556 : vector<12x384xf32>
    %c2_372 = arith.constant 2 : index
    %c0_373 = arith.constant 0 : index
    %c0_374 = arith.constant 0 : index
    %c0_375 = arith.constant 0 : index
    %558 = vector.load %arg23[%c2_372, %c0_373, %c0_374, %c0_375] : memref<5x9x12x12xf32, #tpu.memory_space<vmem>>, vector<1x1x12x12xf32>
    %559 = vector.shape_cast %558 : vector<1x1x12x12xf32> to vector<12x12xf32>
    %cst_376 = arith.constant dense<0.000000e+00> : vector<12x384xf32>
    %560 = tpu.matmul %559, %557, %cst_376 {dimension_numbers = #tpu.dot_dimension_numbers<[1], [0], [0], [1], [0, 0, 1, 1], [], []>} : vector<12x12xf32>, vector<12x384xf32>, vector<12x384xf32> -> vector<12x384xf32>
    %c16_i32_377 = arith.constant 16 : i32
    %561 = tpu.dynamic_rotate %552 by %c16_i32_377 dim 1 : vector<12x384xf32>, i32 -> vector<12x384xf32>
    %c1_378 = arith.constant 1 : index
    %c0_379 = arith.constant 0 : index
    %c0_380 = arith.constant 0 : index
    %562 = vector.load %arg25[%c1_378, %c0_379, %c0_380] : memref<9x1x384xf32, #tpu.memory_space<vmem>>, vector<1x1x384xf32>
    %563 = vector.shape_cast %562 : vector<1x1x384xf32> to vector<1x384xf32>
    %564 = vector.broadcast %563 : vector<1x384xf32> to vector<12x384xf32>
    %565 = arith.mulf %561, %564 : vector<12x384xf32>
    %c2_381 = arith.constant 2 : index
    %c1_382 = arith.constant 1 : index
    %c0_383 = arith.constant 0 : index
    %c0_384 = arith.constant 0 : index
    %566 = vector.load %arg23[%c2_381, %c1_382, %c0_383, %c0_384] : memref<5x9x12x12xf32, #tpu.memory_space<vmem>>, vector<1x1x12x12xf32>
    %567 = vector.shape_cast %566 : vector<1x1x12x12xf32> to vector<12x12xf32>
    %cst_385 = arith.constant dense<0.000000e+00> : vector<12x384xf32>
    %568 = tpu.matmul %567, %565, %cst_385 {dimension_numbers = #tpu.dot_dimension_numbers<[1], [0], [0], [1], [0, 0, 1, 1], [], []>} : vector<12x12xf32>, vector<12x384xf32>, vector<12x384xf32> -> vector<12x384xf32>
    %569 = arith.addf %560, %568 : vector<12x384xf32>
    %c15_i32_386 = arith.constant 15 : i32
    %570 = tpu.dynamic_rotate %552 by %c15_i32_386 dim 1 : vector<12x384xf32>, i32 -> vector<12x384xf32>
    %c2_387 = arith.constant 2 : index
    %c0_388 = arith.constant 0 : index
    %c0_389 = arith.constant 0 : index
    %571 = vector.load %arg25[%c2_387, %c0_388, %c0_389] : memref<9x1x384xf32, #tpu.memory_space<vmem>>, vector<1x1x384xf32>
    %572 = vector.shape_cast %571 : vector<1x1x384xf32> to vector<1x384xf32>
    %573 = vector.broadcast %572 : vector<1x384xf32> to vector<12x384xf32>
    %574 = arith.mulf %570, %573 : vector<12x384xf32>
    %c2_390 = arith.constant 2 : index
    %c2_391 = arith.constant 2 : index
    %c0_392 = arith.constant 0 : index
    %c0_393 = arith.constant 0 : index
    %575 = vector.load %arg23[%c2_390, %c2_391, %c0_392, %c0_393] : memref<5x9x12x12xf32, #tpu.memory_space<vmem>>, vector<1x1x12x12xf32>
    %576 = vector.shape_cast %575 : vector<1x1x12x12xf32> to vector<12x12xf32>
    %cst_394 = arith.constant dense<0.000000e+00> : vector<12x384xf32>
    %577 = tpu.matmul %576, %574, %cst_394 {dimension_numbers = #tpu.dot_dimension_numbers<[1], [0], [0], [1], [0, 0, 1, 1], [], []>} : vector<12x12xf32>, vector<12x384xf32>, vector<12x384xf32> -> vector<12x384xf32>
    %578 = arith.addf %569, %577 : vector<12x384xf32>
    %c1_i32_395 = arith.constant 1 : i32
    %579 = tpu.dynamic_rotate %552 by %c1_i32_395 dim 1 : vector<12x384xf32>, i32 -> vector<12x384xf32>
    %c3_396 = arith.constant 3 : index
    %c0_397 = arith.constant 0 : index
    %c0_398 = arith.constant 0 : index
    %580 = vector.load %arg25[%c3_396, %c0_397, %c0_398] : memref<9x1x384xf32, #tpu.memory_space<vmem>>, vector<1x1x384xf32>
    %581 = vector.shape_cast %580 : vector<1x1x384xf32> to vector<1x384xf32>
    %582 = vector.broadcast %581 : vector<1x384xf32> to vector<12x384xf32>
    %583 = arith.mulf %579, %582 : vector<12x384xf32>
    %c2_399 = arith.constant 2 : index
    %c3_400 = arith.constant 3 : index
    %c0_401 = arith.constant 0 : index
    %c0_402 = arith.constant 0 : index
    %584 = vector.load %arg23[%c2_399, %c3_400, %c0_401, %c0_402] : memref<5x9x12x12xf32, #tpu.memory_space<vmem>>, vector<1x1x12x12xf32>
    %585 = vector.shape_cast %584 : vector<1x1x12x12xf32> to vector<12x12xf32>
    %cst_403 = arith.constant dense<0.000000e+00> : vector<12x384xf32>
    %586 = tpu.matmul %585, %583, %cst_403 {dimension_numbers = #tpu.dot_dimension_numbers<[1], [0], [0], [1], [0, 0, 1, 1], [], []>} : vector<12x12xf32>, vector<12x384xf32>, vector<12x384xf32> -> vector<12x384xf32>
    %587 = arith.addf %578, %586 : vector<12x384xf32>
    %c4_404 = arith.constant 4 : index
    %c0_405 = arith.constant 0 : index
    %c0_406 = arith.constant 0 : index
    %588 = vector.load %arg25[%c4_404, %c0_405, %c0_406] : memref<9x1x384xf32, #tpu.memory_space<vmem>>, vector<1x1x384xf32>
    %589 = vector.shape_cast %588 : vector<1x1x384xf32> to vector<1x384xf32>
    %590 = vector.broadcast %589 : vector<1x384xf32> to vector<12x384xf32>
    %591 = arith.mulf %552, %590 : vector<12x384xf32>
    %c2_407 = arith.constant 2 : index
    %c4_408 = arith.constant 4 : index
    %c0_409 = arith.constant 0 : index
    %c0_410 = arith.constant 0 : index
    %592 = vector.load %arg23[%c2_407, %c4_408, %c0_409, %c0_410] : memref<5x9x12x12xf32, #tpu.memory_space<vmem>>, vector<1x1x12x12xf32>
    %593 = vector.shape_cast %592 : vector<1x1x12x12xf32> to vector<12x12xf32>
    %cst_411 = arith.constant dense<0.000000e+00> : vector<12x384xf32>
    %594 = tpu.matmul %593, %591, %cst_411 {dimension_numbers = #tpu.dot_dimension_numbers<[1], [0], [0], [1], [0, 0, 1, 1], [], []>} : vector<12x12xf32>, vector<12x384xf32>, vector<12x384xf32> -> vector<12x384xf32>
    %595 = arith.addf %587, %594 : vector<12x384xf32>
    %c383_i32_412 = arith.constant 383 : i32
    %596 = tpu.dynamic_rotate %552 by %c383_i32_412 dim 1 : vector<12x384xf32>, i32 -> vector<12x384xf32>
    %c5_413 = arith.constant 5 : index
    %c0_414 = arith.constant 0 : index
    %c0_415 = arith.constant 0 : index
    %597 = vector.load %arg25[%c5_413, %c0_414, %c0_415] : memref<9x1x384xf32, #tpu.memory_space<vmem>>, vector<1x1x384xf32>
    %598 = vector.shape_cast %597 : vector<1x1x384xf32> to vector<1x384xf32>
    %599 = vector.broadcast %598 : vector<1x384xf32> to vector<12x384xf32>
    %600 = arith.mulf %596, %599 : vector<12x384xf32>
    %c2_416 = arith.constant 2 : index
    %c5_417 = arith.constant 5 : index
    %c0_418 = arith.constant 0 : index
    %c0_419 = arith.constant 0 : index
    %601 = vector.load %arg23[%c2_416, %c5_417, %c0_418, %c0_419] : memref<5x9x12x12xf32, #tpu.memory_space<vmem>>, vector<1x1x12x12xf32>
    %602 = vector.shape_cast %601 : vector<1x1x12x12xf32> to vector<12x12xf32>
    %cst_420 = arith.constant dense<0.000000e+00> : vector<12x384xf32>
    %603 = tpu.matmul %602, %600, %cst_420 {dimension_numbers = #tpu.dot_dimension_numbers<[1], [0], [0], [1], [0, 0, 1, 1], [], []>} : vector<12x12xf32>, vector<12x384xf32>, vector<12x384xf32> -> vector<12x384xf32>
    %604 = arith.addf %595, %603 : vector<12x384xf32>
    %c369_i32_421 = arith.constant 369 : i32
    %605 = tpu.dynamic_rotate %552 by %c369_i32_421 dim 1 : vector<12x384xf32>, i32 -> vector<12x384xf32>
    %c6_422 = arith.constant 6 : index
    %c0_423 = arith.constant 0 : index
    %c0_424 = arith.constant 0 : index
    %606 = vector.load %arg25[%c6_422, %c0_423, %c0_424] : memref<9x1x384xf32, #tpu.memory_space<vmem>>, vector<1x1x384xf32>
    %607 = vector.shape_cast %606 : vector<1x1x384xf32> to vector<1x384xf32>
    %608 = vector.broadcast %607 : vector<1x384xf32> to vector<12x384xf32>
    %609 = arith.mulf %605, %608 : vector<12x384xf32>
    %c2_425 = arith.constant 2 : index
    %c6_426 = arith.constant 6 : index
    %c0_427 = arith.constant 0 : index
    %c0_428 = arith.constant 0 : index
    %610 = vector.load %arg23[%c2_425, %c6_426, %c0_427, %c0_428] : memref<5x9x12x12xf32, #tpu.memory_space<vmem>>, vector<1x1x12x12xf32>
    %611 = vector.shape_cast %610 : vector<1x1x12x12xf32> to vector<12x12xf32>
    %cst_429 = arith.constant dense<0.000000e+00> : vector<12x384xf32>
    %612 = tpu.matmul %611, %609, %cst_429 {dimension_numbers = #tpu.dot_dimension_numbers<[1], [0], [0], [1], [0, 0, 1, 1], [], []>} : vector<12x12xf32>, vector<12x384xf32>, vector<12x384xf32> -> vector<12x384xf32>
    %613 = arith.addf %604, %612 : vector<12x384xf32>
    %c368_i32_430 = arith.constant 368 : i32
    %614 = tpu.dynamic_rotate %552 by %c368_i32_430 dim 1 : vector<12x384xf32>, i32 -> vector<12x384xf32>
    %c7_431 = arith.constant 7 : index
    %c0_432 = arith.constant 0 : index
    %c0_433 = arith.constant 0 : index
    %615 = vector.load %arg25[%c7_431, %c0_432, %c0_433] : memref<9x1x384xf32, #tpu.memory_space<vmem>>, vector<1x1x384xf32>
    %616 = vector.shape_cast %615 : vector<1x1x384xf32> to vector<1x384xf32>
    %617 = vector.broadcast %616 : vector<1x384xf32> to vector<12x384xf32>
    %618 = arith.mulf %614, %617 : vector<12x384xf32>
    %c2_434 = arith.constant 2 : index
    %c7_435 = arith.constant 7 : index
    %c0_436 = arith.constant 0 : index
    %c0_437 = arith.constant 0 : index
    %619 = vector.load %arg23[%c2_434, %c7_435, %c0_436, %c0_437] : memref<5x9x12x12xf32, #tpu.memory_space<vmem>>, vector<1x1x12x12xf32>
    %620 = vector.shape_cast %619 : vector<1x1x12x12xf32> to vector<12x12xf32>
    %cst_438 = arith.constant dense<0.000000e+00> : vector<12x384xf32>
    %621 = tpu.matmul %620, %618, %cst_438 {dimension_numbers = #tpu.dot_dimension_numbers<[1], [0], [0], [1], [0, 0, 1, 1], [], []>} : vector<12x12xf32>, vector<12x384xf32>, vector<12x384xf32> -> vector<12x384xf32>
    %622 = arith.addf %613, %621 : vector<12x384xf32>
    %c367_i32_439 = arith.constant 367 : i32
    %623 = tpu.dynamic_rotate %552 by %c367_i32_439 dim 1 : vector<12x384xf32>, i32 -> vector<12x384xf32>
    %c8_440 = arith.constant 8 : index
    %c0_441 = arith.constant 0 : index
    %c0_442 = arith.constant 0 : index
    %624 = vector.load %arg25[%c8_440, %c0_441, %c0_442] : memref<9x1x384xf32, #tpu.memory_space<vmem>>, vector<1x1x384xf32>
    %625 = vector.shape_cast %624 : vector<1x1x384xf32> to vector<1x384xf32>
    %626 = vector.broadcast %625 : vector<1x384xf32> to vector<12x384xf32>
    %627 = arith.mulf %623, %626 : vector<12x384xf32>
    %c2_443 = arith.constant 2 : index
    %c8_444 = arith.constant 8 : index
    %c0_445 = arith.constant 0 : index
    %c0_446 = arith.constant 0 : index
    %628 = vector.load %arg23[%c2_443, %c8_444, %c0_445, %c0_446] : memref<5x9x12x12xf32, #tpu.memory_space<vmem>>, vector<1x1x12x12xf32>
    %629 = vector.shape_cast %628 : vector<1x1x12x12xf32> to vector<12x12xf32>
    %cst_447 = arith.constant dense<0.000000e+00> : vector<12x384xf32>
    %630 = tpu.matmul %629, %627, %cst_447 {dimension_numbers = #tpu.dot_dimension_numbers<[1], [0], [0], [1], [0, 0, 1, 1], [], []>} : vector<12x12xf32>, vector<12x384xf32>, vector<12x384xf32> -> vector<12x384xf32>
    %631 = arith.addf %622, %630 : vector<12x384xf32>
    %c2_448 = arith.constant 2 : index
    %c0_449 = arith.constant 0 : index
    %c0_450 = arith.constant 0 : index
    %632 = vector.load %arg24[%c2_448, %c0_449, %c0_450] : memref<5x12x1xf32, #tpu.memory_space<vmem>>, vector<1x12x1xf32>
    %633 = vector.shape_cast %632 : vector<1x12x1xf32> to vector<12x1xf32>
    %634 = vector.broadcast %633 : vector<12x1xf32> to vector<12x384xf32>
    %635 = arith.addf %631, %634 : vector<12x384xf32>
    %c0_451 = arith.constant 0 : index
    %c2_452 = arith.constant 2 : index
    %636 = memref.load %arg28[%c0_451, %c2_452] : memref<1x8xf32, #tpu.memory_space<smem>>
    %cst_453 = arith.constant 0.000000e+00 : f32
    %637 = vector.broadcast %cst_453 : f32 to vector<12x384xf32>
    %638 = arith.cmpf oge, %635, %637 : vector<12x384xf32>
    %639 = vector.broadcast %636 : f32 to vector<12x384xf32>
    %640 = arith.mulf %639, %635 : vector<12x384xf32>
    %641 = arith.select %638, %635, %640 : vector<12x384xi1>, vector<12x384xf32>
    %642 = arith.addf %641, %552 : vector<12x384xf32>
    %c17_i32_454 = arith.constant 17 : i32
    %643 = tpu.dynamic_rotate %642 by %c17_i32_454 dim 1 : vector<12x384xf32>, i32 -> vector<12x384xf32>
    %c0_455 = arith.constant 0 : index
    %c0_456 = arith.constant 0 : index
    %c0_457 = arith.constant 0 : index
    %644 = vector.load %arg25[%c0_455, %c0_456, %c0_457] : memref<9x1x384xf32, #tpu.memory_space<vmem>>, vector<1x1x384xf32>
    %645 = vector.shape_cast %644 : vector<1x1x384xf32> to vector<1x384xf32>
    %646 = vector.broadcast %645 : vector<1x384xf32> to vector<12x384xf32>
    %647 = arith.mulf %643, %646 : vector<12x384xf32>
    %c3_458 = arith.constant 3 : index
    %c0_459 = arith.constant 0 : index
    %c0_460 = arith.constant 0 : index
    %c0_461 = arith.constant 0 : index
    %648 = vector.load %arg23[%c3_458, %c0_459, %c0_460, %c0_461] : memref<5x9x12x12xf32, #tpu.memory_space<vmem>>, vector<1x1x12x12xf32>
    %649 = vector.shape_cast %648 : vector<1x1x12x12xf32> to vector<12x12xf32>
    %cst_462 = arith.constant dense<0.000000e+00> : vector<12x384xf32>
    %650 = tpu.matmul %649, %647, %cst_462 {dimension_numbers = #tpu.dot_dimension_numbers<[1], [0], [0], [1], [0, 0, 1, 1], [], []>} : vector<12x12xf32>, vector<12x384xf32>, vector<12x384xf32> -> vector<12x384xf32>
    %c16_i32_463 = arith.constant 16 : i32
    %651 = tpu.dynamic_rotate %642 by %c16_i32_463 dim 1 : vector<12x384xf32>, i32 -> vector<12x384xf32>
    %c1_464 = arith.constant 1 : index
    %c0_465 = arith.constant 0 : index
    %c0_466 = arith.constant 0 : index
    %652 = vector.load %arg25[%c1_464, %c0_465, %c0_466] : memref<9x1x384xf32, #tpu.memory_space<vmem>>, vector<1x1x384xf32>
    %653 = vector.shape_cast %652 : vector<1x1x384xf32> to vector<1x384xf32>
    %654 = vector.broadcast %653 : vector<1x384xf32> to vector<12x384xf32>
    %655 = arith.mulf %651, %654 : vector<12x384xf32>
    %c3_467 = arith.constant 3 : index
    %c1_468 = arith.constant 1 : index
    %c0_469 = arith.constant 0 : index
    %c0_470 = arith.constant 0 : index
    %656 = vector.load %arg23[%c3_467, %c1_468, %c0_469, %c0_470] : memref<5x9x12x12xf32, #tpu.memory_space<vmem>>, vector<1x1x12x12xf32>
    %657 = vector.shape_cast %656 : vector<1x1x12x12xf32> to vector<12x12xf32>
    %cst_471 = arith.constant dense<0.000000e+00> : vector<12x384xf32>
    %658 = tpu.matmul %657, %655, %cst_471 {dimension_numbers = #tpu.dot_dimension_numbers<[1], [0], [0], [1], [0, 0, 1, 1], [], []>} : vector<12x12xf32>, vector<12x384xf32>, vector<12x384xf32> -> vector<12x384xf32>
    %659 = arith.addf %650, %658 : vector<12x384xf32>
    %c15_i32_472 = arith.constant 15 : i32
    %660 = tpu.dynamic_rotate %642 by %c15_i32_472 dim 1 : vector<12x384xf32>, i32 -> vector<12x384xf32>
    %c2_473 = arith.constant 2 : index
    %c0_474 = arith.constant 0 : index
    %c0_475 = arith.constant 0 : index
    %661 = vector.load %arg25[%c2_473, %c0_474, %c0_475] : memref<9x1x384xf32, #tpu.memory_space<vmem>>, vector<1x1x384xf32>
    %662 = vector.shape_cast %661 : vector<1x1x384xf32> to vector<1x384xf32>
    %663 = vector.broadcast %662 : vector<1x384xf32> to vector<12x384xf32>
    %664 = arith.mulf %660, %663 : vector<12x384xf32>
    %c3_476 = arith.constant 3 : index
    %c2_477 = arith.constant 2 : index
    %c0_478 = arith.constant 0 : index
    %c0_479 = arith.constant 0 : index
    %665 = vector.load %arg23[%c3_476, %c2_477, %c0_478, %c0_479] : memref<5x9x12x12xf32, #tpu.memory_space<vmem>>, vector<1x1x12x12xf32>
    %666 = vector.shape_cast %665 : vector<1x1x12x12xf32> to vector<12x12xf32>
    %cst_480 = arith.constant dense<0.000000e+00> : vector<12x384xf32>
    %667 = tpu.matmul %666, %664, %cst_480 {dimension_numbers = #tpu.dot_dimension_numbers<[1], [0], [0], [1], [0, 0, 1, 1], [], []>} : vector<12x12xf32>, vector<12x384xf32>, vector<12x384xf32> -> vector<12x384xf32>
    %668 = arith.addf %659, %667 : vector<12x384xf32>
    %c1_i32_481 = arith.constant 1 : i32
    %669 = tpu.dynamic_rotate %642 by %c1_i32_481 dim 1 : vector<12x384xf32>, i32 -> vector<12x384xf32>
    %c3_482 = arith.constant 3 : index
    %c0_483 = arith.constant 0 : index
    %c0_484 = arith.constant 0 : index
    %670 = vector.load %arg25[%c3_482, %c0_483, %c0_484] : memref<9x1x384xf32, #tpu.memory_space<vmem>>, vector<1x1x384xf32>
    %671 = vector.shape_cast %670 : vector<1x1x384xf32> to vector<1x384xf32>
    %672 = vector.broadcast %671 : vector<1x384xf32> to vector<12x384xf32>
    %673 = arith.mulf %669, %672 : vector<12x384xf32>
    %c3_485 = arith.constant 3 : index
    %c3_486 = arith.constant 3 : index
    %c0_487 = arith.constant 0 : index
    %c0_488 = arith.constant 0 : index
    %674 = vector.load %arg23[%c3_485, %c3_486, %c0_487, %c0_488] : memref<5x9x12x12xf32, #tpu.memory_space<vmem>>, vector<1x1x12x12xf32>
    %675 = vector.shape_cast %674 : vector<1x1x12x12xf32> to vector<12x12xf32>
    %cst_489 = arith.constant dense<0.000000e+00> : vector<12x384xf32>
    %676 = tpu.matmul %675, %673, %cst_489 {dimension_numbers = #tpu.dot_dimension_numbers<[1], [0], [0], [1], [0, 0, 1, 1], [], []>} : vector<12x12xf32>, vector<12x384xf32>, vector<12x384xf32> -> vector<12x384xf32>
    %677 = arith.addf %668, %676 : vector<12x384xf32>
    %c4_490 = arith.constant 4 : index
    %c0_491 = arith.constant 0 : index
    %c0_492 = arith.constant 0 : index
    %678 = vector.load %arg25[%c4_490, %c0_491, %c0_492] : memref<9x1x384xf32, #tpu.memory_space<vmem>>, vector<1x1x384xf32>
    %679 = vector.shape_cast %678 : vector<1x1x384xf32> to vector<1x384xf32>
    %680 = vector.broadcast %679 : vector<1x384xf32> to vector<12x384xf32>
    %681 = arith.mulf %642, %680 : vector<12x384xf32>
    %c3_493 = arith.constant 3 : index
    %c4_494 = arith.constant 4 : index
    %c0_495 = arith.constant 0 : index
    %c0_496 = arith.constant 0 : index
    %682 = vector.load %arg23[%c3_493, %c4_494, %c0_495, %c0_496] : memref<5x9x12x12xf32, #tpu.memory_space<vmem>>, vector<1x1x12x12xf32>
    %683 = vector.shape_cast %682 : vector<1x1x12x12xf32> to vector<12x12xf32>
    %cst_497 = arith.constant dense<0.000000e+00> : vector<12x384xf32>
    %684 = tpu.matmul %683, %681, %cst_497 {dimension_numbers = #tpu.dot_dimension_numbers<[1], [0], [0], [1], [0, 0, 1, 1], [], []>} : vector<12x12xf32>, vector<12x384xf32>, vector<12x384xf32> -> vector<12x384xf32>
    %685 = arith.addf %677, %684 : vector<12x384xf32>
    %c383_i32_498 = arith.constant 383 : i32
    %686 = tpu.dynamic_rotate %642 by %c383_i32_498 dim 1 : vector<12x384xf32>, i32 -> vector<12x384xf32>
    %c5_499 = arith.constant 5 : index
    %c0_500 = arith.constant 0 : index
    %c0_501 = arith.constant 0 : index
    %687 = vector.load %arg25[%c5_499, %c0_500, %c0_501] : memref<9x1x384xf32, #tpu.memory_space<vmem>>, vector<1x1x384xf32>
    %688 = vector.shape_cast %687 : vector<1x1x384xf32> to vector<1x384xf32>
    %689 = vector.broadcast %688 : vector<1x384xf32> to vector<12x384xf32>
    %690 = arith.mulf %686, %689 : vector<12x384xf32>
    %c3_502 = arith.constant 3 : index
    %c5_503 = arith.constant 5 : index
    %c0_504 = arith.constant 0 : index
    %c0_505 = arith.constant 0 : index
    %691 = vector.load %arg23[%c3_502, %c5_503, %c0_504, %c0_505] : memref<5x9x12x12xf32, #tpu.memory_space<vmem>>, vector<1x1x12x12xf32>
    %692 = vector.shape_cast %691 : vector<1x1x12x12xf32> to vector<12x12xf32>
    %cst_506 = arith.constant dense<0.000000e+00> : vector<12x384xf32>
    %693 = tpu.matmul %692, %690, %cst_506 {dimension_numbers = #tpu.dot_dimension_numbers<[1], [0], [0], [1], [0, 0, 1, 1], [], []>} : vector<12x12xf32>, vector<12x384xf32>, vector<12x384xf32> -> vector<12x384xf32>
    %694 = arith.addf %685, %693 : vector<12x384xf32>
    %c369_i32_507 = arith.constant 369 : i32
    %695 = tpu.dynamic_rotate %642 by %c369_i32_507 dim 1 : vector<12x384xf32>, i32 -> vector<12x384xf32>
    %c6_508 = arith.constant 6 : index
    %c0_509 = arith.constant 0 : index
    %c0_510 = arith.constant 0 : index
    %696 = vector.load %arg25[%c6_508, %c0_509, %c0_510] : memref<9x1x384xf32, #tpu.memory_space<vmem>>, vector<1x1x384xf32>
    %697 = vector.shape_cast %696 : vector<1x1x384xf32> to vector<1x384xf32>
    %698 = vector.broadcast %697 : vector<1x384xf32> to vector<12x384xf32>
    %699 = arith.mulf %695, %698 : vector<12x384xf32>
    %c3_511 = arith.constant 3 : index
    %c6_512 = arith.constant 6 : index
    %c0_513 = arith.constant 0 : index
    %c0_514 = arith.constant 0 : index
    %700 = vector.load %arg23[%c3_511, %c6_512, %c0_513, %c0_514] : memref<5x9x12x12xf32, #tpu.memory_space<vmem>>, vector<1x1x12x12xf32>
    %701 = vector.shape_cast %700 : vector<1x1x12x12xf32> to vector<12x12xf32>
    %cst_515 = arith.constant dense<0.000000e+00> : vector<12x384xf32>
    %702 = tpu.matmul %701, %699, %cst_515 {dimension_numbers = #tpu.dot_dimension_numbers<[1], [0], [0], [1], [0, 0, 1, 1], [], []>} : vector<12x12xf32>, vector<12x384xf32>, vector<12x384xf32> -> vector<12x384xf32>
    %703 = arith.addf %694, %702 : vector<12x384xf32>
    %c368_i32_516 = arith.constant 368 : i32
    %704 = tpu.dynamic_rotate %642 by %c368_i32_516 dim 1 : vector<12x384xf32>, i32 -> vector<12x384xf32>
    %c7_517 = arith.constant 7 : index
    %c0_518 = arith.constant 0 : index
    %c0_519 = arith.constant 0 : index
    %705 = vector.load %arg25[%c7_517, %c0_518, %c0_519] : memref<9x1x384xf32, #tpu.memory_space<vmem>>, vector<1x1x384xf32>
    %706 = vector.shape_cast %705 : vector<1x1x384xf32> to vector<1x384xf32>
    %707 = vector.broadcast %706 : vector<1x384xf32> to vector<12x384xf32>
    %708 = arith.mulf %704, %707 : vector<12x384xf32>
    %c3_520 = arith.constant 3 : index
    %c7_521 = arith.constant 7 : index
    %c0_522 = arith.constant 0 : index
    %c0_523 = arith.constant 0 : index
    %709 = vector.load %arg23[%c3_520, %c7_521, %c0_522, %c0_523] : memref<5x9x12x12xf32, #tpu.memory_space<vmem>>, vector<1x1x12x12xf32>
    %710 = vector.shape_cast %709 : vector<1x1x12x12xf32> to vector<12x12xf32>
    %cst_524 = arith.constant dense<0.000000e+00> : vector<12x384xf32>
    %711 = tpu.matmul %710, %708, %cst_524 {dimension_numbers = #tpu.dot_dimension_numbers<[1], [0], [0], [1], [0, 0, 1, 1], [], []>} : vector<12x12xf32>, vector<12x384xf32>, vector<12x384xf32> -> vector<12x384xf32>
    %712 = arith.addf %703, %711 : vector<12x384xf32>
    %c367_i32_525 = arith.constant 367 : i32
    %713 = tpu.dynamic_rotate %642 by %c367_i32_525 dim 1 : vector<12x384xf32>, i32 -> vector<12x384xf32>
    %c8_526 = arith.constant 8 : index
    %c0_527 = arith.constant 0 : index
    %c0_528 = arith.constant 0 : index
    %714 = vector.load %arg25[%c8_526, %c0_527, %c0_528] : memref<9x1x384xf32, #tpu.memory_space<vmem>>, vector<1x1x384xf32>
    %715 = vector.shape_cast %714 : vector<1x1x384xf32> to vector<1x384xf32>
    %716 = vector.broadcast %715 : vector<1x384xf32> to vector<12x384xf32>
    %717 = arith.mulf %713, %716 : vector<12x384xf32>
    %c3_529 = arith.constant 3 : index
    %c8_530 = arith.constant 8 : index
    %c0_531 = arith.constant 0 : index
    %c0_532 = arith.constant 0 : index
    %718 = vector.load %arg23[%c3_529, %c8_530, %c0_531, %c0_532] : memref<5x9x12x12xf32, #tpu.memory_space<vmem>>, vector<1x1x12x12xf32>
    %719 = vector.shape_cast %718 : vector<1x1x12x12xf32> to vector<12x12xf32>
    %cst_533 = arith.constant dense<0.000000e+00> : vector<12x384xf32>
    %720 = tpu.matmul %719, %717, %cst_533 {dimension_numbers = #tpu.dot_dimension_numbers<[1], [0], [0], [1], [0, 0, 1, 1], [], []>} : vector<12x12xf32>, vector<12x384xf32>, vector<12x384xf32> -> vector<12x384xf32>
    %721 = arith.addf %712, %720 : vector<12x384xf32>
    %c3_534 = arith.constant 3 : index
    %c0_535 = arith.constant 0 : index
    %c0_536 = arith.constant 0 : index
    %722 = vector.load %arg24[%c3_534, %c0_535, %c0_536] : memref<5x12x1xf32, #tpu.memory_space<vmem>>, vector<1x12x1xf32>
    %723 = vector.shape_cast %722 : vector<1x12x1xf32> to vector<12x1xf32>
    %724 = vector.broadcast %723 : vector<12x1xf32> to vector<12x384xf32>
    %725 = arith.addf %721, %724 : vector<12x384xf32>
    %c0_537 = arith.constant 0 : index
    %c3_538 = arith.constant 3 : index
    %726 = memref.load %arg28[%c0_537, %c3_538] : memref<1x8xf32, #tpu.memory_space<smem>>
    %cst_539 = arith.constant 0.000000e+00 : f32
    %727 = vector.broadcast %cst_539 : f32 to vector<12x384xf32>
    %728 = arith.cmpf oge, %725, %727 : vector<12x384xf32>
    %729 = vector.broadcast %726 : f32 to vector<12x384xf32>
    %730 = arith.mulf %729, %725 : vector<12x384xf32>
    %731 = arith.select %728, %725, %730 : vector<12x384xi1>, vector<12x384xf32>
    %732 = arith.addf %731, %642 : vector<12x384xf32>
    %c17_i32_540 = arith.constant 17 : i32
    %733 = tpu.dynamic_rotate %732 by %c17_i32_540 dim 1 : vector<12x384xf32>, i32 -> vector<12x384xf32>
    %c0_541 = arith.constant 0 : index
    %c0_542 = arith.constant 0 : index
    %c0_543 = arith.constant 0 : index
    %734 = vector.load %arg25[%c0_541, %c0_542, %c0_543] : memref<9x1x384xf32, #tpu.memory_space<vmem>>, vector<1x1x384xf32>
    %735 = vector.shape_cast %734 : vector<1x1x384xf32> to vector<1x384xf32>
    %736 = vector.broadcast %735 : vector<1x384xf32> to vector<12x384xf32>
    %737 = arith.mulf %733, %736 : vector<12x384xf32>
    %c4_544 = arith.constant 4 : index
    %c0_545 = arith.constant 0 : index
    %c0_546 = arith.constant 0 : index
    %c0_547 = arith.constant 0 : index
    %738 = vector.load %arg23[%c4_544, %c0_545, %c0_546, %c0_547] : memref<5x9x12x12xf32, #tpu.memory_space<vmem>>, vector<1x1x12x12xf32>
    %739 = vector.shape_cast %738 : vector<1x1x12x12xf32> to vector<12x12xf32>
    %cst_548 = arith.constant dense<0.000000e+00> : vector<12x384xf32>
    %740 = tpu.matmul %739, %737, %cst_548 {dimension_numbers = #tpu.dot_dimension_numbers<[1], [0], [0], [1], [0, 0, 1, 1], [], []>} : vector<12x12xf32>, vector<12x384xf32>, vector<12x384xf32> -> vector<12x384xf32>
    %c16_i32_549 = arith.constant 16 : i32
    %741 = tpu.dynamic_rotate %732 by %c16_i32_549 dim 1 : vector<12x384xf32>, i32 -> vector<12x384xf32>
    %c1_550 = arith.constant 1 : index
    %c0_551 = arith.constant 0 : index
    %c0_552 = arith.constant 0 : index
    %742 = vector.load %arg25[%c1_550, %c0_551, %c0_552] : memref<9x1x384xf32, #tpu.memory_space<vmem>>, vector<1x1x384xf32>
    %743 = vector.shape_cast %742 : vector<1x1x384xf32> to vector<1x384xf32>
    %744 = vector.broadcast %743 : vector<1x384xf32> to vector<12x384xf32>
    %745 = arith.mulf %741, %744 : vector<12x384xf32>
    %c4_553 = arith.constant 4 : index
    %c1_554 = arith.constant 1 : index
    %c0_555 = arith.constant 0 : index
    %c0_556 = arith.constant 0 : index
    %746 = vector.load %arg23[%c4_553, %c1_554, %c0_555, %c0_556] : memref<5x9x12x12xf32, #tpu.memory_space<vmem>>, vector<1x1x12x12xf32>
    %747 = vector.shape_cast %746 : vector<1x1x12x12xf32> to vector<12x12xf32>
    %cst_557 = arith.constant dense<0.000000e+00> : vector<12x384xf32>
    %748 = tpu.matmul %747, %745, %cst_557 {dimension_numbers = #tpu.dot_dimension_numbers<[1], [0], [0], [1], [0, 0, 1, 1], [], []>} : vector<12x12xf32>, vector<12x384xf32>, vector<12x384xf32> -> vector<12x384xf32>
    %749 = arith.addf %740, %748 : vector<12x384xf32>
    %c15_i32_558 = arith.constant 15 : i32
    %750 = tpu.dynamic_rotate %732 by %c15_i32_558 dim 1 : vector<12x384xf32>, i32 -> vector<12x384xf32>
    %c2_559 = arith.constant 2 : index
    %c0_560 = arith.constant 0 : index
    %c0_561 = arith.constant 0 : index
    %751 = vector.load %arg25[%c2_559, %c0_560, %c0_561] : memref<9x1x384xf32, #tpu.memory_space<vmem>>, vector<1x1x384xf32>
    %752 = vector.shape_cast %751 : vector<1x1x384xf32> to vector<1x384xf32>
    %753 = vector.broadcast %752 : vector<1x384xf32> to vector<12x384xf32>
    %754 = arith.mulf %750, %753 : vector<12x384xf32>
    %c4_562 = arith.constant 4 : index
    %c2_563 = arith.constant 2 : index
    %c0_564 = arith.constant 0 : index
    %c0_565 = arith.constant 0 : index
    %755 = vector.load %arg23[%c4_562, %c2_563, %c0_564, %c0_565] : memref<5x9x12x12xf32, #tpu.memory_space<vmem>>, vector<1x1x12x12xf32>
    %756 = vector.shape_cast %755 : vector<1x1x12x12xf32> to vector<12x12xf32>
    %cst_566 = arith.constant dense<0.000000e+00> : vector<12x384xf32>
    %757 = tpu.matmul %756, %754, %cst_566 {dimension_numbers = #tpu.dot_dimension_numbers<[1], [0], [0], [1], [0, 0, 1, 1], [], []>} : vector<12x12xf32>, vector<12x384xf32>, vector<12x384xf32> -> vector<12x384xf32>
    %758 = arith.addf %749, %757 : vector<12x384xf32>
    %c1_i32_567 = arith.constant 1 : i32
    %759 = tpu.dynamic_rotate %732 by %c1_i32_567 dim 1 : vector<12x384xf32>, i32 -> vector<12x384xf32>
    %c3_568 = arith.constant 3 : index
    %c0_569 = arith.constant 0 : index
    %c0_570 = arith.constant 0 : index
    %760 = vector.load %arg25[%c3_568, %c0_569, %c0_570] : memref<9x1x384xf32, #tpu.memory_space<vmem>>, vector<1x1x384xf32>
    %761 = vector.shape_cast %760 : vector<1x1x384xf32> to vector<1x384xf32>
    %762 = vector.broadcast %761 : vector<1x384xf32> to vector<12x384xf32>
    %763 = arith.mulf %759, %762 : vector<12x384xf32>
    %c4_571 = arith.constant 4 : index
    %c3_572 = arith.constant 3 : index
    %c0_573 = arith.constant 0 : index
    %c0_574 = arith.constant 0 : index
    %764 = vector.load %arg23[%c4_571, %c3_572, %c0_573, %c0_574] : memref<5x9x12x12xf32, #tpu.memory_space<vmem>>, vector<1x1x12x12xf32>
    %765 = vector.shape_cast %764 : vector<1x1x12x12xf32> to vector<12x12xf32>
    %cst_575 = arith.constant dense<0.000000e+00> : vector<12x384xf32>
    %766 = tpu.matmul %765, %763, %cst_575 {dimension_numbers = #tpu.dot_dimension_numbers<[1], [0], [0], [1], [0, 0, 1, 1], [], []>} : vector<12x12xf32>, vector<12x384xf32>, vector<12x384xf32> -> vector<12x384xf32>
    %767 = arith.addf %758, %766 : vector<12x384xf32>
    %c4_576 = arith.constant 4 : index
    %c0_577 = arith.constant 0 : index
    %c0_578 = arith.constant 0 : index
    %768 = vector.load %arg25[%c4_576, %c0_577, %c0_578] : memref<9x1x384xf32, #tpu.memory_space<vmem>>, vector<1x1x384xf32>
    %769 = vector.shape_cast %768 : vector<1x1x384xf32> to vector<1x384xf32>
    %770 = vector.broadcast %769 : vector<1x384xf32> to vector<12x384xf32>
    %771 = arith.mulf %732, %770 : vector<12x384xf32>
    %c4_579 = arith.constant 4 : index
    %c4_580 = arith.constant 4 : index
    %c0_581 = arith.constant 0 : index
    %c0_582 = arith.constant 0 : index
    %772 = vector.load %arg23[%c4_579, %c4_580, %c0_581, %c0_582] : memref<5x9x12x12xf32, #tpu.memory_space<vmem>>, vector<1x1x12x12xf32>
    %773 = vector.shape_cast %772 : vector<1x1x12x12xf32> to vector<12x12xf32>
    %cst_583 = arith.constant dense<0.000000e+00> : vector<12x384xf32>
    %774 = tpu.matmul %773, %771, %cst_583 {dimension_numbers = #tpu.dot_dimension_numbers<[1], [0], [0], [1], [0, 0, 1, 1], [], []>} : vector<12x12xf32>, vector<12x384xf32>, vector<12x384xf32> -> vector<12x384xf32>
    %775 = arith.addf %767, %774 : vector<12x384xf32>
    %c383_i32_584 = arith.constant 383 : i32
    %776 = tpu.dynamic_rotate %732 by %c383_i32_584 dim 1 : vector<12x384xf32>, i32 -> vector<12x384xf32>
    %c5_585 = arith.constant 5 : index
    %c0_586 = arith.constant 0 : index
    %c0_587 = arith.constant 0 : index
    %777 = vector.load %arg25[%c5_585, %c0_586, %c0_587] : memref<9x1x384xf32, #tpu.memory_space<vmem>>, vector<1x1x384xf32>
    %778 = vector.shape_cast %777 : vector<1x1x384xf32> to vector<1x384xf32>
    %779 = vector.broadcast %778 : vector<1x384xf32> to vector<12x384xf32>
    %780 = arith.mulf %776, %779 : vector<12x384xf32>
    %c4_588 = arith.constant 4 : index
    %c5_589 = arith.constant 5 : index
    %c0_590 = arith.constant 0 : index
    %c0_591 = arith.constant 0 : index
    %781 = vector.load %arg23[%c4_588, %c5_589, %c0_590, %c0_591] : memref<5x9x12x12xf32, #tpu.memory_space<vmem>>, vector<1x1x12x12xf32>
    %782 = vector.shape_cast %781 : vector<1x1x12x12xf32> to vector<12x12xf32>
    %cst_592 = arith.constant dense<0.000000e+00> : vector<12x384xf32>
    %783 = tpu.matmul %782, %780, %cst_592 {dimension_numbers = #tpu.dot_dimension_numbers<[1], [0], [0], [1], [0, 0, 1, 1], [], []>} : vector<12x12xf32>, vector<12x384xf32>, vector<12x384xf32> -> vector<12x384xf32>
    %784 = arith.addf %775, %783 : vector<12x384xf32>
    %c369_i32_593 = arith.constant 369 : i32
    %785 = tpu.dynamic_rotate %732 by %c369_i32_593 dim 1 : vector<12x384xf32>, i32 -> vector<12x384xf32>
    %c6_594 = arith.constant 6 : index
    %c0_595 = arith.constant 0 : index
    %c0_596 = arith.constant 0 : index
    %786 = vector.load %arg25[%c6_594, %c0_595, %c0_596] : memref<9x1x384xf32, #tpu.memory_space<vmem>>, vector<1x1x384xf32>
    %787 = vector.shape_cast %786 : vector<1x1x384xf32> to vector<1x384xf32>
    %788 = vector.broadcast %787 : vector<1x384xf32> to vector<12x384xf32>
    %789 = arith.mulf %785, %788 : vector<12x384xf32>
    %c4_597 = arith.constant 4 : index
    %c6_598 = arith.constant 6 : index
    %c0_599 = arith.constant 0 : index
    %c0_600 = arith.constant 0 : index
    %790 = vector.load %arg23[%c4_597, %c6_598, %c0_599, %c0_600] : memref<5x9x12x12xf32, #tpu.memory_space<vmem>>, vector<1x1x12x12xf32>
    %791 = vector.shape_cast %790 : vector<1x1x12x12xf32> to vector<12x12xf32>
    %cst_601 = arith.constant dense<0.000000e+00> : vector<12x384xf32>
    %792 = tpu.matmul %791, %789, %cst_601 {dimension_numbers = #tpu.dot_dimension_numbers<[1], [0], [0], [1], [0, 0, 1, 1], [], []>} : vector<12x12xf32>, vector<12x384xf32>, vector<12x384xf32> -> vector<12x384xf32>
    %793 = arith.addf %784, %792 : vector<12x384xf32>
    %c368_i32_602 = arith.constant 368 : i32
    %794 = tpu.dynamic_rotate %732 by %c368_i32_602 dim 1 : vector<12x384xf32>, i32 -> vector<12x384xf32>
    %c7_603 = arith.constant 7 : index
    %c0_604 = arith.constant 0 : index
    %c0_605 = arith.constant 0 : index
    %795 = vector.load %arg25[%c7_603, %c0_604, %c0_605] : memref<9x1x384xf32, #tpu.memory_space<vmem>>, vector<1x1x384xf32>
    %796 = vector.shape_cast %795 : vector<1x1x384xf32> to vector<1x384xf32>
    %797 = vector.broadcast %796 : vector<1x384xf32> to vector<12x384xf32>
    %798 = arith.mulf %794, %797 : vector<12x384xf32>
    %c4_606 = arith.constant 4 : index
    %c7_607 = arith.constant 7 : index
    %c0_608 = arith.constant 0 : index
    %c0_609 = arith.constant 0 : index
    %799 = vector.load %arg23[%c4_606, %c7_607, %c0_608, %c0_609] : memref<5x9x12x12xf32, #tpu.memory_space<vmem>>, vector<1x1x12x12xf32>
    %800 = vector.shape_cast %799 : vector<1x1x12x12xf32> to vector<12x12xf32>
    %cst_610 = arith.constant dense<0.000000e+00> : vector<12x384xf32>
    %801 = tpu.matmul %800, %798, %cst_610 {dimension_numbers = #tpu.dot_dimension_numbers<[1], [0], [0], [1], [0, 0, 1, 1], [], []>} : vector<12x12xf32>, vector<12x384xf32>, vector<12x384xf32> -> vector<12x384xf32>
    %802 = arith.addf %793, %801 : vector<12x384xf32>
    %c367_i32_611 = arith.constant 367 : i32
    %803 = tpu.dynamic_rotate %732 by %c367_i32_611 dim 1 : vector<12x384xf32>, i32 -> vector<12x384xf32>
    %c8_612 = arith.constant 8 : index
    %c0_613 = arith.constant 0 : index
    %c0_614 = arith.constant 0 : index
    %804 = vector.load %arg25[%c8_612, %c0_613, %c0_614] : memref<9x1x384xf32, #tpu.memory_space<vmem>>, vector<1x1x384xf32>
    %805 = vector.shape_cast %804 : vector<1x1x384xf32> to vector<1x384xf32>
    %806 = vector.broadcast %805 : vector<1x384xf32> to vector<12x384xf32>
    %807 = arith.mulf %803, %806 : vector<12x384xf32>
    %c4_615 = arith.constant 4 : index
    %c8_616 = arith.constant 8 : index
    %c0_617 = arith.constant 0 : index
    %c0_618 = arith.constant 0 : index
    %808 = vector.load %arg23[%c4_615, %c8_616, %c0_617, %c0_618] : memref<5x9x12x12xf32, #tpu.memory_space<vmem>>, vector<1x1x12x12xf32>
    %809 = vector.shape_cast %808 : vector<1x1x12x12xf32> to vector<12x12xf32>
    %cst_619 = arith.constant dense<0.000000e+00> : vector<12x384xf32>
    %810 = tpu.matmul %809, %807, %cst_619 {dimension_numbers = #tpu.dot_dimension_numbers<[1], [0], [0], [1], [0, 0, 1, 1], [], []>} : vector<12x12xf32>, vector<12x384xf32>, vector<12x384xf32> -> vector<12x384xf32>
    %811 = arith.addf %802, %810 : vector<12x384xf32>
    %c4_620 = arith.constant 4 : index
    %c0_621 = arith.constant 0 : index
    %c0_622 = arith.constant 0 : index
    %812 = vector.load %arg24[%c4_620, %c0_621, %c0_622] : memref<5x12x1xf32, #tpu.memory_space<vmem>>, vector<1x12x1xf32>
    %813 = vector.shape_cast %812 : vector<1x12x1xf32> to vector<12x1xf32>
    %814 = vector.broadcast %813 : vector<12x1xf32> to vector<12x384xf32>
    %815 = arith.addf %811, %814 : vector<12x384xf32>
    %c0_623 = arith.constant 0 : index
    %c4_624 = arith.constant 4 : index
    %816 = memref.load %arg28[%c0_623, %c4_624] : memref<1x8xf32, #tpu.memory_space<smem>>
    %cst_625 = arith.constant 0.000000e+00 : f32
    %817 = vector.broadcast %cst_625 : f32 to vector<12x384xf32>
    %818 = arith.cmpf oge, %815, %817 : vector<12x384xf32>
    %819 = vector.broadcast %816 : f32 to vector<12x384xf32>
    %820 = arith.mulf %819, %815 : vector<12x384xf32>
    %821 = arith.select %818, %815, %820 : vector<12x384xi1>, vector<12x384xf32>
    %822 = arith.addf %821, %732 : vector<12x384xf32>
    %c0_626 = arith.constant 0 : index
    %c0_627 = arith.constant 0 : index
    %823 = vector.load %arg26[%c0_626, %c0_627] : memref<384x30xf32, #tpu.memory_space<vmem>>, vector<384x30xf32>
    %cst_628 = arith.constant dense<0.000000e+00> : vector<12x30xf32>
    %824 = tpu.matmul %822, %823, %cst_628 {dimension_numbers = #tpu.dot_dimension_numbers<[1], [0], [0], [1], [0, 0, 1, 1], [], []>} : vector<12x384xf32>, vector<384x30xf32>, vector<12x30xf32> -> vector<12x30xf32>
    %c0_629 = arith.constant 0 : index
    %c0_630 = arith.constant 0 : index
    %825 = vector.load %arg27[%c0_629, %c0_630] : memref<1x30xf32, #tpu.memory_space<vmem>>, vector<1x30xf32>
    %826 = vector.broadcast %825 : vector<1x30xf32> to vector<12x30xf32>
    %827 = arith.addf %824, %826 : vector<12x30xf32>
    %c0_631 = arith.constant 0 : index
    %c0_632 = arith.constant 0 : index
    %828 = vector.load %arg29[%c0_631, %c0_632] : memref<12x30xf32, #tpu.memory_space<vmem>>, vector<12x30xf32>
    tpu.vector_store %arg29[%c0_631, %c0_632], %827 {strides = array<i32>} : memref<12x30xf32, #tpu.memory_space<vmem>>, vector<12x30xf32>,
    return
  }
}

</mosaic_0001>

<bundles_post_ra>
// kernel: trajectory_model_forward.1
= control target key start
LH: loop header
LB: loop body
LE: loop exit
PB: predicated region body
PF: predicated region fallthrough
CT: control target
= control target key end

     0   :  { %s10724_s6 = smov 1   ;;  %s10725_s10 = smov 2   ;;  %s15652_s0 = inlined_call_operand.smem [shape: u32[30], index: -1, kind: input, shape index: {}] }
   0x1   :  { %s10777_s5 = sld [smem:[%s15652_s0]]   ;;  %s10726_s14 = smov 3  }
   0x2   :  { %s10782_s9 = sld [smem:[%s15652_s0 + %s10724_s6]]   ;;  %s10727_s18 = smov 4  }
   0x3   :  { %s10787_s13 = sld [smem:[%s15652_s0 + %s10725_s10]]   ;;  %s10728_s22 = smov 5  }
   0x4   :  { %s10792_s17 = sld [smem:[%s15652_s0 + %s10726_s14]]   ;;  %s10729_s26 = smov 6  }
   0x5   :  { %s10797_s21 = sld [smem:[%s15652_s0 + %s10727_s18]]   ;;  %s10730_s30 = smov 7  }
   0x6   :  { %s10802_s25 = sld [smem:[%s15652_s0 + %s10728_s22]]   ;;  %s10731_s4 = smov 8  }
   0x7   :  { %s10807_s29 = sld [smem:[%s15652_s0 + %s10729_s26]]   ;;  %s10732_s10 = smov 9  }
   0x8   :  { %s10812_s3 = sld [smem:[%s15652_s0 + %s10730_s30]]   ;;  %s10733_s15 = smov 10  }
   0x9   :  { %s10817_s8 = sld [smem:[%s15652_s0 + %s10731_s4]]   ;;  %s10734_s20 = smov 11  }
   0xa   :  { %15815 = sst [smem:[#allocation5_spill]] %s10792_s17  ;;  %s10735_s26 = smov 12  }
   0xb   :  { %15816 = sst [smem:[#allocation6_spill]] %s10797_s21  ;;  %s10736_s1 = smov 13  }
   0xc   :  { %15817 = sst [smem:[#allocation7_spill]] %s10802_s25  ;;  %s10737_s7 = smov 14  }
   0xd   :  { %15818 = sst [smem:[#allocation8_spill]] %s10807_s29  ;;  %s10739_s22 = smov 16  }
   0xe   :  { %s10822_s14 = sld [smem:[%s15652_s0 + %s10732_s10]]   ;;  %s10740_s28 = smov 17  }
   0xf   :  { %s10827_s19 = sld [smem:[%s15652_s0 + %s10733_s15]]   ;;  %s10738_s15 = smov 15  }
  0x10   :  { %s10832_s24 = sld [smem:[%s15652_s0 + %s10734_s20]]  }
  0x11   :  { %s10837_s30 = sld [smem:[%s15652_s0 + %s10735_s26]]  }
  0x12   :  { %s10842_s6 = sld [smem:[%s15652_s0 + %s10736_s1]]   ;;  %s10752_s1 = smov 29  }
  0x13   :  { %s10847_s12 = sld [smem:[%s15652_s0 + %s10737_s7]]   ;;  %s10741_s7 = smov 18  }
  0x14   :  { %s10852_s20 = sld [smem:[%s15652_s0 + %s10738_s15]]   ;;  %s10742_s15 = smov 19  }
  0x15   :  { %s10857_s27 = sld [smem:[%s15652_s0 + %s10739_s22]]   ;;  %s10743_s22 = smov 20  }
  0x16   :  { %s10862_s4 = sld [smem:[%s15652_s0 + %s10740_s28]]   ;;  %s10744_s28 = smov 21  }
  0x17   :  { %s10867_s25 = sld [smem:[%s15652_s0 + %s10741_s7]]   ;;  %s10745_s7 = smov 22  }
  0x18   :  { %s10872_s17 = sld [smem:[%s15652_s0 + %s10742_s15]]   ;;  %s10746_s15 = smov 23  }
  0x19   :  { %s10877_s29 = sld [smem:[%s15652_s0 + %s10743_s22]]   ;;  %s10747_s22 = smov 24  }
  0x1a   :  { %s10892_s21 = sld [smem:[%s15652_s0 + %s10746_s15]]   ;;  %s10750_s15 = smov 27  }
  0x1b   :  { %15819 = sst [smem:[#allocation9_spill]] %s10857_s27 }
  0x1c   :  { %s10882_s27 = sld [smem:[%s15652_s0 + %s10744_s28]]   ;;  %s10748_s28 = smov 25  }
  0x1d   :  { %15820 = sst [smem:[#allocation10_spill]] %s10867_s25 }
  0x1e   :  { %s10887_s25 = sld [smem:[%s15652_s0 + %s10745_s7]]   ;;  %s10749_s7 = smov 26  }
  0x1f   :  { %15821 = sst [smem:[#allocation11_spill]] %s10877_s29 }
  0x20   :  { %15824 = sst [smem:[#allocation14_spill]] %s10892_s21 }
  0x21   :  { %s10897_s29 = sld [smem:[%s15652_s0 + %s10747_s22]]   ;;  %s10751_s22 = smov 28  }
  0x22   :  { %15822 = sst [smem:[#allocation12_spill]] %s10882_s27 }
  0x23   :  { %s10902_s27 = sld [smem:[%s15652_s0 + %s10748_s28]]  }
  0x24   :  { %15823 = sst [smem:[#allocation13_spill]] %s10887_s25 }
  0x25   :  { %s10907_s25 = sld [smem:[%s15652_s0 + %s10749_s7]]  }
  0x26   :  { %s10912_s21 = sld [smem:[%s15652_s0 + %s10750_s15]]  }
  0x27   :  { %15825 = sst [smem:[#allocation15_spill]] %s10897_s29 }
  0x28   :  { %s9334_s29 = sld [smem:[%s15652_s0 + %s10751_s22]]  }
  0x29   :  { %15826 = sst [smem:[#allocation16_spill]] %s10902_s27 }
  0x2a   :  { %s10920_s27 = sld [smem:[%s15652_s0 + %s10752_s1]]  }
  0x2b   :  { %64 = vsyncpa [#allocation3], 0 }
  0x2e   :  { %s126_s7 = sshll.u32 %s9334_s29, 4  ;;  %s10714_s15 = scalar_lea.vmem %s9334_s29, 1  ;;  %s127_s7 = int_to_ptr.vmem [resolvable:$true] %s126_s7 }
  0x2f   :  { %s10710_s10 = sshra.s32 %s127_s7, 4  ;;  %s10711_s10 = int_to_ptr.vmem [resolvable:$true] %s10710_s10 }
  0x30   :  { %s10712_s11 = scalar_lea.vmem %s10711_s10, 1  ;;  %p10715_p1 = scmp.lt.s32.totalorder %s10711_s10, %s9334_s29 }
  0x31   :  { %p10713_p0 = scmp.ne.s32.totalorder %s10711_s10, %s10712_s11  ;;  %p10716_p2 = scmp.lt.s32.totalorder %s10714_s15, %s10712_s11 }
  0x33   :  { %p10717_p3 = por %p10716_p2, %p10715_p1 }
  0x35   :  { %p10718_p4 = pnand %p10717_p3, %p10713_p0 }
  0x37   :  { %10721 = shalt.err (!%p10718_p4)
}
  0x38   :  { %s10753_s16 = smov [#allocation2]  }
  0x39   :  { %129 = dma.vmem_to_smem %s127_s7, 16, %s10753_s16, [#allocation3]  }
  0x3a   :  { %10722 = dma.done.wait [#allocation3], 16  }
  0x3b   :  { %10723 = vsyncadd [#allocation3], 4294967280 }
  0x3c   :  { %134 = sfence }
  0x3d   :  { %v141_v0 = vld [vmem:[%s10812_s3] sm:$0x3]  ;;  %vm165_vm0 = vcmask 1041408   ;;  %vm146_vm1 = vcmask 15360   ;;  %v10936_v3 = vld [vmem:[%s10777_s5 + $0x8] sm:$0xff]  ;;  %vm293_vm2 = vcmask 1042432  }
  0x3e   :  { %v10924_v1 = vld [vmem:[%s10777_s5] sm:$0xff]  ;;  %9336 = vmatpush.msk.msra.mxu0 %vm165_vm0, %v141_v0  ;;  %9343 = vmatpush.msk.msra.mxu1 %vm165_vm0, %v141_v0  ;;  %v10939_v4 = vld [vmem:[%s10782_s9 + $0x8] sm:$0xff]  ;;  %vm274_vm3 = vcmask 23552   ;;  %v495_v7 = vld [vmem:[%s10832_s24 + $0x38] sm:$0xff]  ;;  %vm434_vm4 = vcmask 523264   ;;  %vm553_vm5 = vcmask 130048  }
  0x3f   :  { %v10927_v2 = vld [vmem:[%s10782_s9] sm:$0xff]  ;;  %9337 = vmatmul.msk.f32.vlgmr.msra.gmra.mxu0 %vm146_vm1, %v10924_v1  ;;  %v494_v8 = vld [vmem:[%s10832_s24 + $0x30] sm:$0xff]  ;;  %v429_v9 = vld [vmem:[%s10822_s14 + $0x38] sm:$0xff]  ;;  %s15831_s0 = sld [smem:[#allocation11_spill]]  ;;  %vm637_vm6 = vcmask 392192   ;;  %vm3681_vm7 = vcmask 261120  }
  0x40   :  { %9344 = vmatmul.msk.f32.vlgmr.msra.gmra.mxu1 %vm146_vm1, %v10927_v2  ;;  %v269_v5 = vld [vmem:[%s10842_s6] sm:$0x7]  ;;  %v10952_v10 = vld [vmem:[%s10777_s5 + $0x10] sm:$0xff]  ;;  %v427_v13 = vld [vmem:[%s10822_s14 + $0x28] sm:$0xff]  ;;  %s15839_s29 = sld [smem:[#allocation5_spill]]  ;;  %s10759_s6 = smov 96  }
  0x41   :  { %v263_v6 = vld [vmem:[%s10787_s13] sm:$0xff]  ;;  %9350 = vmatpush.msk.msra.mxu2 %vm293_vm2, %v269_v5  ;;  %461 = vmatpush.msrb.mxu1 %v429_v9  ;;  %v428_v11 = vld [vmem:[%s10822_s14 + $0x30] sm:$0xff]  ;;  %v493_v14 = vld [vmem:[%s10832_s24 + $0x28] sm:$0xff]  ;;  %s15852_s3 = sld [smem:[#allocation7_spill]]  ;;  %vm3700_vm8 = vcmask 654336   ;;  %vm3707_vm9 = vcmask 785408  }
  0x42   :  { %9351 = vmatmul.msk.f32.vlgmr.msra.gmra.mxu2 %vm274_vm3, %v263_v6  ;;  %v10956_v12 = vld [vmem:[%s10782_s9 + $0x10] sm:$0xff]  ;;  %v426_v15 = vld [vmem:[%s10822_s14 + $0x20] sm:$0xff]  ;;  %v264_v17 = vld [vmem:[%s10787_s13 + $0x8] sm:$0xff]  ;;  %vm3714_vm10 = vcmask 916480   ;;  %s10762_s18 = smov 17   ;;  %s10763_s22 = smov 15  }
  0x43   :  { %526 = vmatpush.msrb.mxu2 %v495_v7  ;;  %462 = vmatpush.msrb.mxu1 %v428_v11  ;;  %v492_v16 = vld [vmem:[%s10832_s24 + $0x20] sm:$0xff]  ;;  %v425_v18 = vld [vmem:[%s10822_s14 + $0x18] sm:$0xff]  ;;  %v424_v20 = vld [vmem:[%s10822_s14 + $0x10] sm:$0xff]  ;;  %s10764_s23 = smov 1   ;;  %s10765_s26 = smov 127  }
  0x44   :  { %v491_v19 = vld [vmem:[%s10832_s24 + $0x18] sm:$0xff]  ;;  %v490_v21 = vld [vmem:[%s10832_s24 + $0x10] sm:$0xff]  ;;  %v10985_v25 = vld [vmem:[%s10777_s5 + $0x20] sm:$0xff]  ;;  %s15858_s1 = sld [smem:[#allocation16_spill]]  ;;  %s10766_s28 = smov 113  }
  0x45   :  { %527 = vmatpush.msrb.mxu2 %v494_v8  ;;  %463 = vmatpush.msrb.mxu1 %v427_v13  ;;  %v10973_v22 = vld [vmem:[%s10777_s5 + $0x18] sm:$0xff]  ;;  %v265_v24 = vld [vmem:[%s10787_s13 + $0x10] sm:$0xff]  ;;  %v10988_v26 = vld [vmem:[%s10782_s9 + $0x20] sm:$0xff]  ;;  %s10767_s2 = smov 111   ;;  %s15863_s7 = sld [smem:[#allocation14_spill]] }
  0x46   :  { %v10976_v23 = vld [vmem:[%s10782_s9 + $0x18] sm:$0xff]  ;;  %v10997_v28 = vld [vmem:[%s10777_s5 + $0x28] sm:$0xff]  ;;  %v267_v30 = vld [vmem:[%s10787_s13 + $0x20] sm:$0xff]  ;;  %s15834_s5 = sld [smem:[#allocation6_spill]] }
  0x47   :  { %9338 = vmatmul.msk.f32.gmra.mxu0 %vm146_vm1, %v10936_v3  ;;  %528 = vmatpush.msrb.mxu2 %v493_v14  ;;  %v266_v27 = vld [vmem:[%s10787_s13 + $0x18] sm:$0xff]  ;;  %v11000_v29 = vld [vmem:[%s10782_s9 + $0x28] sm:$0xff]  ;;  %v422_v34 = vld [vmem:[%s10822_s14] sm:$0xff]  ;;  %s15835_s9 = sld [smem:[#allocation10_spill]] }
  0x48   :  { %9345 = vmatmul.msk.f32.gmra.mxu1 %vm146_vm1, %v10939_v4  ;;  %v268_v31 = vld [vmem:[%s10787_s13 + $0x28] sm:$0xff]  ;;  %v488_v35 = vld [vmem:[%s10832_s24] sm:$0xff]  ;;  %v9423_v36 = vld [vmem:[%s10832_s24 + $0x78] sm:$0xff]  ;;  %s15836_s13 = sld [smem:[#allocation9_spill]] }
  0x49   :  { %464 = vmatpush.msrb.mxu1 %v426_v15  ;;  %529 = vmatpush.msrb.mxu2 %v492_v16  ;;  %v423_v32 = vld [vmem:[%s10822_s14 + $0x8] sm:$0xff]  ;;  %v11016_v37 = vld [vmem:[%s10817_s8] ss:$0 sm:$0xff]  ;;  %v9422_v42 = vld [vmem:[%s10832_s24 + $0x70] sm:$0xff]  ;;  %s10754_s8 = smov 16   ;;  %s15887_s10 = sld [smem:[#allocation15_spill]] }
  0x4a   :  { %9352 = vmatmul.msk.f32.gmra.mxu2 %vm274_vm3, %v264_v17  ;;  %v489_v33 = vld [vmem:[%s10832_s24 + $0x8] sm:$0xff]  ;;  %v9408_v43 = vld [vmem:[%s10822_s14 + $0x78] sm:$0xff]  ;;  %v9407_v44 = vld [vmem:[%s10822_s14 + $0x70] sm:$0xff]  ;;  %s4885_s11 = sld [smem:[#allocation2]] }
  0x4b   :  { %465 = vmatpush.msrb.mxu1 %v425_v18  ;;  %530 = vmatpush.msrb.mxu2 %v491_v19  ;;  %v9406_v45 = vld [vmem:[%s10822_s14 + $0x68] sm:$0xff]  ;;  %v9405_v51 = vld [vmem:[%s10822_s14 + $0x60] sm:$0xff]  ;;  %v9404_v53 = vld [vmem:[%s10822_s14 + $0x58] sm:$0xff]  ;;  %s9925_s15 = sld [smem:[#allocation2 + $0x1]] }
  0x4c   :  { %v9421_v46 = vld [vmem:[%s10832_s24 + $0x68] sm:$0xff]  ;;  %v9420_v52 = vld [vmem:[%s10832_s24 + $0x60] sm:$0xff]  ;;  %v9419_v54 = vld [vmem:[%s10832_s24 + $0x58] sm:$0xff]  ;;  %s10027_s16 = sld [smem:[#allocation2 + $0x2]] }
  0x4d   :  { %466 = vmatpush.msrb.mxu1 %v424_v20  ;;  %531 = vmatpush.msrb.mxu2 %v490_v21  ;;  %v9403_v55 = vld [vmem:[%s10822_s14 + $0x50] sm:$0xff]  ;;  %v9402_v57 = vld [vmem:[%s10822_s14 + $0x48] sm:$0xff]  ;;  %v9401_v59 = vld [vmem:[%s10822_s14 + $0x40] sm:$0xff] }
  0x4e   :  { %v9418_v56 = vld [vmem:[%s10832_s24 + $0x50] sm:$0xff]  ;;  %v9417_v58 = vld [vmem:[%s10832_s24 + $0x48] sm:$0xff]  ;;  %v9416_v60 = vld [vmem:[%s10832_s24 + $0x40] sm:$0xff] }
  0x4f   :  { %9339 = vmatmul.msk.f32.gmra.mxu0 %vm146_vm1, %v10952_v10  ;;  %467 = vmatpush.msrb.mxu1 %v423_v32  ;;  %v9471_v19 = vld [vmem:[%s10832_s24 + $0xb8] sm:$0xff]  ;;  %v9470_v20 = vld [vmem:[%s10832_s24 + $0xb0] sm:$0xff]  ;;  %v9453_v32 = vld [vmem:[%s10822_s14 + $0xa0] sm:$0xff] }
  0x50   :  { %9346 = vmatmul.msk.f32.gmra.mxu1 %vm146_vm1, %v10956_v12  ;;  %532 = vmatpush.msrb.mxu2 %v489_v33  ;;  %v9456_v21 = vld [vmem:[%s10822_s14 + $0xb8] sm:$0xff]  ;;  %v332_v33 = vld [vmem:[%s10872_s17] sm:$0x3]  ;;  %s15837_s17 = sld [smem:[#allocation8_spill]] }
  0x51   :  { %468 = vmatpush.msrb.mxu1 %v422_v34  ;;  %9357 = vmatpush.msk.msra.mxu3 %vm165_vm0, %v332_v33  ;;  %v9452_v34 = vld [vmem:[%s10822_s14 + $0x98] sm:$0xff]  ;;  %v1983_v33 = vld [vmem:[%s10852_s20 + $0x10] sm:$0xff] }
  0x52   :  { %9353 = vmatmul.msk.f32.gmra.mxu2 %vm274_vm3, %v265_v24  ;;  %v9455_v24 = vld [vmem:[%s10822_s14 + $0xb0] sm:$0xff]  ;;  %9358 = vmatmul.msk.f32.vlgmr.msra.gmra.mxu3 %vm146_vm1, %v10927_v2 }
  0x53   :  { %533 = vmatpush.msrb.mxu2 %v488_v35  ;;  %857 = vmatpush.msra.mxu1 %v9408_v43  ;;  %v9467_v35 = vld [vmem:[%s10832_s24 + $0x98] sm:$0xff]  ;;  %v9464_v43 = vld [vmem:[%s10832_s24 + $0x80] sm:$0xff] }
  0x55   :  { %906 = vmatpush.msra.mxu2 %v9423_v36  ;;  %858 = vmatpush.msra.mxu1 %v9407_v44  ;;  %v9451_v36 = vld [vmem:[%s10822_s14 + $0x90] sm:$0xff]  ;;  %v9519_v44 = vld [vmem:[%s10832_s24 + $0xf8] sm:$0xff] }
  0x57   :  { %9340 = vmatmul.msk.f32.gmra.mxu0 %vm146_vm1, %v10973_v22  ;;  %907 = vmatpush.msra.mxu2 %v9422_v42  ;;  %v9449_v42 = vld [vmem:[%s10822_s14 + $0x80] sm:$0xff] }
  0x58   :  { %9347 = vmatmul.msk.f32.gmra.mxu1 %vm146_vm1, %v10976_v23 }
  0x59   :  { %859 = vmatpush.msra.mxu1 %v9406_v45  ;;  %908 = vmatpush.msra.mxu2 %v9421_v46  ;;  %v9503_v45 = vld [vmem:[%s10822_s14 + $0xf0] sm:$0xff] }
  0x5a   :  { %9354 = vmatmul.msk.f32.gmra.mxu2 %vm274_vm3, %v266_v27  ;;  %v9469_v27 = vld [vmem:[%s10832_s24 + $0xa8] sm:$0xff]  ;;  %9359 = vmatmul.msk.f32.gmra.mxu3 %vm146_vm1, %v10939_v4  ;;  %v9518_v46 = vld [vmem:[%s10832_s24 + $0xf0] sm:$0xff] }
  0x5b   :  { %860 = vmatpush.msra.mxu1 %v9405_v51  ;;  %909 = vmatpush.msra.mxu2 %v9420_v52  ;;  %v9501_v51 = vld [vmem:[%s10822_s14 + $0xe0] sm:$0xff] }
  0x5c   :  { %v9516_v52 = vld [vmem:[%s10832_s24 + $0xe0] sm:$0xff] }
  0x5d   :  { %861 = vmatpush.msra.mxu1 %v9404_v53  ;;  %910 = vmatpush.msra.mxu2 %v9419_v54  ;;  %v9515_v53 = vld [vmem:[%s10832_s24 + $0xd8] sm:$0xff]  ;;  %v9499_v54 = vld [vmem:[%s10822_s14 + $0xd0] sm:$0xff] }
  0x5f   :  { %9341 = vmatmul.msk.f32.gmra.mxu0 %vm146_vm1, %v10985_v25  ;;  %862 = vmatpush.msra.mxu1 %v9403_v55  ;;  %v9514_v55 = vld [vmem:[%s10832_s24 + $0xd0] sm:$0xff] }
  0x60   :  { %9348 = vmatmul.msk.f32.gmra.mxu1 %vm146_vm1, %v10988_v26  ;;  %911 = vmatpush.msra.mxu2 %v9418_v56  ;;  %v9498_v56 = vld [vmem:[%s10822_s14 + $0xc8] sm:$0xff] }
  0x61   :  { %863 = vmatpush.msra.mxu1 %v9402_v57  ;;  %v9513_v57 = vld [vmem:[%s10832_s24 + $0xc8] sm:$0xff] }
  0x62   :  { %9355 = vmatmul.msk.f32.gmra.mxu2 %vm274_vm3, %v267_v30  ;;  %v9454_v30 = vld [vmem:[%s10822_s14 + $0xa8] sm:$0xff]  ;;  %9360 = vmatmul.msk.f32.gmra.mxu3 %vm146_vm1, %v10956_v12 }
  0x63   :  { %912 = vmatpush.msra.mxu2 %v9417_v58  ;;  %864 = vmatpush.msra.mxu1 %v9401_v59  ;;  %v9497_v58 = vld [vmem:[%s10822_s14 + $0xc0] sm:$0xff] }
  0x64   :  { %v9512_v59 = vld [vmem:[%s10832_s24 + $0xc0] sm:$0xff] }
  0x65   :  { %913 = vmatpush.msra.mxu2 %v9416_v60 }
  0x67   :  { %9342 = vmatmul.msk.f32.gmra.mxu0 %vm146_vm1, %v10997_v28 }
  0x68   :  { %9349 = vmatmul.msk.f32.gmra.mxu1 %vm146_vm1, %v11000_v29 }
  0x6a   :  { %9356 = vmatmul.msk.f32.gmra.mxu2 %vm274_vm3, %v268_v31  ;;  %v9468_v31 = vld [vmem:[%s10832_s24 + $0xa0] sm:$0xff]  ;;  %9361 = vmatmul.msk.f32.gmra.mxu3 %vm146_vm1, %v10976_v23  ;;  %v9504_v23 = vld [vmem:[%s10822_s14 + $0xf8] sm:$0xff]  ;;  %vm3869_vm3 = vcmask 97280  }
  0x72   :  { %9362 = vmatmul.msk.f32.gmra.mxu3 %vm146_vm1, %v10988_v26  ;;  %v9502_v26 = vld [vmem:[%s10822_s14 + $0xe8] sm:$0xff] }
  0x7a   :  { %9363 = vmatmul.msk.f32.gmra.mxu3 %vm146_vm1, %v11000_v29  ;;  %v9500_v29 = vld [vmem:[%s10822_s14 + $0xd8] sm:$0xff] }
  0xbc   :  { %v186_v38 = vpop.f32.mrf.mxu0 }
  0xbd   :  { %v245_v39 = vpop.f32.mrf.mxu1  ;;  %v11019_v40 = vadd.f32 %v11016_v37, %v186_v38  ;;  %v9450_v38 = vld [vmem:[%s10822_s14 + $0x88] sm:$0xff]  ;;  %s10755_s14 = smov 32  }
  0xbe   :  { %v11022_v41 = vadd.f32 %v11016_v37, %v245_v39  ;;  %v9465_v39 = vld [vmem:[%s10832_s24 + $0x88] sm:$0xff] }
  0xbf   :  { %9371 = vmatmul.msk.f32.vlgmr.msrb.gmra.mxu1 %vm434_vm4, %v11019_v40 }
  0xc0   :  { %9377 = vmatmul.msk.f32.vlgmr.msrb.gmra.mxu2 %vm434_vm4, %v11022_v41  ;;  %1235 = vmatpush.msrb.mxu1 %v9456_v21 }
  0xc1   :  { %1284 = vmatpush.msrb.mxu2 %v9471_v19  ;;  %v1987_v19 = vld [vmem:[%s10852_s20 + $0x30] sm:$0xff] }
  0xc2   :  { %1236 = vmatpush.msrb.mxu1 %v9455_v24  ;;  %v1986_v24 = vld [vmem:[%s10852_s20 + $0x28] sm:$0xff] }
  0xc3   :  { %1285 = vmatpush.msrb.mxu2 %v9470_v20  ;;  %v2052_v20 = vld [vmem:[%s10862_s4 + $0x30] sm:$0xff] }
  0xc4   :  { %v189_v47 = vpop.f32.mrf.mxu0  ;;  %1237 = vmatpush.msrb.mxu1 %v9454_v30  ;;  %v2050_v30 = vld [vmem:[%s10862_s4 + $0x20] sm:$0xff] }
  0xc5   :  { %v248_v48 = vpop.f32.mrf.mxu1  ;;  %v11034_v49 = vadd.f32 %v11016_v37, %v189_v47  ;;  %1286 = vmatpush.msrb.mxu2 %v9469_v27  ;;  %v11127_v2 = vpop.f32.mrf.mxu2  ;;  %v9517_v47 = vld [vmem:[%s10832_s24 + $0xe8] sm:$0xff] }
  0xc6   :  { %v11037_v50 = vadd.f32 %v11016_v37, %v248_v48  ;;  %1238 = vmatpush.msrb.mxu1 %v9453_v32  ;;  %v2049_v32 = vld [vmem:[%s10862_s4 + $0x18] sm:$0xff] }
  0xc7   :  { %9372 = vmatmul.msk.f32.gmra.mxu1 %vm434_vm4, %v11034_v49  ;;  %1287 = vmatpush.msrb.mxu2 %v9468_v31  ;;  %v1984_v31 = vld [vmem:[%s10852_s20 + $0x18] sm:$0xff] }
  0xc8   :  { %9378 = vmatmul.msk.f32.gmra.mxu2 %vm434_vm4, %v11037_v50  ;;  %1239 = vmatpush.msrb.mxu1 %v9452_v34  ;;  %v2048_v34 = vld [vmem:[%s10862_s4 + $0x10] sm:$0xff] }
  0xc9   :  { %1288 = vmatpush.msrb.mxu2 %v9467_v35 }
  0xca   :  { %1240 = vmatpush.msrb.mxu1 %v9451_v36  ;;  %v1982_v36 = vld [vmem:[%s10852_s20 + $0x8] sm:$0xff] }
  0xcc   :  { %v192_v61 = vpop.f32.mrf.mxu0  ;;  %1241 = vmatpush.msrb.mxu1 %v9450_v38 }
  0xcd   :  { %v251_v62 = vpop.f32.mrf.mxu1  ;;  %v11054_v63 = vadd.f32 %v11016_v37, %v192_v61  ;;  %v11139_v4 = vpop.f32.mrf.mxu2 }
  0xce   :  { %v11057_v0 = vadd.f32 %v11016_v37, %v251_v62  ;;  %1242 = vmatpush.msrb.mxu1 %v9449_v42 }
  0xcf   :  { %9373 = vmatmul.msk.f32.gmra.mxu1 %vm434_vm4, %v11054_v63 }
  0xd0   :  { %9379 = vmatmul.msk.f32.gmra.mxu2 %vm434_vm4, %v11057_v0 }
  0xd4   :  { %v195_v5 = vpop.f32.mrf.mxu0 }
  0xd5   :  { %v254_v6 = vpop.f32.mrf.mxu1  ;;  %v11064_v7 = vadd.f32 %v11016_v37, %v195_v5  ;;  %v11149_v12 = vpop.f32.mrf.mxu2 }
  0xd6   :  { %v11067_v8 = vadd.f32 %v11016_v37, %v254_v6 }
  0xd7   :  { %9374 = vmatmul.msk.f32.gmra.mxu1 %vm434_vm4, %v11064_v7 }
  0xd8   :  { %9380 = vmatmul.msk.f32.gmra.mxu2 %vm434_vm4, %v11067_v8 }
  0xdc   :  { %v198_v9 = vpop.f32.mrf.mxu0 }
  0xdd   :  { %v257_v11 = vpop.f32.mrf.mxu1  ;;  %v11074_v13 = vadd.f32 %v11016_v37, %v198_v9  ;;  %v11163_v48 = vpop.f32.mrf.mxu2 }
  0xde   :  { %v11077_v14 = vadd.f32 %v11016_v37, %v257_v11 }
  0xdf   :  { %9375 = vmatmul.msk.f32.gmra.mxu1 %vm434_vm4, %v11074_v13 }
  0xe0   :  { %9381 = vmatmul.msk.f32.gmra.mxu2 %vm434_vm4, %v11077_v14 }
  0xe4   :  { %v201_v15 = vpop.f32.mrf.mxu0 }
  0xe5   :  { %v260_v16 = vpop.f32.mrf.mxu1  ;;  %v11084_v17 = vadd.f32 %v11016_v37, %v201_v15  ;;  %v11179_v60 = vpop.f32.mrf.mxu2  ;;  %v1988_v15 = vld [vmem:[%s10852_s20 + $0x38] sm:$0xff] }
  0xe6   :  { %v11087_v18 = vadd.f32 %v11016_v37, %v260_v16  ;;  %v9466_v37 = vld [vmem:[%s10832_s24 + $0x90] sm:$0xff]  ;;  %v2053_v16 = vld [vmem:[%s10862_s4 + $0x38] sm:$0xff]  ;;  %s10757_s24 = smov 64  }
  0xe7   :  { %9376 = vmatmul.msk.f32.gmra.mxu1 %vm434_vm4, %v11084_v17  ;;  %1289 = vmatpush.msrb.mxu2 %v9466_v37  ;;  %v2047_v37 = vld [vmem:[%s10862_s4 + $0x8] sm:$0xff] }
  0xe8   :  { %9382 = vmatmul.msk.f32.gmra.mxu2 %vm434_vm4, %v11087_v18 }
  0xe9   :  { %1290 = vmatpush.msrb.mxu2 %v9465_v39  ;;  %v2046_v39 = vld [vmem:[%s10862_s4] sm:$0xff] }
  0xeb   :  { %1291 = vmatpush.msrb.mxu2 %v9464_v43  ;;  %v10285_v43 = vld [vmem:[%s10837_s30] ss:$0 sm:$0xff] }
  0xed   :  { %v11189_v61 = vpop.f32.mrf.mxu2 }
  0xef   :  { %9410 = vmatmul.msk.f32.vlgmr.msra.gmra.mxu1 %vm434_vm4, %v11019_v40 }
  0xf0   :  { %9425 = vmatmul.msk.f32.vlgmr.msra.gmra.mxu2 %vm434_vm4, %v11022_v41  ;;  %1613 = vmatpush.msra.mxu1 %v9504_v23 }
  0xf1   :  { %1662 = vmatpush.msra.mxu2 %v9519_v44 }
  0xf2   :  { %1614 = vmatpush.msra.mxu1 %v9503_v45 }
  0xf3   :  { %1663 = vmatpush.msra.mxu2 %v9518_v46 }
  0xf4   :  { %1615 = vmatpush.msra.mxu1 %v9502_v26 }
  0xf5   :  { %1664 = vmatpush.msra.mxu2 %v9517_v47  ;;  %v11273_v47 = vld [vmem:[%s10827_s19] ss:$0 sm:$0xff] }
  0xf6   :  { %1616 = vmatpush.msra.mxu1 %v9501_v51 }
  0xf7   :  { %9411 = vmatmul.msk.f32.gmra.mxu1 %vm434_vm4, %v11034_v49  ;;  %1665 = vmatpush.msra.mxu2 %v9516_v52  ;;  %v11277_v52 = vpop.f32.mrf.mxu3 }
  0xf8   :  { %9426 = vmatmul.msk.f32.gmra.mxu2 %vm434_vm4, %v11037_v50  ;;  %1617 = vmatpush.msra.mxu1 %v9500_v29  ;;  %15827 = vst [vmem:[#allocation17_spill] sm:$0xff] %v11277_v52  ;;  %v9582_v29 = vld [vmem:[%s10852_s20 + $0x78] sm:$0xff] }
  0xf9   :  { %1666 = vmatpush.msra.mxu2 %v9515_v53  ;;  %v9597_v53 = vld [vmem:[%s10862_s4 + $0x78] sm:$0xff] }
  0xfa   :  { %1618 = vmatpush.msra.mxu1 %v9499_v54 }
  0xfb   :  { %1667 = vmatpush.msra.mxu2 %v9514_v55  ;;  %v9596_v55 = vld [vmem:[%s10862_s4 + $0x70] sm:$0xff] }
  0xfc   :  { %1619 = vmatpush.msra.mxu1 %v9498_v56 }
  0xfd   :  { %1668 = vmatpush.msra.mxu2 %v9513_v57  ;;  %v9580_v57 = vld [vmem:[%s10852_s20 + $0x68] sm:$0xff] }
  0xfe   :  { %1620 = vmatpush.msra.mxu1 %v9497_v58  ;;  %v9595_v58 = vld [vmem:[%s10862_s4 + $0x68] sm:$0xff] }
  0xff   :  { %9412 = vmatmul.msk.f32.gmra.mxu1 %vm434_vm4, %v11054_v63  ;;  %1669 = vmatpush.msra.mxu2 %v9512_v59 }
 0x100   :  { %9427 = vmatmul.msk.f32.gmra.mxu2 %vm434_vm4, %v11057_v0 }
 0x107   :  { %9413 = vmatmul.msk.f32.gmra.mxu1 %vm434_vm4, %v11064_v7 }
 0x108   :  { %9428 = vmatmul.msk.f32.gmra.mxu2 %vm434_vm4, %v11067_v8 }
 0x10f   :  { %9414 = vmatmul.msk.f32.gmra.mxu1 %vm434_vm4, %v11074_v13 }
 0x110   :  { %9429 = vmatmul.msk.f32.gmra.mxu2 %vm434_vm4, %v11077_v14 }
 0x117   :  { %9415 = vmatmul.msk.f32.gmra.mxu1 %vm434_vm4, %v11084_v17 }
 0x118   :  { %9430 = vmatmul.msk.f32.gmra.mxu2 %vm434_vm4, %v11087_v18 }
 0x11f   :  { %9458 = vmatmul.msk.f32.vlgmr.msrb.gmra.mxu1 %vm434_vm4, %v11019_v40 }
 0x120   :  { %9473 = vmatmul.msk.f32.vlgmr.msrb.gmra.mxu2 %vm434_vm4, %v11022_v41  ;;  %2019 = vmatpush.msrb.mxu1 %v1988_v15  ;;  %v9594_v15 = vld [vmem:[%s10862_s4 + $0x60] sm:$0xff] }
 0x121   :  { %2066 = vmatpush.msrb.mxu2 %v2053_v16  ;;  %v9578_v16 = vld [vmem:[%s10852_s20 + $0x58] sm:$0xff] }
 0x122   :  { %2020 = vmatpush.msrb.mxu1 %v1987_v19  ;;  %v9593_v19 = vld [vmem:[%s10862_s4 + $0x58] sm:$0xff] }
 0x123   :  { %2067 = vmatpush.msrb.mxu2 %v2052_v20 }
 0x124   :  { %2021 = vmatpush.msrb.mxu1 %v1986_v24 }
 0x127   :  { %9459 = vmatmul.msk.f32.gmra.mxu1 %vm434_vm4, %v11034_v49 }
 0x128   :  { %9474 = vmatmul.msk.f32.gmra.mxu2 %vm434_vm4, %v11037_v50 }
 0x12f   :  { %9460 = vmatmul.msk.f32.gmra.mxu1 %vm434_vm4, %v11054_v63 }
 0x130   :  { %9475 = vmatmul.msk.f32.gmra.mxu2 %vm434_vm4, %v11057_v0 }
 0x137   :  { %9461 = vmatmul.msk.f32.gmra.mxu1 %vm434_vm4, %v11064_v7 }
 0x138   :  { %9476 = vmatmul.msk.f32.gmra.mxu2 %vm434_vm4, %v11067_v8 }
 0x13c   :  { %v11191_v62 = vpop.f32.mrf.mxu1 }
 0x13d   :  { %v471_v54 = vadd.f32 %v11273_v47, %v11191_v62  ;;  %v11303_v62 = vpop.f32.mrf.mxu3 }
 0x13e   :  { %15828 = vst [vmem:[#allocation18_spill] sm:$0xff] %v11303_v62 }
 0x13f   :  { %9462 = vmatmul.msk.f32.gmra.mxu1 %vm434_vm4, %v11074_v13 }
 0x140   :  { %9477 = vmatmul.msk.f32.gmra.mxu2 %vm434_vm4, %v11077_v14 }
 0x143   :  { %v11197_v5 = vpop.f32.mrf.mxu2 }
 0x144   :  { %v11199_v6 = vpop.f32.mrf.mxu1 }
 0x145   :  { %v474_v20 = vadd.f32 %v11273_v47, %v11199_v6 }
 0x147   :  { %9463 = vmatmul.msk.f32.gmra.mxu1 %vm434_vm4, %v11084_v17 }
 0x148   :  { %9478 = vmatmul.msk.f32.gmra.mxu2 %vm434_vm4, %v11087_v18 }
 0x14b   :  { %v11205_v9 = vpop.f32.mrf.mxu2 }
 0x14c   :  { %v11207_v11 = vpop.f32.mrf.mxu1  ;;  %v539_v26 = vadd.f32 %v10285_v43, %v11205_v9  ;;  %v9579_v9 = vld [vmem:[%s10852_s20 + $0x60] sm:$0xff] }
 0x14f   :  { %9506 = vmatmul.msk.f32.vlgmr.msra.gmra.mxu1 %vm434_vm4, %v11019_v40  ;;  %v2051_v40 = vld [vmem:[%s10862_s4 + $0x28] sm:$0xff] }
 0x150   :  { %9521 = vmatmul.msk.f32.vlgmr.msra.gmra.mxu2 %vm434_vm4, %v11022_v41  ;;  %v1985_v41 = vld [vmem:[%s10852_s20 + $0x20] sm:$0xff] }
 0x151   :  { %2068 = vmatpush.msrb.mxu2 %v2051_v40  ;;  %2022 = vmatpush.msrb.mxu1 %v1985_v41  ;;  %v9576_v40 = vld [vmem:[%s10852_s20 + $0x48] sm:$0xff] }
 0x152   :  { %v9591_v41 = vld [vmem:[%s10862_s4 + $0x48] sm:$0xff] }
 0x153   :  { %v541_v21 = vpop.f32.mrf.mxu2  ;;  %2069 = vmatpush.msrb.mxu2 %v2050_v30  ;;  %2023 = vmatpush.msrb.mxu1 %v1984_v31  ;;  %v11326_v31 = vpop.f32.mrf.mxu3 }
 0x154   :  { %v11219_v27 = vpop.f32.mrf.mxu1  ;;  %v542_v46 = vadd.f32 %v10285_v43, %v541_v21  ;;  %v9592_v21 = vld [vmem:[%s10862_s4 + $0x50] sm:$0xff]  ;;  %15829 = vst [vmem:[#allocation19_spill] sm:$0xff] %v11326_v31 }
 0x155   :  { %2070 = vmatpush.msrb.mxu2 %v2049_v32  ;;  %2024 = vmatpush.msrb.mxu1 %v1983_v33  ;;  %v9575_v32 = vld [vmem:[%s10852_s20 + $0x40] sm:$0xff] }
 0x156   :  { %v9590_v33 = vld [vmem:[%s10862_s4 + $0x40] sm:$0xff] }
 0x157   :  { %9507 = vmatmul.msk.f32.gmra.mxu1 %vm434_vm4, %v11034_v49  ;;  %2071 = vmatpush.msrb.mxu2 %v2048_v34  ;;  %v1981_v49 = vld [vmem:[%s10852_s20] sm:$0xff]  ;;  %v477_v34 = vadd.f32 %v11273_v47, %v11207_v11  ;;  %v480_v11 = vadd.f32 %v11273_v47, %v11219_v27 }
 0x158   :  { %9522 = vmatmul.msk.f32.gmra.mxu2 %vm434_vm4, %v11037_v50  ;;  %2025 = vmatpush.msrb.mxu1 %v1982_v36 }
 0x159   :  { %2072 = vmatpush.msrb.mxu2 %v2047_v37 }
 0x15a   :  { %2026 = vmatpush.msrb.mxu1 %v1981_v49  ;;  %v10287_v49 = vld [vmem:[%s10837_s30 + $0x1] ss:$0 sm:$0xff] }
 0x15b   :  { %v544_v35 = vpop.f32.mrf.mxu2  ;;  %2073 = vmatpush.msrb.mxu2 %v2046_v39  ;;  %v11343_v36 = vpop.f32.mrf.mxu3 }
 0x15c   :  { %v11233_v38 = vpop.f32.mrf.mxu1  ;;  %2395 = vmatpush.msra.mxu1 %v9582_v29  ;;  %15830 = vst [vmem:[#allocation20_spill] sm:$0xff] %v11343_v36  ;;  %v9645_v29 = vld [vmem:[%s10862_s4 + $0xb8] sm:$0xff] }
 0x15d   :  { %2444 = vmatpush.msra.mxu2 %v9597_v53  ;;  %v483_v27 = vadd.f32 %v11273_v47, %v11233_v38  ;;  %v9629_v53 = vld [vmem:[%s10852_s20 + $0xb0] sm:$0xff] }
 0x15f   :  { %9508 = vmatmul.msk.f32.gmra.mxu1 %vm434_vm4, %v11054_v63  ;;  %2445 = vmatpush.msra.mxu2 %v9596_v55  ;;  %v9628_v55 = vld [vmem:[%s10852_s20 + $0xa8] sm:$0xff] }
 0x160   :  { %9523 = vmatmul.msk.f32.gmra.mxu2 %vm434_vm4, %v11057_v0 }
 0x161   :  { %2446 = vmatpush.msra.mxu2 %v9595_v58  ;;  %v9642_v58 = vld [vmem:[%s10862_s4 + $0xa0] sm:$0xff] }
 0x163   :  { %v547_v50 = vpop.f32.mrf.mxu2  ;;  %2447 = vmatpush.msra.mxu2 %v9594_v15  ;;  %v9641_v15 = vld [vmem:[%s10862_s4 + $0x98] sm:$0xff] }
 0x164   :  { %v11241_v42 = vpop.f32.mrf.mxu1  ;;  %v548_v63 = vadd.f32 %v10285_v43, %v547_v50 }
 0x165   :  { %2448 = vmatpush.msra.mxu2 %v9593_v19  ;;  %v9640_v19 = vld [vmem:[%s10862_s4 + $0x90] sm:$0xff] }
 0x167   :  { %9509 = vmatmul.msk.f32.gmra.mxu1 %vm434_vm4, %v11064_v7  ;;  %v545_v7 = vadd.f32 %v10285_v43, %v544_v35  ;;  %2449 = vmatpush.msra.mxu2 %v9592_v21  ;;  %v9639_v21 = vld [vmem:[%s10862_s4 + $0x88] sm:$0xff] }
 0x168   :  { %9524 = vmatmul.msk.f32.gmra.mxu2 %vm434_vm4, %v11067_v8 }
 0x169   :  { %2450 = vmatpush.msra.mxu2 %v9591_v41 }
 0x16b   :  { %v550_v23 = vpop.f32.mrf.mxu2  ;;  %2451 = vmatpush.msra.mxu2 %v9590_v33 }
 0x16c   :  { %v551_v44 = vadd.f32 %v10285_v43, %v550_v23  ;;  %v11248_v45 = vpop.f32.mrf.mxu1  ;;  %v11359_v23 = vpop.f32.mrf.mxu3 }
 0x16d   :  { %15832 = vst [vmem:[#allocation21_spill] sm:$0xff] %v11359_v23 }
 0x16e   :  { %9383 = vmatpush.xpose.msk.msrb.mxu3 %vm553_vm5, %v551_v44 }
 0x16f   :  { %9510 = vmatmul.msk.f32.gmra.mxu1 %vm434_vm4, %v11074_v13  ;;  %v11266_v13 = vld [vmem:[%s10847_s12] ss:$0 sm:$0xff]  ;;  %s15856_s12 = sld [smem:[#allocation12_spill]] }
 0x170   :  { %9525 = vmatmul.msk.f32.gmra.mxu2 %vm434_vm4, %v11077_v14  ;;  %v11330_v6 = vadd.f32 %v11266_v13, %v11149_v12  ;;  %v11347_v37 = vadd.f32 %v11266_v13, %v11163_v48  ;;  %v11363_v48 = vadd.f32 %v11266_v13, %v11179_v60  ;;  %v11386_v38 = vadd.f32 %v11266_v13, %v11189_v61 }
 0x172   :  { %9384 = vmatpush.xpose.msk.msrb.mxu3 %vm553_vm5, %v548_v63  ;;  %v371_v63 = vld [vmem:[%s15831_s0] sm:$0x3]  ;;  %s10129_s0 = sld [smem:[#allocation2 + $0x3]] }
 0x173   :  { %v11256_v0 = vpop.f32.mrf.mxu2  ;;  %9364 = vmatpush.msk.msrb.mxu0 %vm165_vm0, %v371_v63 }
 0x174   :  { %v11258_v8 = vpop.f32.mrf.mxu1  ;;  %9365 = vmatmul.msk.f32.vlgmr.msrb.gmra.mxu0 %vm146_vm1, %v10924_v1  ;;  %v486_v1 = vadd.f32 %v11273_v47, %v11241_v42  ;;  %v11411_v47 = vld [vmem:[%s10827_s19 + $0x1] ss:$0 sm:$0xff] }
 0x176   :  { %9385 = vmatpush.xpose.msk.msrb.mxu3 %vm553_vm5, %v545_v7 }
 0x177   :  { %9511 = vmatmul.msk.f32.gmra.mxu1 %vm434_vm4, %v11084_v17  ;;  %v11281_v17 = vadd.f32 %v11266_v13, %v11127_v2  ;;  %v9581_v2 = vld [vmem:[%s10852_s20 + $0x70] sm:$0xff] }
 0x178   :  { %9526 = vmatmul.msk.f32.gmra.mxu2 %vm434_vm4, %v11087_v18  ;;  %v536_v18 = vadd.f32 %v10285_v43, %v11197_v5  ;;  %2396 = vmatpush.msra.mxu1 %v9581_v2  ;;  %v11307_v5 = vadd.f32 %v11266_v13, %v11139_v4  ;;  %v9577_v4 = vld [vmem:[%s10852_s20 + $0x50] sm:$0xff] }
 0x17a   :  { %9386 = vmatpush.xpose.msk.msrb.mxu3 %vm553_vm5, %v542_v46  ;;  %2397 = vmatpush.msra.mxu1 %v9580_v57  ;;  %v9627_v57 = vld [vmem:[%s10852_s20 + $0xa0] sm:$0xff] }
 0x17b   :  { %v11269_v14 = vpop.f32.mrf.mxu2 }
 0x17c   :  { %v11275_v51 = vpop.f32.mrf.mxu1  ;;  %2398 = vmatpush.msra.mxu1 %v9579_v9  ;;  %v919_v13 = vadd.f32 %v10287_v49, %v11269_v14  ;;  %9366 = vmatmul.msk.f32.gmra.mxu0 %vm146_vm1, %v10936_v3  ;;  %v916_v14 = vadd.f32 %v10287_v49, %v11256_v0  ;;  %v9630_v3 = vld [vmem:[%s10852_s20 + $0xb8] sm:$0xff]  ;;  %v867_v0 = vadd.f32 %v11411_v47, %v11248_v45 }
 0x17d   :  { %v9626_v9 = vld [vmem:[%s10852_s20 + $0x98] sm:$0xff]  ;;  %v873_v41 = vadd.f32 %v11411_v47, %v11275_v51 }
 0x17e   :  { %9387 = vmatpush.xpose.msk.msrb.mxu3 %vm553_vm5, %v539_v26  ;;  %2399 = vmatpush.msra.mxu1 %v9578_v16  ;;  %v11382_v26 = vpop.f32.mrf.mxu3  ;;  %v9625_v16 = vld [vmem:[%s10852_s20 + $0x90] sm:$0xff] }
 0x17f   :  { %9545 = vmatmul.msk.f32.vlgmr.msrb.gmra.mxu1 %vm434_vm4, %v11281_v17  ;;  %15833 = vst [vmem:[#allocation22_spill] sm:$0xff] %v11382_v26  ;;  %810 = vmatpush.msra.mxu0 %v11382_v26 }
 0x180   :  { %9551 = vmatmul.msk.f32.vlgmr.msrb.gmra.mxu2 %vm434_vm4, %v11281_v17  ;;  %2400 = vmatpush.msra.mxu1 %v9577_v4  ;;  %v9624_v4 = vld [vmem:[%s10852_s20 + $0x88] sm:$0xff] }
 0x181   :  { %811 = vmatpush.msra.mxu0 %v11359_v23  ;;  %2822 = vmatpush.msrb.mxu2 %v9645_v29  ;;  %v9690_v29 = vld [vmem:[%s10862_s4 + $0xe0] sm:$0xff] }
 0x182   :  { %9388 = vmatpush.xpose.msk.msrb.mxu3 %vm553_vm5, %v536_v18  ;;  %2401 = vmatpush.msra.mxu1 %v9576_v40  ;;  %v9638_v40 = vld [vmem:[%s10862_s4 + $0x80] sm:$0xff] }
 0x183   :  { %v11296_v56 = vpop.f32.mrf.mxu2  ;;  %812 = vmatpush.msra.mxu0 %v11343_v36 }
 0x184   :  { %v11301_v59 = vpop.f32.mrf.mxu1  ;;  %2402 = vmatpush.msra.mxu1 %v9575_v32  ;;  %v922_v18 = vadd.f32 %v10287_v49, %v11296_v56  ;;  %v9643_v56 = vld [vmem:[%s10862_s4 + $0xa8] sm:$0xff]  ;;  %9367 = vmatmul.msk.f32.gmra.mxu0 %vm146_vm1, %v10952_v10  ;;  %v870_v10 = vadd.f32 %v11411_v47, %v11258_v8 }
 0x185   :  { %9389 = vmatmul.msk.f32.vlgmr.msrb.gmra.mxu3 %vm553_vm5, %v471_v54  ;;  %813 = vmatpush.msra.mxu0 %v11326_v31  ;;  %v9644_v54 = vld [vmem:[%s10862_s4 + $0xb0] sm:$0xff]  ;;  %v876_v33 = vadd.f32 %v11411_v47, %v11301_v59 }
 0x186   :  { %2773 = vmatpush.msrb.mxu1 %v9630_v3  ;;  %2823 = vmatpush.msrb.mxu2 %v9644_v54  ;;  %v9675_v3 = vld [vmem:[%s10852_s20 + $0xe0] sm:$0xff] }
 0x187   :  { %9546 = vmatmul.msk.f32.gmra.mxu1 %vm434_vm4, %v11307_v5  ;;  %814 = vmatpush.msra.mxu0 %v11303_v62 }
 0x188   :  { %9552 = vmatmul.msk.f32.gmra.mxu2 %vm434_vm4, %v11307_v5  ;;  %2774 = vmatpush.msrb.mxu1 %v9629_v53  ;;  %v9689_v53 = vld [vmem:[%s10862_s4 + $0xd8] sm:$0xff] }
 0x189   :  { %815 = vmatpush.msra.mxu0 %v11277_v52  ;;  %2824 = vmatpush.msrb.mxu2 %v9643_v56 }
 0x18a   :  { %2775 = vmatpush.msrb.mxu1 %v9628_v55 }
 0x18b   :  { %v924_v24 = vpop.f32.mrf.mxu2  ;;  %1188 = vmatpush.msrb.mxu0 %v11382_v26  ;;  %2825 = vmatpush.msrb.mxu2 %v9642_v58  ;;  %v9687_v58 = vld [vmem:[%s10862_s4 + $0xc8] sm:$0xff] }
 0x18c   :  { %v11324_v30 = vpop.f32.mrf.mxu1  ;;  %v925_v60 = vadd.f32 %v10287_v49, %v924_v24  ;;  %2776 = vmatpush.msrb.mxu1 %v9627_v57  ;;  %v9623_v24 = vld [vmem:[%s10852_s20 + $0x80] sm:$0xff]  ;;  %9368 = vmatmul.msk.f32.gmra.mxu0 %vm146_vm1, %v10973_v22  ;;  %v9672_v57 = vld [vmem:[%s10852_s20 + $0xc8] sm:$0xff] }
 0x18d   :  { %9390 = vmatmul.msk.f32.gmra.mxu3 %vm553_vm5, %v474_v20  ;;  %1189 = vmatpush.msrb.mxu0 %v11359_v23  ;;  %v10289_v22 = vld [vmem:[%s10837_s30 + $0x2] ss:$0 sm:$0xff]  ;;  %v879_v59 = vadd.f32 %v11411_v47, %v11324_v30 }
 0x18e   :  { %2777 = vmatpush.msrb.mxu1 %v9626_v9  ;;  %2826 = vmatpush.msrb.mxu2 %v9641_v15  ;;  %v9671_v9 = vld [vmem:[%s10852_s20 + $0xc0] sm:$0xff] }
 0x18f   :  { %9547 = vmatmul.msk.f32.gmra.mxu1 %vm434_vm4, %v11330_v6  ;;  %1190 = vmatpush.msrb.mxu0 %v11343_v36  ;;  %v9686_v15 = vld [vmem:[%s10862_s4 + $0xc0] sm:$0xff] }
 0x190   :  { %9553 = vmatmul.msk.f32.gmra.mxu2 %vm434_vm4, %v11330_v6  ;;  %2778 = vmatpush.msrb.mxu1 %v9625_v16 }
 0x191   :  { %1191 = vmatpush.msrb.mxu0 %v11326_v31  ;;  %2827 = vmatpush.msrb.mxu2 %v9640_v19 }
 0x192   :  { %2779 = vmatpush.msrb.mxu1 %v9624_v4 }
 0x193   :  { %v927_v35 = vpop.f32.mrf.mxu2  ;;  %1192 = vmatpush.msrb.mxu0 %v11303_v62  ;;  %2828 = vmatpush.msrb.mxu2 %v9639_v21 }
 0x194   :  { %v11341_v12 = vpop.f32.mrf.mxu1  ;;  %v928_v44 = vadd.f32 %v10287_v49, %v927_v35  ;;  %2780 = vmatpush.msrb.mxu1 %v9623_v24  ;;  %9369 = vmatmul.msk.f32.gmra.mxu0 %vm146_vm1, %v10985_v25 }
 0x195   :  { %9391 = vmatmul.msk.f32.gmra.mxu3 %vm553_vm5, %v477_v34  ;;  %2829 = vmatpush.msrb.mxu2 %v9638_v40  ;;  %v882_v30 = vadd.f32 %v11411_v47, %v11341_v12  ;;  %v9678_v12 = vld [vmem:[%s10852_s20 + $0xf8] sm:$0xff]  ;;  %v9676_v47 = vld [vmem:[%s10852_s20 + $0xe8] sm:$0xff] }
 0x196   :  { %1193 = vmatpush.msrb.mxu0 %v11277_v52 }
 0x197   :  { %9548 = vmatmul.msk.f32.gmra.mxu1 %vm434_vm4, %v11347_v37 }
 0x198   :  { %9554 = vmatmul.msk.f32.gmra.mxu2 %vm434_vm4, %v11347_v37 }
 0x19b   :  { %v930_v39 = vpop.f32.mrf.mxu2 }
 0x19c   :  { %v931_v50 = vadd.f32 %v10287_v49, %v930_v39  ;;  %v11357_v43 = vpop.f32.mrf.mxu1  ;;  %9370 = vmatmul.msk.f32.gmra.mxu0 %vm146_vm1, %v10997_v28  ;;  %vm3876_vm1 = vcmask 1043456  }
 0x19d   :  { %9392 = vmatmul.msk.f32.gmra.mxu3 %vm553_vm5, %v480_v11 }
 0x19e   :  { %9431 = vmatpush.xpose.msk.msra.mxu3 %vm553_vm5, %v931_v50 }
 0x19f   :  { %9549 = vmatmul.msk.f32.gmra.mxu1 %vm434_vm4, %v11363_v48 }
 0x1a0   :  { %9555 = vmatmul.msk.f32.gmra.mxu2 %vm434_vm4, %v11363_v48 }
 0x1a2   :  { %9432 = vmatpush.xpose.msk.msra.mxu3 %vm553_vm5, %v928_v44 }
 0x1a3   :  { %v11374_v7 = vpop.f32.mrf.mxu2 }
 0x1a4   :  { %v11380_v46 = vpop.f32.mrf.mxu1  ;;  %v1294_v63 = vadd.f32 %v10289_v22, %v11374_v7  ;;  %v9692_v7 = vld [vmem:[%s10862_s4 + $0xf0] sm:$0xff] }
 0x1a5   :  { %9393 = vmatmul.msk.f32.gmra.mxu3 %vm553_vm5, %v483_v27  ;;  %v11512_v27 = vld [vmem:[%s10827_s19 + $0x2] ss:$0 sm:$0xff] }
 0x1a6   :  { %9433 = vmatpush.xpose.msk.msra.mxu3 %vm553_vm5, %v925_v60  ;;  %v1248_v55 = vadd.f32 %v11512_v27, %v11380_v46 }
 0x1a7   :  { %9550 = vmatmul.msk.f32.gmra.mxu1 %vm434_vm4, %v11386_v38 }
 0x1a8   :  { %9556 = vmatmul.msk.f32.gmra.mxu2 %vm434_vm4, %v11386_v38 }
 0x1aa   :  { %9434 = vmatpush.xpose.msk.msra.mxu3 %vm553_vm5, %v922_v18  ;;  %v9693_v18 = vld [vmem:[%s10862_s4 + $0xf8] sm:$0xff] }
 0x1ab   :  { %v11399_v61 = vpop.f32.mrf.mxu2 }
 0x1ac   :  { %v11407_v42 = vpop.f32.mrf.mxu1  ;;  %v1297_v44 = vadd.f32 %v10289_v22, %v11399_v61  ;;  %v1245_v61 = vadd.f32 %v11512_v27, %v11357_v43  ;;  %v9674_v43 = vld [vmem:[%s10852_s20 + $0xd8] sm:$0xff] }
 0x1ad   :  { %9394 = vmatmul.msk.f32.gmra.mxu3 %vm553_vm5, %v486_v1  ;;  %v9677_v1 = vld [vmem:[%s10852_s20 + $0xf0] sm:$0xff]  ;;  %v1251_v46 = vadd.f32 %v11512_v27, %v11407_v42 }
 0x1ae   :  { %9435 = vmatpush.xpose.msk.msra.mxu3 %vm553_vm5, %v919_v13 }
 0x1af   :  { %9584 = vmatmul.msk.f32.vlgmr.msra.gmra.mxu1 %vm434_vm4, %v11281_v17 }
 0x1b0   :  { %9599 = vmatmul.msk.f32.vlgmr.msra.gmra.mxu2 %vm434_vm4, %v11281_v17  ;;  %3151 = vmatpush.msra.mxu1 %v9678_v12 }
 0x1b1   :  { %3200 = vmatpush.msra.mxu2 %v9693_v18 }
 0x1b2   :  { %9436 = vmatpush.xpose.msk.msra.mxu3 %vm553_vm5, %v916_v14  ;;  %3152 = vmatpush.msra.mxu1 %v9677_v1  ;;  %v9691_v14 = vld [vmem:[%s10862_s4 + $0xe8] sm:$0xff] }
 0x1b3   :  { %v11427_v2 = vpop.f32.mrf.mxu2  ;;  %3201 = vmatpush.msra.mxu2 %v9692_v7  ;;  %v11630_v7 = vld [vmem:[%s15834_s5 + $0x10] sm:$0xff] }
 0x1b4   :  { %v11438_v45 = vpop.f32.mrf.mxu1  ;;  %v1300_v28 = vadd.f32 %v10289_v22, %v11427_v2  ;;  %3153 = vmatpush.msra.mxu1 %v9676_v47  ;;  %v9688_v2 = vld [vmem:[%s10862_s4 + $0xd0] sm:$0xff]  ;;  %s15857_s4 = sld [smem:[#allocation13_spill]] }
 0x1b5   :  { %9437 = vmatmul.msk.f32.vlgmr.msra.gmra.mxu3 %vm553_vm5, %v867_v0  ;;  %3202 = vmatpush.msra.mxu2 %v9691_v14  ;;  %v9673_v0 = vld [vmem:[%s10852_s20 + $0xd0] sm:$0xff]  ;;  %s10760_s20 = smov 112  }
 0x1b6   :  { %3154 = vmatpush.msra.mxu1 %v9675_v3 }
 0x1b7   :  { %9585 = vmatmul.msk.f32.gmra.mxu1 %vm434_vm4, %v11307_v5  ;;  %3203 = vmatpush.msra.mxu2 %v9690_v29 }
 0x1b8   :  { %9600 = vmatmul.msk.f32.gmra.mxu2 %vm434_vm4, %v11307_v5  ;;  %3155 = vmatpush.msra.mxu1 %v9674_v43 }
 0x1b9   :  { %3204 = vmatpush.msra.mxu2 %v9689_v53 }
 0x1ba   :  { %3156 = vmatpush.msra.mxu1 %v9673_v0 }
 0x1bb   :  { %v1302_v20 = vpop.f32.mrf.mxu2  ;;  %3205 = vmatpush.msra.mxu2 %v9688_v2 }
 0x1bc   :  { %v11464_v8 = vpop.f32.mrf.mxu1  ;;  %v1303_v49 = vadd.f32 %v10289_v22, %v1302_v20  ;;  %3157 = vmatpush.msra.mxu1 %v9672_v57  ;;  %v1254_v20 = vadd.f32 %v11512_v27, %v11438_v45  ;;  %v10293_v57 = vld [vmem:[%s15835_s9] ss:$0 sm:$0xff] }
 0x1bd   :  { %9438 = vmatmul.msk.f32.gmra.mxu3 %vm553_vm5, %v870_v10  ;;  %3206 = vmatpush.msra.mxu2 %v9687_v58  ;;  %v10291_v10 = vld [vmem:[%s10837_s30 + $0x3] ss:$0 sm:$0xff]  ;;  %v1257_v45 = vadd.f32 %v11512_v27, %v11464_v8  ;;  %s10758_s30 = smov 80  }
 0x1be   :  { %3158 = vmatpush.msra.mxu1 %v9671_v9 }
 0x1bf   :  { %9586 = vmatmul.msk.f32.gmra.mxu1 %vm434_vm4, %v11330_v6  ;;  %3207 = vmatpush.msra.mxu2 %v9686_v15 }
 0x1c0   :  { %9601 = vmatmul.msk.f32.gmra.mxu2 %vm434_vm4, %v11330_v6 }
 0x1c3   :  { %v1305_v32 = vpop.f32.mrf.mxu2 }
 0x1c4   :  { %v11479_v35 = vpop.f32.mrf.mxu1  ;;  %v1306_v25 = vadd.f32 %v10289_v22, %v1305_v32 }
 0x1c5   :  { %9439 = vmatmul.msk.f32.gmra.mxu3 %vm553_vm5, %v873_v41 }
 0x1c7   :  { %9587 = vmatmul.msk.f32.gmra.mxu1 %vm434_vm4, %v11347_v37 }
 0x1c8   :  { %9602 = vmatmul.msk.f32.gmra.mxu2 %vm434_vm4, %v11347_v37 }
 0x1cb   :  { %v1308_v34 = vpop.f32.mrf.mxu2 }
 0x1cc   :  { %v1309_v51 = vadd.f32 %v10289_v22, %v1308_v34  ;;  %v11495_v39 = vpop.f32.mrf.mxu1  ;;  %v11588_v34 = vld [vmem:[%s15834_s5] sm:$0xff] }
 0x1cd   :  { %9440 = vmatmul.msk.f32.gmra.mxu3 %vm553_vm5, %v876_v33 }
 0x1ce   :  { %9479 = vmatpush.xpose.msk.msrb.mxu3 %vm553_vm5, %v1309_v51  ;;  %v1260_v51 = vadd.f32 %v11512_v27, %v11479_v35 }
 0x1cf   :  { %9588 = vmatmul.msk.f32.gmra.mxu1 %vm434_vm4, %v11363_v48 }
 0x1d0   :  { %9603 = vmatmul.msk.f32.gmra.mxu2 %vm434_vm4, %v11363_v48 }
 0x1d2   :  { %9480 = vmatpush.xpose.msk.msrb.mxu3 %vm553_vm5, %v1306_v25 }
 0x1d3   :  { %v11492_v11 = vpop.f32.mrf.mxu2 }
 0x1d4   :  { %v11515_v60 = vpop.f32.mrf.mxu1 }
 0x1d5   :  { %9441 = vmatmul.msk.f32.gmra.mxu3 %vm553_vm5, %v879_v59 }
 0x1d6   :  { %9481 = vmatpush.xpose.msk.msrb.mxu3 %vm553_vm5, %v1303_v49 }
 0x1d7   :  { %9589 = vmatmul.msk.f32.gmra.mxu1 %vm434_vm4, %v11386_v38 }
 0x1d8   :  { %9604 = vmatmul.msk.f32.gmra.mxu2 %vm434_vm4, %v11386_v38 }
 0x1da   :  { %9482 = vmatpush.xpose.msk.msrb.mxu3 %vm553_vm5, %v1300_v28 }
 0x1db   :  { %v11506_v50 = vpop.f32.mrf.mxu2 }
 0x1dc   :  { %v11539_v54 = vpop.f32.mrf.mxu1  ;;  %v1675_v49 = vadd.f32 %v10291_v10, %v11506_v50  ;;  %v11612_v50 = vld [vmem:[%s15834_s5 + $0x8] sm:$0xff] }
 0x1dd   :  { %9442 = vmatmul.msk.f32.gmra.mxu3 %vm553_vm5, %v882_v30  ;;  %v11604_v30 = vld [vmem:[%s10827_s19 + $0x3] ss:$0 sm:$0xff]  ;;  %s10756_s19 = smov 48  }
 0x1de   :  { %9483 = vmatpush.xpose.msk.msrb.mxu3 %vm553_vm5, %v1297_v44  ;;  %v1672_v44 = vadd.f32 %v10291_v10, %v11492_v11  ;;  %v1623_v12 = vadd.f32 %v11604_v30, %v11495_v39  ;;  %v1629_v43 = vadd.f32 %v11604_v30, %v11539_v54 }
 0x1df   :  { %9632 = vmatmul.msk.f32.vlgmr.msrb.gmra.mxu1 %vm434_vm4, %v11281_v17 }
 0x1e0   :  { %9647 = vmatmul.msk.f32.vlgmr.msrb.gmra.mxu2 %vm434_vm4, %v11281_v17 }
 0x1e2   :  { %9484 = vmatpush.xpose.msk.msrb.mxu3 %vm553_vm5, %v1294_v63 }
 0x1e3   :  { %v1677_v13 = vpop.f32.mrf.mxu2 }
 0x1e4   :  { %v11556_v19 = vpop.f32.mrf.mxu1  ;;  %v1678_v32 = vadd.f32 %v10291_v10, %v1677_v13 }
 0x1e5   :  { %9485 = vmatmul.msk.f32.vlgmr.msrb.gmra.mxu3 %vm553_vm5, %v1245_v61  ;;  %v1626_v61 = vadd.f32 %v11604_v30, %v11515_v60  ;;  %v11647_v60 = vld [vmem:[%s15834_s5 + $0x18] sm:$0xff]  ;;  %v1632_v58 = vadd.f32 %v11604_v30, %v11556_v19  ;;  %v11683_v19 = vld [vmem:[%s15834_s5 + $0x28] sm:$0xff] }
 0x1e7   :  { %9633 = vmatmul.msk.f32.gmra.mxu1 %vm434_vm4, %v11307_v5 }
 0x1e8   :  { %9648 = vmatmul.msk.f32.gmra.mxu2 %vm434_vm4, %v11307_v5 }
 0x1eb   :  { %v1680_v56 = vpop.f32.mrf.mxu2 }
 0x1ec   :  { %v11567_v42 = vpop.f32.mrf.mxu1  ;;  %v1681_v41 = vadd.f32 %v10291_v10, %v1680_v56 }
 0x1ed   :  { %9486 = vmatmul.msk.f32.gmra.mxu3 %vm553_vm5, %v1248_v55 }
 0x1ef   :  { %9634 = vmatmul.msk.f32.gmra.mxu1 %vm434_vm4, %v11330_v6 }
 0x1f0   :  { %9649 = vmatmul.msk.f32.gmra.mxu2 %vm434_vm4, %v11330_v6 }
 0x1f3   :  { %v1683_v16 = vpop.f32.mrf.mxu2 }
 0x1f4   :  { %v1684_v24 = vadd.f32 %v10291_v10, %v1683_v16  ;;  %v11581_v22 = vpop.f32.mrf.mxu1 }
 0x1f5   :  { %9487 = vmatmul.msk.f32.gmra.mxu3 %vm553_vm5, %v1251_v46 }
 0x1f7   :  { %9635 = vmatmul.msk.f32.gmra.mxu1 %vm434_vm4, %v11347_v37 }
 0x1f8   :  { %9650 = vmatmul.msk.f32.gmra.mxu2 %vm434_vm4, %v11347_v37 }
 0x1fb   :  { %v1686_v4 = vpop.f32.mrf.mxu2 }
 0x1fc   :  { %v1687_v21 = vadd.f32 %v10291_v10, %v1686_v4  ;;  %v11614_v63 = vpop.f32.mrf.mxu1 }
 0x1fd   :  { %9488 = vmatmul.msk.f32.gmra.mxu3 %vm553_vm5, %v1254_v20 }
 0x1fe   :  { %9527 = vmatpush.xpose.msk.msra.mxu3 %vm553_vm5, %v1687_v21  ;;  %v1635_v21 = vadd.f32 %v11604_v30, %v11567_v42 }
 0x1ff   :  { %9636 = vmatmul.msk.f32.gmra.mxu1 %vm434_vm4, %v11363_v48 }
 0x200   :  { %9651 = vmatmul.msk.f32.gmra.mxu2 %vm434_vm4, %v11363_v48 }
 0x202   :  { %9528 = vmatpush.xpose.msk.msra.mxu3 %vm553_vm5, %v1684_v24 }
 0x203   :  { %v11577_v40 = vpop.f32.mrf.mxu2 }
 0x204   :  { %v11637_v14 = vpop.f32.mrf.mxu1 }
 0x205   :  { %9489 = vmatmul.msk.f32.gmra.mxu3 %vm553_vm5, %v1257_v45 }
 0x206   :  { %9529 = vmatpush.xpose.msk.msra.mxu3 %vm553_vm5, %v1681_v41 }
 0x207   :  { %9637 = vmatmul.msk.f32.gmra.mxu1 %vm434_vm4, %v11386_v38 }
 0x208   :  { %v607_v33 = vpop.f32.mrf.mxu3  ;;  %9652 = vmatmul.msk.f32.gmra.mxu2 %vm434_vm4, %v11386_v38 }
 0x209   :  { %v625_v8 = vmul.f32 0.125, %v607_v33 }
 0x20a   :  { %9530 = vmatpush.xpose.msk.msra.mxu3 %vm553_vm5, %v1678_v32 }
 0x20b   :  { %v11593_v25 = vpop.f32.mrf.mxu2  ;;  %v11596_v59 = vadd.f32 %v625_v8, %v11588_v34 }
 0x20c   :  { %v11657_v55 = vpop.f32.mrf.mxu1 }
 0x20d   :  { %9490 = vmatmul.msk.f32.gmra.mxu3 %vm553_vm5, %v1260_v51  ;;  %v638_v28 = vsel %vm637_vm6, %v11596_v59, -inf  ;;  %v1638_v51 = vadd.f32 %v11604_v30, %v11581_v22 }
 0x20e   :  { %9531 = vmatpush.xpose.msk.msra.mxu3 %vm553_vm5, %v1675_v49  ;;  %639 = vmax.xlane.f32.xlu0 %v638_v28 }
 0x20f   :  { %9680 = vmatmul.msk.f32.vlgmr.msra.gmra.mxu1 %vm434_vm4, %v11281_v17 }
 0x210   :  { %v610_v35 = vpop.f32.mrf.mxu3  ;;  %9695 = vmatmul.msk.f32.vlgmr.msra.gmra.mxu2 %vm434_vm4, %v11281_v17 }
 0x211   :  { %v626_v27 = vmul.f32 0.125, %v610_v35 }
 0x212   :  { %9532 = vmatpush.xpose.msk.msra.mxu3 %vm553_vm5, %v1672_v44  ;;  %v2079_v44 = vadd.f32 %v10293_v57, %v11593_v25 }
 0x213   :  { %v2081_v18 = vpop.f32.mrf.mxu2  ;;  %v11620_v11 = vadd.f32 %v626_v27, %v11612_v50  ;;  %v2076_v27 = vadd.f32 %v10293_v57, %v11577_v40 }
 0x215   :  { %9533 = vmatmul.msk.f32.vlgmr.msra.gmra.mxu3 %vm553_vm5, %v1623_v12  ;;  %v641_v1 = vsel %vm637_vm6, %v11620_v11, -inf }
 0x216   :  { %642 = vmax.xlane.f32.xlu0 %v641_v1 }
 0x217   :  { %9681 = vmatmul.msk.f32.gmra.mxu1 %vm434_vm4, %v11307_v5 }
 0x218   :  { %v613_v17 = vpop.f32.mrf.mxu3  ;;  %9696 = vmatmul.msk.f32.gmra.mxu2 %vm434_vm4, %v11307_v5 }
 0x219   :  { %v627_v39 = vmul.f32 0.125, %v613_v17 }
 0x21b   :  { %v2084_v13 = vpop.f32.mrf.mxu2  ;;  %v11635_v47 = vadd.f32 %v627_v39, %v11630_v7 }
 0x21c   :  { %v2085_v41 = vadd.f32 %v10293_v57, %v2084_v13 }
 0x21d   :  { %9534 = vmatmul.msk.f32.gmra.mxu3 %vm553_vm5, %v1626_v61  ;;  %v644_v3 = vsel %vm637_vm6, %v11635_v47, -inf }
 0x21e   :  { %645 = vmax.xlane.f32.xlu1 %v644_v3 }
 0x21f   :  { %9682 = vmatmul.msk.f32.gmra.mxu1 %vm434_vm4, %v11330_v6 }
 0x220   :  { %v616_v5 = vpop.f32.mrf.mxu3  ;;  %9697 = vmatmul.msk.f32.gmra.mxu2 %vm434_vm4, %v11330_v6  ;;  %v11664_v6 = vld [vmem:[%s15834_s5 + $0x20] sm:$0xff] }
 0x221   :  { %v628_v29 = vmul.f32 0.125, %v616_v5 }
 0x223   :  { %v2087_v53 = vpop.f32.mrf.mxu2  ;;  %v11652_v0 = vadd.f32 %v628_v29, %v11647_v60 }
 0x224   :  { %v2088_v10 = vadd.f32 %v10293_v57, %v2087_v53 }
 0x225   :  { %9535 = vmatmul.msk.f32.gmra.mxu3 %vm553_vm5, %v1629_v43  ;;  %v647_v2 = vsel %vm637_vm6, %v11652_v0, -inf }
 0x226   :  { %648 = vmax.xlane.f32.xlu1 %v647_v2 }
 0x227   :  { %9683 = vmatmul.msk.f32.gmra.mxu1 %vm434_vm4, %v11347_v37 }
 0x228   :  { %v619_v56 = vpop.f32.mrf.mxu3  ;;  %9698 = vmatmul.msk.f32.gmra.mxu2 %vm434_vm4, %v11347_v37  ;;  %v11676_v37 = vpop.f32.mrf.mxu1 }
 0x229   :  { %v629_v54 = vmul.f32 0.125, %v619_v56 }
 0x22b   :  { %v2090_v9 = vpop.f32.mrf.mxu2  ;;  %v11670_v15 = vadd.f32 %v629_v54, %v11664_v6 }
 0x22c   :  { %v2091_v46 = vadd.f32 %v10293_v57, %v2090_v9  ;;  %v10295_v9 = vld [vmem:[%s15835_s9 + $0x1] ss:$0 sm:$0xff] }
 0x22d   :  { %9536 = vmatmul.msk.f32.gmra.mxu3 %vm553_vm5, %v1632_v58  ;;  %v650_v16 = vsel %vm637_vm6, %v11670_v15, -inf }
 0x22e   :  { %9557 = vmatpush.xpose.msk.msrb.mxu3 %vm553_vm5, %v2091_v46  ;;  %651 = vmax.xlane.f32.xlu2 %v650_v16 }
 0x22f   :  { %9684 = vmatmul.msk.f32.gmra.mxu1 %vm434_vm4, %v11363_v48 }
 0x230   :  { %v622_v20 = vpop.f32.mrf.mxu3  ;;  %9699 = vmatmul.msk.f32.gmra.mxu2 %vm434_vm4, %v11363_v48  ;;  %v2082_v48 = vadd.f32 %v10293_v57, %v2081_v18  ;;  %v2040_v8 = vpop.f32.mrf.mxu1 }
 0x231   :  { %v630_v4 = vmul.f32 0.125, %v622_v20 }
 0x232   :  { %9558 = vmatpush.xpose.msk.msrb.mxu3 %vm553_vm5, %v2088_v10 }
 0x233   :  { %v11688_v24 = vpop.f32.mrf.mxu2  ;;  %v11691_v45 = vadd.f32 %v630_v4, %v11683_v19 }
 0x235   :  { %9537 = vmatmul.msk.f32.gmra.mxu3 %vm553_vm5, %v1635_v21  ;;  %v653_v32 = vsel %vm637_vm6, %v11691_v45, -inf }
 0x236   :  { %9559 = vmatpush.xpose.msk.msrb.mxu3 %vm553_vm5, %v2085_v41  ;;  %654 = vmax.xlane.f32.xlu2 %v653_v32 }
 0x237   :  { %9685 = vmatmul.msk.f32.gmra.mxu1 %vm434_vm4, %v11386_v38 }
 0x238   :  { %v986_v33 = vpop.f32.mrf.mxu3  ;;  %9700 = vmatmul.msk.f32.gmra.mxu2 %vm434_vm4, %v11386_v38  ;;  %v10292_v38 = vld [vmem:[%s15836_s13] ss:$0 sm:$0xff]  ;;  %v2043_v1 = vpop.f32.mrf.mxu1 }
 0x239   :  { %v1004_v42 = vmul.f32 0.125, %v986_v33  ;;  %v2029_v30 = vadd.f32 %v10292_v38, %v11614_v63  ;;  %v2032_v40 = vadd.f32 %v10292_v38, %v11637_v14  ;;  %v2035_v53 = vadd.f32 %v10292_v38, %v11657_v55 }
 0x23a   :  { %9560 = vmatpush.xpose.msk.msrb.mxu3 %vm553_vm5, %v2082_v48  ;;  %v2038_v46 = vadd.f32 %v10292_v38, %v11676_v37  ;;  %v2041_v37 = vadd.f32 %v10292_v38, %v2040_v8  ;;  %v2044_v8 = vadd.f32 %v10292_v38, %v2043_v1  ;;  %v2454_v38 = vadd.f32 %v10295_v9, %v11688_v24 }
 0x23b   :  { %v11704_v49 = vpop.f32.mrf.mxu2  ;;  %v11707_v28 = vadd.f32 %v1004_v42, %v11588_v34 }
 0x23d   :  { %9538 = vmatmul.msk.f32.gmra.mxu3 %vm553_vm5, %v1638_v51  ;;  %v1016_v35 = vsel %vm637_vm6, %v11707_v28, -inf }
 0x23e   :  { %9561 = vmatpush.xpose.msk.msrb.mxu3 %vm553_vm5, %v2079_v44  ;;  %1017 = vmax.xlane.f32.xlu0 %v1016_v35 }
 0x240   :  { %v989_v12 = vpop.f32.mrf.mxu3  ;;  %v2404_v5 = vpop.f32.mrf.mxu1 }
 0x241   :  { %v1005_v22 = vmul.f32 0.125, %v989_v12 }
 0x242   :  { %9562 = vmatpush.xpose.msk.msrb.mxu3 %vm553_vm5, %v2076_v27 }
 0x243   :  { %v2459_v18 = vpop.f32.mrf.mxu2  ;;  %v11719_v25 = vadd.f32 %v1005_v22, %v11612_v50 }
 0x244   :  { %v2460_v44 = vadd.f32 %v10295_v9, %v2459_v18  ;;  %v11769_v18 = vld [vmem:[%s15836_s13 + $0x1] ss:$0 sm:$0xff] }
 0x245   :  { %9563 = vmatmul.msk.f32.vlgmr.msrb.gmra.mxu3 %vm553_vm5, %v2029_v30  ;;  %v1019_v17 = vsel %vm637_vm6, %v11719_v25, -inf  ;;  %v2457_v30 = vadd.f32 %v10295_v9, %v11704_v49 }
 0x246   :  { %1020 = vmax.xlane.f32.xlu2 %v1019_v17 }
 0x248   :  { %v992_v39 = vpop.f32.mrf.mxu3  ;;  %v2407_v54 = vpop.f32.mrf.mxu1 }
 0x249   :  { %v1006_v61 = vmul.f32 0.125, %v992_v39 }
 0x24b   :  { %v2462_v13 = vpop.f32.mrf.mxu2  ;;  %v11726_v3 = vadd.f32 %v1006_v61, %v11630_v7 }
 0x24c   :  { %v2463_v42 = vadd.f32 %v10295_v9, %v2462_v13 }
 0x24d   :  { %9564 = vmatmul.msk.f32.gmra.mxu3 %vm553_vm5, %v2032_v40  ;;  %v1022_v63 = vsel %vm637_vm6, %v11726_v3, -inf  ;;  %v2405_v40 = vadd.f32 %v11769_v18, %v2404_v5 }
 0x24e   :  { %1023 = vmax.xlane.f32.xlu1 %v1022_v63 }
 0x250   :  { %v995_v29 = vpop.f32.mrf.mxu3  ;;  %v2410_v32 = vpop.f32.mrf.mxu1 }
 0x251   :  { %v1007_v43 = vmul.f32 0.125, %v995_v29 }
 0x253   :  { %v2465_v2 = vpop.f32.mrf.mxu2  ;;  %v11733_v56 = vadd.f32 %v1007_v43, %v11647_v60 }
 0x254   :  { %v2466_v4 = vadd.f32 %v10295_v9, %v2465_v2 }
 0x255   :  { %9565 = vmatmul.msk.f32.gmra.mxu3 %vm553_vm5, %v2035_v53  ;;  %v1025_v14 = vsel %vm637_vm6, %v11733_v56, -inf  ;;  %v2408_v53 = vadd.f32 %v11769_v18, %v2407_v54 }
 0x256   :  { %1026 = vmax.xlane.f32.xlu0 %v1025_v14 }
 0x258   :  { %v998_v57 = vpop.f32.mrf.mxu3  ;;  %v2413_v17 = vpop.f32.mrf.mxu1 }
 0x259   :  { %v1008_v58 = vmul.f32 0.125, %v998_v57 }
 0x25b   :  { %v2468_v16 = vpop.f32.mrf.mxu2  ;;  %v11741_v10 = vadd.f32 %v1008_v58, %v11664_v6 }
 0x25c   :  { %v2469_v55 = vadd.f32 %v10295_v9, %v2468_v16 }
 0x25d   :  { %9566 = vmatmul.msk.f32.gmra.mxu3 %vm553_vm5, %v2038_v46  ;;  %v1028_v20 = vsel %vm637_vm6, %v11741_v10, -inf }
 0x25e   :  { %9605 = vmatpush.xpose.msk.msra.mxu3 %vm553_vm5, %v2469_v55  ;;  %1029 = vmax.xlane.f32.xlu2 %v1028_v20  ;;  %v2411_v55 = vadd.f32 %v11769_v18, %v2410_v32  ;;  %v2414_v32 = vadd.f32 %v11769_v18, %v2413_v17 }
 0x260   :  { %v1001_v21 = vpop.f32.mrf.mxu3  ;;  %v2416_v29 = vpop.f32.mrf.mxu1 }
 0x261   :  { %v1009_v41 = vmul.f32 0.125, %v1001_v21 }
 0x262   :  { %9606 = vmatpush.xpose.msk.msra.mxu3 %vm553_vm5, %v2466_v4 }
 0x263   :  { %v11748_v48 = vpop.f32.mrf.mxu2  ;;  %v11751_v33 = vadd.f32 %v1009_v41, %v11683_v19 }
 0x265   :  { %9567 = vmatmul.msk.f32.gmra.mxu3 %vm553_vm5, %v2041_v37  ;;  %v1031_v51 = vsel %vm637_vm6, %v11751_v33, -inf }
 0x266   :  { %9607 = vmatpush.xpose.msk.msra.mxu3 %vm553_vm5, %v2463_v42  ;;  %1032 = vmax.xlane.f32.xlu1 %v1031_v51 }
 0x268   :  { %v1364_v35 = vpop.f32.mrf.mxu3  ;;  %v2419_v57 = vpop.f32.mrf.mxu1 }
 0x269   :  { %v1382_v27 = vmul.f32 0.125, %v1364_v35 }
 0x26a   :  { %9608 = vmatpush.xpose.msk.msra.mxu3 %vm553_vm5, %v2460_v44  ;;  %v10297_v44 = vld [vmem:[%s15835_s9 + $0x2] ss:$0 sm:$0xff] }
 0x26b   :  { %v11758_v12 = vpop.f32.mrf.mxu2  ;;  %v11761_v22 = vadd.f32 %v1382_v27, %v11588_v34 }
 0x26d   :  { %9568 = vmatmul.msk.f32.gmra.mxu3 %vm553_vm5, %v2044_v8  ;;  %v1394_v39 = vsel %vm637_vm6, %v11761_v22, -inf }
 0x26e   :  { %9609 = vmatpush.xpose.msk.msra.mxu3 %vm553_vm5, %v2457_v30  ;;  %1395 = vmax.xlane.f32.xlu0 %v1394_v39 }
 0x270   :  { %v1367_v1 = vpop.f32.mrf.mxu3  ;;  %v2782_v51 = vpop.f32.mrf.mxu1 }
 0x271   :  { %v1383_v61 = vmul.f32 0.125, %v1367_v1 }
 0x272   :  { %9610 = vmatpush.xpose.msk.msra.mxu3 %vm553_vm5, %v2454_v38 }
 0x273   :  { %v11774_v49 = vpop.f32.mrf.mxu2  ;;  %v11777_v13 = vadd.f32 %v1383_v61, %v11612_v50 }
 0x275   :  { %9611 = vmatmul.msk.f32.vlgmr.msra.gmra.mxu3 %vm553_vm5, %v2405_v40  ;;  %v1397_v63 = vsel %vm637_vm6, %v11777_v13, -inf }
 0x276   :  { %1398 = vmax.xlane.f32.xlu2 %v1397_v63 }
 0x278   :  { %v1370_v43 = vpop.f32.mrf.mxu3 }
 0x279   :  { %v1384_v24 = vmul.f32 0.125, %v1370_v43  ;;  %v2417_v43 = vadd.f32 %v11769_v18, %v2416_v29  ;;  %v2838_v29 = vadd.f32 %v10297_v44, %v11774_v49 }
 0x27b   :  { %v2840_v2 = vpop.f32.mrf.mxu2  ;;  %v11784_v14 = vadd.f32 %v1384_v24, %v11630_v7 }
 0x27d   :  { %9612 = vmatmul.msk.f32.gmra.mxu3 %vm553_vm5, %v2408_v53  ;;  %v1400_v5 = vsel %vm637_vm6, %v11784_v14, -inf }
 0x27e   :  { %1401 = vmax.xlane.f32.xlu2 %v1400_v5 }
 0x280   :  { %v1373_v58 = vpop.f32.mrf.mxu3 }
 0x281   :  { %v1385_v9 = vmul.f32 0.125, %v1373_v58  ;;  %v640_v46 = vpop.xlane.xlu0 %639  ;;  %v2785_v58 = vpop.f32.mrf.mxu1 }
 0x282   :  { %v656_v16 = vsub.f32 %v11596_v59, %v640_v46 }
 0x283   :  { %v2843_v54 = vpop.f32.mrf.mxu2  ;;  %v11792_v20 = vadd.f32 %v1385_v9, %v11647_v60  ;;  %v2841_v9 = vadd.f32 %v10297_v44, %v2840_v2 }
 0x284   :  { %v662_v4 = vmul.f32 1.442695, %v656_v16 }
 0x285   :  { %9613 = vmatmul.msk.f32.gmra.mxu3 %vm553_vm5, %v2411_v55  ;;  %v1403_v21 = vsel %vm637_vm6, %v11792_v20, -inf }
 0x286   :  { %10302 = vpow2.f32 %v662_v4  ;;  %1404 = vmax.xlane.f32.xlu2 %v1403_v21  ;;  %v2420_v4 = vadd.f32 %v11769_v18, %v2419_v57  ;;  %v2832_v18 = vadd.f32 %v10297_v44, %v11748_v48 }
 0x288   :  { %v1376_v41 = vpop.f32.mrf.mxu3 }
 0x289   :  { %v1386_v37 = vmul.f32 0.125, %v1376_v41  ;;  %v643_v42 = vpop.xlane.xlu0 %642 }
 0x28a   :  { %v657_v59 = vsub.f32 %v11620_v11, %v643_v42  ;;  %v2844_v11 = vadd.f32 %v10297_v44, %v2843_v54 }
 0x28b   :  { %v2846_v35 = vpop.f32.mrf.mxu2  ;;  %v11801_v27 = vadd.f32 %v1386_v37, %v11664_v6  ;;  %v2835_v37 = vadd.f32 %v10297_v44, %v11758_v12 }
 0x28c   :  { %v11803_v8 = vpop.eup %10302  ;;  %v664_v30 = vmul.f32 1.442695, %v657_v59  ;;  %v2847_v39 = vadd.f32 %v10297_v44, %v2846_v35  ;;  %v2788_v59 = vpop.f32.mrf.mxu1 }
 0x28d   :  { %9614 = vmatmul.msk.f32.gmra.mxu3 %vm553_vm5, %v2414_v32  ;;  %v674_v38 = vsel %vm637_vm6, %v11803_v8, 0.0  ;;  %v1406_v1 = vsel %vm637_vm6, %v11801_v27, -inf }
 0x28e   :  { %10304 = vpow2.f32 %v664_v30  ;;  %9653 = vmatpush.xpose.msk.msrb.mxu3 %vm553_vm5, %v2847_v39  ;;  %675 = vadd.xlane.f32.xlu1 %v674_v38 }
 0x28f   :  { %1407 = vmax.xlane.f32.xlu2 %v1406_v1 }
 0x290   :  { %v1379_v17 = vpop.f32.mrf.mxu3 }
 0x291   :  { %v1387_v61 = vmul.f32 0.125, %v1379_v17  ;;  %v646_v40 = vpop.xlane.xlu1 %645 }
 0x292   :  { %v658_v63 = vsub.f32 %v11635_v47, %v646_v40  ;;  %9654 = vmatpush.xpose.msk.msrb.mxu3 %vm553_vm5, %v2844_v11 }
 0x293   :  { %v11814_v24 = vpop.f32.mrf.mxu2  ;;  %v11817_v53 = vadd.f32 %v1387_v61, %v11683_v19 }
 0x294   :  { %v11819_v5 = vpop.eup %10304  ;;  %v666_v46 = vmul.f32 1.442695, %v658_v63  ;;  %v2791_v17 = vpop.f32.mrf.mxu1 }
 0x295   :  { %9615 = vmatmul.msk.f32.gmra.mxu3 %vm553_vm5, %v2417_v43  ;;  %v677_v16 = vsel %vm637_vm6, %v11819_v5, 0.0  ;;  %v1409_v47 = vsel %vm637_vm6, %v11817_v53, -inf }
 0x296   :  { %10306 = vpow2.f32 %v666_v46  ;;  %9655 = vmatpush.xpose.msk.msrb.mxu3 %vm553_vm5, %v2841_v9  ;;  %678 = vadd.xlane.f32.xlu0 %v677_v16 }
 0x297   :  { %1410 = vmax.xlane.f32.xlu2 %v1409_v47 }
 0x298   :  { %v1742_v55 = vpop.f32.mrf.mxu3 }
 0x299   :  { %v649_v54 = vpop.xlane.xlu1 %648  ;;  %v1760_v32 = vmul.f32 0.125, %v1742_v55 }
 0x29a   :  { %v659_v2 = vsub.f32 %v11652_v0, %v649_v54  ;;  %9656 = vmatpush.xpose.msk.msrb.mxu3 %vm553_vm5, %v2838_v29  ;;  %v11841_v0 = vld [vmem:[%s15836_s13 + $0x2] ss:$0 sm:$0xff] }
 0x29b   :  { %v11831_v21 = vpop.f32.mrf.mxu2  ;;  %v11847_v30 = vadd.f32 %v1760_v32, %v11588_v34  ;;  %v2783_v39 = vadd.f32 %v11841_v0, %v2782_v51  ;;  %v2786_v43 = vadd.f32 %v11841_v0, %v2785_v58 }
 0x29c   :  { %v11833_v41 = vpop.eup %10306  ;;  %v668_v42 = vmul.f32 1.442695, %v659_v2 }
 0x29d   :  { %9616 = vmatmul.msk.f32.gmra.mxu3 %vm553_vm5, %v2420_v4  ;;  %v680_v49 = vsel %vm637_vm6, %v11833_v41, 0.0  ;;  %v2794_v4 = vpop.f32.mrf.mxu1 }
 0x29e   :  { %10308 = vpow2.f32 %v668_v42  ;;  %9657 = vmatpush.xpose.msk.msrb.mxu3 %vm553_vm5, %v2835_v37  ;;  %v2789_v42 = vadd.f32 %v11841_v0, %v2788_v59 }
 0x29f   :  { %681 = vadd.xlane.f32.xlu2 %v680_v49 }
 0x2a0   :  { %v1745_v57 = vpop.f32.mrf.mxu3 }
 0x2a1   :  { %v652_v35 = vpop.xlane.xlu2 %651  ;;  %v1761_v44 = vmul.f32 0.125, %v1745_v57 }
 0x2a2   :  { %v660_v12 = vsub.f32 %v11670_v15, %v652_v35  ;;  %9658 = vmatpush.xpose.msk.msrb.mxu3 %vm553_vm5, %v2832_v18  ;;  %v1772_v15 = vsel %vm637_vm6, %v11847_v30, -inf }
 0x2a3   :  { %v11850_v38 = vpop.f32.mrf.mxu2  ;;  %v11861_v63 = vadd.f32 %v1761_v44, %v11612_v50 }
 0x2a4   :  { %v11852_v1 = vpop.eup %10308  ;;  %v670_v11 = vmul.f32 1.442695, %v660_v12 }
 0x2a5   :  { %9659 = vmatmul.msk.f32.vlgmr.msrb.gmra.mxu3 %vm553_vm5, %v2783_v39  ;;  %v683_v48 = vsel %vm637_vm6, %v11852_v1, 0.0 }
 0x2a6   :  { %10310 = vpow2.f32 %v670_v11  ;;  %684 = vadd.xlane.f32.xlu1 %v683_v48  ;;  %v10299_v48 = vld [vmem:[%s15835_s9 + $0x3] ss:$0 sm:$0xff] }
 0x2a7   :  { %1773 = vmax.xlane.f32.xlu2 %v1772_v15  ;;  %v2792_v15 = vadd.f32 %v11841_v0, %v2791_v17 }
 0x2a8   :  { %v1748_v61 = vpop.f32.mrf.mxu3 }
 0x2a9   :  { %v655_v51 = vpop.xlane.xlu2 %654  ;;  %v1762_v47 = vmul.f32 0.125, %v1748_v61 }
 0x2aa   :  { %v661_v40 = vsub.f32 %v11691_v45, %v655_v51  ;;  %v1775_v45 = vsel %vm637_vm6, %v11861_v63, -inf }
 0x2ab   :  { %v3218_v9 = vpop.f32.mrf.mxu2  ;;  %v11872_v58 = vadd.f32 %v1762_v47, %v11630_v7 }
 0x2ac   :  { %v11864_v46 = vpop.eup %10310  ;;  %v672_v16 = vmul.f32 1.442695, %v661_v40 }
 0x2ad   :  { %9660 = vmatmul.msk.f32.gmra.mxu3 %vm553_vm5, %v2786_v43  ;;  %v686_v29 = vsel %vm637_vm6, %v11864_v46, 0.0  ;;  %v1778_v35 = vsel %vm637_vm6, %v11872_v58, -inf  ;;  %v2797_v43 = vpop.f32.mrf.mxu1 }
 0x2ae   :  { %10312 = vpow2.f32 %v672_v16  ;;  %687 = vadd.xlane.f32.xlu0 %v686_v29 }
 0x2af   :  { %1776 = vmax.xlane.f32.xlu2 %v1775_v45 }
 0x2b0   :  { %v1751_v55 = vpop.f32.mrf.mxu3 }
 0x2b1   :  { %v1763_v54 = vmul.f32 0.125, %v1751_v55  ;;  %v1018_v2 = vpop.xlane.xlu0 %1017 }
 0x2b2   :  { %v1034_v37 = vsub.f32 %v11707_v28, %v1018_v2 }
 0x2b3   :  { %v3221_v49 = vpop.f32.mrf.mxu2  ;;  %v11877_v32 = vadd.f32 %v1763_v54, %v11647_v60 }
 0x2b4   :  { %v11879_v18 = vpop.eup %10312  ;;  %v1040_v57 = vmul.f32 1.442695, %v1034_v37  ;;  %v2795_v37 = vadd.f32 %v11841_v0, %v2794_v4  ;;  %v3216_v4 = vadd.f32 %v10299_v48, %v11850_v38  ;;  %v11928_v38 = vld [vmem:[%s15836_s13 + $0x3] ss:$0 sm:$0xff] }
 0x2b5   :  { %9661 = vmatmul.msk.f32.gmra.mxu3 %vm553_vm5, %v2789_v42  ;;  %v1781_v12 = vsel %vm637_vm6, %v11877_v32, -inf  ;;  %v689_v28 = vsel %vm637_vm6, %v11879_v18, 0.0 }
 0x2b6   :  { %10314 = vpow2.f32 %v1040_v57  ;;  %1779 = vmax.xlane.f32.xlu0 %v1778_v35  ;;  %1782 = vmax.xlane.f32.xlu1 %v1781_v12  ;;  %v3219_v35 = vadd.f32 %v10299_v48, %v3218_v9 }
 0x2b7   :  { %690 = vadd.xlane.f32.xlu2 %v689_v28 }
 0x2b8   :  { %v1754_v59 = vpop.f32.mrf.mxu3 }
 0x2b9   :  { %v1764_v39 = vmul.f32 0.125, %v1754_v59  ;;  %v1021_v11 = vpop.xlane.xlu2 %1020 }
 0x2ba   :  { %v1035_v44 = vsub.f32 %v11719_v25, %v1021_v11  ;;  %v3222_v25 = vadd.f32 %v10299_v48, %v3221_v49 }
 0x2bb   :  { %v3224_v61 = vpop.f32.mrf.mxu2  ;;  %v11892_v51 = vadd.f32 %v1764_v39, %v11664_v6  ;;  %v2798_v39 = vadd.f32 %v11841_v0, %v2797_v43  ;;  %v3210_v0 = vadd.f32 %v10299_v48, %v11814_v24 }
 0x2bc   :  { %v11894_v40 = vpop.eup %10314  ;;  %v1042_v16 = vmul.f32 1.442695, %v1035_v44  ;;  %v3225_v47 = vadd.f32 %v10299_v48, %v3224_v61  ;;  %v3213_v44 = vadd.f32 %v10299_v48, %v11831_v21  ;;  %v11935_v21 = vld [vmem:[%s15837_s17 + $0x8] sm:$0xff] }
 0x2bd   :  { %9662 = vmatmul.msk.f32.gmra.mxu3 %vm553_vm5, %v2792_v15  ;;  %v1052_v29 = vsel %vm637_vm6, %v11894_v40, 0.0  ;;  %v1784_v45 = vsel %vm637_vm6, %v11892_v51, -inf }
 0x2be   :  { %10316 = vpow2.f32 %v1042_v16  ;;  %9701 = vmatpush.xpose.msk.msra.mxu3 %vm553_vm5, %v3225_v47  ;;  %1053 = vadd.xlane.f32.xlu1 %v1052_v29  ;;  %v11931_v47 = vld [vmem:[%s15837_s17] sm:$0xff] }
 0x2bf   :  { %1785 = vmax.xlane.f32.xlu2 %v1784_v45 }
 0x2c0   :  { %v1757_v17 = vpop.f32.mrf.mxu3 }
 0x2c1   :  { %v1765_v55 = vmul.f32 0.125, %v1757_v17  ;;  %v1024_v54 = vpop.xlane.xlu1 %1023 }
 0x2c2   :  { %v1036_v2 = vsub.f32 %v11726_v3, %v1024_v54  ;;  %9702 = vmatpush.xpose.msk.msra.mxu3 %vm553_vm5, %v3222_v25  ;;  %v3160_v3 = vpop.f32.mrf.mxu1 }
 0x2c3   :  { %v11906_v42 = vadd.f32 %v1765_v55, %v11683_v19  ;;  %v3161_v55 = vadd.f32 %v11928_v38, %v3160_v3 }
 0x2c4   :  { %v11908_v57 = vpop.eup %10316  ;;  %v1044_v12 = vmul.f32 1.442695, %v1036_v2 }
 0x2c5   :  { %9663 = vmatmul.msk.f32.gmra.mxu3 %vm553_vm5, %v2795_v37  ;;  %v1787_v49 = vsel %vm637_vm6, %v11906_v42, -inf  ;;  %v1055_v28 = vsel %vm637_vm6, %v11908_v57, 0.0 }
 0x2c6   :  { %10318 = vpow2.f32 %v1044_v12  ;;  %9703 = vmatpush.xpose.msk.msra.mxu3 %vm553_vm5, %v3219_v35  ;;  %1788 = vmax.xlane.f32.xlu0 %v1787_v49  ;;  %v11952_v35 = vld [vmem:[%s15837_s17 + $0x10] sm:$0xff] }
 0x2c7   :  { %1056 = vadd.xlane.f32.xlu1 %v1055_v28 }
 0x2c8   :  { %v2146_v9 = vpop.f32.mrf.mxu3 }
 0x2c9   :  { %v1027_v59 = vpop.xlane.xlu0 %1026  ;;  %v2164_v16 = vmul.f32 0.125, %v2146_v9 }
 0x2ca   :  { %9704 = vmatpush.xpose.msk.msra.mxu3 %vm553_vm5, %v3216_v4  ;;  %v1037_v15 = vsub.f32 %v11733_v56, %v1027_v59  ;;  %v3163_v43 = vpop.f32.mrf.mxu1 }
 0x2cb   :  { %v11939_v17 = vadd.f32 %v2164_v16, %v11931_v47 }
 0x2cc   :  { %v11919_v11 = vpop.eup %10318  ;;  %v1046_v56 = vmul.f32 1.442695, %v1037_v15 }
 0x2cd   :  { %9664 = vmatmul.msk.f32.gmra.mxu3 %vm553_vm5, %v2798_v39  ;;  %v1058_v61 = vsel %vm637_vm6, %v11919_v11, 0.0  ;;  %v2176_v2 = vsel %vm637_vm6, %v11939_v17, -inf }
 0x2ce   :  { %9705 = vmatpush.xpose.msk.msra.mxu3 %vm553_vm5, %v3213_v44  ;;  %10320 = vpow2.f32 %v1046_v56  ;;  %v11973_v56 = vld [vmem:[%s15837_s17 + $0x20] sm:$0xff] }
 0x2cf   :  { %1059 = vadd.xlane.f32.xlu1 %v1058_v61 }
 0x2d0   :  { %v2149_v29 = vpop.f32.mrf.mxu3 }
 0x2d1   :  { %v2165_v45 = vmul.f32 0.125, %v2149_v29  ;;  %v1030_v25 = vpop.xlane.xlu2 %1029 }
 0x2d2   :  { %9706 = vmatpush.xpose.msk.msra.mxu3 %vm553_vm5, %v3210_v0  ;;  %v1038_v24 = vsub.f32 %v11741_v10, %v1030_v25  ;;  %v3166_v28 = vpop.f32.mrf.mxu1  ;;  %v3164_v10 = vadd.f32 %v11928_v38, %v3163_v43 }
 0x2d3   :  { %v11943_v54 = vadd.f32 %v2165_v45, %v11935_v21  ;;  %v3167_v0 = vadd.f32 %v11928_v38, %v3166_v28 }
 0x2d4   :  { %v1048_v12 = vmul.f32 1.442695, %v1038_v24  ;;  %v11954_v4 = vpop.eup %10320 }
 0x2d5   :  { %9707 = vmatmul.msk.f32.vlgmr.msra.gmra.mxu3 %vm553_vm5, %v3161_v55  ;;  %v2179_v48 = vsel %vm637_vm6, %v11943_v54, -inf  ;;  %v1061_v44 = vsel %vm637_vm6, %v11954_v4, 0.0 }
 0x2d6   :  { %2180 = vmax.xlane.f32.xlu2 %v2179_v48  ;;  %10322 = vpow2.f32 %v1048_v12 }
 0x2d7   :  { %2177 = vmax.xlane.f32.xlu1 %v2176_v2 }
 0x2d8   :  { %v2152_v37 = vpop.f32.mrf.mxu3 }
 0x2d9   :  { %v2166_v49 = vmul.f32 0.125, %v2152_v37  ;;  %v1033_v3 = vpop.xlane.xlu1 %1032 }
 0x2da   :  { %v1039_v59 = vsub.f32 %v11751_v33, %v1033_v3  ;;  %v3169_v43 = vpop.f32.mrf.mxu1 }
 0x2db   :  { %v11958_v9 = vadd.f32 %v2166_v49, %v11952_v35  ;;  %v3170_v48 = vadd.f32 %v11928_v38, %v3169_v43 }
 0x2dc   :  { %v1050_v61 = vmul.f32 1.442695, %v1039_v59  ;;  %v11966_v16 = vpop.eup %10322 }
 0x2dd   :  { %9708 = vmatmul.msk.f32.gmra.mxu3 %vm553_vm5, %v3164_v10  ;;  %v2182_v39 = vsel %vm637_vm6, %v11958_v9, -inf  ;;  %v1064_v33 = vsel %vm637_vm6, %v11966_v16, 0.0  ;;  %v11988_v10 = vld [vmem:[%s15837_s17 + $0x18] sm:$0xff] }
 0x2de   :  { %2183 = vmax.xlane.f32.xlu0 %v2182_v39  ;;  %10324 = vpow2.f32 %v1050_v61  ;;  %v11991_v39 = vld [vmem:[%s15837_s17 + $0x28] sm:$0xff] }
 0x2df   :  { %1062 = vadd.xlane.f32.xlu1 %v1061_v44 }
 0x2e0   :  { %v2155_v15 = vpop.f32.mrf.mxu3 }
 0x2e1   :  { %v1396_v55 = vpop.xlane.xlu0 %1395  ;;  %v2167_v28 = vmul.f32 0.125, %v2155_v15 }
 0x2e2   :  { %v1412_v37 = vsub.f32 %v11761_v22, %v1396_v55  ;;  %v3172_v49 = vpop.f32.mrf.mxu1 }
 0x2e3   :  { %v11995_v43 = vadd.f32 %v2167_v28, %v11988_v10  ;;  %v3173_v15 = vadd.f32 %v11928_v38, %v3172_v49 }
 0x2e4   :  { %v11975_v24 = vpop.eup %10324  ;;  %v1418_v44 = vmul.f32 1.442695, %v1412_v37 }
 0x2e5   :  { %9709 = vmatmul.msk.f32.gmra.mxu3 %vm553_vm5, %v3167_v0  ;;  %v1067_v3 = vsel %vm637_vm6, %v11975_v24, 0.0 }
 0x2e6   :  { %10326 = vpow2.f32 %v1418_v44 }
 0x2e7   :  { %1065 = vadd.xlane.f32.xlu1 %v1064_v33 }
 0x2e8   :  { %v2158_v29 = vpop.f32.mrf.mxu3 }
 0x2e9   :  { %v2168_v45 = vmul.f32 0.125, %v2158_v29  ;;  %v1399_v25 = vpop.xlane.xlu2 %1398 }
 0x2eb   :  { %v11979_v2 = vadd.f32 %v2168_v45, %v11973_v56  ;;  %v1413_v45 = vsub.f32 %v11777_v13, %v1399_v25 }
 0x2ec   :  { %v12008_v28 = vpop.eup %10326 }
 0x2ed   :  { %9710 = vmatmul.msk.f32.gmra.mxu3 %vm553_vm5, %v3170_v48  ;;  %v2188_v12 = vsel %vm637_vm6, %v11979_v2, -inf  ;;  %v3175_v48 = vpop.f32.mrf.mxu1  ;;  %v1420_v37 = vmul.f32 1.442695, %v1413_v45  ;;  %v1430_v44 = vsel %vm637_vm6, %v12008_v28, 0.0 }
 0x2ee   :  { %2189 = vmax.xlane.f32.xlu2 %v2188_v12  ;;  %v3176_v13 = vadd.f32 %v11928_v38, %v3175_v48 }
 0x2ef   :  { %1068 = vadd.xlane.f32.xlu1 %v1067_v3 }
 0x2f0   :  { %v2161_v59 = vpop.f32.mrf.mxu3 }
 0x2f1   :  { %v2169_v61 = vmul.f32 0.125, %v2161_v59  ;;  %v1402_v22 = vpop.xlane.xlu2 %1401 }
 0x2f2   :  { %v1414_v0 = vsub.f32 %v11784_v14, %v1402_v22  ;;  %v2185_v14 = vsel %vm637_vm6, %v11995_v43, -inf }
 0x2f3   :  { %v11999_v33 = vadd.f32 %v2169_v61, %v11991_v39 }
 0x2f4   :  { %v1422_v29 = vmul.f32 1.442695, %v1414_v0 }
 0x2f5   :  { %15838 = vst [vmem:[#allocation23_spill] sm:$0xff] %v11999_v33  ;;  %9711 = vmatmul.msk.f32.gmra.mxu3 %vm553_vm5, %v3173_v15  ;;  %v2191_v55 = vsel %vm637_vm6, %v11999_v33, -inf }
 0x2f6   :  { %10328 = vpow2.f32 %v1422_v29  ;;  %2192 = vmax.xlane.f32.xlu0 %v2191_v55 }
 0x2f7   :  { %2186 = vmax.xlane.f32.xlu1 %v2185_v14  ;;  %10330 = vpow2.f32 %v1420_v37  ;;  %v12028_v14 = vld [vmem:[%s15839_s29] sm:$0xff] }
 0x2f9   :  { %v1405_v12 = vpop.xlane.xlu2 %1404 }
 0x2fa   :  { %v1415_v49 = vsub.f32 %v11792_v20, %v1405_v12 }
 0x2fc   :  { %v12011_v25 = vpop.eup %10328  ;;  %v1424_v3 = vmul.f32 1.442695, %v1415_v49 }
 0x2fd   :  { %9712 = vmatmul.msk.f32.gmra.mxu3 %vm553_vm5, %v3176_v13  ;;  %v1436_v59 = vsel %vm637_vm6, %v12011_v25, 0.0  ;;  %v12018_v38 = vpop.eup %10330 }
 0x2fe   :  { %10332 = vpow2.f32 %v1424_v3  ;;  %1437 = vadd.xlane.f32.xlu2 %v1436_v59  ;;  %v1433_v45 = vsel %vm637_vm6, %v12018_v38, 0.0 }
 0x2ff   :  { %1431 = vadd.xlane.f32.xlu1 %v1430_v44 }
 0x301   :  { %v676_v20 = vpop.xlane.xlu1 %675 }
 0x302   :  { %10334 = vrcp.f32 %v676_v20  ;;  %v1408_v61 = vpop.xlane.xlu2 %1407 }
 0x303   :  { %v1416_v22 = vsub.f32 %v11801_v27, %v1408_v61  ;;  %v12043_v61 = vld [vmem:[%s15839_s29 + $0x8] sm:$0xff] }
 0x304   :  { %v12021_v0 = vpop.eup %10332 }
 0x305   :  { %v1426_v15 = vmul.f32 1.442695, %v1416_v22  ;;  %v1439_v29 = vsel %vm637_vm6, %v12021_v0, 0.0 }
 0x306   :  { %1440 = vadd.xlane.f32.xlu0 %v1439_v29 }
 0x307   :  { %10336 = vpow2.f32 %v1426_v15  ;;  %1434 = vadd.xlane.f32.xlu1 %v1433_v45 }
 0x308   :  { %v10335_v55 = vpop.eup %10334 }
 0x309   :  { %v679_v48 = vpop.xlane.xlu0 %678  ;;  %v698_v37 = vmul.f32 %v10335_v55, %v11803_v8 }
 0x30a   :  { %10338 = vrcp.f32 %v679_v48  ;;  %v1411_v27 = vpop.xlane.xlu2 %1410 }
 0x30b   :  { %v1417_v12 = vsub.f32 %v11817_v53, %v1411_v27  ;;  %v704_v49 = vmul.f32 %v698_v37, %v12028_v14 }
 0x30d   :  { %v12033_v13 = vpop.eup %10336  ;;  %v1428_v3 = vmul.f32 1.442695, %v1417_v12  ;;  %v12036_v59 = vadd.f32 %v704_v49, %v11588_v34 }
 0x30e   :  { %v1442_v44 = vsel %vm637_vm6, %v12033_v13, 0.0 }
 0x30f   :  { %10340 = vpow2.f32 %v1428_v3  ;;  %1443 = vadd.xlane.f32.xlu1 %v1442_v44  ;;  %v716_v8 = vsel %vm637_vm6, %v12036_v59, -inf }
 0x310   :  { %v10339_v20 = vpop.eup %10338  ;;  %717 = vmax.xlane.f32.xlu0 %v716_v8  ;;  %v12060_v8 = vld [vmem:[%s15839_s29 + $0x10] sm:$0xff] }
 0x311   :  { %v699_v53 = vmul.f32 %v10339_v20, %v11819_v5 }
 0x312   :  { %v682_v22 = vpop.xlane.xlu2 %681 }
 0x313   :  { %v705_v15 = vmul.f32 %v699_v53, %v12043_v61  ;;  %10342 = vrcp.f32 %v682_v22 }
 0x315   :  { %v12047_v29 = vpop.eup %10340  ;;  %v12050_v34 = vadd.f32 %v705_v15, %v11612_v50 }
 0x316   :  { %v1445_v45 = vsel %vm637_vm6, %v12047_v29, 0.0 }
 0x317   :  { %1446 = vadd.xlane.f32.xlu2 %v1445_v45  ;;  %v719_v55 = vsel %vm637_vm6, %v12050_v34, -inf }
 0x318   :  { %720 = vmax.xlane.f32.xlu0 %v719_v55 }
 0x319   :  { %v685_v27 = vpop.xlane.xlu1 %684  ;;  %v10343_v12 = vpop.eup %10342 }
 0x31a   :  { %v1774_v48 = vpop.xlane.xlu2 %1773  ;;  %v700_v3 = vmul.f32 %v10343_v12, %v11833_v41 }
 0x31b   :  { %v1790_v5 = vsub.f32 %v11847_v30, %v1774_v48 }
 0x31c   :  { %v706_v22 = vmul.f32 %v700_v3, %v12060_v8 }
 0x31d   :  { %v1796_v37 = vmul.f32 1.442695, %v1790_v5 }
 0x31e   :  { %v12069_v48 = vadd.f32 %v706_v22, %v11630_v7  ;;  %v12088_v22 = vld [vmem:[%s15839_s29 + $0x20] sm:$0xff] }
 0x31f   :  { %10344 = vpow2.f32 %v1796_v37  ;;  %v12073_v37 = vld [vmem:[%s15839_s29 + $0x18] sm:$0xff] }
 0x320   :  { %10346 = vrcp.f32 %v685_v27 }
 0x321   :  { %v688_v50 = vpop.xlane.xlu0 %687 }
 0x322   :  { %v1777_v49 = vpop.xlane.xlu2 %1776 }
 0x323   :  { %v1791_v44 = vsub.f32 %v11861_v63, %v1777_v49 }
 0x325   :  { %v12062_v20 = vpop.eup %10344  ;;  %v1798_v53 = vmul.f32 1.442695, %v1791_v44 }
 0x326   :  { %v1808_v30 = vsel %vm637_vm6, %v12062_v20, 0.0  ;;  %v10347_v15 = vpop.eup %10346 }
 0x327   :  { %10348 = vpow2.f32 %v1798_v53  ;;  %1809 = vadd.xlane.f32.xlu0 %v1808_v30  ;;  %v701_v5 = vmul.f32 %v10347_v15, %v11852_v1 }
 0x328   :  { %10350 = vrcp.f32 %v688_v50  ;;  %v722_v50 = vsel %vm637_vm6, %v12069_v48, -inf }
 0x329   :  { %v1780_v45 = vpop.xlane.xlu0 %1779  ;;  %v1783_v55 = vpop.xlane.xlu1 %1782 }
 0x32a   :  { %v1792_v41 = vsub.f32 %v11872_v58, %v1780_v45  ;;  %v691_v63 = vpop.xlane.xlu2 %690  ;;  %v707_v58 = vmul.f32 %v701_v5, %v12073_v37  ;;  %v1793_v45 = vsub.f32 %v11877_v32, %v1783_v55 }
 0x32c   :  { %v1800_v27 = vmul.f32 1.442695, %v1792_v41  ;;  %v12083_v44 = vadd.f32 %v707_v58, %v11647_v60 }
 0x32d   :  { %v12075_v12 = vpop.eup %10348 }
 0x32e   :  { %10352 = vpow2.f32 %v1800_v27  ;;  %v1811_v49 = vsel %vm637_vm6, %v12075_v12, 0.0  ;;  %v10351_v3 = vpop.eup %10350  ;;  %v725_v27 = vsel %vm637_vm6, %v12083_v44, -inf }
 0x32f   :  { %723 = vmax.xlane.f32.xlu0 %v722_v50  ;;  %1812 = vadd.xlane.f32.xlu1 %v1811_v49  ;;  %v702_v53 = vmul.f32 %v10351_v3, %v11864_v46  ;;  %v1802_v46 = vmul.f32 1.442695, %v1793_v45 }
 0x331   :  { %v1054_v7 = vpop.xlane.xlu1 %1053  ;;  %v708_v60 = vmul.f32 %v702_v53, %v12088_v22 }
 0x332   :  { %v1786_v1 = vpop.xlane.xlu2 %1785 }
 0x333   :  { %v1794_v30 = vsub.f32 %v11892_v51, %v1786_v1  ;;  %v12099_v50 = vadd.f32 %v708_v60, %v11664_v6 }
 0x334   :  { %v12090_v15 = vpop.eup %10352 }
 0x335   :  { %v1804_v41 = vmul.f32 1.442695, %v1794_v30  ;;  %v1814_v5 = vsel %vm637_vm6, %v12090_v15, 0.0  ;;  %v728_v55 = vsel %vm637_vm6, %v12099_v50, -inf  ;;  %v12112_v30 = vld [vmem:[%s15839_s29 + $0x28] sm:$0xff] }
 0x336   :  { %1815 = vadd.xlane.f32.xlu2 %v1814_v5  ;;  %v12118_v5 = vld [vmem:[%s15834_s5 + $0x8] sm:$0xff] }
 0x337   :  { %10354 = vpow2.f32 %v1804_v41  ;;  %726 = vmax.xlane.f32.xlu0 %v725_v27 }
 0x338   :  { %10356 = vrcp.f32 %v691_v63 }
 0x33a   :  { %v1057_v51 = vpop.xlane.xlu1 %1056 }
 0x33b   :  { %10358 = vrcp.f32 %v1057_v51 }
 0x33c   :  { %10360 = vpow2.f32 %v1802_v46 }
 0x33d   :  { %v12101_v32 = vpop.eup %10354  ;;  %10362 = vrcp.f32 %v1054_v7 }
 0x33e   :  { %15840 = vst [vmem:[#allocation24_spill] sm:$0xff] %v12101_v32  ;;  %v1820_v49 = vsel %vm637_vm6, %v12101_v32, 0.0  ;;  %v10357_v58 = vpop.eup %10356 }
 0x33f   :  { %729 = vmax.xlane.f32.xlu0 %v728_v55  ;;  %1821 = vadd.xlane.f32.xlu1 %v1820_v49  ;;  %v703_v1 = vmul.f32 %v10357_v58, %v11879_v18 }
 0x341   :  { %v10359_v63 = vpop.eup %10358 }
 0x342   :  { %v1060_v3 = vpop.xlane.xlu1 %1059  ;;  %v1077_v6 = vmul.f32 %v10359_v63, %v11908_v57  ;;  %v12109_v53 = vpop.eup %10360  ;;  %v709_v57 = vmul.f32 %v703_v1, %v12112_v30 }
 0x343   :  { %10364 = vrcp.f32 %v1060_v3  ;;  %v1817_v41 = vsel %vm637_vm6, %v12109_v53, 0.0  ;;  %v10363_v27 = vpop.eup %10362  ;;  %v12137_v3 = vld [vmem:[%s15834_s5 + $0x10] sm:$0xff] }
 0x344   :  { %v1083_v45 = vmul.f32 %v1077_v6, %v12043_v61  ;;  %v12129_v51 = vadd.f32 %v709_v57, %v11683_v19  ;;  %v1076_v49 = vmul.f32 %v10363_v27, %v11894_v40  ;;  %v12146_v40 = vld [vmem:[%s15834_s5] sm:$0xff] }
 0x346   :  { %v12121_v7 = vadd.f32 %v12118_v5, %v1083_v45  ;;  %v731_v63 = vsel %vm637_vm6, %v12129_v51, -inf  ;;  %v1082_v1 = vmul.f32 %v1076_v49, %v12028_v14 }
 0x347   :  { %1818 = vadd.xlane.f32.xlu0 %v1817_v41 }
 0x348   :  { %v1097_v18 = vsel %vm637_vm6, %v12121_v7, -inf  ;;  %v12149_v45 = vadd.f32 %v12146_v40, %v1082_v1  ;;  %v1789_v1 = vpop.xlane.xlu0 %1788 }
 0x349   :  { %v10365_v60 = vpop.eup %10364  ;;  %1098 = vmax.xlane.f32.xlu1 %v1097_v18 }
 0x34a   :  { %v12126_v46 = vpop.xlane.xlu1 %2177  ;;  %v1078_v55 = vmul.f32 %v10365_v60, %v11919_v11  ;;  %v1094_v41 = vsel %vm637_vm6, %v12149_v45, -inf }
 0x34c   :  { %v1084_v58 = vmul.f32 %v1078_v55, %v12060_v8  ;;  %v12156_v55 = vld [vmem:[%s15834_s5 + $0x18] sm:$0xff] }
 0x34e   :  { %v12140_v6 = vadd.f32 %v12137_v3, %v1084_v58 }
 0x34f   :  { %732 = vmax.xlane.f32.xlu0 %v731_v63 }
 0x350   :  { %v1100_v19 = vsel %vm637_vm6, %v12140_v6, -inf }
 0x351   :  { %1101 = vmax.xlane.f32.xlu2 %v1100_v19  ;;  %v12163_v19 = vpop.xlane.xlu2 %2180  ;;  %v12175_v52 = vpop.xlane.xlu0 %2183 }
 0x352   :  { %v1063_v11 = vpop.xlane.xlu1 %1062 }
 0x353   :  { %10366 = vrcp.f32 %v1063_v11 }
 0x357   :  { %1095 = vmax.xlane.f32.xlu0 %v1094_v41 }
 0x359   :  { %v10367_v57 = vpop.eup %10366 }
 0x35a   :  { %v1066_v27 = vpop.xlane.xlu1 %1065  ;;  %v1079_v18 = vmul.f32 %v10367_v57, %v11954_v4  ;;  %v12168_v57 = vld [vmem:[%s15834_s5 + $0x20] sm:$0xff] }
 0x35b   :  { %10368 = vrcp.f32 %v1066_v27 }
 0x35c   :  { %v1085_v60 = vmul.f32 %v1079_v18, %v12073_v37 }
 0x35e   :  { %v12159_v49 = vadd.f32 %v12156_v55, %v1085_v60 }
 0x360   :  { %v1103_v58 = vsel %vm637_vm6, %v12159_v49, -inf }
 0x361   :  { %v10369_v63 = vpop.eup %10368  ;;  %1104 = vmax.xlane.f32.xlu0 %v1103_v58  ;;  %v12177_v62 = vpop.xlane.xlu2 %2189 }
 0x362   :  { %v1069_v11 = vpop.xlane.xlu1 %1068  ;;  %v1080_v4 = vmul.f32 %v10369_v63, %v11966_v16 }
 0x363   :  { %10370 = vrcp.f32 %v1069_v11  ;;  %v12184_v11 = vld [vmem:[%s15834_s5 + $0x28] sm:$0xff] }
 0x364   :  { %v1086_v41 = vmul.f32 %v1080_v4, %v12088_v22 }
 0x366   :  { %v12171_v27 = vadd.f32 %v12168_v57, %v1086_v41 }
 0x368   :  { %v1106_v18 = vsel %vm637_vm6, %v12171_v27, -inf }
 0x369   :  { %v10371_v60 = vpop.eup %10370  ;;  %1107 = vmax.xlane.f32.xlu1 %v1106_v18  ;;  %v12191_v31 = vpop.xlane.xlu0 %2192 }
 0x36a   :  { %v12179_v58 = vpop.xlane.xlu1 %2186  ;;  %v1081_v16 = vmul.f32 %v10371_v60, %v11975_v24 }
 0x36c   :  { %v1087_v63 = vmul.f32 %v1081_v16, %v12112_v30 }
 0x36e   :  { %v12187_v4 = vadd.f32 %v12184_v11, %v1087_v63 }
 0x370   :  { %15841 = vst [vmem:[#allocation25_spill] sm:$0xff] %v12187_v4  ;;  %v1109_v41 = vsel %vm637_vm6, %v12187_v4, -inf }
 0x371   :  { %1110 = vmax.xlane.f32.xlu2 %v1109_v41  ;;  %v1438_v36 = vpop.xlane.xlu2 %1437 }
 0x372   :  { %v1432_v23 = vpop.xlane.xlu1 %1431  ;;  %10372 = vrcp.f32 %v1438_v36 }
 0x373   :  { %10374 = vrcp.f32 %v1432_v23 }
 0x378   :  { %v10373_v18 = vpop.eup %10372 }
 0x379   :  { %v10375_v26 = vpop.eup %10374  ;;  %v1441_v24 = vpop.xlane.xlu0 %1440  ;;  %v1456_v60 = vmul.f32 %v10373_v18, %v12011_v25 }
 0x37a   :  { %v1435_v16 = vpop.xlane.xlu1 %1434  ;;  %10376 = vrcp.f32 %v1441_v24  ;;  %v1454_v63 = vmul.f32 %v10375_v26, %v12008_v28 }
 0x37b   :  { %10378 = vrcp.f32 %v1435_v16  ;;  %v1462_v32 = vmul.f32 %v1456_v60, %v12060_v8 }
 0x37c   :  { %v1460_v4 = vmul.f32 %v1454_v63, %v12028_v14 }
 0x37d   :  { %v12198_v41 = vadd.f32 %v12137_v3, %v1462_v32 }
 0x37e   :  { %v12201_v36 = vadd.f32 %v12146_v40, %v1460_v4 }
 0x37f   :  { %15842 = vst [vmem:[#allocation26_spill] sm:$0xff] %v12198_v41  ;;  %v1478_v23 = vsel %vm637_vm6, %v12198_v41, -inf }
 0x380   :  { %v10377_v33 = vpop.eup %10376  ;;  %v1472_v25 = vsel %vm637_vm6, %v12201_v36, -inf  ;;  %1479 = vmax.xlane.f32.xlu2 %v1478_v23  ;;  %v1795_v23 = vsub.f32 %v11906_v42, %v1789_v1 }
 0x381   :  { %v10379_v26 = vpop.eup %10378  ;;  %1473 = vmax.xlane.f32.xlu0 %v1472_v25  ;;  %v1457_v28 = vmul.f32 %v10377_v33, %v12021_v0 }
 0x382   :  { %v1444_v18 = vpop.xlane.xlu1 %1443  ;;  %v1455_v24 = vmul.f32 %v10379_v26, %v12018_v38 }
 0x383   :  { %10380 = vrcp.f32 %v1444_v18  ;;  %v718_v32 = vpop.xlane.xlu0 %717  ;;  %v1463_v4 = vmul.f32 %v1457_v28, %v12073_v37 }
 0x384   :  { %v734_v60 = vsub.f32 %v12036_v59, %v718_v32  ;;  %v1461_v16 = vmul.f32 %v1455_v24, %v12043_v61  ;;  %v1806_v59 = vmul.f32 1.442695, %v1795_v23 }
 0x385   :  { %v12213_v63 = vadd.f32 %v12156_v55, %v1463_v4 }
 0x386   :  { %v740_v41 = vmul.f32 1.442695, %v734_v60  ;;  %v12217_v25 = vadd.f32 %v12118_v5, %v1461_v16 }
 0x387   :  { %v1481_v33 = vsel %vm637_vm6, %v12213_v63, -inf }
 0x388   :  { %10382 = vpow2.f32 %v740_v41  ;;  %v1475_v38 = vsel %vm637_vm6, %v12217_v25, -inf  ;;  %v2194_v41 = vsub.f32 %v11939_v17, %v12126_v46 }
 0x389   :  { %v10381_v0 = vpop.eup %10380  ;;  %1482 = vmax.xlane.f32.xlu0 %v1481_v33  ;;  %1476 = vmax.xlane.f32.xlu1 %v1475_v38 }
 0x38a   :  { %v1447_v26 = vpop.xlane.xlu2 %1446  ;;  %v1458_v28 = vmul.f32 %v10381_v0, %v12033_v13  ;;  %v2200_v16 = vmul.f32 1.442695, %v2194_v41 }
 0x38b   :  { %10384 = vrcp.f32 %v1447_v26  ;;  %v721_v42 = vpop.xlane.xlu0 %720 }
 0x38c   :  { %v735_v1 = vsub.f32 %v12050_v34, %v721_v42  ;;  %v1464_v18 = vmul.f32 %v1458_v28, %v12088_v22  ;;  %10386 = vpow2.f32 %v1806_v59 }
 0x38e   :  { %v12226_v24 = vpop.eup %10382  ;;  %v742_v32 = vmul.f32 1.442695, %v735_v1  ;;  %v12231_v4 = vadd.f32 %v12168_v57, %v1464_v18 }
 0x38f   :  { %v752_v60 = vsel %vm637_vm6, %v12226_v24, 0.0 }
 0x390   :  { %10388 = vpow2.f32 %v742_v32  ;;  %v1484_v13 = vsel %vm637_vm6, %v12231_v4, -inf  ;;  %753 = vadd.xlane.f32.xlu2 %v752_v60 }
 0x391   :  { %v10385_v34 = vpop.eup %10384  ;;  %1485 = vmax.xlane.f32.xlu1 %v1484_v13  ;;  %10390 = vpow2.f32 %v2200_v16  ;;  %v2524_v16 = vpop.f32.mrf.mxu3 }
 0x392   :  { %v1459_v23 = vmul.f32 %v10385_v34, %v12047_v29  ;;  %v12238_v33 = vpop.eup %10386 }
 0x393   :  { %v1823_v38 = vsel %vm637_vm6, %v12238_v33, 0.0 }
 0x394   :  { %v1465_v0 = vmul.f32 %v1459_v23, %v12112_v30 }
 0x396   :  { %v12240_v17 = vpop.eup %10388  ;;  %v12248_v26 = vadd.f32 %v12184_v11, %v1465_v0 }
 0x397   :  { %v755_v46 = vsel %vm637_vm6, %v12240_v17, 0.0  ;;  %v12250_v29 = vpop.eup %10390 }
 0x398   :  { %756 = vadd.xlane.f32.xlu0 %v755_v46  ;;  %1824 = vadd.xlane.f32.xlu2 %v1823_v38  ;;  %v2212_v28 = vsel %vm637_vm6, %v12250_v29, 0.0  ;;  %v1487_v42 = vsel %vm637_vm6, %v12248_v26, -inf }
 0x39a   :  { %v1810_v59 = vpop.xlane.xlu0 %1809 }
 0x39b   :  { %10392 = vrcp.f32 %v1810_v59  ;;  %v2527_v59 = vpop.f32.mrf.mxu3 }
 0x3a0   :  { %2213 = vadd.xlane.f32.xlu0 %v2212_v28  ;;  %1488 = vmax.xlane.f32.xlu2 %v1487_v42 }
 0x3a1   :  { %v10393_v1 = vpop.eup %10392 }
 0x3a2   :  { %v724_v18 = vpop.xlane.xlu0 %723  ;;  %v1832_v41 = vmul.f32 %v10393_v1, %v12062_v20  ;;  %v2195_v20 = vsub.f32 %v11943_v54, %v12163_v19  ;;  %v1813_v42 = vpop.xlane.xlu1 %1812  ;;  %v2196_v19 = vsub.f32 %v11958_v9, %v12175_v52  ;;  %v2197_v9 = vsub.f32 %v11995_v43, %v12179_v58 }
 0x3a3   :  { %v736_v32 = vsub.f32 %v12069_v48, %v724_v18 }
 0x3a4   :  { %v1838_v60 = vmul.f32 %v1832_v41, %v12028_v14  ;;  %v2542_v14 = vmul.f32 0.125, %v2524_v16  ;;  %v2202_v28 = vmul.f32 1.442695, %v2195_v20  ;;  %v2204_v16 = vmul.f32 1.442695, %v2196_v19 }
 0x3a5   :  { %v744_v13 = vmul.f32 1.442695, %v736_v32 }
 0x3a6   :  { %v12260_v34 = vadd.f32 %v12146_v40, %v1838_v60  ;;  %v12272_v18 = vadd.f32 %v2542_v14, %v11931_v47 }
 0x3a7   :  { %10394 = vpow2.f32 %v744_v13  ;;  %v2543_v13 = vmul.f32 0.125, %v2527_v59 }
 0x3a8   :  { %v1850_v23 = vsel %vm637_vm6, %v12260_v34, -inf  ;;  %v2554_v32 = vsel %vm637_vm6, %v12272_v18, -inf }
 0x3a9   :  { %1851 = vmax.xlane.f32.xlu0 %v1850_v23  ;;  %v12288_v20 = vadd.f32 %v2543_v13, %v11935_v21  ;;  %v2206_v21 = vmul.f32 1.442695, %v2197_v9 }
 0x3aa   :  { %v727_v46 = vpop.xlane.xlu0 %726 }
 0x3ab   :  { %v737_v38 = vsub.f32 %v12083_v44, %v727_v46  ;;  %v2557_v59 = vsel %vm637_vm6, %v12288_v20, -inf }
 0x3ad   :  { %v12265_v0 = vpop.eup %10394  ;;  %v746_v48 = vmul.f32 1.442695, %v737_v38  ;;  %v2530_v38 = vpop.f32.mrf.mxu3 }
 0x3ae   :  { %v758_v40 = vsel %vm637_vm6, %v12265_v0, 0.0 }
 0x3af   :  { %10396 = vpow2.f32 %v746_v48  ;;  %759 = vadd.xlane.f32.xlu1 %v758_v40  ;;  %v2544_v48 = vmul.f32 0.125, %v2530_v38 }
 0x3b0   :  { %10398 = vpow2.f32 %v2202_v28 }
 0x3b1   :  { %v12301_v43 = vadd.f32 %v2544_v48, %v11952_v35 }
 0x3b2   :  { %v730_v1 = vpop.xlane.xlu0 %729  ;;  %v12283_v23 = vpop.xlane.xlu1 %1821 }
 0x3b3   :  { %v738_v44 = vsub.f32 %v12099_v50, %v730_v1 }
 0x3b5   :  { %v12275_v41 = vpop.eup %10396  ;;  %v748_v54 = vmul.f32 1.442695, %v738_v44  ;;  %v2533_v13 = vpop.f32.mrf.mxu3 }
 0x3b6   :  { %v761_v60 = vsel %vm637_vm6, %v12275_v41, 0.0  ;;  %v12285_v46 = vpop.eup %10398 }
 0x3b7   :  { %10400 = vpow2.f32 %v748_v54  ;;  %2555 = vmax.xlane.f32.xlu1 %v2554_v32  ;;  %762 = vadd.xlane.f32.xlu2 %v761_v60  ;;  %v2215_v40 = vsel %vm637_vm6, %v12285_v46, 0.0  ;;  %v2560_v32 = vsel %vm637_vm6, %v12301_v43, -inf }
 0x3b8   :  { %10402 = vpow2.f32 %v2204_v16  ;;  %v1816_v16 = vpop.xlane.xlu2 %1815 }
 0x3b9   :  { %10404 = vrcp.f32 %v1813_v42 }
 0x3ba   :  { %v1819_v50 = vpop.xlane.xlu0 %1818  ;;  %10406 = vpow2.f32 %v2206_v21 }
 0x3bc   :  { %v1099_v28 = vpop.xlane.xlu1 %1098 }
 0x3bd   :  { %v12290_v52 = vpop.eup %10400  ;;  %v1113_v54 = vsub.f32 %v12121_v7, %v1099_v28  ;;  %v2536_v28 = vpop.f32.mrf.mxu3 }
 0x3be   :  { %v764_v14 = vsel %vm637_vm6, %v12290_v52, 0.0  ;;  %v12304_v44 = vpop.eup %10402 }
 0x3bf   :  { %765 = vadd.xlane.f32.xlu0 %v764_v14  ;;  %2216 = vadd.xlane.f32.xlu1 %v2215_v40  ;;  %v10405_v60 = vpop.eup %10404  ;;  %v2218_v35 = vsel %vm637_vm6, %v12304_v44, 0.0 }
 0x3c0   :  { %2558 = vmax.xlane.f32.xlu2 %v2557_v59  ;;  %v1833_v38 = vmul.f32 %v10405_v60, %v12075_v12  ;;  %v12312_v7 = vpop.eup %10406  ;;  %v2545_v60 = vmul.f32 0.125, %v2533_v13 }
 0x3c1   :  { %v2221_v40 = vsel %vm637_vm6, %v12312_v7, 0.0 }
 0x3c2   :  { %v733_v1 = vpop.xlane.xlu0 %732 }
 0x3c3   :  { %v739_v58 = vsub.f32 %v12129_v51, %v733_v1  ;;  %v1120_v51 = vmul.f32 1.442695, %v1113_v54 }
 0x3c4   :  { %v1102_v1 = vpop.xlane.xlu2 %1101 }
 0x3c5   :  { %v750_v19 = vmul.f32 1.442695, %v739_v58 }
 0x3c7   :  { %10408 = vpow2.f32 %v750_v19  ;;  %2561 = vmax.xlane.f32.xlu0 %v2560_v32 }
 0x3c8   :  { %2219 = vadd.xlane.f32.xlu2 %v2218_v35  ;;  %10410 = vrcp.f32 %v1819_v50  ;;  %v1839_v50 = vmul.f32 %v1833_v38, %v12043_v61  ;;  %v1114_v61 = vsub.f32 %v12140_v6, %v1102_v1  ;;  %v12344_v6 = vadd.f32 %v2545_v60, %v11988_v10 }
 0x3c9   :  { %10412 = vrcp.f32 %v1816_v16 }
 0x3ca   :  { %v1096_v42 = vpop.xlane.xlu0 %1095  ;;  %10414 = vpow2.f32 %v1120_v51  ;;  %v1122_v51 = vmul.f32 1.442695, %v1114_v61  ;;  %v2563_v10 = vsel %vm637_vm6, %v12344_v6, -inf }
 0x3cb   :  { %v1112_v9 = vsub.f32 %v12149_v45, %v1096_v42  ;;  %v12323_v45 = vadd.f32 %v12118_v5, %v1839_v50  ;;  %v2539_v42 = vpop.f32.mrf.mxu3  ;;  %v2546_v50 = vmul.f32 0.125, %v2536_v28  ;;  %v15843_v28 = vld [vmem:[#allocation23_spill] sm:$0xff] }
 0x3cc   :  { %v2199_v1 = vsub.f32 %v15843_v28, %v12191_v31 }
 0x3cd   :  { %v12315_v48 = vpop.eup %10408  ;;  %v1118_v14 = vmul.f32 1.442695, %v1112_v9  ;;  %v1853_v35 = vsel %vm637_vm6, %v12323_v45, -inf }
 0x3ce   :  { %v767_v59 = vsel %vm637_vm6, %v12315_v48, 0.0  ;;  %v10411_v21 = vpop.eup %10410  ;;  %v2210_v60 = vmul.f32 1.442695, %v2199_v1 }
 0x3cf   :  { %10416 = vpow2.f32 %v1118_v14  ;;  %2222 = vadd.xlane.f32.xlu0 %v2221_v40  ;;  %768 = vadd.xlane.f32.xlu1 %v767_v59  ;;  %v10413_v12 = vpop.eup %10412  ;;  %v1835_v58 = vmul.f32 %v10411_v21, %v12109_v53  ;;  %v2547_v40 = vmul.f32 0.125, %v2539_v42 }
 0x3d0   :  { %v12326_v54 = vpop.eup %10414  ;;  %v1834_v19 = vmul.f32 %v10413_v12, %v12090_v15  ;;  %10418 = vpow2.f32 %v1122_v51  ;;  %v12366_v12 = vadd.f32 %v2546_v50, %v11973_v56 }
 0x3d1   :  { %v1133_v16 = vsel %vm637_vm6, %v12326_v54, 0.0  ;;  %v1841_v53 = vmul.f32 %v1835_v58, %v12073_v37  ;;  %v2198_v37 = vsub.f32 %v11979_v2, %v12177_v62  ;;  %10420 = vrcp.f32 %v12283_v23 }
 0x3d2   :  { %v1840_v15 = vmul.f32 %v1834_v19, %v12060_v8 }
 0x3d3   :  { %v12341_v13 = vadd.f32 %v12156_v55, %v1841_v53  ;;  %v2208_v62 = vmul.f32 1.442695, %v2198_v37  ;;  %v15845_v53 = vld [vmem:[#allocation25_spill] sm:$0xff]  ;;  %v2902_v50 = vpop.f32.mrf.mxu3 }
 0x3d4   :  { %v1105_v38 = vpop.xlane.xlu0 %1104  ;;  %v12347_v9 = vadd.f32 %v12137_v3, %v1840_v15 }
 0x3d5   :  { %v12329_v32 = vpop.eup %10416  ;;  %v1115_v59 = vsub.f32 %v12159_v49, %v1105_v38  ;;  %v1859_v55 = vsel %vm637_vm6, %v12341_v13, -inf  ;;  %v12361_v49 = vadd.f32 %v2547_v40, %v11991_v39  ;;  %10422 = vpow2.f32 %v2208_v62 }
 0x3d6   :  { %v1130_v5 = vsel %vm637_vm6, %v12329_v32, 0.0  ;;  %v1856_v3 = vsel %vm637_vm6, %v12347_v9, -inf  ;;  %v12363_v21 = vpop.eup %10418  ;;  %v2566_v39 = vsel %vm637_vm6, %v12366_v12, -inf  ;;  %v2920_v62 = vmul.f32 0.125, %v2902_v50 }
 0x3d7   :  { %1134 = vadd.xlane.f32.xlu0 %v1133_v16  ;;  %1854 = vmax.xlane.f32.xlu1 %v1853_v35  ;;  %v2569_v58 = vsel %vm637_vm6, %v12361_v49, -inf  ;;  %v1136_v23 = vsel %vm637_vm6, %v12363_v21, 0.0  ;;  %v10421_v19 = vpop.eup %10420  ;;  %v15844_v16 = vld [vmem:[#allocation24_spill] sm:$0xff] }
 0x3d8   :  { %1131 = vadd.xlane.f32.xlu2 %v1130_v5  ;;  %v1836_v31 = vmul.f32 %v10421_v19, %v15844_v16 }
 0x3da   :  { %v1842_v38 = vmul.f32 %v1836_v31, %v12088_v22 }
 0x3db   :  { %v12376_v56 = vpop.eup %10422 }
 0x3dc   :  { %v1108_v14 = vpop.xlane.xlu1 %1107  ;;  %v2224_v42 = vsel %vm637_vm6, %v12376_v56, 0.0 }
 0x3dd   :  { %v1116_v8 = vsub.f32 %v12171_v27, %v1108_v14  ;;  %v1124_v27 = vmul.f32 1.442695, %v1115_v59 }
 0x3df   :  { %1860 = vmax.xlane.f32.xlu0 %v1859_v55  ;;  %2564 = vmax.xlane.f32.xlu1 %v2563_v10  ;;  %v1126_v2 = vmul.f32 1.442695, %v1116_v8  ;;  %v12392_v8 = vadd.f32 %v12168_v57, %v1842_v38 }
 0x3e0   :  { %1857 = vmax.xlane.f32.xlu2 %v1856_v3 }
 0x3e1   :  { %10424 = vpow2.f32 %v1126_v2  ;;  %v1862_v59 = vsel %vm637_vm6, %v12392_v8, -inf  ;;  %v12407_v2 = vadd.f32 %v2920_v62, %v11931_v47 }
 0x3e2   :  { %10426 = vpow2.f32 %v1124_v27 }
 0x3e3   :  { %10428 = vpow2.f32 %v2210_v60  ;;  %v2932_v1 = vsel %vm637_vm6, %v12407_v2, -inf  ;;  %v15846_v60 = vld [vmem:[#allocation22_spill] sm:$0xff] }
 0x3e4   :  { %v1111_v61 = vpop.xlane.xlu2 %1110 }
 0x3e5   :  { %v1117_v15 = vsub.f32 %v15845_v53, %v1111_v61  ;;  %v15847_v61 = vld [vmem:[#allocation21_spill] sm:$0xff]  ;;  %v15848_v53 = vld [vmem:[#allocation20_spill] sm:$0xff] }
 0x3e7   :  { %2570 = vmax.xlane.f32.xlu0 %v2569_v58  ;;  %1137 = vadd.xlane.f32.xlu1 %v1136_v23  ;;  %v12379_v35 = vpop.eup %10424  ;;  %v1128_v14 = vmul.f32 1.442695, %v1117_v15 }
 0x3e8   :  { %2567 = vmax.xlane.f32.xlu2 %v2566_v39  ;;  %v12381_v5 = vpop.eup %10426  ;;  %v1142_v51 = vsel %vm637_vm6, %v12379_v35, 0.0 }
 0x3e9   :  { %v1139_v37 = vsel %vm637_vm6, %v12381_v5, 0.0  ;;  %v12394_v40 = vpop.eup %10428  ;;  %10430 = vpow2.f32 %v1128_v14 }
 0x3ea   :  { %v2227_v55 = vsel %vm637_vm6, %v12394_v40, 0.0 }
 0x3ef   :  { %1143 = vadd.xlane.f32.xlu0 %v1142_v51  ;;  %2225 = vadd.xlane.f32.xlu1 %v2224_v42  ;;  %v12400_v10 = vpop.eup %10430  ;;  %v15849_v51 = vld [vmem:[#allocation19_spill] sm:$0xff] }
 0x3f0   :  { %1140 = vadd.xlane.f32.xlu2 %v1139_v37  ;;  %v1145_v57 = vsel %vm637_vm6, %v12400_v10, 0.0  ;;  %v15850_v37 = vld [vmem:[#allocation18_spill] sm:$0xff] }
 0x3f3   :  { %v12402_v3 = vpop.xlane.xlu2 %1479 }
 0x3f4   :  { %v1474_v22 = vpop.xlane.xlu0 %1473 }
 0x3f5   :  { %v1490_v16 = vsub.f32 %v12201_v36, %v1474_v22  ;;  %v2905_v22 = vpop.f32.mrf.mxu3 }
 0x3f6   :  { %v2921_v62 = vmul.f32 0.125, %v2905_v22 }
 0x3f7   :  { %1863 = vmax.xlane.f32.xlu1 %v1862_v59  ;;  %v1496_v38 = vmul.f32 1.442695, %v1490_v16  ;;  %v15851_v59 = vld [vmem:[#allocation17_spill] sm:$0xff] }
 0x3f8   :  { %2228 = vadd.xlane.f32.xlu2 %v2227_v55 }
 0x3fc   :  { %v12409_v27 = vpop.xlane.xlu0 %1482  ;;  %v12416_v47 = vpop.xlane.xlu1 %1476 }
 0x3ff   :  { %1146 = vadd.xlane.f32.xlu1 %v1145_v57 }
 0x403   :  { %v754_v28 = vpop.xlane.xlu2 %753 }
 0x404   :  { %10432 = vrcp.f32 %v754_v28  ;;  %v12431_v55 = vpop.xlane.xlu1 %1485 }
 0x407   :  { %2933 = vmax.xlane.f32.xlu1 %v2932_v1 }
 0x40a   :  { %v10433_v58 = vpop.eup %10432 }
 0x40b   :  { %v776_v23 = vmul.f32 %v10433_v58, %v12226_v24  ;;  %v757_v19 = vpop.xlane.xlu0 %756  ;;  %v1825_v39 = vpop.xlane.xlu2 %1824 }
 0x40c   :  { %10434 = vrcp.f32 %v757_v19 }
 0x40d   :  { %10436 = vrcp.f32 %v1825_v39  ;;  %9395 = vmatmul.msk.f32.vlgmr.msra.gmra.mxu0 %vm637_vm6, %v776_v23 }
 0x40e   :  { %1566 = vmatpush.msra.mxu0 %v15846_v60  ;;  %10438 = vpow2.f32 %v1496_v38 }
 0x410   :  { %1567 = vmatpush.msra.mxu0 %v15847_v61 }
 0x412   :  { %v10435_v31 = vpop.eup %10434  ;;  %1568 = vmatpush.msra.mxu0 %v15848_v53 }
 0x413   :  { %v10437_v15 = vpop.eup %10436  ;;  %v777_v24 = vmul.f32 %v10435_v31, %v12240_v17  ;;  %v2214_v50 = vpop.xlane.xlu0 %2213 }
 0x414   :  { %1569 = vmatpush.msra.mxu0 %v15849_v51  ;;  %v1837_v42 = vmul.f32 %v10437_v15, %v12238_v33  ;;  %v12435_v33 = vpop.eup %10438  ;;  %v12437_v57 = vpop.xlane.xlu2 %1488 }
 0x415   :  { %9396 = vmatmul.msk.f32.gmra.mxu0 %vm637_vm6, %v777_v24  ;;  %v1508_v28 = vsel %vm637_vm6, %v12435_v33, 0.0 }
 0x416   :  { %1570 = vmatpush.msra.mxu0 %v15850_v37  ;;  %v1843_v14 = vmul.f32 %v1837_v42, %v12112_v30 }
 0x418   :  { %1571 = vmatpush.msra.mxu0 %v15851_v59  ;;  %v12429_v36 = vadd.f32 %v12184_v11, %v1843_v14  ;;  %v12442_v11 = vld [vmem:[%s15837_s17 + $0x8] sm:$0xff] }
 0x419   :  { %v12445_v1 = vadd.f32 %v12442_v11, %v2921_v62  ;;  %v12457_v62 = vld [vmem:[%s15852_s3] sm:$0xff] }
 0x41a   :  { %v1865_v17 = vsel %vm637_vm6, %v12429_v36, -inf }
 0x41b   :  { %1866 = vmax.xlane.f32.xlu2 %v1865_v17  ;;  %v2935_v16 = vsel %vm637_vm6, %v12445_v1, -inf }
 0x41c   :  { %v12447_v23 = vpop.xlane.xlu0 %1851 }
 0x422   :  { %v760_v30 = vpop.xlane.xlu1 %759 }
 0x423   :  { %10440 = vrcp.f32 %v760_v30  ;;  %1509 = vadd.xlane.f32.xlu2 %v1508_v28  ;;  %v1491_v30 = vsub.f32 %v12217_v25, %v12416_v47  ;;  %v15853_v28 = vld [vmem:[#allocation26_spill] sm:$0xff]  ;;  %v12472_v25 = vld [vmem:[%s15837_s17] sm:$0xff] }
 0x424   :  { %10442 = vrcp.f32 %v2214_v50 }
 0x429   :  { %v10441_v58 = vpop.eup %10440 }
 0x42a   :  { %v2556_v19 = vpop.xlane.xlu1 %2555  ;;  %v763_v39 = vpop.xlane.xlu2 %762  ;;  %v778_v31 = vmul.f32 %v10441_v58, %v12265_v0  ;;  %v1492_v58 = vsub.f32 %v15853_v28, %v12402_v3 }
 0x42b   :  { %v2572_v15 = vsub.f32 %v12272_v18, %v2556_v19  ;;  %10444 = vrcp.f32 %v763_v39  ;;  %2936 = vmax.xlane.f32.xlu2 %v2935_v16  ;;  %v10443_v42 = vpop.eup %10442  ;;  %v1498_v16 = vmul.f32 1.442695, %v1491_v30 }
 0x42c   :  { %9397 = vmatmul.msk.f32.gmra.mxu0 %vm637_vm6, %v778_v31  ;;  %v2236_v22 = vmul.f32 %v10443_v42, %v12250_v29  ;;  %v1500_v31 = vmul.f32 1.442695, %v1492_v58  ;;  %v1493_v42 = vsub.f32 %v12213_v63, %v12409_v27 }
 0x42d   :  { %v2578_v24 = vmul.f32 1.442695, %v2572_v15 }
 0x42e   :  { %v2242_v19 = vmul.f32 %v2236_v22, %v12457_v62  ;;  %v2908_v22 = vpop.f32.mrf.mxu3 }
 0x42f   :  { %10446 = vpow2.f32 %v2578_v24 }
 0x430   :  { %v12475_v3 = vadd.f32 %v12472_v25, %v2242_v19  ;;  %v2922_v19 = vmul.f32 0.125, %v2908_v22 }
 0x431   :  { %v10445_v38 = vpop.eup %10444 }
 0x432   :  { %v766_v14 = vpop.xlane.xlu0 %765  ;;  %v779_v17 = vmul.f32 %v10445_v38, %v12275_v41  ;;  %v2217_v39 = vpop.xlane.xlu1 %2216 }
 0x433   :  { %10448 = vrcp.f32 %v766_v14  ;;  %v2559_v50 = vpop.xlane.xlu2 %2558 }
 0x434   :  { %v2573_v0 = vsub.f32 %v12288_v20, %v2559_v50  ;;  %9398 = vmatmul.msk.f32.gmra.mxu0 %vm637_vm6, %v779_v17 }
 0x435   :  { %v12461_v18 = vpop.eup %10446 }
 0x436   :  { %v2580_v41 = vmul.f32 1.442695, %v2573_v0  ;;  %v2590_v29 = vsel %vm637_vm6, %v12461_v18, 0.0  ;;  %v1502_v0 = vmul.f32 1.442695, %v1493_v42 }
 0x437   :  { %2591 = vadd.xlane.f32.xlu0 %v2590_v29 }
 0x438   :  { %10450 = vpow2.f32 %v2580_v41  ;;  %v12495_v41 = vld [vmem:[%s15852_s3 + $0x8] sm:$0xff] }
 0x439   :  { %v10449_v20 = vpop.eup %10448  ;;  %10452 = vrcp.f32 %v2217_v39 }
 0x43a   :  { %v2562_v15 = vpop.xlane.xlu0 %2561  ;;  %v780_v24 = vmul.f32 %v10449_v20, %v12290_v52  ;;  %10454 = vpow2.f32 %v1498_v16  ;;  %v2254_v52 = vsel %vm637_vm6, %v12475_v3, -inf }
 0x43b   :  { %v2574_v47 = vsub.f32 %v12301_v43, %v2562_v15  ;;  %10456 = vpow2.f32 %v1500_v31  ;;  %v2220_v17 = vpop.xlane.xlu2 %2219  ;;  %v2911_v15 = vpop.f32.mrf.mxu3 }
 0x43c   :  { %9399 = vmatmul.msk.f32.gmra.mxu0 %vm637_vm6, %v780_v24 }
 0x43d   :  { %v2582_v38 = vmul.f32 1.442695, %v2574_v47 }
 0x43e   :  { %v12481_v14 = vpop.eup %10450 }
 0x43f   :  { %10458 = vpow2.f32 %v2582_v38  ;;  %2255 = vmax.xlane.f32.xlu0 %v2254_v52  ;;  %v2593_v43 = vsel %vm637_vm6, %v12481_v14, 0.0  ;;  %v10453_v50 = vpop.eup %10452  ;;  %v12509_v38 = vld [vmem:[%s15837_s17 + $0x10] sm:$0xff] }
 0x440   :  { %2594 = vadd.xlane.f32.xlu1 %v2593_v43  ;;  %10460 = vrcp.f32 %v2220_v17  ;;  %v12489_v30 = vpop.eup %10454  ;;  %v2237_v28 = vmul.f32 %v10453_v50, %v12285_v46  ;;  %v12512_v17 = vadd.f32 %v12509_v38, %v2922_v19 }
 0x441   :  { %v12492_v58 = vpop.eup %10456  ;;  %v1511_v39 = vsel %vm637_vm6, %v12489_v30, 0.0 }
 0x442   :  { %v12487_v63 = vpop.xlane.xlu0 %2222  ;;  %v769_v27 = vpop.xlane.xlu1 %768  ;;  %v1514_v46 = vsel %vm637_vm6, %v12492_v58, 0.0  ;;  %v2243_v31 = vmul.f32 %v2237_v28, %v12495_v41  ;;  %v2938_v28 = vsel %vm637_vm6, %v12512_v17, -inf }
 0x443   :  { %10462 = vrcp.f32 %v769_v27  ;;  %v12522_v27 = vld [vmem:[%s15852_s3 + $0x10] sm:$0xff] }
 0x444   :  { %10464 = vpow2.f32 %v1502_v0  ;;  %v12519_v0 = vadd.f32 %v12442_v11, %v2243_v31 }
 0x445   :  { %v12497_v29 = vpop.eup %10458 }
 0x446   :  { %v2596_v20 = vsel %vm637_vm6, %v12497_v29, 0.0  ;;  %v10461_v16 = vpop.eup %10460 }
 0x447   :  { %1512 = vadd.xlane.f32.xlu0 %v1511_v39  ;;  %2597 = vadd.xlane.f32.xlu2 %v2596_v20  ;;  %v2238_v52 = vmul.f32 %v10461_v16, %v12304_v44  ;;  %v2923_v39 = vmul.f32 0.125, %v2911_v15  ;;  %v2257_v20 = vsel %vm637_vm6, %v12519_v0, -inf }
 0x448   :  { %1515 = vadd.xlane.f32.xlu1 %v1514_v46 }
 0x449   :  { %v10463_v24 = vpop.eup %10462  ;;  %v2244_v44 = vmul.f32 %v2238_v52, %v12522_v27  ;;  %v2914_v52 = vpop.f32.mrf.mxu3 }
 0x44a   :  { %v1135_v47 = vpop.xlane.xlu0 %1134  ;;  %v12506_v42 = vpop.xlane.xlu1 %1854  ;;  %v781_v50 = vmul.f32 %v10463_v24, %v12315_v48  ;;  %v1495_v48 = vsub.f32 %v12248_v26, %v12437_v57 }
 0x44b   :  { %v12515_v22 = vpop.eup %10464  ;;  %v1132_v43 = vpop.xlane.xlu2 %1131  ;;  %v12537_v24 = vadd.f32 %v12509_v38, %v2244_v44  ;;  %v2924_v44 = vmul.f32 0.125, %v2914_v52 }
 0x44c   :  { %10466 = vrcp.f32 %v1132_v43  ;;  %9400 = vmatmul.msk.f32.gmra.mxu0 %vm637_vm6, %v781_v50  ;;  %v1517_v19 = vsel %vm637_vm6, %v12515_v22, 0.0  ;;  %v1506_v15 = vmul.f32 1.442695, %v1495_v48  ;;  %v12544_v50 = vld [vmem:[%s15837_s17 + $0x18] sm:$0xff]  ;;  %v1494_v48 = vsub.f32 %v12231_v4, %v12431_v55  ;;  %v12563_v55 = vld [vmem:[%s15837_s17 + $0x20] sm:$0xff] }
 0x44d   :  { %10468 = vrcp.f32 %v1135_v47  ;;  %v1868_v47 = vsub.f32 %v12260_v34, %v12447_v23 }
 0x44e   :  { %10470 = vpow2.f32 %v1506_v15  ;;  %v1504_v23 = vmul.f32 1.442695, %v1494_v48 }
 0x44f   :  { %2939 = vmax.xlane.f32.xlu0 %v2938_v28  ;;  %1518 = vadd.xlane.f32.xlu2 %v1517_v19  ;;  %v12547_v28 = vadd.f32 %v12544_v50, %v2923_v39  ;;  %v1874_v34 = vmul.f32 1.442695, %v1868_v47 }
 0x450   :  { %2258 = vmax.xlane.f32.xlu1 %v2257_v20  ;;  %v12566_v20 = vadd.f32 %v12563_v55, %v2924_v44 }
 0x452   :  { %v10467_v16 = vpop.eup %10466  ;;  %v12534_v46 = vpop.xlane.xlu0 %1860 }
 0x453   :  { %v2565_v31 = vpop.xlane.xlu1 %2564  ;;  %v1154_v43 = vmul.f32 %v10467_v16, %v12329_v32  ;;  %v12541_v57 = vpop.xlane.xlu2 %1857  ;;  %v2260_v32 = vsel %vm637_vm6, %v12537_v24, -inf }
 0x454   :  { %v2575_v26 = vsub.f32 %v12344_v6, %v2565_v31  ;;  %v2941_v6 = vsel %vm637_vm6, %v12547_v28, -inf  ;;  %v10469_v39 = vpop.eup %10468 }
 0x455   :  { %9443 = vmatmul.msk.f32.vlgmr.msrb.gmra.mxu0 %vm637_vm6, %v1154_v43 }
 0x456   :  { %v2584_v19 = vmul.f32 1.442695, %v2575_v26  ;;  %1944 = vmatpush.msrb.mxu0 %v15846_v60 }
 0x457   :  { %2261 = vmax.xlane.f32.xlu2 %v2260_v32 }
 0x458   :  { %10472 = vpow2.f32 %v2584_v19  ;;  %1945 = vmatpush.msrb.mxu0 %v15847_v61  ;;  %2942 = vmax.xlane.f32.xlu1 %v2941_v6  ;;  %v1155_v61 = vmul.f32 %v10469_v39, %v12326_v54  ;;  %v12592_v6 = vld [vmem:[%s15852_s3 + $0x18] sm:$0xff] }
 0x459   :  { %10474 = vrcp.f32 %v12487_v63  ;;  %v12572_v63 = vpop.eup %10470 }
 0x45a   :  { %1946 = vmatpush.msrb.mxu0 %v15848_v53  ;;  %v2571_v4 = vpop.xlane.xlu0 %2570 }
 0x45b   :  { %v1138_v60 = vpop.xlane.xlu1 %1137  ;;  %v2577_v16 = vsub.f32 %v12361_v49, %v2571_v4  ;;  %v2568_v31 = vpop.xlane.xlu2 %2567  ;;  %v2944_v49 = vsel %vm637_vm6, %v12566_v20, -inf }
 0x45c   :  { %10476 = vrcp.f32 %v1138_v60  ;;  %1947 = vmatpush.msrb.mxu0 %v15849_v51  ;;  %v2576_v52 = vsub.f32 %v12366_v12, %v2568_v31  ;;  %v1523_v51 = vsel %vm637_vm6, %v12572_v63, 0.0  ;;  %v2917_v31 = vpop.f32.mrf.mxu3 }
 0x45d   :  { %10478 = vpow2.f32 %v1874_v34  ;;  %9444 = vmatmul.msk.f32.gmra.mxu0 %vm637_vm6, %v1155_v61  ;;  %v2588_v43 = vmul.f32 1.442695, %v2577_v16 }
 0x45e   :  { %v12575_v53 = vpop.eup %10472  ;;  %10480 = vpow2.f32 %v1504_v23  ;;  %v2586_v15 = vmul.f32 1.442695, %v2576_v52  ;;  %1948 = vmatpush.msrb.mxu0 %v15850_v37  ;;  %v1870_v23 = vsub.f32 %v12347_v9, %v12541_v57  ;;  %v12611_v52 = vld [vmem:[%s15852_s3 + $0x20] sm:$0xff] }
 0x45f   :  { %v2599_v54 = vsel %vm637_vm6, %v12575_v53, 0.0  ;;  %2945 = vmax.xlane.f32.xlu2 %v2944_v49  ;;  %v10475_v12 = vpop.eup %10474 }
 0x460   :  { %10482 = vpow2.f32 %v2586_v15  ;;  %1949 = vmatpush.msrb.mxu0 %v15851_v59  ;;  %2600 = vadd.xlane.f32.xlu0 %v2599_v54  ;;  %v2239_v48 = vmul.f32 %v10475_v12, %v12312_v7  ;;  %v1878_v9 = vmul.f32 1.442695, %v1870_v23 }
 0x461   :  { %1524 = vadd.xlane.f32.xlu1 %v1523_v51  ;;  %10484 = vpow2.f32 %v2588_v43  ;;  %v1869_v51 = vsub.f32 %v12323_v45, %v12506_v42  ;;  %v1871_v45 = vsub.f32 %v12341_v13, %v12534_v46 }
 0x462   :  { %v10477_v26 = vpop.eup %10476  ;;  %v2245_v34 = vmul.f32 %v2239_v48, %v12592_v6  ;;  %v1144_v4 = vpop.xlane.xlu0 %1143 }
 0x463   :  { %v2226_v37 = vpop.xlane.xlu1 %2225  ;;  %v1156_v47 = vmul.f32 %v10477_v26, %v12363_v21  ;;  %v12586_v19 = vpop.eup %10478 }
 0x464   :  { %v1141_v44 = vpop.xlane.xlu2 %1140  ;;  %v12589_v32 = vpop.eup %10480  ;;  %10486 = vrcp.f32 %v2226_v37  ;;  %v1886_v21 = vsel %vm637_vm6, %v12586_v19, 0.0  ;;  %v12614_v43 = vadd.f32 %v12544_v50, %v2245_v34  ;;  %v12639_v34 = vld [vmem:[%s15837_s17 + $0x28] sm:$0xff] }
 0x465   :  { %10488 = vrcp.f32 %v1141_v44  ;;  %9445 = vmatmul.msk.f32.gmra.mxu0 %vm637_vm6, %v1156_v47  ;;  %v1520_v39 = vsel %vm637_vm6, %v12589_v32, 0.0  ;;  %v12621_v26 = vpop.f32.mrf.mxu0  ;;  %v2925_v47 = vmul.f32 0.125, %v2917_v31  ;;  %v3280_v46 = vpop.f32.mrf.mxu3 }
 0x466   :  { %v12595_v59 = vpop.eup %10482  ;;  %10490 = vrcp.f32 %v1144_v4  ;;  %v1880_v4 = vmul.f32 1.442695, %v1871_v45 }
 0x467   :  { %1887 = vadd.xlane.f32.xlu2 %v1886_v21  ;;  %v2602_v7 = vsel %vm637_vm6, %v12595_v59, 0.0  ;;  %v12606_v60 = vpop.eup %10484  ;;  %v1876_v21 = vmul.f32 1.442695, %v1869_v51  ;;  %v12642_v23 = vadd.f32 %v12639_v34, %v2925_v47 }
 0x468   :  { %1521 = vadd.xlane.f32.xlu0 %v1520_v39  ;;  %v2605_v37 = vsel %vm637_vm6, %v12606_v60, 0.0 }
 0x469   :  { %2603 = vadd.xlane.f32.xlu1 %v2602_v7  ;;  %v12636_v7 = vld [vmem:[%s15852_s3 + $0x28] sm:$0xff] }
 0x46a   :  { %v10487_v16 = vpop.eup %10486 }
 0x46b   :  { %v12608_v61 = vpop.xlane.xlu1 %1863  ;;  %v10489_v15 = vpop.eup %10488  ;;  %v2240_v54 = vmul.f32 %v10487_v16, %v12376_v56  ;;  %v2263_v56 = vsel %vm637_vm6, %v12614_v43, -inf }
 0x46c   :  { %v2229_v49 = vpop.xlane.xlu2 %2228  ;;  %v1157_v57 = vmul.f32 %v10489_v15, %v12381_v5  ;;  %v10491_v42 = vpop.eup %10490 }
 0x46d   :  { %10492 = vrcp.f32 %v2229_v49  ;;  %v2246_v12 = vmul.f32 %v2240_v54, %v12611_v52  ;;  %v1158_v16 = vmul.f32 %v10491_v42, %v12379_v35  ;;  %v2947_v49 = vsel %vm637_vm6, %v12642_v23, -inf }
 0x46e   :  { %9446 = vmatmul.msk.f32.gmra.mxu0 %vm637_vm6, %v1157_v57  ;;  %10494 = vpow2.f32 %v1878_v9  ;;  %v12655_v9 = vpop.f32.mrf.mxu0  ;;  %v3298_v57 = vmul.f32 0.125, %v3280_v46 }
 0x46f   :  { %2606 = vadd.xlane.f32.xlu2 %v2605_v37  ;;  %v12629_v5 = vadd.f32 %v12563_v55, %v2246_v12 }
 0x470   :  { %2264 = vmax.xlane.f32.xlu0 %v2263_v56  ;;  %v12666_v42 = vadd.f32 %v12472_v25, %v3298_v57 }
 0x471   :  { %v2266_v44 = vsel %vm637_vm6, %v12629_v5, -inf }
 0x472   :  { %2267 = vmax.xlane.f32.xlu1 %v2266_v44 }
 0x473   :  { %v10493_v48 = vpop.eup %10492  ;;  %v1147_v39 = vpop.xlane.xlu1 %1146 }
 0x474   :  { %10496 = vrcp.f32 %v1147_v39  ;;  %v2241_v13 = vmul.f32 %v10493_v48, %v12394_v40  ;;  %v12647_v15 = vpop.eup %10494  ;;  %v3283_v48 = vpop.f32.mrf.mxu3 }
 0x475   :  { %10498 = vpow2.f32 %v1876_v21  ;;  %v1892_v35 = vsel %vm637_vm6, %v12647_v15, 0.0  ;;  %v3299_v39 = vmul.f32 0.125, %v3283_v48 }
 0x476   :  { %v2247_v31 = vmul.f32 %v2241_v13, %v12636_v7  ;;  %9447 = vmatmul.msk.f32.gmra.mxu0 %vm637_vm6, %v1158_v16  ;;  %10500 = vpow2.f32 %v1880_v4  ;;  %v12677_v13 = vpop.f32.mrf.mxu0 }
 0x477   :  { %v12682_v4 = vadd.f32 %v12442_v11, %v3299_v39 }
 0x478   :  { %v12653_v54 = vadd.f32 %v12639_v34, %v2247_v31  ;;  %2948 = vmax.xlane.f32.xlu0 %v2947_v49 }
 0x479   :  { %v3313_v31 = vsel %vm637_vm6, %v12682_v4, -inf }
 0x47a   :  { %v10497_v40 = vpop.eup %10496  ;;  %v2269_v12 = vsel %vm637_vm6, %v12653_v54, -inf  ;;  %1893 = vadd.xlane.f32.xlu1 %v1892_v35 }
 0x47b   :  { %2270 = vmax.xlane.f32.xlu2 %v2269_v12  ;;  %v2934_v51 = vpop.xlane.xlu1 %2933  ;;  %v1159_v37 = vmul.f32 %v10497_v40, %v12400_v10  ;;  %v12663_v56 = vpop.eup %10498  ;;  %v3310_v10 = vsel %vm637_vm6, %v12666_v42, -inf }
 0x47c   :  { %v2950_v47 = vsub.f32 %v12407_v2, %v2934_v51  ;;  %v12668_v44 = vpop.eup %10500  ;;  %v1889_v21 = vsel %vm637_vm6, %v12663_v56, 0.0 }
 0x47d   :  { %v1895_v2 = vsel %vm637_vm6, %v12668_v44, 0.0 }
 0x47e   :  { %v2956_v45 = vmul.f32 1.442695, %v2950_v47  ;;  %9448 = vmatmul.msk.f32.gmra.mxu0 %vm637_vm6, %v1159_v37  ;;  %v12688_v49 = vpop.f32.mrf.mxu0 }
 0x480   :  { %10502 = vpow2.f32 %v2956_v45  ;;  %1890 = vadd.xlane.f32.xlu0 %v1889_v21 }
 0x482   :  { %3311 = vmax.xlane.f32.xlu1 %v3310_v10 }
 0x483   :  { %1896 = vadd.xlane.f32.xlu2 %v1895_v2  ;;  %v1872_v2 = vsub.f32 %v12392_v8, %v12608_v61 }
 0x486   :  { %v12679_v46 = vpop.eup %10502  ;;  %v12690_v57 = vpop.f32.mrf.mxu0 }
 0x487   :  { %v2968_v16 = vsel %vm637_vm6, %v12679_v46, 0.0 }
 0x488   :  { %2969 = vadd.xlane.f32.xlu0 %v2968_v16 }
 0x48b   :  { %3314 = vmax.xlane.f32.xlu2 %v3313_v31 }
 0x48e   :  { %v1867_v40 = vpop.xlane.xlu2 %1866  ;;  %v12694_v45 = vpop.f32.mrf.mxu0 }
 0x48f   :  { %v1873_v48 = vsub.f32 %v12429_v36, %v1867_v40 }
 0x491   :  { %v1884_v39 = vmul.f32 1.442695, %v1873_v48 }
 0x496   :  { %v1510_v35 = vpop.xlane.xlu2 %1509 }
 0x497   :  { %10504 = vrcp.f32 %v1510_v35 }
 0x49d   :  { %v10505_v12 = vpop.eup %10504 }
 0x49e   :  { %v1532_v51 = vmul.f32 %v10505_v12, %v12435_v33  ;;  %v2937_v37 = vpop.xlane.xlu2 %2936  ;;  %v1882_v12 = vmul.f32 1.442695, %v1872_v2 }
 0x49f   :  { %v2951_v47 = vsub.f32 %v12445_v1, %v2937_v37  ;;  %v3286_v37 = vpop.f32.mrf.mxu3 }
 0x4a0   :  { %9491 = vmatmul.msk.f32.vlgmr.msra.gmra.mxu0 %vm637_vm6, %v1532_v51 }
 0x4a1   :  { %v2958_v21 = vmul.f32 1.442695, %v2951_v47  ;;  %2348 = vmatpush.msra.mxu0 %v12694_v45 }
 0x4a3   :  { %10506 = vpow2.f32 %v2958_v21  ;;  %2349 = vmatpush.msra.mxu0 %v12690_v57 }
 0x4a4   :  { %10508 = vpow2.f32 %v1884_v39 }
 0x4a5   :  { %2350 = vmatpush.msra.mxu0 %v12688_v49 }
 0x4a7   :  { %2351 = vmatpush.msra.mxu0 %v12677_v13 }
 0x4a9   :  { %v12702_v33 = vpop.eup %10506  ;;  %2352 = vmatpush.msra.mxu0 %v12655_v9 }
 0x4aa   :  { %v2592_v1 = vpop.xlane.xlu0 %2591  ;;  %v2971_v36 = vsel %vm637_vm6, %v12702_v33, 0.0  ;;  %v12708_v10 = vpop.eup %10508 }
 0x4ab   :  { %10510 = vrcp.f32 %v2592_v1  ;;  %2972 = vadd.xlane.f32.xlu1 %v2971_v36  ;;  %2353 = vmatpush.msra.mxu0 %v12621_v26  ;;  %15854 = vst [vmem:[#allocation23_spill] sm:$0xff] %v12708_v10  ;;  %v1901_v40 = vsel %vm637_vm6, %v12708_v10, 0.0 }
 0x4b1   :  { %v10511_v16 = vpop.eup %10510 }
 0x4b2   :  { %v2256_v31 = vpop.xlane.xlu0 %2255  ;;  %v2614_v35 = vmul.f32 %v10511_v16, %v12461_v18  ;;  %v3289_v16 = vpop.f32.mrf.mxu3 }
 0x4b3   :  { %v2595_v51 = vpop.xlane.xlu1 %2594  ;;  %1902 = vadd.xlane.f32.xlu1 %v1901_v40 }
 0x4b4   :  { %10512 = vrcp.f32 %v2595_v51  ;;  %v2620_v47 = vmul.f32 %v2614_v35, %v12457_v62  ;;  %v3300_v35 = vmul.f32 0.125, %v3286_v37 }
 0x4b5   :  { %10514 = vpow2.f32 %v1882_v12 }
 0x4b6   :  { %v12717_v48 = vadd.f32 %v12472_v25, %v2620_v47  ;;  %v3301_v47 = vmul.f32 0.125, %v3289_v16  ;;  %v12736_v37 = vadd.f32 %v12509_v38, %v3300_v35  ;;  %v2272_v16 = vsub.f32 %v12475_v3, %v2256_v31 }
 0x4b8   :  { %v2632_v8 = vsel %vm637_vm6, %v12717_v48, -inf }
 0x4b9   :  { %2633 = vmax.xlane.f32.xlu0 %v2632_v8 }
 0x4ba   :  { %v10513_v61 = vpop.eup %10512  ;;  %v1513_v21 = vpop.xlane.xlu0 %1512 }
 0x4bb   :  { %v2598_v39 = vpop.xlane.xlu2 %2597  ;;  %10516 = vrcp.f32 %v1513_v21  ;;  %v1516_v18 = vpop.xlane.xlu1 %1515  ;;  %v2615_v1 = vmul.f32 %v10513_v61, %v12481_v14 }
 0x4bc   :  { %v12722_v36 = vpop.eup %10514  ;;  %10518 = vrcp.f32 %v1516_v18 }
 0x4bd   :  { %v2621_v2 = vmul.f32 %v2615_v1, %v12495_v41  ;;  %v1898_v12 = vsel %vm637_vm6, %v12722_v36, 0.0 }
 0x4bf   :  { %v12726_v40 = vadd.f32 %v12442_v11, %v2621_v2 }
 0x4c1   :  { %v10517_v51 = vpop.eup %10516  ;;  %1899 = vadd.xlane.f32.xlu0 %v1898_v12  ;;  %v2635_v8 = vsel %vm637_vm6, %v12726_v40, -inf  ;;  %v12740_v12 = vadd.f32 %v12544_v50, %v3301_v47 }
 0x4c2   :  { %2636 = vmax.xlane.f32.xlu1 %v2635_v8  ;;  %v2940_v14 = vpop.xlane.xlu0 %2939  ;;  %v1533_v21 = vmul.f32 %v10517_v51, %v12489_v30  ;;  %v10519_v10 = vpop.eup %10518  ;;  %v3316_v30 = vsel %vm637_vm6, %v12736_v37, -inf  ;;  %v2278_v51 = vmul.f32 1.442695, %v2272_v16 }
 0x4c3   :  { %v1519_v61 = vpop.xlane.xlu2 %1518  ;;  %v2952_v1 = vsub.f32 %v12512_v17, %v2940_v14  ;;  %v2259_v2 = vpop.xlane.xlu1 %2258  ;;  %v3319_v17 = vsel %vm637_vm6, %v12740_v12, -inf  ;;  %v1534_v3 = vmul.f32 %v10519_v10, %v12492_v58 }
 0x4c4   :  { %9492 = vmatmul.msk.f32.gmra.mxu0 %vm637_vm6, %v1533_v21  ;;  %v2273_v21 = vsub.f32 %v12519_v0, %v2259_v2 }
 0x4c5   :  { %v2960_v18 = vmul.f32 1.442695, %v2952_v1 }
 0x4c6   :  { %v2280_v58 = vmul.f32 1.442695, %v2273_v21 }
 0x4c7   :  { %10520 = vpow2.f32 %v2960_v18 }
 0x4c8   :  { %10522 = vrcp.f32 %v2598_v39 }
 0x4c9   :  { %10524 = vrcp.f32 %v1519_v61  ;;  %3317 = vmax.xlane.f32.xlu0 %v3316_v30 }
 0x4ca   :  { %3320 = vmax.xlane.f32.xlu1 %v3319_v17  ;;  %10526 = vpow2.f32 %v2278_v51 }
 0x4cb   :  { %v2262_v35 = vpop.xlane.xlu2 %2261  ;;  %v2943_v31 = vpop.xlane.xlu1 %2942 }
 0x4cc   :  { %v2274_v47 = vsub.f32 %v12537_v24, %v2262_v35  ;;  %v2953_v8 = vsub.f32 %v12547_v28, %v2943_v31  ;;  %9493 = vmatmul.msk.f32.gmra.mxu0 %vm637_vm6, %v1534_v3 }
 0x4cd   :  { %v12750_v39 = vpop.eup %10520 }
 0x4ce   :  { %v2282_v14 = vmul.f32 1.442695, %v2274_v47  ;;  %v10523_v61 = vpop.eup %10522  ;;  %v2962_v1 = vmul.f32 1.442695, %v2953_v8  ;;  %v2974_v16 = vsel %vm637_vm6, %v12750_v39, 0.0  ;;  %v3292_v8 = vpop.f32.mrf.mxu3 }
 0x4cf   :  { %v10525_v18 = vpop.eup %10524  ;;  %2975 = vadd.xlane.f32.xlu2 %v2974_v16  ;;  %v2616_v10 = vmul.f32 %v10523_v61, %v12497_v29 }
 0x4d0   :  { %10528 = vpow2.f32 %v2282_v14  ;;  %v1535_v28 = vmul.f32 %v10525_v18, %v12515_v22  ;;  %v12757_v30 = vpop.eup %10526 }
 0x4d1   :  { %10530 = vpow2.f32 %v2962_v1  ;;  %v2290_v22 = vsel %vm637_vm6, %v12757_v30, 0.0  ;;  %v2622_v31 = vmul.f32 %v2616_v10, %v12522_v27 }
 0x4d3   :  { %v2946_v24 = vpop.xlane.xlu2 %2945  ;;  %v2601_v51 = vpop.xlane.xlu0 %2600  ;;  %v12773_v61 = vadd.f32 %v12509_v38, %v2622_v31 }
 0x4d4   :  { %v2954_v17 = vsub.f32 %v12566_v20, %v2946_v24  ;;  %10532 = vrcp.f32 %v2601_v51  ;;  %v1525_v0 = vpop.xlane.xlu1 %1524  ;;  %9494 = vmatmul.msk.f32.gmra.mxu0 %vm637_vm6, %v1535_v28  ;;  %v3302_v24 = vmul.f32 0.125, %v3292_v8 }
 0x4d5   :  { %10534 = vpow2.f32 %v2280_v58  ;;  %v2638_v28 = vsel %vm637_vm6, %v12773_v61, -inf }
 0x4d6   :  { %v12761_v2 = vpop.eup %10528  ;;  %v2964_v35 = vmul.f32 1.442695, %v2954_v17  ;;  %v3295_v8 = vpop.f32.mrf.mxu3 }
 0x4d7   :  { %v12763_v3 = vpop.eup %10530  ;;  %v2296_v29 = vsel %vm637_vm6, %v12761_v2, 0.0  ;;  %2291 = vadd.xlane.f32.xlu2 %v2290_v22  ;;  %v12788_v22 = vadd.f32 %v12563_v55, %v3302_v24 }
 0x4d8   :  { %10536 = vpow2.f32 %v2964_v35  ;;  %v2977_v20 = vsel %vm637_vm6, %v12763_v3, 0.0  ;;  %2297 = vadd.xlane.f32.xlu1 %v2296_v29 }
 0x4d9   :  { %2978 = vadd.xlane.f32.xlu0 %v2977_v20 }
 0x4da   :  { %v10533_v47 = vpop.eup %10532 }
 0x4db   :  { %v1888_v14 = vpop.xlane.xlu2 %1887  ;;  %v1522_v21 = vpop.xlane.xlu0 %1521  ;;  %v2617_v1 = vmul.f32 %v10533_v47, %v12575_v53 }
 0x4dc   :  { %v12776_v16 = vpop.eup %10534  ;;  %10538 = vrcp.f32 %v1522_v21  ;;  %v2604_v18 = vpop.xlane.xlu1 %2603 }
 0x4dd   :  { %10540 = vrcp.f32 %v2604_v18  ;;  %v2293_v51 = vsel %vm637_vm6, %v12776_v16, 0.0  ;;  %v2623_v53 = vmul.f32 %v2617_v1, %v12592_v6 }
 0x4de   :  { %v12778_v58 = vpop.eup %10536  ;;  %10542 = vrcp.f32 %v1525_v0 }
 0x4df   :  { %v2980_v10 = vsel %vm637_vm6, %v12778_v58, 0.0  ;;  %2639 = vmax.xlane.f32.xlu2 %v2638_v28  ;;  %v12792_v47 = vadd.f32 %v12544_v50, %v2623_v53  ;;  %v3322_v28 = vsel %vm637_vm6, %v12788_v22, -inf }
 0x4e0   :  { %2981 = vadd.xlane.f32.xlu1 %v2980_v10 }
 0x4e1   :  { %2294 = vadd.xlane.f32.xlu0 %v2293_v51  ;;  %v2641_v51 = vsel %vm637_vm6, %v12792_v47, -inf }
 0x4e2   :  { %v10539_v17 = vpop.eup %10538 }
 0x4e3   :  { %v2607_v35 = vpop.xlane.xlu2 %2606  ;;  %v10541_v29 = vpop.eup %10540  ;;  %v1536_v20 = vmul.f32 %v10539_v17, %v12589_v32  ;;  %v3303_v32 = vmul.f32 0.125, %v3295_v8 }
 0x4e4   :  { %v2265_v31 = vpop.xlane.xlu0 %2264  ;;  %10544 = vrcp.f32 %v2607_v35  ;;  %v2618_v1 = vmul.f32 %v10541_v29, %v12595_v59  ;;  %v10543_v53 = vpop.eup %10542 }
 0x4e5   :  { %v2275_v21 = vsub.f32 %v12614_v43, %v2265_v31  ;;  %v2268_v18 = vpop.xlane.xlu1 %2267  ;;  %9495 = vmatmul.msk.f32.gmra.mxu0 %vm637_vm6, %v1536_v20  ;;  %v1537_v31 = vmul.f32 %v10543_v53, %v12572_v63  ;;  %v12811_v20 = vadd.f32 %v12639_v34, %v3303_v32 }
 0x4e6   :  { %v2276_v24 = vsub.f32 %v12629_v5, %v2268_v18  ;;  %v2624_v10 = vmul.f32 %v2618_v1, %v12611_v52 }
 0x4e7   :  { %v2284_v0 = vmul.f32 1.442695, %v2275_v21  ;;  %3323 = vmax.xlane.f32.xlu2 %v3322_v28  ;;  %v3325_v63 = vsel %vm637_vm6, %v12811_v20, -inf }
 0x4e8   :  { %v12804_v59 = vadd.f32 %v12563_v55, %v2624_v10  ;;  %v2286_v17 = vmul.f32 1.442695, %v2276_v24 }
 0x4e9   :  { %10546 = vpow2.f32 %v2284_v0  ;;  %2642 = vmax.xlane.f32.xlu0 %v2641_v51 }
 0x4ea   :  { %v10545_v43 = vpop.eup %10544  ;;  %10548 = vrcp.f32 %v1888_v14  ;;  %v2644_v5 = vsel %vm637_vm6, %v12804_v59, -inf }
 0x4eb   :  { %v2619_v35 = vmul.f32 %v10545_v43, %v12606_v60  ;;  %2645 = vmax.xlane.f32.xlu1 %v2644_v5  ;;  %10550 = vpow2.f32 %v2286_v17 }
 0x4ec   :  { %v2949_v29 = vpop.xlane.xlu0 %2948 }
 0x4ed   :  { %v2955_v8 = vsub.f32 %v12642_v23, %v2949_v29  ;;  %v2625_v21 = vmul.f32 %v2619_v35, %v12636_v7  ;;  %v1894_v1 = vpop.xlane.xlu1 %1893  ;;  %9496 = vmatmul.msk.f32.gmra.mxu0 %vm637_vm6, %v1537_v31 }
 0x4ee   :  { %v2271_v14 = vpop.xlane.xlu2 %2270 }
 0x4ef   :  { %v12816_v18 = vpop.eup %10546  ;;  %v2966_v0 = vmul.f32 1.442695, %v2955_v8  ;;  %v2277_v60 = vsub.f32 %v12653_v54, %v2271_v14  ;;  %v12820_v24 = vadd.f32 %v12639_v34, %v2625_v21 }
 0x4f0   :  { %v2299_v23 = vsel %vm637_vm6, %v12816_v18, 0.0  ;;  %v10549_v28 = vpop.eup %10548 }
 0x4f1   :  { %10552 = vpow2.f32 %v2966_v0  ;;  %3326 = vmax.xlane.f32.xlu0 %v3325_v63  ;;  %2300 = vadd.xlane.f32.xlu2 %v2299_v23  ;;  %v2647_v10 = vsel %vm637_vm6, %v12820_v24, -inf  ;;  %v2288_v32 = vmul.f32 1.442695, %v2277_v60  ;;  %v1910_v51 = vmul.f32 %v10549_v28, %v12586_v19  ;;  %v12829_v53 = vpop.eup %10550 }
 0x4f2   :  { %v2302_v29 = vsel %vm637_vm6, %v12829_v53, 0.0 }
 0x4f3   :  { %2648 = vmax.xlane.f32.xlu1 %v2647_v10 }
 0x4f4   :  { %v1891_v54 = vpop.xlane.xlu0 %1890 }
 0x4f5   :  { %10554 = vrcp.f32 %v1891_v54  ;;  %v3312_v43 = vpop.xlane.xlu1 %3311  ;;  %9539 = vmatmul.msk.f32.vlgmr.msrb.gmra.mxu0 %vm637_vm6, %v1910_v51 }
 0x4f6   :  { %v1897_v17 = vpop.xlane.xlu2 %1896  ;;  %10556 = vpow2.f32 %v2288_v32  ;;  %v3328_v35 = vsub.f32 %v12666_v42, %v3312_v43  ;;  %2726 = vmatpush.msrb.mxu0 %v12694_v45 }
 0x4f7   :  { %v12832_v5 = vpop.eup %10552  ;;  %10558 = vrcp.f32 %v1894_v1 }
 0x4f8   :  { %v2983_v19 = vsel %vm637_vm6, %v12832_v5, 0.0  ;;  %v3334_v31 = vmul.f32 1.442695, %v3328_v35  ;;  %2727 = vmatpush.msrb.mxu0 %v12690_v57 }
 0x4f9   :  { %2303 = vadd.xlane.f32.xlu0 %v2302_v29  ;;  %2984 = vadd.xlane.f32.xlu2 %v2983_v19 }
 0x4fa   :  { %10560 = vpow2.f32 %v3334_v31  ;;  %2728 = vmatpush.msrb.mxu0 %v12688_v49 }
 0x4fb   :  { %v10555_v8 = vpop.eup %10554 }
 0x4fc   :  { %v2970_v21 = vpop.xlane.xlu0 %2969  ;;  %v1911_v14 = vmul.f32 %v10555_v8, %v12663_v56  ;;  %v12843_v42 = vpop.eup %10556  ;;  %2729 = vmatpush.msrb.mxu0 %v12677_v13 }
 0x4fd   :  { %10562 = vrcp.f32 %v2970_v21  ;;  %v10559_v1 = vpop.eup %10558  ;;  %v2305_v63 = vsel %vm637_vm6, %v12843_v42, 0.0 }
 0x4fe   :  { %9540 = vmatmul.msk.f32.gmra.mxu0 %vm637_vm6, %v1911_v14  ;;  %v3315_v0 = vpop.xlane.xlu2 %3314  ;;  %10564 = vrcp.f32 %v1897_v17 }
 0x4ff   :  { %v3329_v60 = vsub.f32 %v12682_v4, %v3315_v0  ;;  %2730 = vmatpush.msrb.mxu0 %v12655_v9  ;;  %v1912_v4 = vmul.f32 %v10559_v1, %v12647_v15 }
 0x500   :  { %v12850_v23 = vpop.eup %10560 }
 0x501   :  { %v3336_v28 = vmul.f32 1.442695, %v3329_v60  ;;  %2306 = vadd.xlane.f32.xlu0 %v2305_v63  ;;  %v3346_v56 = vsel %vm637_vm6, %v12850_v23, 0.0  ;;  %2731 = vmatpush.msrb.mxu0 %v12621_v26 }
 0x502   :  { %3347 = vadd.xlane.f32.xlu2 %v3346_v56 }
 0x503   :  { %v10563_v10 = vpop.eup %10562  ;;  %10566 = vpow2.f32 %v3336_v28 }
 0x504   :  { %v2992_v32 = vmul.f32 %v10563_v10, %v12679_v46  ;;  %v10565_v54 = vpop.eup %10564 }
 0x505   :  { %v1913_v15 = vmul.f32 %v10565_v54, %v12668_v44 }
 0x506   :  { %9541 = vmatmul.msk.f32.gmra.mxu0 %vm637_vm6, %v1912_v4  ;;  %v2998_v51 = vmul.f32 %v2992_v32, %v12457_v62 }
 0x508   :  { %v12861_v43 = vadd.f32 %v12472_v25, %v2998_v51 }
 0x509   :  { %v12863_v17 = vpop.eup %10566 }
 0x50a   :  { %v3010_v35 = vsel %vm637_vm6, %v12861_v43, -inf  ;;  %v3349_v29 = vsel %vm637_vm6, %v12863_v17, 0.0 }
 0x50b   :  { %3011 = vmax.xlane.f32.xlu1 %v3010_v35  ;;  %3350 = vadd.xlane.f32.xlu2 %v3349_v29 }
 0x50e   :  { %9542 = vmatmul.msk.f32.gmra.mxu0 %vm637_vm6, %v1913_v15 }
 0x51e   :  { %v2973_v46 = vpop.xlane.xlu1 %2972 }
 0x51f   :  { %10568 = vrcp.f32 %v2973_v46 }
 0x525   :  { %v10569_v62 = vpop.eup %10568 }
 0x526   :  { %v2993_v25 = vmul.f32 %v10569_v62, %v12702_v33  ;;  %v1903_v14 = vpop.xlane.xlu1 %1902 }
 0x528   :  { %v2999_v19 = vmul.f32 %v2993_v25, %v12495_v41 }
 0x52a   :  { %v12874_v31 = vadd.f32 %v12442_v11, %v2999_v19 }
 0x52c   :  { %v2634_v8 = vpop.xlane.xlu0 %2633  ;;  %v3013_v21 = vsel %vm637_vm6, %v12874_v31, -inf }
 0x52d   :  { %v2650_v0 = vsub.f32 %v12717_v48, %v2634_v8  ;;  %3014 = vmax.xlane.f32.xlu1 %v3013_v21  ;;  %v12899_v21 = vpop.f32.mrf.mxu0 }
 0x52f   :  { %v2656_v44 = vmul.f32 1.442695, %v2650_v0 }
 0x531   :  { %10570 = vpow2.f32 %v2656_v44 }
 0x534   :  { %v1900_v60 = vpop.xlane.xlu0 %1899 }
 0x535   :  { %10572 = vrcp.f32 %v1900_v60  ;;  %v2637_v1 = vpop.xlane.xlu1 %2636 }
 0x536   :  { %v2651_v33 = vsub.f32 %v12726_v40, %v2637_v1 }
 0x537   :  { %v12880_v63 = vpop.eup %10570 }
 0x538   :  { %v2658_v41 = vmul.f32 1.442695, %v2651_v33  ;;  %v2668_v11 = vsel %vm637_vm6, %v12880_v63, 0.0 }
 0x539   :  { %2669 = vadd.xlane.f32.xlu0 %v2668_v11 }
 0x53a   :  { %10574 = vpow2.f32 %v2658_v41 }
 0x53b   :  { %v10573_v28 = vpop.eup %10572  ;;  %10576 = vrcp.f32 %v1903_v14 }
 0x53c   :  { %v3318_v56 = vpop.xlane.xlu0 %3317  ;;  %v1914_v48 = vmul.f32 %v10573_v28, %v12722_v36  ;;  %v15855_v36 = vld [vmem:[#allocation23_spill] sm:$0xff] }
 0x53d   :  { %v3330_v10 = vsub.f32 %v12736_v37, %v3318_v56  ;;  %v3321_v4 = vpop.xlane.xlu1 %3320 }
 0x53e   :  { %9543 = vmatmul.msk.f32.gmra.mxu0 %vm637_vm6, %v1914_v48  ;;  %v3331_v40 = vsub.f32 %v12740_v12, %v3321_v4 }
 0x53f   :  { %v3338_v32 = vmul.f32 1.442695, %v3330_v10  ;;  %v12914_v10 = vpop.f32.mrf.mxu0 }
 0x540   :  { %v12888_v51 = vpop.eup %10574  ;;  %v3340_v15 = vmul.f32 1.442695, %v3331_v40 }
 0x541   :  { %v10577_v54 = vpop.eup %10576  ;;  %10578 = vpow2.f32 %v3338_v32  ;;  %v2671_v35 = vsel %vm637_vm6, %v12888_v51, 0.0 }
 0x542   :  { %2672 = vadd.xlane.f32.xlu0 %v2671_v35  ;;  %v2976_v29 = vpop.xlane.xlu2 %2975  ;;  %v1915_v46 = vmul.f32 %v10577_v54, %v15855_v36 }
 0x543   :  { %10580 = vrcp.f32 %v2976_v29 }
 0x544   :  { %10582 = vpow2.f32 %v3340_v15 }
 0x546   :  { %9544 = vmatmul.msk.f32.gmra.mxu0 %vm637_vm6, %v1915_v46 }
 0x547   :  { %v12894_v37 = vpop.eup %10578 }
 0x548   :  { %v3352_v12 = vsel %vm637_vm6, %v12894_v37, 0.0 }
 0x549   :  { %v10581_v62 = vpop.eup %10580  ;;  %3353 = vadd.xlane.f32.xlu2 %v3352_v12  ;;  %v12933_v12 = vpop.f32.mrf.mxu0 }
 0x54a   :  { %v2292_v19 = vpop.xlane.xlu2 %2291  ;;  %v2994_v8 = vmul.f32 %v10581_v62, %v12750_v39  ;;  %v12902_v44 = vpop.eup %10582 }
 0x54b   :  { %v2298_v25 = vpop.xlane.xlu1 %2297  ;;  %v3355_v1 = vsel %vm637_vm6, %v12902_v44, 0.0 }
 0x54c   :  { %v2979_v14 = vpop.xlane.xlu0 %2978  ;;  %v3000_v0 = vmul.f32 %v2994_v8, %v12522_v27 }
 0x54d   :  { %10584 = vrcp.f32 %v2979_v14 }
 0x54e   :  { %10586 = vrcp.f32 %v2292_v19  ;;  %v12905_v60 = vadd.f32 %v12509_v38, %v3000_v0 }
 0x550   :  { %v3016_v33 = vsel %vm637_vm6, %v12905_v60, -inf }
 0x551   :  { %3356 = vadd.xlane.f32.xlu2 %v3355_v1  ;;  %3017 = vmax.xlane.f32.xlu1 %v3016_v33 }
 0x552   :  { %v2640_v11 = vpop.xlane.xlu2 %2639 }
 0x553   :  { %v10585_v39 = vpop.eup %10584  ;;  %v2982_v41 = vpop.xlane.xlu1 %2981  ;;  %v2652_v27 = vsub.f32 %v12773_v61, %v2640_v11 }
 0x554   :  { %v10587_v28 = vpop.eup %10586  ;;  %v2295_v56 = vpop.xlane.xlu0 %2294  ;;  %10588 = vrcp.f32 %v2982_v41  ;;  %v2995_v48 = vmul.f32 %v10585_v39, %v12763_v3 }
 0x555   :  { %v2314_v38 = vmul.f32 %v10587_v28, %v12757_v30  ;;  %10590 = vrcp.f32 %v2295_v56  ;;  %v2660_v4 = vmul.f32 1.442695, %v2652_v27  ;;  %v12956_v28 = vpop.f32.mrf.mxu0 }
 0x556   :  { %v3001_v32 = vmul.f32 %v2995_v48, %v12592_v6 }
 0x557   :  { %9569 = vmatmul.msk.f32.vlgmr.msra.gmra.mxu0 %vm637_vm6, %v2314_v38  ;;  %10592 = vpow2.f32 %v2660_v4 }
 0x558   :  { %v12919_v40 = vadd.f32 %v12544_v50, %v3001_v32  ;;  %3104 = vmatpush.msra.mxu0 %v12694_v45  ;;  %10594 = vrcp.f32 %v2298_v25 }
 0x55a   :  { %v10589_v54 = vpop.eup %10588  ;;  %v3019_v3 = vsel %vm637_vm6, %v12919_v40, -inf  ;;  %3105 = vmatpush.msra.mxu0 %v12690_v57  ;;  %v3324_v61 = vpop.xlane.xlu2 %3323 }
 0x55b   :  { %v10591_v30 = vpop.eup %10590  ;;  %3020 = vmax.xlane.f32.xlu1 %v3019_v3  ;;  %v2996_v35 = vmul.f32 %v10589_v54, %v12778_v58  ;;  %v3332_v29 = vsub.f32 %v12788_v22, %v3324_v61 }
 0x55c   :  { %v2643_v6 = vpop.xlane.xlu0 %2642  ;;  %v2315_v50 = vmul.f32 %v10591_v30, %v12776_v16  ;;  %3106 = vmatpush.msra.mxu0 %v12688_v49 }
 0x55d   :  { %v2653_v15 = vsub.f32 %v12792_v47, %v2643_v6  ;;  %v3002_v36 = vmul.f32 %v2996_v35, %v12611_v52  ;;  %v12931_v46 = vpop.eup %10592  ;;  %v3342_v62 = vmul.f32 1.442695, %v3332_v29  ;;  %v12971_v30 = vpop.f32.mrf.mxu0 }
 0x55e   :  { %3107 = vmatpush.msra.mxu0 %v12677_v13  ;;  %v2646_v25 = vpop.xlane.xlu1 %2645  ;;  %v2674_v16 = vsel %vm637_vm6, %v12931_v46, 0.0  ;;  %v10595_v19 = vpop.eup %10594 }
 0x55f   :  { %v2662_v58 = vmul.f32 1.442695, %v2653_v15  ;;  %9570 = vmatmul.msk.f32.gmra.mxu0 %vm637_vm6, %v2315_v50  ;;  %v12940_v22 = vadd.f32 %v12563_v55, %v3002_v36  ;;  %10596 = vpow2.f32 %v3342_v62  ;;  %v2654_v52 = vsub.f32 %v12804_v59, %v2646_v25  ;;  %2675 = vadd.xlane.f32.xlu0 %v2674_v16 }
 0x560   :  { %3108 = vmatpush.msra.mxu0 %v12655_v9  ;;  %v2316_v1 = vmul.f32 %v10595_v19, %v12761_v2 }
 0x561   :  { %10598 = vpow2.f32 %v2662_v58  ;;  %v3022_v47 = vsel %vm637_vm6, %v12940_v22, -inf  ;;  %v2664_v8 = vmul.f32 1.442695, %v2654_v52 }
 0x562   :  { %3109 = vmatpush.msra.mxu0 %v12621_v26 }
 0x563   :  { %3023 = vmax.xlane.f32.xlu1 %v3022_v47 }
 0x564   :  { %v3327_v14 = vpop.xlane.xlu0 %3326  ;;  %v2301_v0 = vpop.xlane.xlu2 %2300 }
 0x565   :  { %v3333_v55 = vsub.f32 %v12811_v20, %v3327_v14  ;;  %10600 = vrcp.f32 %v2301_v0  ;;  %v12949_v59 = vpop.eup %10596 }
 0x566   :  { %10602 = vpow2.f32 %v2664_v8  ;;  %v2649_v41 = vpop.xlane.xlu1 %2648  ;;  %v3358_v11 = vsel %vm637_vm6, %v12949_v59, 0.0 }
 0x567   :  { %v12951_v33 = vpop.eup %10598  ;;  %v3344_v39 = vmul.f32 1.442695, %v3333_v55  ;;  %9571 = vmatmul.msk.f32.gmra.mxu0 %vm637_vm6, %v2316_v1  ;;  %v2655_v56 = vsub.f32 %v12820_v24, %v2649_v41  ;;  %3359 = vadd.xlane.f32.xlu2 %v3358_v11  ;;  %v10699_v55 = vld [vmem:[%s15837_s17] sm:$0xff] }
 0x568   :  { %v2677_v20 = vsel %vm637_vm6, %v12951_v33, 0.0 }
 0x569   :  { %10604 = vpow2.f32 %v3344_v39  ;;  %2678 = vadd.xlane.f32.xlu0 %v2677_v20  ;;  %v2666_v27 = vmul.f32 1.442695, %v2655_v56 }
 0x56b   :  { %v10601_v2 = vpop.eup %10600 }
 0x56c   :  { %v2304_v48 = vpop.xlane.xlu0 %2303  ;;  %v2985_v38 = vpop.xlane.xlu2 %2984  ;;  %v2317_v4 = vmul.f32 %v10601_v2, %v12816_v18  ;;  %v10701_v2 = vld [vmem:[%s15837_s17 + $0x8] sm:$0xff] }
 0x56d   :  { %v12962_v32 = vpop.eup %10602  ;;  %10606 = vrcp.f32 %v2304_v48 }
 0x56e   :  { %10608 = vrcp.f32 %v2985_v38  ;;  %v2680_v24 = vsel %vm637_vm6, %v12962_v32, 0.0 }
 0x56f   :  { %v12964_v54 = vpop.eup %10604  ;;  %10610 = vpow2.f32 %v2666_v27  ;;  %9572 = vmatmul.msk.f32.gmra.mxu0 %vm637_vm6, %v2317_v4 }
 0x570   :  { %v3361_v3 = vsel %vm637_vm6, %v12964_v54, 0.0 }
 0x571   :  { %2681 = vadd.xlane.f32.xlu0 %v2680_v24  ;;  %3362 = vadd.xlane.f32.xlu2 %v3361_v3 }
 0x573   :  { %v10607_v18 = vpop.eup %10606 }
 0x574   :  { %v10609_v61 = vpop.eup %10608  ;;  %v2307_v35 = vpop.xlane.xlu0 %2306  ;;  %v2318_v6 = vmul.f32 %v10607_v18, %v12829_v53 }
 0x575   :  { %v12974_v29 = vpop.eup %10610  ;;  %10612 = vrcp.f32 %v2307_v35  ;;  %v2997_v50 = vmul.f32 %v10609_v61, %v12832_v5  ;;  %v3348_v15 = vpop.xlane.xlu2 %3347 }
 0x576   :  { %10614 = vrcp.f32 %v3348_v15  ;;  %v2683_v62 = vsel %vm637_vm6, %v12974_v29, 0.0  ;;  %v12984_v53 = vpop.f32.mrf.mxu0 }
 0x577   :  { %9573 = vmatmul.msk.f32.gmra.mxu0 %vm637_vm6, %v2318_v6  ;;  %v3003_v36 = vmul.f32 %v2997_v50, %v12636_v7 }
 0x579   :  { %2684 = vadd.xlane.f32.xlu2 %v2683_v62  ;;  %v12982_v58 = vadd.f32 %v12639_v34, %v3003_v36  ;;  %v10698_v34 = vld [vmem:[%s15852_s3] sm:$0xff] }
 0x57b   :  { %v10613_v25 = vpop.eup %10612  ;;  %v3025_v5 = vsel %vm637_vm6, %v12982_v58, -inf }
 0x57c   :  { %3026 = vmax.xlane.f32.xlu1 %v3025_v5  ;;  %v2319_v16 = vmul.f32 %v10613_v25, %v12843_v42  ;;  %v10615_v52 = vpop.eup %10614 }
 0x57d   :  { %v3370_v19 = vmul.f32 %v10615_v52, %v12850_v23 }
 0x57e   :  { %v3012_v7 = vpop.xlane.xlu1 %3011  ;;  %v3351_v47 = vpop.xlane.xlu2 %3350 }
 0x57f   :  { %v3028_v8 = vsub.f32 %v12861_v43, %v3012_v7  ;;  %9574 = vmatmul.msk.f32.gmra.mxu0 %vm637_vm6, %v2319_v16  ;;  %10616 = vrcp.f32 %v3351_v47  ;;  %v3376_v14 = vmul.f32 %v10698_v34, %v3370_v19  ;;  %v12996_v42 = vpop.f32.mrf.mxu0  ;;  %v10700_v43 = vld [vmem:[%s15852_s3 + $0x8] sm:$0xff] }
 0x581   :  { %v3034_v0 = vmul.f32 1.442695, %v3028_v8  ;;  %v12994_v1 = vadd.f32 %v10699_v55, %v3376_v14  ;;  %v10703_v8 = vld [vmem:[%s15837_s17 + $0x10] sm:$0xff] }
 0x583   :  { %10618 = vpow2.f32 %v3034_v0  ;;  %v3388_v39 = vsel %vm637_vm6, %v12994_v1, -inf }
 0x584   :  { %3389 = vmax.xlane.f32.xlu0 %v3388_v39 }
 0x585   :  { %v10617_v41 = vpop.eup %10616 }
 0x586   :  { %v3371_v23 = vmul.f32 %v10617_v41, %v12863_v17 }
 0x587   :  { %v13011_v38 = vpop.f32.mrf.mxu0 }
 0x588   :  { %v3377_v11 = vmul.f32 %v10700_v43, %v3371_v23 }
 0x589   :  { %v13002_v56 = vpop.eup %10618 }
 0x58a   :  { %v3046_v20 = vsel %vm637_vm6, %v13002_v56, 0.0  ;;  %v13007_v27 = vadd.f32 %v10701_v2, %v3377_v11  ;;  %v10705_v11 = vld [vmem:[%s15837_s17 + $0x18] sm:$0xff] }
 0x58b   :  { %3047 = vadd.xlane.f32.xlu1 %v3046_v20 }
 0x58c   :  { %v3391_v48 = vsel %vm637_vm6, %v13007_v27, -inf }
 0x58d   :  { %3392 = vmax.xlane.f32.xlu2 %v3391_v48 }
 0x58f   :  { %v13013_v4 = vpop.f32.mrf.mxu0 }
 0x597   :  { %v13015_v24 = vpop.f32.mrf.mxu0 }
 0x59f   :  { %v13020_v35 = vpop.f32.mrf.mxu0 }
 0x5a0   :  { %v3015_v17 = vpop.xlane.xlu1 %3014 }
 0x5a1   :  { %v3029_v3 = vsub.f32 %v12874_v31, %v3015_v17 }
 0x5a3   :  { %v3036_v18 = vmul.f32 1.442695, %v3029_v3 }
 0x5a5   :  { %10620 = vpow2.f32 %v3036_v18 }
 0x5a7   :  { %v13025_v62 = vpop.f32.mrf.mxu0 }
 0x5ab   :  { %v13018_v61 = vpop.eup %10620 }
 0x5ac   :  { %v2670_v6 = vpop.xlane.xlu0 %2669  ;;  %v3049_v50 = vsel %vm637_vm6, %v13018_v61, 0.0 }
 0x5ad   :  { %10622 = vrcp.f32 %v2670_v6  ;;  %3050 = vadd.xlane.f32.xlu0 %v3049_v50 }
 0x5af   :  { %v13031_v16 = vpop.f32.mrf.mxu0 }
 0x5b3   :  { %v10623_v15 = vpop.eup %10622 }
 0x5b4   :  { %v2692_v36 = vmul.f32 %v10623_v15, %v12880_v63 }
 0x5b5   :  { %v2673_v25 = vpop.xlane.xlu0 %2672 }
 0x5b6   :  { %10624 = vrcp.f32 %v2673_v25  ;;  %9617 = vmatmul.msk.f32.vlgmr.msrb.gmra.mxu0 %vm637_vm6, %v2692_v36 }
 0x5b7   :  { %3482 = vmatpush.msrb.mxu0 %v12694_v45  ;;  %v13039_v7 = vpop.f32.mrf.mxu0 }
 0x5b9   :  { %3483 = vmatpush.msrb.mxu0 %v12690_v57 }
 0x5bb   :  { %3484 = vmatpush.msrb.mxu0 %v12688_v49 }
 0x5bc   :  { %v10625_v31 = vpop.eup %10624  ;;  %v3354_v5 = vpop.xlane.xlu2 %3353 }
 0x5bd   :  { %10626 = vrcp.f32 %v3354_v5  ;;  %v2693_v63 = vmul.f32 %v10625_v31, %v12888_v51  ;;  %3485 = vmatpush.msrb.mxu0 %v12677_v13  ;;  %v10702_v51 = vld [vmem:[%s15852_s3 + $0x10] sm:$0xff] }
 0x5bf   :  { %9618 = vmatmul.msk.f32.gmra.mxu0 %vm637_vm6, %v2693_v63  ;;  %v13053_v41 = vpop.f32.mrf.mxu0 }
 0x5c0   :  { %3486 = vmatpush.msrb.mxu0 %v12655_v9 }
 0x5c2   :  { %3487 = vmatpush.msrb.mxu0 %v12621_v26 }
 0x5c3   :  { %v10627_v57 = vpop.eup %10626 }
 0x5c4   :  { %v3018_v45 = vpop.xlane.xlu1 %3017  ;;  %v3357_v49 = vpop.xlane.xlu2 %3356  ;;  %v3372_v52 = vmul.f32 %v10627_v57, %v12894_v37 }
 0x5c5   :  { %v3030_v47 = vsub.f32 %v12905_v60, %v3018_v45  ;;  %10628 = vrcp.f32 %v3357_v49  ;;  %v10704_v60 = vld [vmem:[%s15852_s3 + $0x18] sm:$0xff] }
 0x5c6   :  { %v3378_v19 = vmul.f32 %v10702_v51, %v3372_v52 }
 0x5c7   :  { %v3038_v13 = vmul.f32 1.442695, %v3030_v47  ;;  %v13065_v6 = vpop.f32.mrf.mxu0  ;;  %v10706_v47 = vld [vmem:[%s15852_s3 + $0x20] sm:$0xff] }
 0x5c8   :  { %v13044_v34 = vadd.f32 %v10703_v8, %v3378_v19  ;;  %v10707_v19 = vld [vmem:[%s15837_s17 + $0x20] sm:$0xff] }
 0x5c9   :  { %10630 = vpow2.f32 %v3038_v13 }
 0x5ca   :  { %v3394_v26 = vsel %vm637_vm6, %v13044_v34, -inf }
 0x5cb   :  { %v10629_v9 = vpop.eup %10628  ;;  %3395 = vmax.xlane.f32.xlu1 %v3394_v26 }
 0x5cc   :  { %v3373_v37 = vmul.f32 %v10629_v9, %v12902_v44 }
 0x5ce   :  { %v3021_v14 = vpop.xlane.xlu1 %3020  ;;  %v3379_v55 = vmul.f32 %v10704_v60, %v3373_v37  ;;  %v10708_v60 = vld [vmem:[%s15852_s3 + $0x28] sm:$0xff] }
 0x5cf   :  { %v3031_v0 = vsub.f32 %v12919_v40, %v3021_v14  ;;  %v13051_v39 = vpop.eup %10630  ;;  %v13073_v5 = vpop.f32.mrf.mxu0 }
 0x5d0   :  { %v3052_v43 = vsel %vm637_vm6, %v13051_v39, 0.0  ;;  %v13058_v20 = vadd.f32 %v10705_v11, %v3379_v55 }
 0x5d1   :  { %v3040_v23 = vmul.f32 1.442695, %v3031_v0  ;;  %3053 = vadd.xlane.f32.xlu2 %v3052_v43  ;;  %v10709_v43 = vld [vmem:[%s15837_s17 + $0x28] sm:$0xff] }
 0x5d2   :  { %v2676_v2 = vpop.xlane.xlu0 %2675  ;;  %v3397_v44 = vsel %vm637_vm6, %v13058_v20, -inf }
 0x5d3   :  { %10632 = vpow2.f32 %v3040_v23  ;;  %3398 = vmax.xlane.f32.xlu0 %v3397_v44 }
 0x5d4   :  { %10634 = vrcp.f32 %v2676_v2 }
 0x5d6   :  { %v3024_v40 = vpop.xlane.xlu1 %3023 }
 0x5d7   :  { %v3032_v48 = vsub.f32 %v12940_v22, %v3024_v40  ;;  %v13086_v9 = vpop.f32.mrf.mxu0 }
 0x5d9   :  { %v13063_v17 = vpop.eup %10632  ;;  %v3042_v3 = vmul.f32 1.442695, %v3032_v48 }
 0x5da   :  { %v10635_v18 = vpop.eup %10634  ;;  %v3055_v50 = vsel %vm637_vm6, %v13063_v17, 0.0  ;;  %v3360_v15 = vpop.xlane.xlu2 %3359 }
 0x5db   :  { %10636 = vpow2.f32 %v3042_v3  ;;  %3056 = vadd.xlane.f32.xlu1 %v3055_v50  ;;  %v2694_v36 = vmul.f32 %v10635_v18, %v12931_v46 }
 0x5dc   :  { %v2679_v25 = vpop.xlane.xlu0 %2678  ;;  %10638 = vrcp.f32 %v3360_v15 }
 0x5dd   :  { %10640 = vrcp.f32 %v2679_v25  ;;  %9619 = vmatmul.msk.f32.gmra.mxu0 %vm637_vm6, %v2694_v36 }
 0x5e1   :  { %v13071_v22 = vpop.eup %10636 }
 0x5e2   :  { %v10639_v31 = vpop.eup %10638  ;;  %v3058_v63 = vsel %vm637_vm6, %v13071_v22, 0.0 }
 0x5e3   :  { %v10641_v57 = vpop.eup %10640  ;;  %3059 = vadd.xlane.f32.xlu0 %v3058_v63  ;;  %v3374_v45 = vmul.f32 %v10639_v31, %v12949_v59 }
 0x5e4   :  { %v2682_v46 = vpop.xlane.xlu0 %2681  ;;  %v2695_v49 = vmul.f32 %v10641_v57, %v12951_v33  ;;  %v3363_v52 = vpop.xlane.xlu2 %3362 }
 0x5e5   :  { %10642 = vrcp.f32 %v2682_v46  ;;  %v3380_v51 = vmul.f32 %v10706_v47, %v3374_v45 }
 0x5e6   :  { %10644 = vrcp.f32 %v3363_v52  ;;  %9620 = vmatmul.msk.f32.gmra.mxu0 %vm637_vm6, %v2695_v49 }
 0x5e7   :  { %v13082_v13 = vadd.f32 %v10707_v19, %v3380_v51 }
 0x5e9   :  { %v3400_v8 = vsel %vm637_vm6, %v13082_v13, -inf }
 0x5ea   :  { %3401 = vmax.xlane.f32.xlu2 %v3400_v8 }
 0x5eb   :  { %v10643_v59 = vpop.eup %10642 }
 0x5ec   :  { %v10645_v26 = vpop.eup %10644  ;;  %v2696_v33 = vmul.f32 %v10643_v59, %v12962_v32  ;;  %v2685_v37 = vpop.xlane.xlu2 %2684 }
 0x5ed   :  { %v3375_v14 = vmul.f32 %v10645_v26, %v12964_v54  ;;  %10646 = vrcp.f32 %v2685_v37  ;;  %v13099_v54 = vpop.f32.mrf.mxu0 }
 0x5ee   :  { %9621 = vmatmul.msk.f32.gmra.mxu0 %vm637_vm6, %v2696_v33 }
 0x5ef   :  { %v3027_v0 = vpop.xlane.xlu1 %3026  ;;  %v3381_v55 = vmul.f32 %v10708_v60, %v3375_v14 }
 0x5f0   :  { %v3033_v23 = vsub.f32 %v12982_v58, %v3027_v0 }
 0x5f1   :  { %v13094_v11 = vadd.f32 %v10709_v43, %v3381_v55 }
 0x5f2   :  { %v3044_v2 = vmul.f32 1.442695, %v3033_v23 }
 0x5f3   :  { %v3403_v44 = vsel %vm637_vm6, %v13094_v11, -inf  ;;  %v10647_v40 = vpop.eup %10646 }
 0x5f4   :  { %10648 = vpow2.f32 %v3044_v2  ;;  %3404 = vmax.xlane.f32.xlu1 %v3403_v44  ;;  %v2697_v32 = vmul.f32 %v10647_v40, %v12974_v29 }
 0x5f5   :  { %v13107_v36 = vpop.f32.mrf.mxu0 }
 0x5f6   :  { %9622 = vmatmul.msk.f32.gmra.mxu0 %vm637_vm6, %v2697_v32 }
 0x5f7   :  { %v3390_v48 = vpop.xlane.xlu0 %3389 }
 0x5f8   :  { %v3406_v3 = vsub.f32 %v12994_v1, %v3390_v48 }
 0x5fa   :  { %v13103_v58 = vpop.eup %10648  ;;  %v3412_v18 = vmul.f32 1.442695, %v3406_v3 }
 0x5fb   :  { %v3061_v50 = vsel %vm637_vm6, %v13103_v58, 0.0 }
 0x5fc   :  { %3062 = vadd.xlane.f32.xlu2 %v3061_v50  ;;  %10650 = vpow2.f32 %v3412_v18 }
 0x5fd   :  { %v13116_v46 = vpop.f32.mrf.mxu0 }
 0x5fe   :  { %v3048_v15 = vpop.xlane.xlu1 %3047 }
 0x5ff   :  { %10652 = vrcp.f32 %v3048_v15 }
 0x600   :  { %v3393_v29 = vpop.xlane.xlu2 %3392 }
 0x601   :  { %v3407_v25 = vsub.f32 %v13007_v27, %v3393_v29 }
 0x602   :  { %v13110_v31 = vpop.eup %10650 }
 0x603   :  { %v3414_v63 = vmul.f32 1.442695, %v3407_v25  ;;  %v3424_v1 = vsel %vm637_vm6, %v13110_v31, 0.0 }
 0x604   :  { %3425 = vadd.xlane.f32.xlu0 %v3424_v1 }
 0x605   :  { %v10653_v57 = vpop.eup %10652  ;;  %10654 = vpow2.f32 %v3414_v63  ;;  %v13122_v52 = vpop.f32.mrf.mxu0 }
 0x606   :  { %v3070_v45 = vmul.f32 %v10653_v57, %v13002_v56 }
 0x608   :  { %9665 = vmatmul.msk.f32.vlgmr.msra.gmra.mxu0 %vm637_vm6, %v3070_v45 }
 0x60b   :  { %v13118_v49 = vpop.eup %10654 }
 0x60c   :  { %v3427_v27 = vsel %vm637_vm6, %v13118_v49, 0.0 }
 0x60d   :  { %3428 = vadd.xlane.f32.xlu1 %v3427_v27  ;;  %v13124_v47 = vpop.f32.mrf.mxu0 }
 0x615   :  { %v13126_v19 = vpop.f32.mrf.mxu0 }
 0x61d   :  { %v13130_v59 = vpop.f32.mrf.mxu0 }
 0x620   :  { %v3051_v51 = vpop.xlane.xlu0 %3050 }
 0x621   :  { %10656 = vrcp.f32 %v3051_v51 }
 0x625   :  { %v13132_v26 = vpop.f32.mrf.mxu0 }
 0x627   :  { %v10657_v8 = vpop.eup %10656 }
 0x628   :  { %v3071_v56 = vmul.f32 %v10657_v8, %v13018_v61 }
 0x62a   :  { %9666 = vmatmul.msk.f32.gmra.mxu0 %vm637_vm6, %v3071_v56 }
 0x62d   :  { %v13135_v14 = vpop.f32.mrf.mxu0 }
 0x635   :  { %v13142_v40 = vpop.f32.mrf.mxu0 }
 0x63d   :  { %v13150_v18 = vpop.f32.mrf.mxu0 }
 0x63e   :  { %v3396_v33 = vpop.xlane.xlu1 %3395 }
 0x63f   :  { %v3408_v37 = vsub.f32 %v13044_v34, %v3396_v33 }
 0x641   :  { %v3416_v0 = vmul.f32 1.442695, %v3408_v37 }
 0x643   :  { %10658 = vpow2.f32 %v3416_v0 }
 0x644   :  { %v3054_v60 = vpop.xlane.xlu2 %3053 }
 0x645   :  { %10660 = vrcp.f32 %v3054_v60  ;;  %v13156_v1 = vpop.f32.mrf.mxu0 }
 0x646   :  { %v3399_v55 = vpop.xlane.xlu0 %3398 }
 0x647   :  { %v3409_v23 = vsub.f32 %v13058_v20, %v3399_v55 }
 0x649   :  { %v13138_v43 = vpop.eup %10658  ;;  %v3418_v61 = vmul.f32 1.442695, %v3409_v23 }
 0x64a   :  { %v3430_v2 = vsel %vm637_vm6, %v13138_v43, 0.0 }
 0x64b   :  { %v10661_v44 = vpop.eup %10660  ;;  %10662 = vpow2.f32 %v3418_v61  ;;  %3431 = vadd.xlane.f32.xlu2 %v3430_v2 }
 0x64c   :  { %v3072_v34 = vmul.f32 %v10661_v44, %v13051_v39 }
 0x64d   :  { %v2733_v51 = vpop.f32.mrf.mxu0 }
 0x64e   :  { %v3057_v32 = vpop.xlane.xlu1 %3056  ;;  %9667 = vmatmul.msk.f32.gmra.mxu0 %vm637_vm6, %v3072_v34 }
 0x64f   :  { %10664 = vrcp.f32 %v3057_v32 }
 0x651   :  { %v13146_v48 = vpop.eup %10662 }
 0x652   :  { %v3433_v20 = vsel %vm637_vm6, %v13146_v48, 0.0 }
 0x653   :  { %3434 = vadd.xlane.f32.xlu0 %v3433_v20 }
 0x655   :  { %v10665_v3 = vpop.eup %10664  ;;  %v2736_v33 = vpop.f32.mrf.mxu0 }
 0x656   :  { %v3060_v50 = vpop.xlane.xlu0 %3059  ;;  %v3073_v15 = vmul.f32 %v10665_v3, %v13063_v17 }
 0x657   :  { %10666 = vrcp.f32 %v3060_v50 }
 0x658   :  { %9668 = vmatmul.msk.f32.gmra.mxu0 %vm637_vm6, %v3073_v15 }
 0x65d   :  { %v10667_v39 = vpop.eup %10666  ;;  %v3402_v29 = vpop.xlane.xlu2 %3401 }
 0x65e   :  { %v3410_v25 = vsub.f32 %v13082_v13, %v3402_v29  ;;  %v3074_v63 = vmul.f32 %v10667_v39, %v13071_v22  ;;  %v2739_v60 = vpop.f32.mrf.mxu0  ;;  %v3758_v39 = vld [vmem:[%s15856_s12 + $0x78] sm:$0xff]  ;;  %v3756_v29 = vld [vmem:[%s15856_s12 + $0x68] sm:$0xff] }
 0x65f   :  { %3759 = vmatpush.msrb.mxu1 %v3758_v39 }
 0x660   :  { %v3420_v57 = vmul.f32 1.442695, %v3410_v25  ;;  %9669 = vmatmul.msk.f32.gmra.mxu0 %vm637_vm6, %v3074_v63  ;;  %v3755_v63 = vld [vmem:[%s15856_s12 + $0x60] sm:$0xff] }
 0x662   :  { %10668 = vpow2.f32 %v3420_v57 }
 0x667   :  { %v3405_v45 = vpop.xlane.xlu1 %3404  ;;  %3513 = vrot.lane.b32.xlu0 %v12996_v42, %s10754_s8 }
 0x668   :  { %v13159_v27 = vpop.eup %10668  ;;  %v3411_v17 = vsub.f32 %v13094_v11, %v3405_v45  ;;  %v3754_v45 = vld [vmem:[%s15856_s12 + $0x58] sm:$0xff] }
 0x669   :  { %v3436_v13 = vsel %vm637_vm6, %v13159_v27, 0.0 }
 0x66a   :  { %v3422_v22 = vmul.f32 1.442695, %v3411_v17  ;;  %3437 = vadd.xlane.f32.xlu1 %v3436_v13 }
 0x66c   :  { %10670 = vpow2.f32 %v3422_v22  ;;  %v3752_v22 = vld [vmem:[%s15856_s12 + $0x48] sm:$0xff] }
 0x66f   :  { %v3063_v8 = vpop.xlane.xlu2 %3062  ;;  %3541 = vrot.lane.b32.xlu0 %v13053_v41, %s10755_s14 }
 0x670   :  { %10672 = vrcp.f32 %v3063_v8  ;;  %v3751_v8 = vld [vmem:[%s15856_s12 + $0x40] sm:$0xff] }
 0x672   :  { %v13168_v56 = vpop.eup %10670 }
 0x673   :  { %v3439_v11 = vsel %vm637_vm6, %v13168_v56, 0.0 }
 0x674   :  { %3440 = vadd.xlane.f32.xlu2 %v3439_v11 }
 0x676   :  { %v10673_v42 = vpop.eup %10672 }
 0x677   :  { %v3075_v37 = vmul.f32 %v10673_v42, %v13103_v58  ;;  %v3426_v0 = vpop.xlane.xlu0 %3425  ;;  %3519 = vrot.lane.b32.xlu0 %v13015_v24, %s10754_s8  ;;  %v2742_v58 = vpop.f32.mrf.mxu0  ;;  %v3749_v42 = vld [vmem:[%s15856_s12 + $0x30] sm:$0xff] }
 0x678   :  { %10674 = vrcp.f32 %v3426_v0 }
 0x679   :  { %9670 = vmatmul.msk.f32.gmra.mxu0 %vm637_vm6, %v3075_v37  ;;  %v3748_v37 = vld [vmem:[%s15856_s12 + $0x28] sm:$0xff] }
 0x67e   :  { %v10675_v55 = vpop.eup %10674 }
 0x67f   :  { %v3448_v41 = vmul.f32 %v10675_v55, %v13110_v31  ;;  %3563 = vrot.lane.b32.xlu0 %v13107_v36, %s10756_s19  ;;  %v2745_v36 = vpop.f32.mrf.mxu0 }
 0x680   :  { %v3429_v23 = vpop.xlane.xlu1 %3428 }
 0x681   :  { %10676 = vrcp.f32 %v3429_v23  ;;  %9713 = vmatmul.msk.f32.vlgmr.msrb.gmra.mxu0 %vm637_vm6, %v3448_v41  ;;  %v3747_v41 = vld [vmem:[%s15856_s12 + $0x20] sm:$0xff]  ;;  %v3746_v23 = vld [vmem:[%s15856_s12 + $0x18] sm:$0xff] }
 0x683   :  { %3537 = vrot.lane.b32.xlu1 %v13031_v16, %s10755_s14 }
 0x687   :  { %v10677_v24 = vpop.eup %10676  ;;  %3585 = vrot.lane.b32.xlu0 %v13130_v59, %s10757_s24  ;;  %v13196_v16 = vpop.f32.mrf.mxu0 }
 0x688   :  { %v3449_v61 = vmul.f32 %v10677_v24, %v13118_v49  ;;  %v3745_v24 = vld [vmem:[%s15856_s12 + $0x10] sm:$0xff] }
 0x68a   :  { %9714 = vmatmul.msk.f32.gmra.mxu0 %vm637_vm6, %v3449_v61  ;;  %v3744_v61 = vld [vmem:[%s15856_s12 + $0x8] sm:$0xff] }
 0x68b   :  { %3539 = vrot.lane.b32.xlu1 %v13039_v7, %s10755_s14 }
 0x68c   :  { %3515 = vrot.lane.b32.xlu2 %v13011_v38, %s10754_s8 }
 0x68f   :  { %3591 = vrot.lane.b32.xlu0 %v13142_v40, %s10757_s24  ;;  %v3111_v38 = vpop.f32.mrf.mxu0 }
 0x693   :  { %3517 = vrot.lane.b32.xlu1 %v13013_v4, %s10754_s8 }
 0x694   :  { %3543 = vrot.lane.b32.xlu2 %v13065_v6, %s10755_s14 }
 0x697   :  { %3613 = vrot.lane.b32.xlu0 %v2739_v60, %s10758_s30 }
 0x69b   :  { %3545 = vrot.lane.b32.xlu1 %v13073_v5, %s10755_s14 }
 0x69c   :  { %3521 = vrot.lane.b32.xlu2 %v13020_v35, %s10754_s8 }
 0x6a3   :  { %3567 = vrot.lane.b32.xlu1 %v13122_v52, %s10756_s19 }
 0x6a4   :  { %3561 = vrot.lane.b32.xlu2 %v13099_v54, %s10756_s19 }
 0x6a7   :  { %v3114_v4 = vpop.f32.mrf.mxu0 }
 0x6a8   :  { %3635 = vrot.lane.b32.xlu0 %v3114_v4, %s10759_s6 }
 0x6ab   :  { %3589 = vrot.lane.b32.xlu1 %v13135_v14, %s10757_s24 }
 0x6ac   :  { %3565 = vrot.lane.b32.xlu2 %v13116_v46, %s10756_s19 }
 0x6b3   :  { %3611 = vrot.lane.b32.xlu1 %v2736_v33, %s10758_s30  ;;  %v3750_v33 = vld [vmem:[%s15856_s12 + $0x38] sm:$0xff] }
 0x6b4   :  { %3587 = vrot.lane.b32.xlu2 %v13132_v26, %s10757_s24 }
 0x6bb   :  { %3633 = vrot.lane.b32.xlu1 %v3111_v38, %s10759_s6 }
 0x6bc   :  { %3609 = vrot.lane.b32.xlu2 %v2733_v51, %s10758_s30  ;;  %v3753_v51 = vld [vmem:[%s15856_s12 + $0x50] sm:$0xff] }
 0x6be   :  { %v3432_v35 = vpop.xlane.xlu2 %3431 }
 0x6bf   :  { %10678 = vrcp.f32 %v3432_v35 }
 0x6c4   :  { %3615 = vrot.lane.b32.xlu2 %v2742_v58, %s10758_s30 }
 0x6c5   :  { %v10679_v7 = vpop.eup %10678 }
 0x6c6   :  { %v3435_v6 = vpop.xlane.xlu0 %3434  ;;  %v3450_v5 = vmul.f32 %v10679_v7, %v13138_v43 }
 0x6c7   :  { %10680 = vrcp.f32 %v3435_v6 }
 0x6c8   :  { %9715 = vmatmul.msk.f32.gmra.mxu0 %vm637_vm6, %v3450_v5 }
 0x6cb   :  { %v3117_v54 = vpop.f32.mrf.mxu0 }
 0x6cc   :  { %3637 = vrot.lane.b32.xlu2 %v3117_v54, %s10759_s6 }
 0x6cd   :  { %v10681_v31 = vpop.eup %10680 }
 0x6ce   :  { %v3451_v46 = vmul.f32 %v10681_v31, %v13146_v48 }
 0x6d0   :  { %9716 = vmatmul.msk.f32.gmra.mxu0 %vm637_vm6, %v3451_v46 }
 0x6d5   :  { %v3120_v49 = vpop.f32.mrf.mxu0 }
 0x6d6   :  { %3639 = vrot.lane.b32.xlu1 %v3120_v49, %s10759_s6 }
 0x6d9   :  { %v13242_v20 = vpop.permute.xlu0 %3513 }
 0x6dd   :  { %v3438_v52 = vpop.xlane.xlu1 %3437  ;;  %v3123_v2 = vpop.f32.mrf.mxu0 }
 0x6de   :  { %3617 = vrot.lane.b32.xlu1 %v2745_v36, %s10758_s30  ;;  %10682 = vrcp.f32 %v3438_v52  ;;  %v3743_v36 = vld [vmem:[%s15856_s12] sm:$0xff] }
 0x6e4   :  { %v10683_v59 = vpop.eup %10682 }
 0x6e5   :  { %v3452_v26 = vmul.f32 %v10683_v59, %v13159_v27 }
 0x6e7   :  { %v3441_v14 = vpop.xlane.xlu2 %3440  ;;  %9717 = vmatmul.msk.f32.gmra.mxu0 %vm637_vm6, %v3452_v26 }
 0x6e8   :  { %10684 = vrcp.f32 %v3441_v14 }
 0x6ee   :  { %v10685_v43 = vpop.eup %10684 }
 0x6ef   :  { %v3453_v44 = vmul.f32 %v10685_v43, %v13168_v56  ;;  %v13240_v48 = vpop.permute.xlu2 %3515 }
 0x6f1   :  { %9718 = vmatmul.msk.f32.gmra.mxu0 %vm637_vm6, %v3453_v44 }
 0x6f5   :  { %v13246_v50 = vpop.permute.xlu1 %3537 }
 0x6f6   :  { %v13229_v40 = vpop.f32.mrf.mxu0 }
 0x6f7   :  { %v13244_v3 = vpop.permute.xlu2 %3543 }
 0x6fe   :  { %v3489_v34 = vpop.f32.mrf.mxu0 }
 0x6ff   :  { %3657 = vrot.lane.b32.xlu0 %v3489_v34, %s10760_s20  ;;  %v13250_v15 = vpop.permute.xlu2 %3521 }
 0x707   :  { %v3492_v32 = vpop.f32.mrf.mxu0  ;;  %3569 = vrot.lane.b32.xlu0 %v13124_v47, %s10756_s19  ;;  %v13248_v47 = vpop.permute.xlu0 %3541 }
 0x708   :  { %3659 = vrot.lane.b32.xlu2 %v3492_v32, %s10760_s20  ;;  %v3562_v57 = vpop.permute.xlu2 %3561 }
 0x70f   :  { %3641 = vrot.lane.b32.xlu0 %v3123_v2, %s10759_s6  ;;  %v13257_v25 = vpop.permute.xlu0 %3519  ;;  %v13315_v2 = vld [vmem:[%s15857_s4] ss:$0 sm:$0xff] }
 0x710   :  { %3593 = vrot.lane.b32.xlu2 %v13150_v18, %s10757_s24  ;;  %v13253_v18 = vpop.permute.xlu1 %3539  ;;  %v13264_v13 = vpop.permute.xlu2 %3565 }
 0x717   :  { %v3564_v17 = vpop.permute.xlu0 %3563 }
 0x718   :  { %3571 = vrot.lane.b32.xlu2 %v13126_v19, %s10756_s19  ;;  %v3757_v19 = vld [vmem:[%s15856_s12 + $0x70] sm:$0xff]  ;;  %v13261_v27 = vpop.permute.xlu1 %3517  ;;  %v3588_v60 = vpop.permute.xlu2 %3587 }
 0x719   :  { %3760 = vmatpush.msrb.mxu1 %v3757_v19 }
 0x71b   :  { %3761 = vmatpush.msrb.mxu1 %v3756_v29 }
 0x71d   :  { %3762 = vmatpush.msrb.mxu1 %v3755_v63 }
 0x71f   :  { %3763 = vmatpush.msrb.mxu1 %v3754_v45  ;;  %v3586_v0 = vpop.permute.xlu0 %3585 }
 0x720   :  { %v13269_v11 = vpop.permute.xlu1 %3545 }
 0x721   :  { %3764 = vmatpush.msrb.mxu1 %v3753_v51 }
 0x723   :  { %3765 = vmatpush.msrb.mxu1 %v3752_v22 }
 0x725   :  { %3766 = vmatpush.msrb.mxu1 %v3751_v8 }
 0x727   :  { %3767 = vmatpush.msrb.mxu1 %v3750_v33  ;;  %v13288_v38 = vpop.permute.xlu0 %3591 }
 0x728   :  { %v13279_v58 = vpop.permute.xlu1 %3567 }
 0x729   :  { %3768 = vmatpush.msrb.mxu1 %v3749_v42 }
 0x72b   :  { %3769 = vmatpush.msrb.mxu1 %v3748_v37 }
 0x72d   :  { %3770 = vmatpush.msrb.mxu1 %v3747_v41 }
 0x72f   :  { %3771 = vmatpush.msrb.mxu1 %v3746_v23  ;;  %v3614_v35 = vpop.permute.xlu0 %3613 }
 0x730   :  { %v3590_v4 = vpop.permute.xlu1 %3589 }
 0x731   :  { %3772 = vmatpush.msrb.mxu1 %v3745_v24 }
 0x733   :  { %3773 = vmatpush.msrb.mxu1 %v3744_v61 }
 0x735   :  { %3774 = vmatpush.msrb.mxu1 %v3743_v36 }
 0x738   :  { %v3612_v5 = vpop.permute.xlu1 %3611 }
 0x745   :  { %v3495_v56 = vpop.f32.mrf.mxu0 }
 0x746   :  { %3661 = vrot.lane.b32.xlu1 %v3495_v56, %s10760_s20 }
 0x74d   :  { %v3498_v55 = vpop.f32.mrf.mxu0 }
 0x74e   :  { %3523 = vrot.lane.b32.xlu1 %v13025_v62, %s10754_s8  ;;  %3663 = vrot.lane.b32.xlu0 %v3498_v55, %s10760_s20  ;;  %v3610_v62 = vpop.permute.xlu2 %3609 }
 0x756   :  { %3595 = vrot.lane.b32.xlu1 %v13156_v1, %s10757_s24  ;;  %3547 = vrot.lane.b32.xlu0 %v13086_v9, %s10755_s14  ;;  %v13292_v7 = vpop.permute.xlu2 %3615  ;;  %v3636_v1 = vpop.permute.xlu0 %3635  ;;  %v3675_v9 = vsel %vm553_vm5, %v12899_v21, %v13242_v20 }
 0x757   :  { %v3682_v54 = vsel %vm3681_vm7, %v3675_v9, %v13246_v50  ;;  %v3634_v21 = vpop.permute.xlu1 %3633 }
 0x758   :  { %v3688_v46 = vsel %vm637_vm6, %v3682_v54, %v3562_v57  ;;  %v3677_v57 = vsel %vm553_vm5, %v12933_v12, %v13261_v27  ;;  %v3678_v12 = vsel %vm553_vm5, %v12956_v28, %v13257_v25 }
 0x759   :  { %v3694_v59 = vsel %vm434_vm4, %v3688_v46, %v3586_v0 }
 0x75a   :  { %v3701_v14 = vsel %vm3700_vm8, %v3694_v59, %v3610_v62 }
 0x75b   :  { %v3708_v43 = vsel %vm3707_vm9, %v3701_v14, %v3634_v21 }
 0x75e   :  { %3619 = vrot.lane.b32.xlu0 %v13196_v16, %s10758_s30  ;;  %v3638_v31 = vpop.permute.xlu2 %3637  ;;  %v3676_v16 = vsel %vm553_vm5, %v12914_v10, %v13240_v48 }
 0x75f   :  { %v3683_v49 = vsel %vm3681_vm7, %v3676_v16, %v13253_v18  ;;  %v3640_v29 = vpop.permute.xlu1 %3639 }
 0x760   :  { %v3689_v26 = vsel %vm637_vm6, %v3683_v49, %v3564_v17  ;;  %v3684_v17 = vsel %vm3681_vm7, %v3677_v57, %v13248_v47  ;;  %v3685_v47 = vsel %vm3681_vm7, %v3678_v12, %v13244_v3  ;;  %v13421_v57 = vld [vmem:[%s15858_s1 + $0x6] sm:$0x7] }
 0x761   :  { %v3695_v10 = vsel %vm434_vm4, %v3689_v26, %v3588_v60  ;;  %v3690_v22 = vsel %vm637_vm6, %v3684_v17, %v13264_v13  ;;  %v3679_v60 = vsel %vm553_vm5, %v12971_v30, %v13250_v15  ;;  %v3691_v55 = vsel %vm637_vm6, %v3685_v47, %v13279_v58 }
 0x762   :  { %v3696_v8 = vsel %vm434_vm4, %v3690_v22, %v3590_v4  ;;  %v3686_v41 = vsel %vm3681_vm7, %v3679_v60, %v13269_v11  ;;  %v3697_v3 = vsel %vm434_vm4, %v3691_v55, %v13288_v38  ;;  %v3817_v47 = vlaneseq }
 0x763   :  { %v3703_v56 = vsel %vm3700_vm8, %v3696_v8, %v3614_v35  ;;  %v3704_v23 = vsel %vm3700_vm8, %v3697_v3, %v13292_v7 }
 0x764   :  { %v3501_v6 = vpop.f32.mrf.mxu0  ;;  %v3710_v33 = vsel %vm3707_vm9, %v3703_v56, %v3638_v31  ;;  %v3711_v24 = vsel %vm3707_vm9, %v3704_v23, %v3640_v29  ;;  %v9719_v56 = vld [vmem:[%s15858_s1 + $0x3] sm:$0x7] }
 0x765   :  { %3665 = vrot.lane.b32.xlu2 %v3501_v6, %s10760_s20 }
 0x766   :  { %v3660_v32 = vpop.permute.xlu2 %3659 }
 0x767   :  { %v3618_v45 = vpop.permute.xlu1 %3617 }
 0x76d   :  { %3643 = vrot.lane.b32.xlu2 %v13229_v40, %s10759_s6  ;;  %v3702_v40 = vsel %vm3700_vm8, %v3695_v10, %v3612_v5 }
 0x76e   :  { %v3504_v52 = vpop.f32.mrf.mxu0  ;;  %v3709_v20 = vsel %vm3707_vm9, %v3702_v40, %v3636_v1  ;;  %v3594_v51 = vpop.permute.xlu2 %3593 }
 0x76f   :  { %3667 = vrot.lane.b32.xlu1 %v3504_v52, %s10760_s20  ;;  %v3716_v39 = vsel %vm3714_vm10, %v3709_v20, %v3660_v32 }
 0x770   :  { %v3732_v18 = vmul.f32 %v13315_v2, %v3716_v39  ;;  %vm3723_vm12 = vcmp.ge.f32.partialorder %v3716_v39, 0.0 }
 0x771   :  { %v3658_v44 = vpop.permute.xlu0 %3657 }
 0x772   :  { %v3715_v34 = vsel %vm3714_vm10, %v3708_v43, %v3658_v44  ;;  %v3738_v19 = vsel %vm3723_vm12, %v3716_v39, %v3732_v18 }
 0x773   :  { %vm3722_vm11 = vcmp.ge.f32.partialorder %v3715_v34, 0.0  ;;  %v3731_v48 = vmul.f32 %v13315_v2, %v3715_v34 }
 0x775   :  { %v3737_v50 = vsel %vm3722_vm11, %v3715_v34, %v3731_v48  ;;  %v10761_v34 = vmov 0.0  }
 0x776   :  { %3775 = vmatmul.f32.vlgmr.msrb.gmra.mxu1 %v3737_v50  ;;  %v3572_v0 = vpop.permute.xlu2 %3571 }
 0x779   :  { %v3570_v63 = vpop.permute.xlu0 %3569 }
 0x77a   :  { %v3692_v25 = vsel %vm637_vm6, %v3686_v41, %v3570_v63 }
 0x77b   :  { %v3698_v30 = vsel %vm434_vm4, %v3692_v25, %v3594_v51  ;;  %v13427_v51 = vperm.slane %v13421_v57, 1 }
 0x77c   :  { %v3705_v36 = vsel %vm3700_vm8, %v3698_v30, %v3618_v45  ;;  %v13424_v45 = vperm.slane %v13421_v57, 0 }
 0x77d   :  { %15860 = vst [vmem:[#allocation25_spill] sm:$0xff] %v13427_v51 }
 0x77e   :  { %3778 = vmatmul.f32.gmra.mxu1 %v3738_v19  ;;  %15859 = vst [vmem:[#allocation24_spill] sm:$0xff] %v13424_v45 }
 0x781   :  { %v3642_v42 = vpop.permute.xlu0 %3641 }
 0x782   :  { %v3712_v62 = vsel %vm3707_vm9, %v3705_v36, %v3642_v42  ;;  %v13441_v42 = vperm.slane %v9719_v56, 0  ;;  %v13502_v36 = vperm.slane %v9719_v56, 2 }
 0x784   :  { %15861 = vst [vmem:[#allocation22_spill] sm:$0xff] %v13441_v42 }
 0x785   :  { %15866 = vst [vmem:[#allocation18_spill] sm:$0xff] %v13502_v36 }
 0x7b8   :  { %v3662_v37 = vpop.permute.xlu1 %3661 }
 0x7b9   :  { %v3717_v27 = vsel %vm3714_vm10, %v3710_v33, %v3662_v37  ;;  %v13443_v37 = vperm.slane %v9719_v56, 1 }
 0x7ba   :  { %v3733_v13 = vmul.f32 %v13315_v2, %v3717_v27  ;;  %vm3724_vm13 = vcmp.ge.f32.partialorder %v3717_v27, 0.0 }
 0x7bb   :  { %15862 = vst [vmem:[#allocation21_spill] sm:$0xff] %v13443_v37 }
 0x7bc   :  { %v3739_v28 = vsel %vm3724_vm13, %v3717_v27, %v3733_v13  ;;  %v3823_v13 = vld [vmem:[%s15858_s1] sm:$0x7] }
 0x7bd   :  { %3781 = vmatmul.f32.gmra.mxu1 %v3739_v28  ;;  %v13467_v60 = vperm.slane %v3823_v13, 0 }
 0x7bf   :  { %v3666_v61 = vpop.permute.xlu2 %3665  ;;  %15865 = vst [vmem:[#allocation19_spill] sm:$0xff] %v13467_v60 }
 0x7c0   :  { %v3664_v15 = vpop.permute.xlu0 %3663  ;;  %v3719_v38 = vsel %vm3714_vm10, %v3712_v62, %v3666_v61  ;;  %v3524_v6 = vpop.permute.xlu1 %3523  ;;  %v13493_v61 = vld [vmem:[%s15863_s7 + $0x18] sm:$0xf] }
 0x7c1   :  { %v3718_v58 = vsel %vm3714_vm10, %v3711_v24, %v3664_v15  ;;  %v3735_v35 = vmul.f32 %v13315_v2, %v3719_v38  ;;  %vm3726_vm15 = vcmp.ge.f32.partialorder %v3719_v38, 0.0  ;;  %v3680_v1 = vsel %vm553_vm5, %v12984_v53, %v3524_v6  ;;  %v9720_v24 = vld [vmem:[%s15863_s7 + $0x10] sm:$0xff] }
 0x7c2   :  { %v3734_v11 = vmul.f32 %v13315_v2, %v3718_v58  ;;  %vm3725_vm14 = vcmp.ge.f32.partialorder %v3718_v58, 0.0 }
 0x7c3   :  { %v3741_v7 = vsel %vm3726_vm15, %v3719_v38, %v3735_v35  ;;  %v13508_v35 = vperm.slane %v3823_v13, 1 }
 0x7c4   :  { %v3740_v4 = vsel %vm3725_vm14, %v3718_v58, %v3734_v11  ;;  %v13498_v11 = vld [vmem:[%s15863_s7 + $0x28] sm:$0xf] }
 0x7c5   :  { %3784 = vmatmul.f32.gmra.mxu1 %v3740_v4  ;;  %15867 = vst [vmem:[#allocation17_spill] sm:$0xff] %v13508_v35 }
 0x7c7   :  { %v3644_v52 = vpop.permute.xlu2 %3643 }
 0x7c8   :  { %v3548_v5 = vpop.permute.xlu0 %3547  ;;  %v3596_v54 = vpop.permute.xlu1 %3595 }
 0x7c9   :  { %v3687_v9 = vsel %vm3681_vm7, %v3680_v1, %v3548_v5 }
 0x7ca   :  { %v3693_v31 = vsel %vm637_vm6, %v3687_v9, %v3572_v0  ;;  %v13464_v0 = vand.u32 127, %v3817_v47 }
 0x7cb   :  { %v3699_v46 = vsel %vm434_vm4, %v3693_v31, %v3596_v54  ;;  %v13521_v31 = vperm.slane %v3823_v13, 2 }
 0x7cc   :  { %15864 = vst [vmem:[#allocation20_spill] sm:$0xff] %v13464_v0  ;;  %vm3847_vm2 = vcmp.lt.s32.totalorder %v13464_v0, 16  ;;  %vm3819_vm5 = vcmp.lt.s32.totalorder %v13464_v0, 17  ;;  %vm4167_vm6 = vcmp.lt.s32.totalorder %v13464_v0, 1  ;;  %vm4395_vm7 = vcmp.lt.s32.totalorder %v13464_v0, 127 }
 0x7cd   :  { %3787 = vmatmul.f32.gmra.mxu1 %v3741_v7  ;;  %15868 = vst [vmem:[#allocation26_spill] sm:$0xff] %v13521_v31 }
 0x7d0   :  { %v3620_v16 = vpop.permute.xlu0 %3619 }
 0x7d1   :  { %v3706_v49 = vsel %vm3700_vm8, %v3699_v46, %v3620_v16  ;;  %vm4515_vm8 = vcmp.lt.s32.totalorder %v13464_v0, 113 }
 0x7d2   :  { %v3713_v59 = vsel %vm3707_vm9, %v3706_v49, %v3644_v52  ;;  %vm4635_vm9 = vcmp.lt.s32.totalorder %v13464_v0, 112 }
 0x7e1   :  { %v3668_v21 = vpop.permute.xlu1 %3667 }
 0x7e2   :  { %v3720_v26 = vsel %vm3714_vm10, %v3713_v59, %v3668_v21  ;;  %v13529_v21 = vld [vmem:[%s15863_s7] sm:$0xff]  ;;  %vm4755_vm10 = vcmp.lt.s32.totalorder %v13464_v0, 111 }
 0x7e3   :  { %v3736_v14 = vmul.f32 %v13315_v2, %v3720_v26  ;;  %vm3727_vm0 = vcmp.ge.f32.partialorder %v3720_v26, 0.0 }
 0x7e5   :  { %v3742_v53 = vsel %vm3727_vm0, %v3720_v26, %v3736_v14 }
 0x7e6   :  { %3790 = vmatmul.f32.gmra.mxu1 %v3742_v53 }
 0x7f3   :  { %v3776_v10 = vpop.f32.mrf.mxu1 }
 0x7fb   :  { %v3779_v43 = vpop.f32.mrf.mxu1 }
 0x7fc   :  { %3795 = vrot.lane.b32.xlu0 %v3779_v43, %s10757_s24 }
 0x804   :  { %3841 = vrot.lane.b32.xlu0 %v10761_v34, %s10754_s8 }
 0x83a   :  { %v3782_v44 = vpop.f32.mrf.mxu1 }
 0x842   :  { %v3785_v40 = vpop.f32.mrf.mxu1 }
 0x843   :  { %3799 = vrot.lane.b32.xlu2 %v3785_v40, %s10757_s24 }
 0x84a   :  { %v3788_v32 = vpop.f32.mrf.mxu1 }
 0x863   :  { %v3791_v48 = vpop.f32.mrf.mxu1 }
 0x864   :  { %3803 = vrot.lane.b32.xlu1 %v3791_v48, %s10757_s24 }
 0x86e   :  { %v3796_v20 = vpop.permute.xlu0 %3795 }
 0x86f   :  { %v13374_v2 = vsel %vm434_vm4, %v3776_v10, %v3796_v20  ;;  %v13542_v10 = vperm.slane %v13421_v57, 2  ;;  %v13553_v20 = vld [vmem:[%s15863_s7 + $0x20] sm:$0xff] }
 0x870   :  { %3839 = vrot.lane.b32.xlu2 %v13374_v2, %s10754_s8 }
 0x871   :  { %15869 = vst [vmem:[#allocation23_spill] sm:$0xff] %v13542_v10 }
 0x876   :  { %v3842_v33 = vpop.permute.xlu0 %3841 }
 0x877   :  { %v3863_v12 = vmul.f32 %v13441_v42, %v3842_v33  ;;  %v3864_v27 = vmul.f32 %v13443_v37, %v3842_v33  ;;  %v3865_v6 = vmul.f32 %v13502_v36, %v3842_v33 }
 0x878   :  { %3811 = vrot.lane.b32.xlu2 %v10761_v34, %s10762_s18 }
 0x879   :  { %9725 = vmatpush.msk.msrb.mxu3 %vm3876_vm1, %v3864_v27  ;;  %9722 = vmatpush.msk.msrb.mxu2 %vm3876_vm1, %v3863_v12 }
 0x880   :  { %4041 = vrot.lane.b32.xlu2 %v10761_v34, %s10763_s22 }
 0x89d   :  { %v3800_v50 = vpop.permute.xlu2 %3799 }
 0x89e   :  { %v13381_v39 = vsel %vm434_vm4, %v3782_v44, %v3800_v50 }
 0x89f   :  { %3813 = vrot.lane.b32.xlu2 %v13381_v39, %s10762_s18  ;;  %3843 = vrot.lane.b32.xlu1 %v13381_v39, %s10754_s8 }
 0x8a7   :  { %4159 = vrot.lane.b32.xlu2 %v13374_v2, %s10764_s23  ;;  %3809 = vrot.lane.b32.xlu1 %v13374_v2, %s10762_s18 }
 0x8af   :  { %4039 = vrot.lane.b32.xlu1 %v13374_v2, %s10763_s22  ;;  %4389 = vrot.lane.b32.xlu2 %v10761_v34, %s10765_s26 }
 0x8b7   :  { %4043 = vrot.lane.b32.xlu1 %v13381_v39, %s10763_s22 }
 0x8ca   :  { %v13405_v29 = vpop.permute.xlu2 %3839 }
 0x8d2   :  { %v13413_v63 = vpop.permute.xlu2 %3811 }
 0x8d3   :  { %v3834_v41 = vmul.f32 %v13467_v60, %v13413_v63  ;;  %v3835_v5 = vmul.f32 %v13508_v35, %v13413_v63  ;;  %v3836_v26 = vmul.f32 %v13521_v31, %v13413_v63 }
 0x8d6   :  { %v3804_v18 = vpop.permute.xlu1 %3803 }
 0x8d7   :  { %v13397_v19 = vsel %vm434_vm4, %v3788_v32, %v3804_v18  ;;  %vm4047_vm4 = vcmp.lt.s32.totalorder %v13464_v0, 15  ;;  %v13548_v32 = vld [vmem:[%s15863_s7 + $0x8] sm:$0xf] }
 0x8d8   :  { %3845 = vrot.lane.b32.xlu0 %v13397_v19, %s10754_s8  ;;  %4393 = vrot.lane.b32.xlu2 %v13397_v19, %s10765_s26  ;;  %v9752_v18 = vld [vmem:[%s15858_s1 + $0x9] sm:$0x7] }
 0x8d9   :  { %4165 = vrot.lane.b32.xlu1 %v13397_v19, %s10764_s23  ;;  %v13563_v63 = vperm.slane %v9752_v18, 2 }
 0x8da   :  { %v13429_v17 = vpop.permute.xlu2 %4041 }
 0x8db   :  { %v4063_v22 = vmul.f32 %v13424_v45, %v13429_v17  ;;  %v13437_v8 = vmul.f32 %v13427_v51, %v13429_v17  ;;  %v4065_v50 = vmul.f32 %v13542_v10, %v13429_v17  ;;  %15871 = vst [vmem:[#allocation28_spill] sm:$0xff] %v13563_v63  ;;  %v13572_v17 = vperm.slane %v9752_v18, 0 }
 0x8dd   :  { %10232 = vmatpush.msk.msra.mxu1 %vm3876_vm1, %v13437_v8  ;;  %9743 = vmatpush.msk.msra.mxu0 %vm3876_vm1, %v4063_v22  ;;  %15872 = vst [vmem:[#allocation29_spill] sm:$0xff] %v13572_v17  ;;  %v9764_v22 = vld [vmem:[%s15858_s1 + $0xc] sm:$0x7] }
 0x8de   :  { %v13577_v12 = vperm.slane %v9764_v22, 1 }
 0x8e0   :  { %3815 = vrot.lane.b32.xlu0 %v13397_v19, %s10762_s18  ;;  %4511 = vrot.lane.b32.xlu2 %v13381_v39, %s10766_s28  ;;  %15873 = vst [vmem:[#allocation30_spill] sm:$0xff] %v13577_v12 }
 0x8e1   :  { %4387 = vrot.lane.b32.xlu1 %v13374_v2, %s10765_s26 }
 0x8e8   :  { %4045 = vrot.lane.b32.xlu0 %v13397_v19, %s10763_s22  ;;  %4627 = vrot.lane.b32.xlu2 %v13374_v2, %s10760_s20 }
 0x8e9   :  { %4509 = vrot.lane.b32.xlu1 %v10761_v34, %s10766_s28 }
 0x8f0   :  { %4161 = vrot.lane.b32.xlu0 %v10761_v34, %s10764_s23  ;;  %4749 = vrot.lane.b32.xlu2 %v10761_v34, %s10767_s2 }
 0x8f1   :  { %4629 = vrot.lane.b32.xlu1 %v10761_v34, %s10760_s20 }
 0x8f8   :  { %4163 = vrot.lane.b32.xlu0 %v13381_v39, %s10764_s23  ;;  %4753 = vrot.lane.b32.xlu2 %v13397_v19, %s10767_s2 }
 0x8f9   :  { %4631 = vrot.lane.b32.xlu1 %v13381_v39, %s10760_s20  ;;  %v3814_v1 = vpop.permute.xlu2 %3813 }
 0x900   :  { %4391 = vrot.lane.b32.xlu0 %v13381_v39, %s10765_s26 }
 0x901   :  { %4747 = vrot.lane.b32.xlu1 %v13374_v2, %s10767_s2  ;;  %v4160_v53 = vpop.permute.xlu2 %4159 }
 0x908   :  { %4507 = vrot.lane.b32.xlu0 %v13374_v2, %s10766_s28 }
 0x909   :  { %v13575_v56 = vpop.permute.xlu2 %4389 }
 0x910   :  { %4513 = vrot.lane.b32.xlu0 %v13397_v19, %s10766_s28 }
 0x911   :  { %v3844_v55 = vpop.permute.xlu1 %3843 }
 0x912   :  { %v3849_v28 = vsel %vm3847_vm2, %v13405_v29, %v3844_v55 }
 0x913   :  { %v3861_v25 = vmul.f32 %v13443_v37, %v3849_v28 }
 0x915   :  { %3924 = vmatpush.msrb.mxu3 %v3861_v25  ;;  %v9776_v25 = vld [vmem:[%s15858_s1 + $0xf] sm:$0x7] }
 0x916   :  { %9726 = vmatmul.msk.f32.vlgmr.msrb.gmra.mxu3 %vm3869_vm3, %v9720_v24 }
 0x917   :  { %9731 = vmatpush.msk.msra.mxu3 %vm3876_vm1, %v3834_v41  ;;  %v4292_v41 = vmul.f32 0.0, %v13577_v12 }
 0x918   :  { %4633 = vrot.lane.b32.xlu0 %v13397_v19, %s10760_s20 }
 0x919   :  { %v3810_v3 = vpop.permute.xlu1 %3809 }
 0x91a   :  { %v3821_v9 = vsel %vm3819_vm5, %v3810_v3, %v3814_v1 }
 0x91b   :  { %v3832_v49 = vmul.f32 %v13508_v35, %v3821_v9 }
 0x91e   :  { %9727 = vmatmul.msk.f32.gmra.mxu3 %vm3869_vm3, %v13493_v61 }
 0x920   :  { %4751 = vrot.lane.b32.xlu0 %v13381_v39, %s10767_s2 }
 0x921   :  { %v4040_v23 = vpop.permute.xlu1 %4039 }
 0x929   :  { %v4044_v30 = vpop.permute.xlu1 %4043 }
 0x92a   :  { %v4049_v15 = vsel %vm4047_vm4, %v4040_v23, %v4044_v30 }
 0x92b   :  { %v13489_v58 = vmul.f32 %v13427_v51, %v4049_v15 }
 0x92d   :  { %10233 = vmatpush.msra.mxu1 %v13489_v58 }
 0x92e   :  { %9748 = vmatmul.msk.f32.vlgmr.msra.gmra.mxu1 %vm3869_vm3, %v13498_v11 }
 0x94a   :  { %v3846_v62 = vpop.permute.xlu0 %3845 }
 0x94b   :  { %v3850_v4 = vsel %vm3847_vm2, %v3846_v62, %v13405_v29  ;;  %v3848_v7 = vsel %vm3847_vm2, %v3844_v55, %v3846_v62  ;;  %v4166_v43 = vpop.permute.xlu1 %4165  ;;  %v13561_v29 = vperm.slane %v9752_v18, 1  ;;  %v4394_v62 = vpop.permute.xlu2 %4393 }
 0x94c   :  { %v3860_v38 = vmul.f32 %v13441_v42, %v3850_v4  ;;  %v3862_v54 = vmul.f32 %v13502_v36, %v3848_v7  ;;  %v4170_v27 = vsel %vm4167_vm6, %v4166_v43, %v4160_v53 }
 0x94d   :  { %15870 = vst [vmem:[#allocation27_spill] sm:$0xff] %v13561_v29  ;;  %v4180_v28 = vmul.f32 %v13572_v17, %v4170_v27  ;;  %v13681_v27 = vld [vmem:[%s15863_s7 + $0x50] sm:$0xff] }
 0x94e   :  { %3901 = vmatpush.msrb.mxu2 %v3860_v38 }
 0x94f   :  { %9723 = vmatmul.msk.f32.vlgmr.msrb.gmra.mxu2 %vm3869_vm3, %v9720_v24 }
 0x950   :  { %9728 = vmatpush.msk.msra.mxu2 %vm3876_vm1, %v3865_v6 }
 0x952   :  { %3947 = vmatpush.msra.mxu2 %v3862_v54  ;;  %v3816_v16 = vpop.permute.xlu0 %3815 }
 0x953   :  { %v3822_v46 = vsel %vm3819_vm5, %v3816_v16, %v3810_v3  ;;  %v3820_v59 = vsel %vm3819_vm5, %v3814_v1, %v3816_v16  ;;  %v4388_v55 = vpop.permute.xlu1 %4387  ;;  %v13597_v3 = vperm.slane %v9776_v25, 0 }
 0x954   :  { %9734 = vmatpush.msk.msrb.mxu2 %vm3876_vm1, %v3835_v5  ;;  %v3831_v52 = vmul.f32 %v13467_v60, %v3822_v46  ;;  %v3833_v14 = vmul.f32 %v13521_v31, %v3820_v59  ;;  %v13617_v5 = vld [vmem:[%s15858_s1 + $0x12] sm:$0x7] }
 0x955   :  { %15874 = vst [vmem:[#allocation31_spill] sm:$0xff] %v13597_v3  ;;  %v13631_v54 = vperm.slane %v13617_v5, 0  ;;  %v13634_v16 = vperm.slane %v13617_v5, 1 }
 0x956   :  { %4008 = vmatpush.msrb.mxu2 %v3832_v49  ;;  %3985 = vmatpush.msra.mxu3 %v3831_v52  ;;  %v9753_v49 = vld [vmem:[%s15863_s7 + $0x30] sm:$0xff]  ;;  %v13641_v52 = vperm.slane %v9776_v25, 2 }
 0x957   :  { %9724 = vmatmul.msk.f32.gmra.mxu2 %vm3869_vm3, %v13493_v61  ;;  %9732 = vmatmul.msk.f32.vlgmr.msra.gmra.mxu3 %vm3869_vm3, %v13529_v21  ;;  %15877 = vst [vmem:[#allocation34_spill] sm:$0xff] %v13631_v54 }
 0x958   :  { %9737 = vmatpush.msk.msrb.mxu3 %vm3876_vm1, %v3836_v26  ;;  %15878 = vst [vmem:[#allocation35_spill] sm:$0xff] %v13634_v16  ;;  %v4413_v59 = vmul.f32 %v13641_v52, %v13575_v56  ;;  %v4398_v26 = vsel %vm4395_vm7, %v4394_v62, %v4388_v55 }
 0x959   :  { %15879 = vst [vmem:[#allocation36_spill] sm:$0xff] %v13641_v52 }
 0x95a   :  { %4031 = vmatpush.msrb.mxu3 %v3833_v14  ;;  %v4046_v44 = vpop.permute.xlu0 %4045 }
 0x95b   :  { %v4050_v40 = vsel %vm4047_vm4, %v4046_v44, %v4040_v23  ;;  %v4048_v48 = vsel %vm4047_vm4, %v4044_v30, %v4046_v44  ;;  %v4289_v23 = vmul.f32 %v13577_v12, %v13381_v39  ;;  %v13602_v30 = vperm.slane %v9764_v22, 0  ;;  %v13619_v1 = vpop.permute.xlu1 %4509 }
 0x95c   :  { %v4060_v34 = vmul.f32 %v13424_v45, %v4050_v40  ;;  %v4062_v57 = vmul.f32 %v13542_v10, %v4048_v48  ;;  %v4411_v39 = vmul.f32 %v13597_v3, %v13575_v56  ;;  %v4531_v14 = vmul.f32 %v13631_v54, %v13619_v1 }
 0x95d   :  { %15875 = vst [vmem:[#allocation32_spill] sm:$0xff] %v13602_v30  ;;  %v4291_v7 = vmul.f32 0.0, %v13602_v30  ;;  %v4288_v9 = vmul.f32 %v13602_v30, %v13374_v2  ;;  %v4410_v40 = vmul.f32 %v13641_v52, %v4398_v26  ;;  %v13666_v48 = vperm.slane %v9776_v25, 1  ;;  %v9789_v26 = vld [vmem:[%s15863_s7 + $0x60] sm:$0xff] }
 0x95e   :  { %4099 = vmatpush.msra.mxu0 %v4060_v34  ;;  %v9754_v34 = vld [vmem:[%s15863_s7 + $0x38] sm:$0xf] }
 0x95f   :  { %9729 = vmatmul.msk.f32.vlgmr.msra.gmra.mxu2 %vm3869_vm3, %v9720_v24  ;;  %9733 = vmatmul.msk.f32.gmra.mxu3 %vm3869_vm3, %v13548_v32  ;;  %15880 = vst [vmem:[#allocation37_spill] sm:$0xff] %v13666_v48  ;;  %v4412_v18 = vmul.f32 %v13666_v48, %v13575_v56 }
 0x960   :  { %9744 = vmatmul.msk.f32.vlgmr.msra.gmra.mxu0 %vm3869_vm3, %v13553_v20  ;;  %9749 = vmatpush.msk.msra.mxu2 %vm3876_vm1, %v4065_v50 }
 0x961   :  { %9746 = vmatpush.msk.msrb.mxu0 %vm3876_vm1, %v13437_v8 }
 0x962   :  { %4145 = vmatpush.msra.mxu2 %v4062_v57  ;;  %v4162_v33 = vpop.permute.xlu0 %4161 }
 0x963   :  { %4122 = vmatpush.msrb.mxu0 %v13489_v58  ;;  %v4183_v47 = vmul.f32 %v13572_v17, %v4162_v33  ;;  %v4184_v13 = vmul.f32 %v13561_v29, %v4162_v33  ;;  %v4185_v8 = vmul.f32 %v13563_v63, %v4162_v33  ;;  %v4630_v44 = vpop.permute.xlu1 %4629  ;;  %v9800_v33 = vld [vmem:[%s15858_s1 + $0x15] sm:$0x7] }
 0x965   :  { %9755 = vmatpush.msk.msra.mxu3 %vm3876_vm1, %v4183_v47  ;;  %9758 = vmatpush.msk.msra.mxu0 %vm3876_vm1, %v4184_v13  ;;  %v13686_v13 = vperm.slane %v9800_v33, 1 }
 0x966   :  { %9761 = vmatpush.msk.msrb.mxu1 %vm3876_vm1, %v4185_v8  ;;  %v13688_v8 = vperm.slane %v9800_v33, 2 }
 0x967   :  { %9730 = vmatmul.msk.f32.gmra.mxu2 %vm3869_vm3, %v13493_v61  ;;  %9738 = vmatmul.msk.f32.vlgmr.msrb.gmra.mxu3 %vm3869_vm3, %v13529_v21  ;;  %v13608_v61 = vperm.slane %v9764_v22, 2  ;;  %15881 = vst [vmem:[#allocation38_spill] sm:$0xff] %v13686_v13 }
 0x968   :  { %9745 = vmatmul.msk.f32.gmra.mxu0 %vm3869_vm3, %v13498_v11  ;;  %4219 = vmatpush.msra.mxu3 %v4180_v28  ;;  %15882 = vst [vmem:[#allocation39_spill] sm:$0xff] %v13688_v8 }
 0x969   :  { %15876 = vst [vmem:[#allocation33_spill] sm:$0xff] %v13608_v61  ;;  %v4293_v6 = vmul.f32 0.0, %v13608_v61  ;;  %v4290_v46 = vmul.f32 %v13608_v61, %v13397_v19 }
 0x96a   :  { %9770 = vmatpush.msk.msrb.mxu3 %vm3876_vm1, %v4292_v41  ;;  %v4164_v24 = vpop.permute.xlu0 %4163 }
 0x96b   :  { %v4168_v15 = vsel %vm4167_vm6, %v4164_v24, %v4166_v43  ;;  %v4169_v58 = vsel %vm4167_vm6, %v4160_v53, %v4164_v24  ;;  %v4532_v53 = vmul.f32 %v13634_v16, %v13619_v1  ;;  %v4512_v43 = vpop.permute.xlu2 %4511  ;;  %v9765_v24 = vld [vmem:[%s15863_s7 + $0x40] sm:$0xff] }
 0x96c   :  { %4350 = vmatpush.msrb.mxu3 %v4289_v23  ;;  %v4181_v4 = vmul.f32 %v13561_v29, %v4169_v58  ;;  %v4182_v38 = vmul.f32 %v13563_v63, %v4168_v15  ;;  %v4652_v15 = vmul.f32 %v13686_v13, %v4630_v44  ;;  %v4653_v58 = vmul.f32 %v13688_v8, %v4630_v44 }
 0x96e   :  { %4242 = vmatpush.msra.mxu0 %v4181_v4  ;;  %4265 = vmatpush.msrb.mxu1 %v4182_v38  ;;  %v13708_v4 = vld [vmem:[%s15863_s7 + $0x58] sm:$0xf] }
 0x96f   :  { %9735 = vmatmul.msk.f32.vlgmr.msrb.gmra.mxu2 %vm3869_vm3, %v13529_v21  ;;  %9739 = vmatmul.msk.f32.gmra.mxu3 %vm3869_vm3, %v13548_v32 }
 0x970   :  { %9747 = vmatmul.msk.f32.vlgmr.msrb.gmra.mxu0 %vm3869_vm3, %v13553_v20  ;;  %9767 = vmatpush.msk.msrb.mxu2 %vm3876_vm1, %v4291_v7 }
 0x971   :  { %9773 = vmatpush.msk.msrb.mxu0 %vm3876_vm1, %v4293_v6  ;;  %9779 = vmatpush.msk.msra.mxu1 %vm3876_vm1, %v4411_v39  ;;  %v13716_v39 = vperm.slane %v13617_v5, 2 }
 0x972   :  { %4327 = vmatpush.msrb.mxu2 %v4288_v9  ;;  %v4392_v2 = vpop.permute.xlu0 %4391  ;;  %9762 = vmatmul.msk.f32.vlgmr.msrb.gmra.mxu1 %vm3869_vm3, %v9753_v49 }
 0x973   :  { %4373 = vmatpush.msrb.mxu0 %v4290_v46  ;;  %v4397_v21 = vsel %vm4395_vm7, %v4388_v55, %v4392_v2  ;;  %v4396_v22 = vsel %vm4395_vm7, %v4392_v2, %v4394_v62  ;;  %v4628_v47 = vpop.permute.xlu2 %4627  ;;  %v13690_v55 = vperm.slane %v9800_v33, 0  ;;  %15884 = vst [vmem:[#allocation41_spill] sm:$0xff] %v13716_v39  ;;  %v4533_v46 = vmul.f32 %v13716_v39, %v13619_v1  ;;  %v9766_v2 = vld [vmem:[%s15863_s7 + $0x48] sm:$0xf] }
 0x974   :  { %v4408_v19 = vmul.f32 %v13597_v3, %v4397_v21  ;;  %v4409_v56 = vmul.f32 %v13666_v48, %v4396_v22  ;;  %v9790_v22 = vld [vmem:[%s15863_s7 + $0x68] sm:$0xf] }
 0x975   :  { %15883 = vst [vmem:[#allocation40_spill] sm:$0xff] %v13690_v55  ;;  %v4651_v25 = vmul.f32 %v13690_v55, %v4630_v44 }
 0x976   :  { %4447 = vmatpush.msra.mxu1 %v4408_v19 }
 0x977   :  { %9736 = vmatmul.msk.f32.gmra.mxu2 %vm3869_vm3, %v13548_v32  ;;  %9756 = vmatmul.msk.f32.vlgmr.msra.gmra.mxu3 %vm3869_vm3, %v9753_v49 }
 0x978   :  { %9759 = vmatmul.msk.f32.vlgmr.msra.gmra.mxu0 %vm3869_vm3, %v9753_v49  ;;  %9785 = vmatpush.msk.msra.mxu3 %vm3876_vm1, %v4413_v59  ;;  %v9812_v59 = vld [vmem:[%s15858_s1 + $0x18] sm:$0x7] }
 0x979   :  { %9791 = vmatpush.msk.msra.mxu0 %vm3876_vm1, %v4531_v14  ;;  %9794 = vmatpush.msk.msrb.mxu1 %vm3876_vm1, %v4532_v53  ;;  %v13734_v19 = vperm.slane %v9812_v59, 1  ;;  %v13741_v53 = vperm.slane %v9812_v59, 2  ;;  %v13759_v33 = vperm.slane %v9812_v59, 0 }
 0x97a   :  { %4493 = vmatpush.msra.mxu3 %v4410_v40  ;;  %v4508_v32 = vpop.permute.xlu0 %4507  ;;  %9763 = vmatmul.msk.f32.gmra.mxu1 %vm3869_vm3, %v9754_v34 }
 0x97b   :  { %v4517_v50 = vsel %vm4515_vm8, %v4508_v32, %v4512_v43  ;;  %v4750_v7 = vpop.permute.xlu2 %4749  ;;  %15885 = vst [vmem:[#allocation42_spill] sm:$0xff] %v13734_v19 }
 0x97c   :  { %v4528_v57 = vmul.f32 %v13631_v54, %v4517_v50  ;;  %15886 = vst [vmem:[#allocation43_spill] sm:$0xff] %v13741_v53  ;;  %v4772_v44 = vmul.f32 %v13734_v19, %v4750_v7 }
 0x97d   :  { %15888 = vst [vmem:[#allocation44_spill] sm:$0xff] %v13759_v33 }
 0x97e   :  { %4567 = vmatpush.msra.mxu0 %v4528_v57 }
 0x97f   :  { %9750 = vmatmul.msk.f32.vlgmr.msra.gmra.mxu2 %vm3869_vm3, %v13553_v20  ;;  %9757 = vmatmul.msk.f32.gmra.mxu3 %vm3869_vm3, %v9754_v34  ;;  %v4632_v20 = vpop.permute.xlu1 %4631 }
 0x980   :  { %9760 = vmatmul.msk.f32.gmra.mxu0 %vm3869_vm3, %v9754_v34  ;;  %9782 = vmatpush.msk.msra.mxu2 %vm3876_vm1, %v4412_v18  ;;  %v4637_v62 = vsel %vm4635_vm9, %v4628_v47, %v4632_v20  ;;  %v4773_v34 = vmul.f32 %v13741_v53, %v4750_v7 }
 0x981   :  { %v4648_v38 = vmul.f32 %v13690_v55, %v4637_v62 }
 0x982   :  { %4470 = vmatpush.msra.mxu2 %v4409_v56  ;;  %v4514_v41 = vpop.permute.xlu0 %4513  ;;  %9780 = vmatmul.msk.f32.vlgmr.msra.gmra.mxu1 %vm3869_vm3, %v13681_v27 }
 0x983   :  { %v4516_v28 = vsel %vm4515_vm8, %v4512_v43, %v4514_v41  ;;  %v4518_v21 = vsel %vm4515_vm8, %v4514_v41, %v4508_v32  ;;  %v4754_v40 = vpop.permute.xlu2 %4753  ;;  %v4867_v41 = vld [vmem:[%s15887_s10] sm:$0xff] }
 0x984   :  { %v4529_v23 = vmul.f32 %v13634_v16, %v4516_v28  ;;  %v4530_v1 = vmul.f32 %v13716_v39, %v4518_v21  ;;  %v9801_v28 = vld [vmem:[%s15863_s7 + $0x70] sm:$0xff] }
 0x986   :  { %4590 = vmatpush.msrb.mxu1 %v4529_v23  ;;  %v9802_v23 = vld [vmem:[%s15863_s7 + $0x78] sm:$0xf] }
 0x987   :  { %9751 = vmatmul.msk.f32.gmra.mxu2 %vm3869_vm3, %v13498_v11  ;;  %9771 = vmatmul.msk.f32.vlgmr.msrb.gmra.mxu3 %vm3869_vm3, %v9765_v24  ;;  %v4748_v43 = vpop.permute.xlu1 %4747 }
 0x988   :  { %9774 = vmatmul.msk.f32.vlgmr.msrb.gmra.mxu0 %vm3869_vm3, %v9765_v24  ;;  %9803 = vmatpush.msk.msrb.mxu3 %vm3876_vm1, %v4651_v25  ;;  %v4758_v50 = vsel %vm4755_vm10, %v4754_v40, %v4748_v43  ;;  %v10768_v25 = vmov 0  }
 0x989   :  { %9806 = vmatpush.msk.msrb.mxu0 %vm3876_vm1, %v4652_v15  ;;  %9809 = vmatpush.msk.msra.mxu1 %vm3876_vm1, %v4653_v58  ;;  %v4770_v57 = vmul.f32 %v13741_v53, %v4758_v50  ;;  %v9814_v15 = vld [vmem:[%s15863_s7 + $0x88] sm:$0xf] }
 0x98a   :  { %4687 = vmatpush.msrb.mxu3 %v4648_v38  ;;  %v4634_v11 = vpop.permute.xlu0 %4633  ;;  %9781 = vmatmul.msk.f32.gmra.mxu1 %vm3869_vm3, %v13708_v4 }
 0x98b   :  { %v4636_v6 = vsel %vm4635_vm9, %v4632_v20, %v4634_v11  ;;  %v4638_v9 = vsel %vm4635_vm9, %v4634_v11, %v4628_v47  ;;  %v4771_v47 = vmul.f32 %v13759_v33, %v4750_v7  ;;  %10280 = vset.pattern.permute.xlu0 %v10768_v25  ;;  %10279 = vset.pattern.permute.xlu1 %v10768_v25 }
 0x98c   :  { %v4649_v49 = vmul.f32 %v13686_v13, %v4636_v6  ;;  %v4650_v5 = vmul.f32 %v13688_v8, %v4638_v9  ;;  %4871 = vperm.xlu0 %10280, %v4867_v41   ;;  %10281 = vset.pattern.permute.xlu2 %v10768_v25 }
 0x98e   :  { %4710 = vmatpush.msrb.mxu0 %v4649_v49  ;;  %4733 = vmatpush.msra.mxu1 %v4650_v5 }
 0x98f   :  { %9768 = vmatmul.msk.f32.vlgmr.msrb.gmra.mxu2 %vm3869_vm3, %v9765_v24  ;;  %9772 = vmatmul.msk.f32.gmra.mxu3 %vm3869_vm3, %v9766_v2  ;;  %v9813_v24 = vld [vmem:[%s15863_s7 + $0x80] sm:$0xff] }
 0x990   :  { %9775 = vmatmul.msk.f32.gmra.mxu0 %vm3869_vm3, %v9766_v2  ;;  %9797 = vmatpush.msk.msrb.mxu2 %vm3876_vm1, %v4533_v46 }
 0x992   :  { %4613 = vmatpush.msrb.mxu2 %v4530_v1  ;;  %v4752_v14 = vpop.permute.xlu0 %4751  ;;  %9795 = vmatmul.msk.f32.vlgmr.msrb.gmra.mxu1 %vm3869_vm3, %v9789_v26 }
 0x993   :  { %v4756_v32 = vsel %vm4755_vm10, %v4752_v14, %v4754_v40  ;;  %v4757_v56 = vsel %vm4755_vm10, %v4748_v43, %v4752_v14 }
 0x994   :  { %v4769_v18 = vmul.f32 %v13734_v19, %v4756_v32  ;;  %v4768_v20 = vmul.f32 %v13759_v33, %v4757_v56 }
 0x997   :  { %9769 = vmatmul.msk.f32.gmra.mxu2 %vm3869_vm3, %v9766_v2  ;;  %9786 = vmatmul.msk.f32.vlgmr.msra.gmra.mxu3 %vm3869_vm3, %v13681_v27 }
 0x998   :  { %9792 = vmatmul.msk.f32.vlgmr.msra.gmra.mxu0 %vm3869_vm3, %v9789_v26  ;;  %9818 = vmatpush.msk.msra.mxu3 %vm3876_vm1, %v4772_v44 }
 0x999   :  { %9821 = vmatpush.msk.msra.mxu0 %vm3876_vm1, %v4773_v34  ;;  %v3926_v58 = vpop.f32.mrf.mxu3 }
 0x99a   :  { %4830 = vmatpush.msra.mxu3 %v4769_v18  ;;  %9796 = vmatmul.msk.f32.gmra.mxu1 %vm3869_vm3, %v9790_v22 }
 0x99b   :  { %4853 = vmatpush.msra.mxu0 %v4770_v57 }
 0x99f   :  { %9783 = vmatmul.msk.f32.vlgmr.msra.gmra.mxu2 %vm3869_vm3, %v13681_v27  ;;  %9787 = vmatmul.msk.f32.gmra.mxu3 %vm3869_vm3, %v13708_v4  ;;  %v4868_v27 = vld [vmem:[%s15887_s10 + $0x8] sm:$0xf] }
 0x9a0   :  { %9815 = vmatpush.msk.msra.mxu2 %vm3876_vm1, %v4771_v47  ;;  %9793 = vmatmul.msk.f32.gmra.mxu0 %vm3869_vm3, %v9790_v22 }
 0x9a1   :  { %4876 = vperm.xlu1 %10279, %v4868_v27   ;;  %v3929_v62 = vpop.f32.mrf.mxu3 }
 0x9a2   :  { %4807 = vmatpush.msra.mxu2 %v4768_v20  ;;  %9810 = vmatmul.msk.f32.vlgmr.msra.gmra.mxu1 %vm3869_vm3, %v9801_v28 }
 0x9a7   :  { %9784 = vmatmul.msk.f32.gmra.mxu2 %vm3869_vm3, %v13708_v4  ;;  %9804 = vmatmul.msk.f32.vlgmr.msrb.gmra.mxu3 %vm3869_vm3, %v9801_v28 }
 0x9a8   :  { %9807 = vmatmul.msk.f32.vlgmr.msrb.gmra.mxu0 %vm3869_vm3, %v9801_v28 }
 0x9aa   :  { %9811 = vmatmul.msk.f32.gmra.mxu1 %vm3869_vm3, %v9802_v23 }
 0x9ab   :  { %v4127_v49 = vpop.f32.mrf.mxu1 }
 0x9af   :  { %9798 = vmatmul.msk.f32.vlgmr.msrb.gmra.mxu2 %vm3869_vm3, %v9789_v26  ;;  %9805 = vmatmul.msk.f32.gmra.mxu3 %vm3869_vm3, %v9802_v23 }
 0x9b0   :  { %9808 = vmatmul.msk.f32.gmra.mxu0 %vm3869_vm3, %v9802_v23 }
 0x9b7   :  { %9799 = vmatmul.msk.f32.gmra.mxu2 %vm3869_vm3, %v9790_v22  ;;  %9819 = vmatmul.msk.f32.vlgmr.msra.gmra.mxu3 %vm3869_vm3, %v9813_v24 }
 0x9b8   :  { %9822 = vmatmul.msk.f32.vlgmr.msra.gmra.mxu0 %vm3869_vm3, %v9813_v24 }
 0x9bf   :  { %9816 = vmatmul.msk.f32.vlgmr.msra.gmra.mxu2 %vm3869_vm3, %v9813_v24  ;;  %9820 = vmatmul.msk.f32.gmra.mxu3 %vm3869_vm3, %v9814_v15 }
 0x9c0   :  { %9823 = vmatmul.msk.f32.gmra.mxu0 %vm3869_vm3, %v9814_v15 }
 0x9c7   :  { %9817 = vmatmul.msk.f32.gmra.mxu2 %vm3869_vm3, %v9814_v15 }
 0x9d2   :  { %v13794_v4 = vpop.f32.mrf.mxu2 }
 0x9da   :  { %v13796_v38 = vpop.f32.mrf.mxu2  ;;  %v13798_v7 = vpop.f32.mrf.mxu3 }
 0x9dd   :  { %v13800_v11 = vpop.f32.mrf.mxu0 }
 0x9e2   :  { %v3949_v6 = vpop.f32.mrf.mxu2  ;;  %v3990_v9 = vpop.f32.mrf.mxu3 }
 0x9e5   :  { %v13802_v46 = vpop.f32.mrf.mxu0 }
 0x9ea   :  { %v3952_v5 = vpop.f32.mrf.mxu2  ;;  %v4033_v2 = vpop.f32.mrf.mxu3 }
 0x9eb   :  { %v4034_v8 = vadd.f32 %v4033_v2, %v3949_v6 }
 0x9ed   :  { %v4124_v21 = vpop.f32.mrf.mxu0 }
 0x9ef   :  { %v4267_v26 = vpop.f32.mrf.mxu1 }
 0x9f2   :  { %v4010_v59 = vpop.f32.mrf.mxu2  ;;  %v4036_v1 = vpop.f32.mrf.mxu3 }
 0x9f3   :  { %v4011_v13 = vadd.f32 %v4010_v59, %v3926_v58  ;;  %v4037_v48 = vadd.f32 %v4036_v1, %v3952_v5  ;;  %v13823_v5 = vstv %s4885_s11 }
 0x9f5   :  { %v4244_v14 = vpop.f32.mrf.mxu0  ;;  %v4154_v55 = vadd.f32 %v4124_v21, %v4011_v13 }
 0x9f7   :  { %v4270_v34 = vpop.f32.mrf.mxu1  ;;  %v4274_v12 = vadd.f32 %v4244_v14, %v4154_v55  ;;  %v3991_v55 = vadd.f32 %v3990_v9, %v13796_v38 }
 0x9fa   :  { %v4013_v43 = vpop.f32.mrf.mxu2  ;;  %v13804_v44 = vpop.f32.mrf.mxu3 }
 0x9fb   :  { %v4014_v63 = vadd.f32 %v4013_v43, %v3929_v62 }
 0x9fd   :  { %v4247_v40 = vpop.f32.mrf.mxu0  ;;  %v4157_v29 = vadd.f32 %v4127_v49, %v4014_v63 }
 0x9fe   :  { %v13821_v62 = vpop.permute.xlu0 %4871 }
 0x9ff   :  { %v13808_v57 = vpop.f32.mrf.mxu1  ;;  %v4277_v21 = vadd.f32 %v4247_v40, %v4157_v29  ;;  %v4156_v29 = vadd.f32 %v13802_v46, %v3991_v55  ;;  %v3988_v40 = vadd.f32 %v13798_v7, %v13794_v4 }
 0xa02   :  { %v4147_v32 = vpop.f32.mrf.mxu2  ;;  %v13806_v50 = vpop.f32.mrf.mxu3 }
 0xa03   :  { %v4155_v16 = vadd.f32 %v4147_v32, %v4034_v8 }
 0xa05   :  { %v4375_v18 = vpop.f32.mrf.mxu0  ;;  %v4275_v54 = vadd.f32 %v4267_v26, %v4155_v16  ;;  %v4276_v26 = vadd.f32 %v13806_v50, %v4156_v29 }
 0xa07   :  { %v13810_v20 = vpop.f32.mrf.mxu1  ;;  %v4383_v30 = vadd.f32 %v4375_v18, %v4275_v54 }
 0xa0a   :  { %v4150_v22 = vpop.f32.mrf.mxu2  ;;  %v4352_v47 = vpop.f32.mrf.mxu3 }
 0xa0b   :  { %v4158_v10 = vadd.f32 %v4150_v22, %v4037_v48  ;;  %v4382_v51 = vadd.f32 %v4352_v47, %v4274_v12 }
 0xa0d   :  { %v4378_v56 = vpop.f32.mrf.mxu0  ;;  %v4278_v8 = vadd.f32 %v4270_v34, %v4158_v10 }
 0xa0f   :  { %v4592_v24 = vpop.f32.mrf.mxu1  ;;  %v4386_v54 = vadd.f32 %v4378_v56, %v4278_v8 }
 0xa12   :  { %v13812_v41 = vpop.f32.mrf.mxu2  ;;  %v4355_v28 = vpop.f32.mrf.mxu3 }
 0xa13   :  { %v4385_v48 = vadd.f32 %v4355_v28, %v4277_v21  ;;  %v4877_v50 = vpop.permute.xlu1 %4876 }
 0xa15   :  { %v13814_v25 = vpop.f32.mrf.mxu0 }
 0xa17   :  { %v4595_v39 = vpop.f32.mrf.mxu1 }
 0xa1a   :  { %v4332_v27 = vpop.f32.mrf.mxu2  ;;  %v4495_v23 = vpop.f32.mrf.mxu3 }
 0xa1b   :  { %v4503_v6 = vadd.f32 %v4495_v23, %v4383_v30  ;;  %v4384_v46 = vadd.f32 %v4332_v27, %v4276_v26  ;;  %v4153_v27 = vadd.f32 %v13800_v11, %v3988_v40 }
 0xa1d   :  { %v13816_v15 = vpop.f32.mrf.mxu0  ;;  %v4504_v56 = vadd.f32 %v13810_v20, %v4384_v46 }
 0xa1f   :  { %v4735_v61 = vpop.f32.mrf.mxu1  ;;  %v4624_v4 = vadd.f32 %v13816_v15, %v4504_v56 }
 0xa22   :  { %v4472_v53 = vpop.f32.mrf.mxu2  ;;  %v4498_v33 = vpop.f32.mrf.mxu3 }
 0xa23   :  { %v4502_v58 = vadd.f32 %v4472_v53, %v4382_v51  ;;  %v4506_v63 = vadd.f32 %v4498_v33, %v4386_v54 }
 0xa25   :  { %v4712_v19 = vpop.f32.mrf.mxu0  ;;  %v4622_v32 = vadd.f32 %v4592_v24, %v4502_v58 }
 0xa27   :  { %v4742_v30 = vadd.f32 %v4712_v19, %v4622_v32  ;;  %v4738_v10 = vpop.f32.mrf.mxu1 }
 0xa2a   :  { %v4475_v52 = vpop.f32.mrf.mxu2  ;;  %v13818_v3 = vpop.f32.mrf.mxu3 }
 0xa2b   :  { %v4505_v51 = vadd.f32 %v4475_v52, %v4385_v48 }
 0xa2d   :  { %v4715_v17 = vpop.f32.mrf.mxu0 }
 0xa32   :  { %v4615_v2 = vpop.f32.mrf.mxu2  ;;  %v4692_v59 = vpop.f32.mrf.mxu3 }
 0xa33   :  { %v4623_v13 = vadd.f32 %v4615_v2, %v4503_v6  ;;  %v4744_v58 = vadd.f32 %v4692_v59, %v4624_v4 }
 0xa35   :  { %v4743_v31 = vadd.f32 %v4735_v61, %v4623_v13  ;;  %v4855_v16 = vpop.f32.mrf.mxu0 }
 0xa37   :  { %v4863_v12 = vadd.f32 %v4855_v16, %v4743_v31  ;;  %v4625_v31 = vadd.f32 %v4595_v39, %v4505_v51 }
 0xa39   :  { %v4881_v53 = vadd.f32 %v13821_v62, %v4863_v12  ;;  %v4745_v34 = vadd.f32 %v4715_v17, %v4625_v31  ;;  %v4273_v17 = vadd.f32 %v13804_v44, %v4153_v27  ;;  %v9826_v31 = vld [vmem:[%s15863_s7 + $0xa0] sm:$0xff] }
 0xa3a   :  { %v4618_v49 = vpop.f32.mrf.mxu2  ;;  %v4832_v61 = vpop.f32.mrf.mxu3 }
 0xa3b   :  { %vm4888_vm11 = vcmp.ge.f32.partialorder %v4881_v53, 0.0  ;;  %v4895_v38 = vmul.f32 %v13823_v5, %v4881_v53  ;;  %v4626_v9 = vadd.f32 %v4618_v49, %v4506_v63  ;;  %v4862_v1 = vadd.f32 %v4832_v61, %v4742_v30  ;;  %v9923_v30 = vld [vmem:[%s15887_s10 + $0x10] sm:$0xff] }
 0xa3c   :  { %v4381_v6 = vadd.f32 %v13812_v41, %v4273_v17 }
 0xa3d   :  { %v13829_v14 = vsel %vm4888_vm11, %v4881_v53, %v4895_v38  ;;  %v4880_v19 = vadd.f32 %v13821_v62, %v4862_v1  ;;  %v4746_v52 = vadd.f32 %v4738_v10, %v4626_v9  ;;  %v4858_v33 = vpop.f32.mrf.mxu0 }
 0xa3e   :  { %4940 = vrot.lane.b32.xlu2 %v13829_v14, %s10754_s8  ;;  %v4501_v15 = vadd.f32 %v13808_v57, %v4381_v6 }
 0xa3f   :  { %vm4887_vm12 = vcmp.ge.f32.partialorder %v4880_v19, 0.0  ;;  %v4894_v43 = vmul.f32 %v13823_v5, %v4880_v19  ;;  %v4866_v39 = vadd.f32 %v4858_v33, %v4746_v52  ;;  %v9924_v33 = vld [vmem:[%s15887_s10 + $0x18] sm:$0xf] }
 0xa40   :  { %v4621_v41 = vadd.f32 %v13814_v25, %v4501_v15 }
 0xa41   :  { %v13837_v18 = vsel %vm4887_vm12, %v4880_v19, %v4894_v43  ;;  %v4884_v23 = vadd.f32 %v4877_v50, %v4866_v39  ;;  %v9827_v43 = vld [vmem:[%s15863_s7 + $0xa8] sm:$0xf] }
 0xa42   :  { %v4809_v22 = vpop.f32.mrf.mxu2  ;;  %4936 = vrot.lane.b32.xlu0 %v13837_v18, %s10754_s8  ;;  %v4835_v47 = vpop.f32.mrf.mxu3  ;;  %v4741_v21 = vadd.f32 %v13818_v3, %v4621_v41 }
 0xa43   :  { %v4865_v28 = vadd.f32 %v4835_v47, %v4745_v34  ;;  %v4898_v20 = vmul.f32 %v13823_v5, %v4884_v23  ;;  %vm4891_vm14 = vcmp.ge.f32.partialorder %v4884_v23, 0.0 }
 0xa44   :  { %v4861_v57 = vadd.f32 %v4809_v22, %v4741_v21 }
 0xa45   :  { %v4883_v24 = vadd.f32 %v4877_v50, %v4865_v28  ;;  %v13857_v8 = vsel %vm4891_vm14, %v4884_v23, %v4898_v20 }
 0xa46   :  { %4913 = vrot.lane.b32.xlu2 %v13829_v14, %s10762_s18  ;;  %v4879_v16 = vadd.f32 %v13821_v62, %v4861_v57 }
 0xa47   :  { %vm4890_vm13 = vcmp.ge.f32.partialorder %v4883_v24, 0.0  ;;  %v4897_v7 = vmul.f32 %v13823_v5, %v4883_v24 }
 0xa48   :  { %v4893_v25 = vmul.f32 %v13823_v5, %v4879_v16  ;;  %vm4886_vm0 = vcmp.ge.f32.partialorder %v4879_v16, 0.0 }
 0xa49   :  { %v13850_v2 = vsel %vm4890_vm13, %v4883_v24, %v4897_v7 }
 0xa4a   :  { %v4812_v11 = vpop.f32.mrf.mxu2  ;;  %4909 = vrot.lane.b32.xlu0 %v13837_v18, %s10762_s18  ;;  %4938 = vrot.lane.b32.xlu1 %v13850_v2, %s10754_s8  ;;  %v13880_v3 = vsel %vm4886_vm0, %v4879_v16, %v4893_v25  ;;  %v15890_v16 = vld [vmem:[#allocation27_spill] sm:$0xff] }
 0xa4b   :  { %v4864_v44 = vadd.f32 %v4812_v11, %v4744_v58  ;;  %v15889_v11 = vld [vmem:[#allocation26_spill] sm:$0xff] }
 0xa4d   :  { %v4882_v13 = vadd.f32 %v4877_v50, %v4864_v44 }
 0xa4e   :  { %4942 = vrot.lane.b32.xlu2 %v13857_v8, %s10754_s8 }
 0xa4f   :  { %v4896_v59 = vmul.f32 %v13823_v5, %v4882_v13  ;;  %vm4889_vm15 = vcmp.ge.f32.partialorder %v4882_v13, 0.0 }
 0xa51   :  { %v13868_v32 = vsel %vm4889_vm15, %v4882_v13, %v4896_v59 }
 0xa52   :  { %5135 = vrot.lane.b32.xlu0 %v13829_v14, %s10763_s22  ;;  %4911 = vrot.lane.b32.xlu1 %v13850_v2, %s10762_s18 }
 0xa56   :  { %4934 = vrot.lane.b32.xlu2 %v13868_v32, %s10754_s8 }
 0xa5a   :  { %4915 = vrot.lane.b32.xlu0 %v13857_v8, %s10762_s18  ;;  %5137 = vrot.lane.b32.xlu1 %v13857_v8, %s10763_s22 }
 0xa5e   :  { %5250 = vrot.lane.b32.xlu2 %v13850_v2, %s10764_s23 }
 0xa62   :  { %5244 = vrot.lane.b32.xlu0 %v13880_v3, %s10764_s23  ;;  %4932 = vrot.lane.b32.xlu1 %v13880_v3, %s10754_s8 }
 0xa66   :  { %5129 = vrot.lane.b32.xlu2 %v13868_v32, %s10763_s22 }
 0xa6a   :  { %5246 = vrot.lane.b32.xlu0 %v13868_v32, %s10764_s23  ;;  %5127 = vrot.lane.b32.xlu1 %v13880_v3, %s10763_s22 }
 0xa6e   :  { %4907 = vrot.lane.b32.xlu2 %v13868_v32, %s10762_s18 }
 0xa72   :  { %5133 = vrot.lane.b32.xlu0 %v13850_v2, %s10763_s22  ;;  %4905 = vrot.lane.b32.xlu1 %v13880_v3, %s10762_s18 }
 0xa76   :  { %5248 = vrot.lane.b32.xlu2 %v13837_v18, %s10764_s23 }
 0xa7a   :  { %5470 = vrot.lane.b32.xlu0 %v13857_v8, %s10765_s26  ;;  %5254 = vrot.lane.b32.xlu1 %v13857_v8, %s10764_s23 }
 0xa7e   :  { %5131 = vrot.lane.b32.xlu2 %v13837_v18, %s10763_s22 }
 0xa82   :  { %5460 = vrot.lane.b32.xlu0 %v13880_v3, %s10765_s26  ;;  %5252 = vrot.lane.b32.xlu1 %v13829_v14, %s10764_s23 }
 0xa86   :  { %5468 = vrot.lane.b32.xlu2 %v13829_v14, %s10765_s26 }
 0xa8a   :  { %5581 = vrot.lane.b32.xlu0 %v13837_v18, %s10766_s28  ;;  %5583 = vrot.lane.b32.xlu1 %v13850_v2, %s10766_s28 }
 0xa8e   :  { %5466 = vrot.lane.b32.xlu2 %v13850_v2, %s10765_s26 }
 0xa92   :  { %5694 = vrot.lane.b32.xlu0 %v13880_v3, %s10760_s20  ;;  %5577 = vrot.lane.b32.xlu1 %v13880_v3, %s10766_s28 }
 0xa96   :  { %5579 = vrot.lane.b32.xlu2 %v13868_v32, %s10766_s28 }
 0xa98   :  { %v4941_v55 = vpop.permute.xlu2 %4940 }
 0xa9a   :  { %5696 = vrot.lane.b32.xlu0 %v13868_v32, %s10760_s20  ;;  %5462 = vrot.lane.b32.xlu1 %v13868_v32, %s10765_s26 }
 0xa9e   :  { %5700 = vrot.lane.b32.xlu2 %v13850_v2, %s10760_s20 }
 0xaa0   :  { %v13930_v62 = vpop.permute.xlu2 %4913 }
 0xaa2   :  { %5587 = vrot.lane.b32.xlu0 %v13857_v8, %s10766_s28  ;;  %5464 = vrot.lane.b32.xlu1 %v13837_v18, %s10765_s26 }
 0xaa6   :  { %5698 = vrot.lane.b32.xlu2 %v13837_v18, %s10760_s20 }
 0xaa8   :  { %v4943_v54 = vpop.permute.xlu2 %4942 }
 0xaaa   :  { %5817 = vrot.lane.b32.xlu0 %v13850_v2, %s10767_s2  ;;  %5704 = vrot.lane.b32.xlu1 %v13857_v8, %s10760_s20 }
 0xaae   :  { %5585 = vrot.lane.b32.xlu2 %v13829_v14, %s10766_s28 }
 0xab0   :  { %v4935_v48 = vpop.permute.xlu2 %4934 }
 0xab1   :  { %v4949_v12 = vsel %vm3847_vm2, %v4943_v54, %v4935_v48 }
 0xab2   :  { %v4953_v5 = vmul.f32 %v4949_v12, %v13441_v42  ;;  %5815 = vrot.lane.b32.xlu0 %v13837_v18, %s10767_s2  ;;  %5702 = vrot.lane.b32.xlu1 %v13829_v14, %s10760_s20  ;;  %v14034_v12 = vld [vmem:[%s15863_s7 + $0xb0] sm:$0xff] }
 0xab4   :  { %9828 = vmatpush.msk.msrb.mxu1 %vm3876_vm1, %v4953_v5  ;;  %v4937_v63 = vpop.permute.xlu0 %4936 }
 0xab5   :  { %v4944_v29 = vsel %vm3847_vm2, %v4937_v63, %v4941_v55 }
 0xab6   :  { %5821 = vrot.lane.b32.xlu2 %v13857_v8, %s10767_s2  ;;  %v4952_v26 = vmul.f32 %v4944_v29, %v13502_v36 }
 0xab8   :  { %v13955_v51 = vpop.permute.xlu2 %5250 }
 0xaba   :  { %5933 = vperm.xlu0 %10280, %v9923_v30   ;;  %5813 = vrot.lane.b32.xlu1 %v13868_v32, %s10767_s2 }
 0xabc   :  { %v13959_v53 = vpop.permute.xlu0 %4909  ;;  %v4939_v10 = vpop.permute.xlu1 %4938 }
 0xabd   :  { %v4945_v49 = vsel %vm3847_vm2, %v4939_v10, %v4943_v54  ;;  %v4947_v61 = vsel %vm3847_vm2, %v4935_v48, %v4939_v10  ;;  %v4917_v58 = vsel %vm3819_vm5, %v13959_v53, %v13930_v62 }
 0xabe   :  { %v4954_v38 = vmul.f32 %v4947_v61, %v13443_v37  ;;  %v4955_v9 = vmul.f32 %v4945_v49, %v13502_v36  ;;  %5819 = vrot.lane.b32.xlu2 %v13829_v14, %s10767_s2  ;;  %v4925_v13 = vmul.f32 %v4917_v58, %v15889_v11 }
 0xac0   :  { %v13971_v1 = vpop.permute.xlu2 %5129  ;;  %9831 = vmatpush.msk.msrb.mxu2 %vm3876_vm1, %v4954_v38  ;;  %9834 = vmatpush.msk.msrb.mxu3 %vm3876_vm1, %v4955_v9 }
 0xac2   :  { %5811 = vrot.lane.b32.xlu1 %v13880_v3, %s10767_s2  ;;  %5035 = vmatpush.msrb.mxu3 %v4952_v26 }
 0xac3   :  { %9835 = vmatmul.msk.f32.vlgmr.msrb.gmra.mxu3 %vm3869_vm3, %v9826_v31 }
 0xac4   :  { %v13980_v19 = vpop.permute.xlu0 %5135  ;;  %v4912_v52 = vpop.permute.xlu1 %4911 }
 0xac8   :  { %v4908_v46 = vpop.permute.xlu2 %4907 }
 0xac9   :  { %v4920_v23 = vsel %vm3819_vm5, %v4908_v46, %v4912_v52 }
 0xaca   :  { %5938 = vperm.xlu1 %10279, %v9924_v33   ;;  %v4927_v20 = vmul.f32 %v4920_v23, %v13508_v35 }
 0xacb   :  { %9836 = vmatmul.msk.f32.gmra.mxu3 %vm3869_vm3, %v9827_v43 }
 0xacc   :  { %v4916_v40 = vpop.permute.xlu0 %4915  ;;  %v5138_v34 = vpop.permute.xlu1 %5137 }
 0xacd   :  { %v4922_v39 = vsel %vm3819_vm5, %v4916_v40, %v4908_v46  ;;  %v5144_v50 = vsel %vm4047_vm4, %v5138_v34, %v13971_v1  ;;  %v4918_v24 = vsel %vm3819_vm5, %v4912_v52, %v4916_v40  ;;  %v15893_v40 = vld [vmem:[#allocation23_spill] sm:$0xff] }
 0xace   :  { %v4926_v22 = vmul.f32 %v4922_v39, %v13467_v60  ;;  %v5148_v47 = vmul.f32 %v5144_v50, %v13424_v45  ;;  %v4928_v44 = vmul.f32 %v4918_v24, %v15889_v11 }
 0xad0   :  { %9837 = vmatpush.msk.msrb.mxu0 %vm3876_vm1, %v4926_v22  ;;  %v13993_v56 = vpop.permute.xlu2 %5248  ;;  %9848 = vmatpush.msk.msra.mxu3 %vm3876_vm1, %v5148_v47  ;;  %v15894_v47 = vld [vmem:[#allocation32_spill] sm:$0xff] }
 0xad4   :  { %v13996_v28 = vpop.permute.xlu0 %5244  ;;  %v4933_v27 = vpop.permute.xlu1 %4932 }
 0xad5   :  { %v4946_v17 = vsel %vm3847_vm2, %v4933_v27, %v4937_v63  ;;  %v4948_v4 = vsel %vm3847_vm2, %v4941_v55, %v4933_v27  ;;  %v5258_v54 = vsel %vm4167_vm6, %v13996_v28, %v13993_v56  ;;  %v15891_v63 = vld [vmem:[#allocation33_spill] sm:$0xff]  ;;  %v5364_v27 = vmul.f32 %v13868_v32, %v15894_v47 }
 0xad6   :  { %v4950_v7 = vmul.f32 %v4948_v4, %v13441_v42  ;;  %v4951_v6 = vmul.f32 %v4946_v17, %v13443_v37  ;;  %v5263_v5 = vmul.f32 %v5258_v54, %v15890_v16  ;;  %v5366_v30 = vmul.f32 %v13857_v8, %v15891_v63  ;;  %v15895_v4 = vld [vmem:[#allocation29_spill] sm:$0xff]  ;;  %v15897_v54 = vld [vmem:[#allocation30_spill] sm:$0xff] }
 0xad7   :  { %v5363_v49 = vmul.f32 %v13829_v14, %v15891_v63 }
 0xad8   :  { %v5132_v15 = vpop.permute.xlu2 %5131  ;;  %4989 = vmatpush.msrb.mxu1 %v4950_v7  ;;  %5012 = vmatpush.msrb.mxu2 %v4951_v6  ;;  %v15896_v6 = vld [vmem:[#allocation28_spill] sm:$0xff] }
 0xad9   :  { %9829 = vmatmul.msk.f32.vlgmr.msrb.gmra.mxu1 %vm3869_vm3, %v9826_v31  ;;  %9832 = vmatmul.msk.f32.vlgmr.msrb.gmra.mxu2 %vm3869_vm3, %v9826_v31  ;;  %v15892_v31 = vld [vmem:[#allocation25_spill] sm:$0xff] }
 0xada   :  { %9840 = vmatpush.msk.msra.mxu1 %vm3876_vm1, %v4927_v20  ;;  %9843 = vmatpush.msk.msra.mxu2 %vm3876_vm1, %v4928_v44  ;;  %v5361_v20 = vmul.f32 %v13880_v3, %v15894_v47  ;;  %v9825_v44 = vld [vmem:[%s15863_s7 + $0x98] sm:$0xf] }
 0xadc   :  { %5119 = vmatpush.msra.mxu2 %v4925_v13  ;;  %v5247_v41 = vpop.permute.xlu0 %5246  ;;  %v5128_v59 = vpop.permute.xlu1 %5127 }
 0xadd   :  { %v5259_v21 = vsel %vm4167_vm6, %v5247_v41, %v13955_v51  ;;  %v5143_v57 = vsel %vm4047_vm4, %v13980_v19, %v5128_v59 }
 0xade   :  { %v5266_v25 = vmul.f32 %v5259_v21, %v15890_v16  ;;  %v5145_v55 = vmul.f32 %v5143_v57, %v13424_v45 }
 0xae0   :  { %v14031_v48 = vpop.permute.xlu2 %5468  ;;  %5184 = vmatpush.msra.mxu3 %v5145_v55 }
 0xae1   :  { %9830 = vmatmul.msk.f32.gmra.mxu1 %vm3869_vm3, %v9827_v43  ;;  %9833 = vmatmul.msk.f32.gmra.mxu2 %vm3869_vm3, %v9827_v43  ;;  %v9824_v43 = vld [vmem:[%s15863_s7 + $0x90] sm:$0xff] }
 0xae2   :  { %9862 = vmatpush.msk.msrb.mxu3 %vm3876_vm1, %v5266_v25 }
 0xae3   :  { %9849 = vmatmul.msk.f32.vlgmr.msra.gmra.mxu3 %vm3869_vm3, %v14034_v12 }
 0xae4   :  { %5324 = vmatpush.msrb.mxu3 %v5263_v5  ;;  %v5134_v10 = vpop.permute.xlu0 %5133  ;;  %v4906_v29 = vpop.permute.xlu1 %4905  ;;  %v5365_v5 = vmul.f32 %v13850_v2, %v15897_v54 }
 0xae5   :  { %v5140_v61 = vsel %vm4047_vm4, %v5134_v10, %v5138_v34  ;;  %v5142_v38 = vsel %vm4047_vm4, %v13971_v1, %v5134_v10  ;;  %v4919_v9 = vsel %vm3819_vm5, %v4906_v29, %v13959_v53  ;;  %v4921_v26 = vsel %vm3819_vm5, %v13930_v62, %v4906_v29  ;;  %v9847_v62 = vld [vmem:[%s15863_s7 + $0xb8] sm:$0xf]  ;;  %v9858_v10 = vld [vmem:[%s15863_s7 + $0xc8] sm:$0xf] }
 0xae6   :  { %9876 = vmatpush.msk.msra.mxu3 %vm3876_vm1, %v5366_v30  ;;  %v5149_v52 = vmul.f32 %v5142_v38, %v15892_v31  ;;  %v4923_v33 = vmul.f32 %v4921_v26, %v13467_v60  ;;  %v4924_v46 = vmul.f32 %v4919_v9, %v13508_v35  ;;  %v5141_v1 = vsel %vm4047_vm4, %v5128_v59, %v5132_v15  ;;  %v15898_v30 = vld [vmem:[#allocation37_spill] sm:$0xff]  ;;  %v15899_v9 = vld [vmem:[#allocation34_spill] sm:$0xff] }
 0xae7   :  { %v5150_v34 = vmul.f32 %v5140_v61, %v15893_v40  ;;  %v5139_v53 = vsel %vm4047_vm4, %v5132_v15, %v13980_v19  ;;  %v5146_v50 = vmul.f32 %v5141_v1, %v15892_v31  ;;  %v9857_v15 = vld [vmem:[%s15863_s7 + $0xc0] sm:$0xff] }
 0xae8   :  { %5446 = vmatpush.msra.mxu3 %v5363_v49  ;;  %v14068_v39 = vpop.permute.xlu2 %5466  ;;  %5073 = vmatpush.msrb.mxu0 %v4923_v33  ;;  %v5147_v19 = vmul.f32 %v5139_v53, %v15893_v40 }
 0xae9   :  { %5096 = vmatpush.msra.mxu1 %v4924_v46  ;;  %9838 = vmatmul.msk.f32.vlgmr.msrb.gmra.mxu0 %vm3869_vm3, %v9824_v43 }
 0xaea   :  { %9841 = vmatmul.msk.f32.vlgmr.msra.gmra.mxu1 %vm3869_vm3, %v9824_v43  ;;  %9844 = vmatmul.msk.f32.vlgmr.msra.gmra.mxu2 %vm3869_vm3, %v9824_v43 }
 0xaeb   :  { %9851 = vmatpush.msk.msra.mxu0 %vm3876_vm1, %v5149_v52  ;;  %9854 = vmatpush.msk.msrb.mxu1 %vm3876_vm1, %v5150_v34  ;;  %v9869_v34 = vld [vmem:[%s15863_s7 + $0xd8] sm:$0xf] }
 0xaec   :  { %9850 = vmatmul.msk.f32.gmra.mxu3 %vm3869_vm3, %v9847_v62  ;;  %v14079_v22 = vpop.permute.xlu0 %5470  ;;  %v5255_v23 = vpop.permute.xlu1 %5254 }
 0xaed   :  { %5207 = vmatpush.msra.mxu0 %v5146_v50  ;;  %5230 = vmatpush.msrb.mxu1 %v5147_v19  ;;  %v5257_v24 = vsel %vm4167_vm6, %v13955_v51, %v5255_v23  ;;  %v5261_v17 = vsel %vm4167_vm6, %v5255_v23, %v5247_v41  ;;  %v5473_v57 = vsel %vm4395_vm7, %v14068_v39, %v14079_v22  ;;  %v15900_v23 = vld [vmem:[#allocation31_spill] sm:$0xff] }
 0xaee   :  { %v5265_v7 = vmul.f32 %v5261_v17, %v15895_v4  ;;  %v5267_v58 = vmul.f32 %v5257_v24, %v15896_v6  ;;  %v15901_v17 = vld [vmem:[#allocation36_spill] sm:$0xff] }
 0xaef   :  { %9870 = vmatpush.msk.msra.mxu1 %vm3876_vm1, %v5364_v27 }
 0xaf0   :  { %9859 = vmatpush.msk.msrb.mxu2 %vm3876_vm1, %v5265_v7  ;;  %v14096_v13 = vpop.permute.xlu2 %5579  ;;  %9865 = vmatpush.msk.msrb.mxu0 %vm3876_vm1, %v5267_v58 }
 0xaf1   :  { %5400 = vmatpush.msra.mxu1 %v5361_v20  ;;  %9839 = vmatmul.msk.f32.gmra.mxu0 %vm3869_vm3, %v9825_v44 }
 0xaf2   :  { %9842 = vmatmul.msk.f32.gmra.mxu1 %vm3869_vm3, %v9825_v44  ;;  %9845 = vmatmul.msk.f32.gmra.mxu2 %vm3869_vm3, %v9825_v44  ;;  %v14179_v44 = vld [vmem:[%s15863_s7 + $0xf0] sm:$0xff] }
 0xaf4   :  { %9863 = vmatmul.msk.f32.vlgmr.msrb.gmra.mxu3 %vm3869_vm3, %v9857_v15  ;;  %v14103_v51 = vpop.permute.xlu0 %5460  ;;  %v5253_v41 = vpop.permute.xlu1 %5252 }
 0xaf5   :  { %v5256_v59 = vsel %vm4167_vm6, %v13993_v56, %v5253_v41  ;;  %v5260_v21 = vsel %vm4167_vm6, %v5253_v41, %v13996_v28  ;;  %v5482_v56 = vmul.f32 %v5473_v57, %v15898_v30  ;;  %v5362_v28 = vmul.f32 %v13837_v18, %v15897_v54 }
 0xaf6   :  { %v5262_v25 = vmul.f32 %v5260_v21, %v15895_v4  ;;  %v5264_v55 = vmul.f32 %v5256_v59, %v15896_v6  ;;  %v5476_v27 = vsel %vm4395_vm7, %v14031_v48, %v14103_v51 }
 0xaf8   :  { %5301 = vmatpush.msrb.mxu2 %v5262_v25  ;;  %5347 = vmatpush.msrb.mxu0 %v5264_v55  ;;  %v14129_v29 = vpop.permute.xlu2 %5700 }
 0xaf9   :  { %9852 = vmatmul.msk.f32.vlgmr.msra.gmra.mxu0 %vm3869_vm3, %v14034_v12 }
 0xafa   :  { %9855 = vmatmul.msk.f32.vlgmr.msrb.gmra.mxu1 %vm3869_vm3, %v14034_v12  ;;  %9873 = vmatpush.msk.msra.mxu2 %vm3876_vm1, %v5365_v5  ;;  %v9868_v12 = vld [vmem:[%s15863_s7 + $0xd0] sm:$0xff] }
 0xafb   :  { %9860 = vmatmul.msk.f32.vlgmr.msrb.gmra.mxu2 %vm3869_vm3, %v9857_v15  ;;  %9884 = vmatpush.msk.msrb.mxu1 %vm3876_vm1, %v5482_v56 }
 0xafc   :  { %5423 = vmatpush.msra.mxu2 %v5362_v28  ;;  %v5582_v49 = vpop.permute.xlu0 %5581  ;;  %v5584_v61 = vpop.permute.xlu1 %5583  ;;  %9864 = vmatmul.msk.f32.gmra.mxu3 %vm3869_vm3, %v9858_v10 }
 0xafd   :  { %v5592_v38 = vsel %vm4515_vm8, %v14096_v13, %v5584_v61 }
 0xafe   :  { %v5598_v26 = vmul.f32 %v5592_v38, %v15899_v9 }
 0xb00   :  { %9892 = vmatpush.msk.msrb.mxu3 %vm3876_vm1, %v5598_v26  ;;  %v14145_v46 = vpop.permute.xlu2 %5698 }
 0xb01   :  { %9853 = vmatmul.msk.f32.gmra.mxu0 %vm3869_vm3, %v9847_v62 }
 0xb02   :  { %9856 = vmatmul.msk.f32.gmra.mxu1 %vm3869_vm3, %v9847_v62 }
 0xb03   :  { %9861 = vmatmul.msk.f32.gmra.mxu2 %vm3869_vm3, %v9858_v10 }
 0xb04   :  { %v14142_v52 = vpop.permute.xlu0 %5694  ;;  %v5578_v33 = vpop.permute.xlu1 %5577  ;;  %9877 = vmatmul.msk.f32.vlgmr.msra.gmra.mxu3 %vm3869_vm3, %v9868_v12 }
 0xb05   :  { %v5591_v43 = vsel %vm4515_vm8, %v5578_v33, %v5582_v49 }
 0xb06   :  { %v5595_v1 = vmul.f32 %v5591_v43, %v15899_v9 }
 0xb08   :  { %5634 = vmatpush.msrb.mxu3 %v5595_v1  ;;  %v5586_v58 = vpop.permute.xlu2 %5585 }
 0xb09   :  { %9866 = vmatmul.msk.f32.vlgmr.msrb.gmra.mxu0 %vm3869_vm3, %v9857_v15  ;;  %v15902_v15 = vld [vmem:[#allocation40_spill] sm:$0xff]  ;;  %v5589_v28 = vsel %vm4515_vm8, %v5582_v49, %v5586_v58 }
 0xb0a   :  { %9871 = vmatmul.msk.f32.vlgmr.msra.gmra.mxu1 %vm3869_vm3, %v9868_v12  ;;  %v9891_v49 = vld [vmem:[%s15863_s7 + $0xf8] sm:$0xf] }
 0xb0b   :  { %9874 = vmatmul.msk.f32.vlgmr.msra.gmra.mxu2 %vm3869_vm3, %v9868_v12  ;;  %v15904_v12 = vld [vmem:[#allocation41_spill] sm:$0xff] }
 0xb0c   :  { %v5697_v53 = vpop.permute.xlu0 %5696  ;;  %v5463_v62 = vpop.permute.xlu1 %5462  ;;  %9878 = vmatmul.msk.f32.gmra.mxu3 %vm3869_vm3, %v9869_v34 }
 0xb0d   :  { %v5475_v50 = vsel %vm4395_vm7, %v5463_v62, %v14068_v39  ;;  %v5477_v19 = vsel %vm4395_vm7, %v14079_v22, %v5463_v62  ;;  %v5709_v20 = vsel %vm4635_vm9, %v5697_v53, %v14129_v29  ;;  %v5708_v39 = vsel %vm4635_vm9, %v14142_v52, %v14145_v46 }
 0xb0e   :  { %v5481_v24 = vmul.f32 %v5475_v50, %v15900_v23  ;;  %v5483_v7 = vmul.f32 %v5477_v19, %v15901_v17  ;;  %v5480_v22 = vmul.f32 %v5476_v27, %v15901_v17  ;;  %v5715_v41 = vmul.f32 %v5709_v20, %v15902_v15 }
 0xb0f   :  { %v5712_v57 = vmul.f32 %v5708_v39, %v15902_v15  ;;  %v15907_v39 = vld [vmem:[#allocation39_spill] sm:$0xff] }
 0xb10   :  { %9881 = vmatpush.msk.msra.mxu0 %vm3876_vm1, %v5481_v24  ;;  %9887 = vmatpush.msk.msrb.mxu2 %vm3876_vm1, %v5483_v7  ;;  %v5822_v1 = vpop.permute.xlu2 %5821  ;;  %v15905_v24 = vld [vmem:[#allocation42_spill] sm:$0xff] }
 0xb11   :  { %9867 = vmatmul.msk.f32.gmra.mxu0 %vm3869_vm3, %v9858_v10  ;;  %v15903_v10 = vld [vmem:[#allocation35_spill] sm:$0xff] }
 0xb12   :  { %9872 = vmatmul.msk.f32.gmra.mxu1 %vm3869_vm3, %v9869_v34  ;;  %5563 = vmatpush.msrb.mxu2 %v5480_v22 }
 0xb13   :  { %9875 = vmatmul.msk.f32.gmra.mxu2 %vm3869_vm3, %v9869_v34 }
 0xb14   :  { %9903 = vmatpush.msk.msra.mxu2 %vm3876_vm1, %v5715_v41  ;;  %v5588_v59 = vpop.permute.xlu0 %5587  ;;  %v5465_v21 = vpop.permute.xlu1 %5464  ;;  %9893 = vmatmul.msk.f32.vlgmr.msrb.gmra.mxu3 %vm3869_vm3, %v14179_v44  ;;  %v9880_v41 = vld [vmem:[%s15863_s7 + $0xe8] sm:$0xf] }
 0xb15   :  { %v5590_v25 = vsel %vm4515_vm8, %v5584_v61, %v5588_v59  ;;  %v5594_v55 = vsel %vm4515_vm8, %v5588_v59, %v14096_v13  ;;  %v5472_v5 = vsel %vm4395_vm7, %v5465_v21, %v14031_v48  ;;  %v5474_v56 = vsel %vm4395_vm7, %v14103_v51, %v5465_v21  ;;  %v9879_v13 = vld [vmem:[%s15863_s7 + $0xe0] sm:$0xff] }
 0xb16   :  { %v5599_v38 = vmul.f32 %v5590_v25, %v15903_v10  ;;  %5751 = vmatpush.msra.mxu2 %v5712_v57  ;;  %v5478_v61 = vmul.f32 %v5474_v56, %v15900_v23  ;;  %v5479_v26 = vmul.f32 %v5472_v5, %v15898_v30  ;;  %v5600_v43 = vmul.f32 %v5594_v55, %v15904_v12 }
 0xb17   :  { %v5593_v48 = vsel %vm4515_vm8, %v5586_v58, %v5578_v33  ;;  %v5596_v51 = vmul.f32 %v5589_v28, %v15903_v10  ;;  %v15906_v58 = vld [vmem:[#allocation38_spill] sm:$0xff]  ;;  %v9901_v28 = vld [vmem:[%s15863_s7 + $0x100] sm:$0xff] }
 0xb18   :  { %5517 = vmatpush.msra.mxu0 %v5478_v61  ;;  %5540 = vmatpush.msrb.mxu1 %v5479_v26  ;;  %v5597_v33 = vmul.f32 %v5593_v48, %v15904_v12  ;;  %v15908_v61 = vld [vmem:[#allocation44_spill] sm:$0xff]  ;;  %v9902_v48 = vld [vmem:[%s15863_s7 + $0x108] sm:$0xf] }
 0xb19   :  { %9882 = vmatmul.msk.f32.vlgmr.msra.gmra.mxu0 %vm3869_vm3, %v9879_v13 }
 0xb1a   :  { %9885 = vmatmul.msk.f32.vlgmr.msrb.gmra.mxu1 %vm3869_vm3, %v9879_v13  ;;  %9895 = vmatpush.msk.msrb.mxu0 %vm3876_vm1, %v5599_v38 }
 0xb1b   :  { %9888 = vmatmul.msk.f32.vlgmr.msrb.gmra.mxu2 %vm3869_vm3, %v9879_v13  ;;  %9898 = vmatpush.msk.msra.mxu1 %vm3876_vm1, %v5600_v43  ;;  %v15909_v13 = vld [vmem:[#allocation43_spill] sm:$0xff] }
 0xb1c   :  { %5657 = vmatpush.msrb.mxu0 %v5596_v51  ;;  %v5818_v34 = vpop.permute.xlu0 %5817  ;;  %v5705_v62 = vpop.permute.xlu1 %5704  ;;  %9894 = vmatmul.msk.f32.gmra.mxu3 %vm3869_vm3, %v9891_v49 }
 0xb1d   :  { %5680 = vmatpush.msra.mxu1 %v5597_v33  ;;  %v5824_v50 = vsel %vm4755_vm10, %v5818_v34, %v5822_v1  ;;  %v5707_v19 = vsel %vm4635_vm9, %v14129_v29, %v5705_v62  ;;  %v5711_v27 = vsel %vm4635_vm9, %v5705_v62, %v5697_v53  ;;  %v5820_v29 = vpop.permute.xlu2 %5819  ;;  %v9912_v62 = vld [vmem:[%s15863_s7 + $0x110] sm:$0xff] }
 0xb1e   :  { %v5833_v7 = vmul.f32 %v5824_v50, %v15905_v24  ;;  %v5716_v20 = vmul.f32 %v5707_v19, %v15906_v58  ;;  %v5717_v22 = vmul.f32 %v5711_v27, %v15907_v39 }
 0xb20   :  { %9906 = vmatpush.msk.msra.mxu3 %vm3876_vm1, %v5716_v20  ;;  %9909 = vmatpush.msk.msra.mxu0 %vm3876_vm1, %v5717_v22 }
 0xb21   :  { %9917 = vmatpush.msk.msrb.mxu2 %vm3876_vm1, %v5833_v7  ;;  %9883 = vmatmul.msk.f32.gmra.mxu0 %vm3869_vm3, %v9880_v41 }
 0xb22   :  { %9886 = vmatmul.msk.f32.gmra.mxu1 %vm3869_vm3, %v9880_v41 }
 0xb23   :  { %9889 = vmatmul.msk.f32.gmra.mxu2 %vm3869_vm3, %v9880_v41 }
 0xb24   :  { %v5816_v53 = vpop.permute.xlu0 %5815  ;;  %v5703_v59 = vpop.permute.xlu1 %5702 }
 0xb25   :  { %v5823_v21 = vsel %vm4755_vm10, %v5816_v53, %v5820_v29  ;;  %v5706_v57 = vsel %vm4635_vm9, %v14145_v46, %v5703_v59  ;;  %v5710_v25 = vsel %vm4635_vm9, %v5703_v59, %v14142_v52 }
 0xb26   :  { %v5713_v55 = vmul.f32 %v5706_v57, %v15906_v58  ;;  %v5714_v5 = vmul.f32 %v5710_v25, %v15907_v39  ;;  %v5830_v56 = vmul.f32 %v5823_v21, %v15905_v24 }
 0xb28   :  { %5774 = vmatpush.msra.mxu3 %v5713_v55  ;;  %5797 = vmatpush.msra.mxu0 %v5714_v5 }
 0xb29   :  { %5891 = vmatpush.msrb.mxu2 %v5830_v56  ;;  %9896 = vmatmul.msk.f32.vlgmr.msrb.gmra.mxu0 %vm3869_vm3, %v14179_v44 }
 0xb2a   :  { %9899 = vmatmul.msk.f32.vlgmr.msra.gmra.mxu1 %vm3869_vm3, %v14179_v44  ;;  %9907 = vmatmul.msk.f32.vlgmr.msra.gmra.mxu3 %vm3869_vm3, %v9901_v28 }
 0xb2b   :  { %9904 = vmatmul.msk.f32.vlgmr.msra.gmra.mxu2 %vm3869_vm3, %v9901_v28 }
 0xb2c   :  { %v5814_v52 = vpop.permute.xlu1 %5813 }
 0xb2d   :  { %v5826_v46 = vsel %vm4755_vm10, %v5814_v52, %v5818_v34  ;;  %v5828_v38 = vsel %vm4755_vm10, %v5822_v1, %v5814_v52 }
 0xb2e   :  { %v5832_v26 = vmul.f32 %v5826_v46, %v15908_v61  ;;  %v5834_v43 = vmul.f32 %v5828_v38, %v15909_v13 }
 0xb30   :  { %9914 = vmatpush.msk.msrb.mxu1 %vm3876_vm1, %v5832_v26  ;;  %9920 = vmatpush.msk.msrb.mxu3 %vm3876_vm1, %v5834_v43 }
 0xb31   :  { %9897 = vmatmul.msk.f32.gmra.mxu0 %vm3869_vm3, %v9891_v49 }
 0xb32   :  { %9900 = vmatmul.msk.f32.gmra.mxu1 %vm3869_vm3, %v9891_v49  ;;  %9908 = vmatmul.msk.f32.gmra.mxu3 %vm3869_vm3, %v9902_v48  ;;  %v9913_v49 = vld [vmem:[%s15863_s7 + $0x118] sm:$0xf] }
 0xb33   :  { %9905 = vmatmul.msk.f32.gmra.mxu2 %vm3869_vm3, %v9902_v48 }
 0xb34   :  { %v5812_v44 = vpop.permute.xlu1 %5811 }
 0xb35   :  { %v5825_v1 = vsel %vm4755_vm10, %v5812_v44, %v5816_v53  ;;  %v5827_v51 = vsel %vm4755_vm10, %v5820_v29, %v5812_v44 }
 0xb36   :  { %v5829_v33 = vmul.f32 %v5825_v1, %v15908_v61  ;;  %v5831_v34 = vmul.f32 %v5827_v51, %v15909_v13 }
 0xb38   :  { %5868 = vmatpush.msrb.mxu1 %v5829_v33  ;;  %5914 = vmatpush.msrb.mxu3 %v5831_v34 }
 0xb39   :  { %9910 = vmatmul.msk.f32.vlgmr.msra.gmra.mxu0 %vm3869_vm3, %v9901_v28 }
 0xb3a   :  { %9915 = vmatmul.msk.f32.vlgmr.msrb.gmra.mxu1 %vm3869_vm3, %v9912_v62  ;;  %9921 = vmatmul.msk.f32.vlgmr.msrb.gmra.mxu3 %vm3869_vm3, %v9912_v62 }
 0xb3b   :  { %9918 = vmatmul.msk.f32.vlgmr.msrb.gmra.mxu2 %vm3869_vm3, %v9912_v62 }
 0xb41   :  { %9911 = vmatmul.msk.f32.gmra.mxu0 %vm3869_vm3, %v9902_v48 }
 0xb42   :  { %9916 = vmatmul.msk.f32.gmra.mxu1 %vm3869_vm3, %v9913_v49  ;;  %9922 = vmatmul.msk.f32.gmra.mxu3 %vm3869_vm3, %v9913_v49 }
 0xb43   :  { %9919 = vmatmul.msk.f32.gmra.mxu2 %vm3869_vm3, %v9913_v49 }
 0xb46   :  { %v5037_v50 = vpop.f32.mrf.mxu3 }
 0xb4e   :  { %v5040_v7 = vpop.f32.mrf.mxu3 }
 0xb56   :  { %v4991_v19 = vpop.f32.mrf.mxu1 }
 0xb5c   :  { %v5014_v27 = vpop.f32.mrf.mxu2 }
 0xb5e   :  { %v4994_v20 = vpop.f32.mrf.mxu1 }
 0xb64   :  { %v5017_v22 = vpop.f32.mrf.mxu2 }
 0xb66   :  { %v5075_v41 = vpop.f32.mrf.mxu0  ;;  %v5186_v53 = vpop.f32.mrf.mxu3 }
 0xb67   :  { %v5098_v29 = vpop.f32.mrf.mxu1  ;;  %v5076_v12 = vadd.f32 %v5075_v41, %v4991_v19 }
 0xb68   :  { %v5099_v16 = vadd.f32 %v5098_v29, %v5014_v27 }
 0xb69   :  { %v5238_v17 = vadd.f32 %v5186_v53, %v5076_v12 }
 0xb6d   :  { %v5121_v59 = vpop.f32.mrf.mxu2 }
 0xb6e   :  { %v5078_v57 = vpop.f32.mrf.mxu0  ;;  %v5122_v31 = vadd.f32 %v5121_v59, %v5037_v50 }
 0xb6f   :  { %v5101_v21 = vpop.f32.mrf.mxu1  ;;  %v5189_v25 = vpop.f32.mrf.mxu3  ;;  %v5079_v6 = vadd.f32 %v5078_v57, %v4994_v20 }
 0xb70   :  { %v5102_v36 = vadd.f32 %v5101_v21, %v5017_v22 }
 0xb71   :  { %v5241_v11 = vadd.f32 %v5189_v25, %v5079_v6 }
 0xb75   :  { %v5124_v55 = vpop.f32.mrf.mxu2 }
 0xb76   :  { %v5209_v56 = vpop.f32.mrf.mxu0  ;;  %v5125_v20 = vadd.f32 %v5124_v55, %v5040_v7 }
 0xb77   :  { %v5232_v5 = vpop.f32.mrf.mxu1  ;;  %v5326_v28 = vpop.f32.mrf.mxu3  ;;  %v5239_v42 = vadd.f32 %v5209_v56, %v5099_v16 }
 0xb78   :  { %v5240_v37 = vadd.f32 %v5232_v5, %v5122_v31  ;;  %v5954_v31 = vstv %s9925_s15 }
 0xb7e   :  { %v5303_v52 = vpop.f32.mrf.mxu2  ;;  %v5212_v38 = vpop.f32.mrf.mxu0 }
 0xb7f   :  { %v5235_v46 = vpop.f32.mrf.mxu1  ;;  %v14281_v26 = vpop.f32.mrf.mxu3  ;;  %v5355_v54 = vadd.f32 %v5303_v52, %v5238_v17  ;;  %v5242_v16 = vadd.f32 %v5212_v38, %v5102_v36 }
 0xb80   :  { %v5939_v38 = vpop.permute.xlu1 %5938 }
 0xb81   :  { %v5359_v7 = vadd.f32 %v14281_v26, %v5242_v16 }
 0xb86   :  { %v5306_v43 = vpop.f32.mrf.mxu2  ;;  %v5349_v44 = vpop.f32.mrf.mxu0 }
 0xb87   :  { %v5402_v48 = vpop.f32.mrf.mxu1  ;;  %v5448_v1 = vpop.f32.mrf.mxu3  ;;  %v5358_v19 = vadd.f32 %v5306_v43, %v5241_v11  ;;  %v5357_v41 = vadd.f32 %v5349_v44, %v5240_v37 }
 0xb88   :  { %v5454_v4 = vadd.f32 %v5402_v48, %v5355_v54  ;;  %v5356_v54 = vadd.f32 %v5326_v28, %v5239_v42 }
 0xb89   :  { %v5456_v29 = vadd.f32 %v5448_v1, %v5357_v41 }
 0xb8e   :  { %v5425_v51 = vpop.f32.mrf.mxu2  ;;  %v5352_v34 = vpop.f32.mrf.mxu0 }
 0xb8f   :  { %v5405_v33 = vpop.f32.mrf.mxu1  ;;  %v5451_v62 = vpop.f32.mrf.mxu3  ;;  %v5455_v59 = vadd.f32 %v5425_v51, %v5356_v54 }
 0xb90   :  { %v5457_v0 = vadd.f32 %v5405_v33, %v5358_v19 }
 0xb96   :  { %v14283_v49 = vpop.f32.mrf.mxu2  ;;  %v5519_v61 = vpop.f32.mrf.mxu0 }
 0xb97   :  { %v5542_v24 = vpop.f32.mrf.mxu1  ;;  %v5636_v13 = vpop.f32.mrf.mxu3  ;;  %v5571_v45 = vadd.f32 %v5519_v61, %v5454_v4  ;;  %v5243_v61 = vadd.f32 %v5235_v46, %v5125_v20 }
 0xb98   :  { %v5934_v4 = vpop.permute.xlu0 %5933 }
 0xb99   :  { %v5688_v60 = vadd.f32 %v5636_v13, %v5571_v45  ;;  %v5360_v45 = vadd.f32 %v5352_v34, %v5243_v61  ;;  %v5572_v13 = vadd.f32 %v5542_v24, %v5455_v59  ;;  %v5458_v24 = vadd.f32 %v14283_v49, %v5359_v7 }
 0xb9b   :  { %v5459_v55 = vadd.f32 %v5451_v62, %v5360_v45 }
 0xb9e   :  { %v5565_v39 = vpop.f32.mrf.mxu2  ;;  %v5522_v58 = vpop.f32.mrf.mxu0 }
 0xb9f   :  { %v14285_v15 = vpop.f32.mrf.mxu1  ;;  %v5639_v30 = vpop.f32.mrf.mxu3  ;;  %v5574_v57 = vadd.f32 %v5522_v58, %v5457_v0  ;;  %v5573_v11 = vadd.f32 %v5565_v39, %v5456_v29 }
 0xba1   :  { %v5691_v22 = vadd.f32 %v5639_v30, %v5574_v57 }
 0xba6   :  { %v5568_v10 = vpop.f32.mrf.mxu2  ;;  %v5659_v9 = vpop.f32.mrf.mxu0 }
 0xba7   :  { %v5682_v23 = vpop.f32.mrf.mxu1  ;;  %v5689_v42 = vadd.f32 %v5659_v9, %v5572_v13  ;;  %v5576_v28 = vadd.f32 %v5568_v10, %v5459_v55  ;;  %v5575_v9 = vadd.f32 %v14285_v15, %v5458_v24  ;;  %v10025_v55 = vld [vmem:[%s15887_s10 + $0x20] sm:$0xff] }
 0xbad   :  { %v5776_v47 = vpop.f32.mrf.mxu3 }
 0xbae   :  { %v5753_v63 = vpop.f32.mrf.mxu2  ;;  %v5662_v35 = vpop.f32.mrf.mxu0  ;;  %v5806_v5 = vadd.f32 %v5776_v47, %v5689_v42 }
 0xbaf   :  { %v5685_v40 = vpop.f32.mrf.mxu1  ;;  %v5805_v12 = vadd.f32 %v5753_v63, %v5688_v60  ;;  %v5690_v60 = vadd.f32 %v5682_v23, %v5573_v11  ;;  %v5692_v43 = vadd.f32 %v5662_v35, %v5575_v9 }
 0xbb0   :  { %v5693_v26 = vadd.f32 %v5685_v40, %v5576_v28 }
 0xbb5   :  { %v5779_v53 = vpop.f32.mrf.mxu3 }
 0xbb6   :  { %v5756_v17 = vpop.f32.mrf.mxu2  ;;  %v5799_v6 = vpop.f32.mrf.mxu0  ;;  %v5809_v1 = vadd.f32 %v5779_v53, %v5692_v43 }
 0xbb7   :  { %v5870_v27 = vpop.f32.mrf.mxu1  ;;  %v5808_v21 = vadd.f32 %v5756_v17, %v5691_v22  ;;  %v5807_v0 = vadd.f32 %v5799_v6, %v5690_v60  ;;  %v9928_v60 = vld [vmem:[%s15863_s7 + $0x130] sm:$0xff] }
 0xbb8   :  { %v5922_v50 = vadd.f32 %v5870_v27, %v5805_v12 }
 0xbba   :  { %v5941_v37 = vadd.f32 %v5934_v4, %v5922_v50 }
 0xbbc   :  { %vm5948_vm11 = vcmp.ge.f32.partialorder %v5941_v37, 0.0  ;;  %v5955_v63 = vmul.f32 %v5954_v31, %v5941_v37 }
 0xbbd   :  { %v5916_v36 = vpop.f32.mrf.mxu3 }
 0xbbe   :  { %v5961_v58 = vsel %vm5948_vm11, %v5941_v37, %v5955_v63  ;;  %v5893_v25 = vpop.f32.mrf.mxu2  ;;  %v5924_v30 = vadd.f32 %v5916_v36, %v5807_v0  ;;  %v5802_v47 = vpop.f32.mrf.mxu0  ;;  %v15913_v37 = vld [vmem:[#allocation18_spill] sm:$0xff]  ;;  %v9929_v36 = vld [vmem:[%s15863_s7 + $0x138] sm:$0xf] }
 0xbbf   :  { %v14289_v56 = vadd.f32 %v5961_v58, %v13880_v3  ;;  %v5873_v39 = vpop.f32.mrf.mxu1  ;;  %v5923_v52 = vadd.f32 %v5893_v25, %v5806_v5  ;;  %v5810_v33 = vadd.f32 %v5802_v47, %v5693_v26  ;;  %v15914_v58 = vld [vmem:[#allocation19_spill] sm:$0xff]  ;;  %v15916_v47 = vld [vmem:[#allocation21_spill] sm:$0xff] }
 0xbc0   :  { %v5925_v23 = vadd.f32 %v5873_v39, %v5808_v21  ;;  %v5943_v46 = vadd.f32 %v5934_v4, %v5924_v30  ;;  %v9926_v39 = vld [vmem:[%s15863_s7 + $0x120] sm:$0xff] }
 0xbc1   :  { %6000 = vrot.lane.b32.xlu0 %v14289_v56, %s10754_s8  ;;  %v5942_v44 = vadd.f32 %v5934_v4, %v5923_v52 }
 0xbc2   :  { %vm5950_vm12 = vcmp.ge.f32.partialorder %v5943_v46, 0.0  ;;  %v5957_v3 = vmul.f32 %v5954_v31, %v5943_v46  ;;  %v5944_v48 = vadd.f32 %v5939_v38, %v5925_v23 }
 0xbc3   :  { %v5956_v41 = vmul.f32 %v5954_v31, %v5942_v44  ;;  %vm5949_vm14 = vcmp.ge.f32.partialorder %v5942_v44, 0.0 }
 0xbc4   :  { %v5963_v51 = vsel %vm5950_vm12, %v5943_v46, %v5957_v3  ;;  %v5958_v49 = vmul.f32 %v5954_v31, %v5944_v48  ;;  %vm5951_vm13 = vcmp.ge.f32.partialorder %v5944_v48, 0.0 }
 0xbc5   :  { %v14296_v10 = vadd.f32 %v5963_v51, %v13829_v14  ;;  %v5919_v62 = vpop.f32.mrf.mxu3  ;;  %v5962_v14 = vsel %vm5949_vm14, %v5942_v44, %v5956_v41  ;;  %v15917_v44 = vld [vmem:[#allocation26_spill] sm:$0xff] }
 0xbc6   :  { %v5896_v34 = vpop.f32.mrf.mxu2  ;;  %v5927_v15 = vadd.f32 %v5919_v62, %v5810_v33  ;;  %v5964_v40 = vsel %vm5951_vm13, %v5944_v48, %v5958_v49  ;;  %v14309_v27 = vadd.f32 %v5962_v14, %v13837_v18  ;;  %v15918_v62 = vld [vmem:[#allocation17_spill] sm:$0xff] }
 0xbc7   :  { %15910 = vst [vmem:[#allocation45_spill] sm:$0xff] %v14296_v10  ;;  %v5926_v19 = vadd.f32 %v5896_v34, %v5809_v1  ;;  %6008 = vrot.lane.b32.xlu2 %v14296_v10, %s10754_s8  ;;  %v14303_v54 = vadd.f32 %v5964_v40, %v13868_v32 }
 0xbc8   :  { %v5946_v35 = vadd.f32 %v5939_v38, %v5927_v15  ;;  %v9927_v15 = vld [vmem:[%s15863_s7 + $0x128] sm:$0xf] }
 0xbc9   :  { %5973 = vrot.lane.b32.xlu0 %v14289_v56, %s10762_s18  ;;  %v5945_v12 = vadd.f32 %v5939_v38, %v5926_v19  ;;  %v15915_v38 = vld [vmem:[#allocation22_spill] sm:$0xff] }
 0xbca   :  { %vm5953_vm15 = vcmp.ge.f32.partialorder %v5946_v35, 0.0  ;;  %v5960_v17 = vmul.f32 %v5954_v31, %v5946_v35 }
 0xbcb   :  { %v5959_v29 = vmul.f32 %v5954_v31, %v5945_v12  ;;  %vm5952_vm0 = vcmp.ge.f32.partialorder %v5945_v12, 0.0 }
 0xbcc   :  { %v5966_v20 = vsel %vm5953_vm15, %v5946_v35, %v5960_v17 }
 0xbcd   :  { %v14306_v53 = vadd.f32 %v5966_v20, %v13857_v8  ;;  %v5965_v57 = vsel %vm5952_vm0, %v5945_v12, %v5959_v29  ;;  %v15919_v20 = vld [vmem:[#allocation24_spill] sm:$0xff] }
 0xbce   :  { %v14318_v32 = vadd.f32 %v5965_v57, %v13850_v2 }
 0xbcf   :  { %15911 = vst [vmem:[#allocation46_spill] sm:$0xff] %v14306_v53  ;;  %5975 = vrot.lane.b32.xlu2 %v14303_v54, %s10762_s18  ;;  %6010 = vrot.lane.b32.xlu1 %v14306_v53, %s10754_s8 }
 0xbd1   :  { %6004 = vrot.lane.b32.xlu0 %v14309_v27, %s10754_s8 }
 0xbd7   :  { %5983 = vrot.lane.b32.xlu1 %v14306_v53, %s10762_s18  ;;  %6006 = vrot.lane.b32.xlu2 %v14318_v32, %s10754_s8 }
 0xbd9   :  { %6205 = vrot.lane.b32.xlu0 %v14306_v53, %s10763_s22 }
 0xbdf   :  { %6002 = vrot.lane.b32.xlu1 %v14303_v54, %s10754_s8  ;;  %5981 = vrot.lane.b32.xlu2 %v14296_v10, %s10762_s18 }
 0xbe1   :  { %5979 = vrot.lane.b32.xlu0 %v14318_v32, %s10762_s18 }
 0xbe7   :  { %6197 = vrot.lane.b32.xlu1 %v14303_v54, %s10763_s22  ;;  %6195 = vrot.lane.b32.xlu2 %v14289_v56, %s10763_s22 }
 0xbe9   :  { %6199 = vrot.lane.b32.xlu0 %v14309_v27, %s10763_s22 }
 0xbef   :  { %6203 = vrot.lane.b32.xlu1 %v14296_v10, %s10763_s22  ;;  %5977 = vrot.lane.b32.xlu2 %v14309_v27, %s10762_s18 }
 0xbf1   :  { %6312 = vrot.lane.b32.xlu0 %v14289_v56, %s10764_s23 }
 0xbf7   :  { %6201 = vrot.lane.b32.xlu1 %v14318_v32, %s10763_s22  ;;  %6314 = vrot.lane.b32.xlu2 %v14303_v54, %s10764_s23 }
 0xbf9   :  { %6320 = vrot.lane.b32.xlu0 %v14296_v10, %s10764_s23 }
 0xbff   :  { %6318 = vrot.lane.b32.xlu1 %v14318_v32, %s10764_s23  ;;  %6316 = vrot.lane.b32.xlu2 %v14309_v27, %s10764_s23 }
 0xc01   :  { %6528 = vrot.lane.b32.xlu0 %v14289_v56, %s10765_s26 }
 0xc07   :  { %6322 = vrot.lane.b32.xlu1 %v14306_v53, %s10764_s23  ;;  %6530 = vrot.lane.b32.xlu2 %v14303_v54, %s10765_s26 }
 0xc09   :  { %6538 = vrot.lane.b32.xlu0 %v14306_v53, %s10765_s26 }
 0xc0f   :  { %6647 = vrot.lane.b32.xlu1 %v14303_v54, %s10766_s28  ;;  %6532 = vrot.lane.b32.xlu2 %v14309_v27, %s10765_s26 }
 0xc11   :  { %6651 = vrot.lane.b32.xlu0 %v14318_v32, %s10766_s28 }
 0xc17   :  { %6649 = vrot.lane.b32.xlu1 %v14309_v27, %s10766_s28  ;;  %6645 = vrot.lane.b32.xlu2 %v14289_v56, %s10766_s28 }
 0xc19   :  { %6653 = vrot.lane.b32.xlu0 %v14296_v10, %s10766_s28 }
 0xc1f   :  { %6534 = vrot.lane.b32.xlu1 %v14318_v32, %s10765_s26  ;;  %6536 = vrot.lane.b32.xlu2 %v14296_v10, %s10765_s26 }
 0xc21   :  { %6766 = vrot.lane.b32.xlu0 %v14309_v27, %s10760_s20  ;;  %v6009_v18 = vpop.permute.xlu2 %6008 }
 0xc27   :  { %6655 = vrot.lane.b32.xlu1 %v14306_v53, %s10766_s28  ;;  %6768 = vrot.lane.b32.xlu2 %v14318_v32, %s10760_s20 }
 0xc29   :  { %6762 = vrot.lane.b32.xlu0 %v14289_v56, %s10760_s20  ;;  %v5976_v2 = vpop.permute.xlu2 %5975 }
 0xc2f   :  { %6772 = vrot.lane.b32.xlu1 %v14306_v53, %s10760_s20  ;;  %6770 = vrot.lane.b32.xlu2 %v14296_v10, %s10760_s20 }
 0xc31   :  { %6879 = vrot.lane.b32.xlu0 %v14289_v56, %s10767_s2  ;;  %v6007_v8 = vpop.permute.xlu2 %6006 }
 0xc33   :  { %v6001_v50 = vpop.permute.xlu0 %6000 }
 0xc34   :  { %v6016_v24 = vsel %vm3847_vm2, %v6009_v18, %v6001_v50 }
 0xc35   :  { %v6018_v51 = vmul.f32 %v6016_v24, %v15915_v38 }
 0xc37   :  { %6764 = vrot.lane.b32.xlu1 %v14303_v54, %s10760_s20  ;;  %6881 = vrot.lane.b32.xlu2 %v14303_v54, %s10767_s2 }
 0xc39   :  { %6883 = vrot.lane.b32.xlu0 %v14309_v27, %s10767_s2  ;;  %v5982_v4 = vpop.permute.xlu2 %5981 }
 0xc3b   :  { %v5974_v61 = vpop.permute.xlu0 %5973 }
 0xc3c   :  { %v5989_v7 = vsel %vm3819_vm5, %v5982_v4, %v5974_v61 }
 0xc3d   :  { %v5991_v5 = vmul.f32 %v5989_v7, %v15914_v58 }
 0xc3f   :  { %6889 = vrot.lane.b32.xlu1 %v14306_v53, %s10767_s2  ;;  %6887 = vrot.lane.b32.xlu2 %v14296_v10, %s10767_s2 }
 0xc41   :  { %v6011_v59 = vpop.permute.xlu1 %6010  ;;  %v14402_v6 = vpop.permute.xlu2 %6195 }
 0xc42   :  { %v6013_v16 = vsel %vm3847_vm2, %v6007_v8, %v6011_v59 }
 0xc43   :  { %v6005_v11 = vpop.permute.xlu0 %6004  ;;  %v6023_v45 = vmul.f32 %v6013_v16, %v15913_v37 }
 0xc44   :  { %v6012_v13 = vsel %vm3847_vm2, %v6005_v11, %v6009_v18  ;;  %v6014_v28 = vsel %vm3847_vm2, %v6001_v50, %v6005_v11 }
 0xc45   :  { %v6020_v22 = vmul.f32 %v6012_v13, %v15913_v37  ;;  %9936 = vmatpush.msk.msra.mxu2 %vm3876_vm1, %v6023_v45  ;;  %v6019_v33 = vmul.f32 %v6014_v28, %v15916_v47  ;;  %v15923_v28 = vld [vmem:[#allocation27_spill] sm:$0xff] }
 0xc47   :  { %6885 = vrot.lane.b32.xlu1 %v14318_v32, %s10767_s2  ;;  %6103 = vmatpush.msra.mxu2 %v6020_v22  ;;  %v15920_v22 = vld [vmem:[#allocation25_spill] sm:$0xff] }
 0xc48   :  { %9937 = vmatmul.msk.f32.vlgmr.msra.gmra.mxu2 %vm3869_vm3, %v9928_v60 }
 0xc49   :  { %v5984_v63 = vpop.permute.xlu1 %5983  ;;  %v5978_v42 = vpop.permute.xlu2 %5977 }
 0xc4a   :  { %v5990_v21 = vsel %vm3819_vm5, %v5984_v63, %v5976_v2  ;;  %v5985_v34 = vsel %vm3819_vm5, %v5978_v42, %v5982_v4  ;;  %v5987_v19 = vsel %vm3819_vm5, %v5974_v61, %v5978_v42  ;;  %v9948_v4 = vld [vmem:[%s15863_s7 + $0x140] sm:$0xff] }
 0xc4b   :  { %v14419_v0 = vpop.permute.xlu0 %6205  ;;  %v5994_v25 = vmul.f32 %v5990_v21, %v15914_v58  ;;  %v5993_v41 = vmul.f32 %v5985_v34, %v15917_v44  ;;  %v5992_v35 = vmul.f32 %v5987_v19, %v15918_v62  ;;  %v9949_v21 = vld [vmem:[%s15863_s7 + $0x148] sm:$0xf] }
 0xc4d   :  { %9939 = vmatpush.msk.msra.mxu3 %vm3876_vm1, %v5994_v25 }
 0xc4f   :  { %7001 = vperm.xlu1 %10279, %v10025_v55   ;;  %6141 = vmatpush.msra.mxu3 %v5991_v5 }
 0xc50   :  { %9938 = vmatmul.msk.f32.gmra.mxu2 %vm3869_vm3, %v9929_v36  ;;  %9940 = vmatmul.msk.f32.vlgmr.msra.gmra.mxu3 %vm3869_vm3, %v9926_v39 }
 0xc51   :  { %v6003_v30 = vpop.permute.xlu1 %6002  ;;  %v14431_v23 = vpop.permute.xlu2 %6314 }
 0xc52   :  { %v6015_v52 = vsel %vm3847_vm2, %v6003_v30, %v6007_v8  ;;  %v6017_v9 = vsel %vm3847_vm2, %v6011_v59, %v6003_v30 }
 0xc53   :  { %v5980_v46 = vpop.permute.xlu0 %5979  ;;  %v6021_v26 = vmul.f32 %v6017_v9, %v15915_v38  ;;  %v6022_v43 = vmul.f32 %v6015_v52, %v15916_v47 }
 0xc54   :  { %v5986_v3 = vsel %vm3819_vm5, %v5980_v46, %v5984_v63  ;;  %v5988_v48 = vsel %vm3819_vm5, %v5976_v2, %v5980_v46  ;;  %v15921_v63 = vld [vmem:[#allocation23_spill] sm:$0xff] }
 0xc55   :  { %v5996_v1 = vmul.f32 %v5986_v3, %v15917_v44  ;;  %v5995_v49 = vmul.f32 %v5988_v48, %v15918_v62  ;;  %9930 = vmatpush.msk.msrb.mxu0 %vm3876_vm1, %v6021_v26  ;;  %9933 = vmatpush.msk.msra.mxu1 %vm3876_vm1, %v6022_v43  ;;  %v9959_v26 = vld [vmem:[%s15863_s7 + $0x150] sm:$0xff]  ;;  %v15924_v43 = vld [vmem:[#allocation33_spill] sm:$0xff] }
 0xc56   :  { %v6434_v3 = vmul.f32 %v14306_v53, %v15924_v43 }
 0xc57   :  { %6057 = vmatpush.msrb.mxu0 %v6018_v51  ;;  %6080 = vmatpush.msra.mxu1 %v6019_v33 }
 0xc58   :  { %9931 = vmatmul.msk.f32.vlgmr.msrb.gmra.mxu0 %vm3869_vm3, %v9928_v60  ;;  %9934 = vmatmul.msk.f32.vlgmr.msra.gmra.mxu1 %vm3869_vm3, %v9928_v60 }
 0xc59   :  { %9945 = vmatpush.msk.msrb.mxu1 %vm3876_vm1, %v5996_v1  ;;  %9942 = vmatpush.msk.msra.mxu0 %vm3876_vm1, %v5995_v49  ;;  %v6198_v40 = vpop.permute.xlu1 %6197  ;;  %v6317_v12 = vpop.permute.xlu2 %6316  ;;  %v6431_v1 = vmul.f32 %v14296_v10, %v15924_v43 }
 0xc5a   :  { %v6212_v17 = vsel %vm4047_vm4, %v14419_v0, %v6198_v40  ;;  %9941 = vmatmul.msk.f32.gmra.mxu3 %vm3869_vm3, %v9927_v15 }
 0xc5b   :  { %6187 = vmatpush.msrb.mxu1 %v5993_v41  ;;  %v6200_v14 = vpop.permute.xlu0 %6199  ;;  %v6216_v29 = vmul.f32 %v6212_v17, %v15919_v20  ;;  %6164 = vmatpush.msra.mxu0 %v5992_v35  ;;  %v15926_v35 = vld [vmem:[#allocation28_spill] sm:$0xff] }
 0xc5c   :  { %v6209_v59 = vsel %vm4047_vm4, %v14402_v6, %v6200_v14 }
 0xc5d   :  { %9950 = vmatpush.msk.msrb.mxu2 %vm3876_vm1, %v6216_v29 }
 0xc60   :  { %9932 = vmatmul.msk.f32.gmra.mxu0 %vm3869_vm3, %v9929_v36  ;;  %9935 = vmatmul.msk.f32.gmra.mxu1 %vm3869_vm3, %v9929_v36 }
 0xc61   :  { %v6204_v57 = vpop.permute.xlu1 %6203  ;;  %v14469_v18 = vpop.permute.xlu2 %6530 }
 0xc62   :  { %v6211_v2 = vsel %vm4047_vm4, %v6204_v57, %v14402_v6  ;;  %v6207_v16 = vsel %vm4047_vm4, %v6200_v14, %v6204_v57  ;;  %v6214_v6 = vmul.f32 %v6209_v59, %v15920_v22  ;;  %v9960_v14 = vld [vmem:[%s15863_s7 + $0x158] sm:$0xf]  ;;  %v15927_v57 = vld [vmem:[#allocation30_spill] sm:$0xff] }
 0xc63   :  { %v6313_v8 = vpop.permute.xlu0 %6312  ;;  %v6213_v50 = vmul.f32 %v6211_v2, %v15919_v20  ;;  %v6215_v25 = vmul.f32 %v6207_v16, %v15921_v63  ;;  %v6433_v2 = vmul.f32 %v14318_v32, %v15927_v57  ;;  %v15928_v59 = vld [vmem:[#allocation36_spill] sm:$0xff] }
 0xc65   :  { %6252 = vmatpush.msrb.mxu2 %v6213_v50 }
 0xc66   :  { %9951 = vmatmul.msk.f32.vlgmr.msrb.gmra.mxu2 %vm3869_vm3, %v9948_v4 }
 0xc68   :  { %9943 = vmatmul.msk.f32.vlgmr.msra.gmra.mxu0 %vm3869_vm3, %v9926_v39  ;;  %9946 = vmatmul.msk.f32.vlgmr.msrb.gmra.mxu1 %vm3869_vm3, %v9926_v39  ;;  %v6326_v39 = vsel %vm4167_vm6, %v6313_v8, %v6317_v12 }
 0xc69   :  { %v6202_v61 = vpop.permute.xlu1 %6201  ;;  %v14492_v7 = vpop.permute.xlu2 %6532  ;;  %v6331_v9 = vmul.f32 %v6326_v39, %v15923_v28 }
 0xc6a   :  { %v6208_v11 = vsel %vm4047_vm4, %v6202_v61, %v14419_v0  ;;  %v6210_v45 = vsel %vm4047_vm4, %v6198_v40, %v6202_v61  ;;  %v15922_v0 = vld [vmem:[#allocation32_spill] sm:$0xff] }
 0xc6b   :  { %v6321_v13 = vpop.permute.xlu0 %6320  ;;  %v6217_v60 = vmul.f32 %v6210_v45, %v15920_v22  ;;  %v6218_v42 = vmul.f32 %v6208_v11, %v15921_v63  ;;  %v6432_v55 = vmul.f32 %v14303_v54, %v15922_v0  ;;  %v6429_v36 = vmul.f32 %v14289_v56, %v15922_v0  ;;  %v15929_v45 = vld [vmem:[#allocation34_spill] sm:$0xff] }
 0xc6c   :  { %v6324_v51 = vsel %vm4167_vm6, %v6317_v12, %v6321_v13  ;;  %v6328_v33 = vsel %vm4167_vm6, %v6321_v13, %v6313_v8 }
 0xc6d   :  { %9953 = vmatpush.msk.msrb.mxu3 %vm3876_vm1, %v6217_v60  ;;  %9956 = vmatpush.msk.msrb.mxu0 %vm3876_vm1, %v6218_v42  ;;  %v6332_v17 = vmul.f32 %v6324_v51, %v15926_v35  ;;  %v9970_v42 = vld [vmem:[%s15863_s7 + $0x160] sm:$0xff] }
 0xc6e   :  { %9952 = vmatmul.msk.f32.gmra.mxu2 %vm3869_vm3, %v9949_v21 }
 0xc6f   :  { %6275 = vmatpush.msrb.mxu3 %v6214_v6  ;;  %6298 = vmatpush.msrb.mxu0 %v6215_v25 }
 0xc70   :  { %9944 = vmatmul.msk.f32.gmra.mxu0 %vm3869_vm3, %v9927_v15  ;;  %9954 = vmatmul.msk.f32.vlgmr.msrb.gmra.mxu3 %vm3869_vm3, %v9948_v4 }
 0xc71   :  { %9972 = vmatpush.msk.msra.mxu0 %vm3876_vm1, %v6432_v55  ;;  %v6319_v5 = vpop.permute.xlu1 %6318  ;;  %9947 = vmatmul.msk.f32.gmra.mxu1 %vm3869_vm3, %v9927_v15  ;;  %v14517_v46 = vpop.permute.xlu2 %6645  ;;  %v15925_v15 = vld [vmem:[#allocation29_spill] sm:$0xff]  ;;  %v9971_v55 = vld [vmem:[%s15863_s7 + $0x168] sm:$0xf] }
 0xc72   :  { %v6327_v24 = vsel %vm4167_vm6, %v14431_v23, %v6319_v5  ;;  %v6330_v12 = vmul.f32 %v6328_v33, %v15925_v15 }
 0xc73   :  { %v14513_v30 = vpop.permute.xlu0 %6528  ;;  %v6334_v52 = vmul.f32 %v6327_v24, %v15923_v28  ;;  %6468 = vmatpush.msra.mxu0 %v6429_v36 }
 0xc74   :  { %v6542_v39 = vsel %vm4395_vm7, %v14513_v30, %v14492_v7 }
 0xc75   :  { %9964 = vmatpush.msk.msra.mxu2 %vm3876_vm1, %v6334_v52 }
 0xc77   :  { %6392 = vmatpush.msra.mxu2 %v6331_v9 }
 0xc78   :  { %9955 = vmatmul.msk.f32.gmra.mxu3 %vm3869_vm3, %v9949_v21  ;;  %9957 = vmatmul.msk.f32.vlgmr.msrb.gmra.mxu0 %vm3869_vm3, %v9948_v4  ;;  %v6430_v4 = vmul.f32 %v14309_v27, %v15927_v57 }
 0xc79   :  { %9965 = vmatmul.msk.f32.vlgmr.msra.gmra.mxu2 %vm3869_vm3, %v9959_v26  ;;  %v6323_v48 = vpop.permute.xlu1 %6322  ;;  %v6537_v29 = vpop.permute.xlu2 %6536 }
 0xc7a   :  { %9978 = vmatpush.msk.msrb.mxu2 %vm3876_vm1, %v6434_v3  ;;  %v6325_v34 = vsel %vm4167_vm6, %v6319_v5, %v6323_v48  ;;  %v6329_v49 = vsel %vm4167_vm6, %v6323_v48, %v14431_v23  ;;  %v6544_v50 = vsel %vm4395_vm7, %v6537_v29, %v14513_v30  ;;  %v6540_v24 = vsel %vm4395_vm7, %v14492_v7, %v6537_v29  ;;  %v15930_v3 = vld [vmem:[#allocation31_spill] sm:$0xff]  ;;  %v15933_v29 = vld [vmem:[#allocation41_spill] sm:$0xff] }
 0xc7b   :  { %v6539_v19 = vpop.permute.xlu0 %6538  ;;  %v6333_v41 = vmul.f32 %v6329_v49, %v15925_v15  ;;  %v6335_v40 = vmul.f32 %v6325_v34, %v15926_v35  ;;  %v6548_v60 = vmul.f32 %v6544_v50, %v15928_v59  ;;  %v6546_v33 = vmul.f32 %v6542_v39, %v15930_v3  ;;  %v9981_v7 = vld [vmem:[%s15863_s7 + $0x170] sm:$0xff]  ;;  %v9992_v34 = vld [vmem:[%s15863_s7 + $0x180] sm:$0xff] }
 0xc7c   :  { %6514 = vmatpush.msrb.mxu2 %v6431_v1  ;;  %v6545_v23 = vsel %vm4395_vm7, %v6539_v19, %v14469_v18  ;;  %v15931_v1 = vld [vmem:[#allocation37_spill] sm:$0xff] }
 0xc7d   :  { %9961 = vmatpush.msk.msra.mxu1 %vm3876_vm1, %v6333_v41  ;;  %9967 = vmatpush.msk.msra.mxu3 %vm3876_vm1, %v6335_v40  ;;  %v6551_v16 = vmul.f32 %v6545_v23, %v15928_v59  ;;  %v6547_v30 = vmul.f32 %v6540_v24, %v15931_v1 }
 0xc7f   :  { %6369 = vmatpush.msra.mxu1 %v6330_v12  ;;  %6415 = vmatpush.msra.mxu3 %v6332_v17  ;;  %v15932_v17 = vld [vmem:[#allocation35_spill] sm:$0xff] }
 0xc80   :  { %9958 = vmatmul.msk.f32.gmra.mxu0 %vm3869_vm3, %v9949_v21  ;;  %9962 = vmatmul.msk.f32.vlgmr.msra.gmra.mxu1 %vm3869_vm3, %v9959_v26 }
 0xc81   :  { %9966 = vmatmul.msk.f32.gmra.mxu2 %vm3869_vm3, %v9960_v14  ;;  %9968 = vmatmul.msk.f32.vlgmr.msra.gmra.mxu3 %vm3869_vm3, %v9959_v26  ;;  %v6648_v8 = vpop.permute.xlu1 %6647  ;;  %v6769_v26 = vpop.permute.xlu2 %6768 }
 0xc82   :  { %9975 = vmatpush.msk.msrb.mxu1 %vm3876_vm1, %v6433_v2 }
 0xc83   :  { %v6652_v61 = vpop.permute.xlu0 %6651 }
 0xc84   :  { %v6660_v11 = vsel %vm4515_vm8, %v6648_v8, %v6652_v61  ;;  %6491 = vmatpush.msrb.mxu1 %v6430_v4 }
 0xc85   :  { %v6666_v13 = vmul.f32 %v6660_v11, %v15929_v45 }
 0xc86   :  { %9989 = vmatpush.msk.msra.mxu1 %vm3876_vm1, %v6551_v16  ;;  %v9993_v16 = vld [vmem:[%s15863_s7 + $0x188] sm:$0xf] }
 0xc87   :  { %9994 = vmatpush.msk.msra.mxu2 %vm3876_vm1, %v6666_v13 }
 0xc88   :  { %6631 = vmatpush.msra.mxu1 %v6548_v60  ;;  %9973 = vmatmul.msk.f32.vlgmr.msra.gmra.mxu0 %vm3869_vm3, %v9970_v42  ;;  %v15934_v60 = vld [vmem:[#allocation38_spill] sm:$0xff] }
 0xc89   :  { %9963 = vmatmul.msk.f32.gmra.mxu1 %vm3869_vm3, %v9960_v14  ;;  %9969 = vmatmul.msk.f32.gmra.mxu3 %vm3869_vm3, %v9960_v14  ;;  %v6650_v21 = vpop.permute.xlu1 %6649  ;;  %v6771_v2 = vpop.permute.xlu2 %6770 }
 0xc8a   :  { %9979 = vmatmul.msk.f32.vlgmr.msrb.gmra.mxu2 %vm3869_vm3, %v9970_v42  ;;  %v6659_v6 = vsel %vm4515_vm8, %v14517_v46, %v6650_v21 }
 0xc8b   :  { %v6663_v25 = vmul.f32 %v6659_v6, %v15929_v45  ;;  %v6654_v5 = vpop.permute.xlu0 %6653  ;;  %v10003_v6 = vld [vmem:[%s15863_s7 + $0x190] sm:$0xff] }
 0xc8c   :  { %v6661_v41 = vsel %vm4515_vm8, %v6654_v5, %v14517_v46  ;;  %v9982_v46 = vld [vmem:[%s15863_s7 + $0x178] sm:$0xf] }
 0xc8d   :  { %6702 = vmatpush.msra.mxu2 %v6663_v25  ;;  %v6665_v4 = vmul.f32 %v6661_v41, %v15933_v29  ;;  %v15937_v41 = vld [vmem:[#allocation43_spill] sm:$0xff] }
 0xc90   :  { %9974 = vmatmul.msk.f32.gmra.mxu0 %vm3869_vm3, %v9971_v55 }
 0xc91   :  { %9976 = vmatmul.msk.f32.vlgmr.msrb.gmra.mxu1 %vm3869_vm3, %v9970_v42  ;;  %v6535_v36 = vpop.permute.xlu1 %6534  ;;  %v6882_v25 = vpop.permute.xlu2 %6881 }
 0xc92   :  { %9980 = vmatmul.msk.f32.gmra.mxu2 %vm3869_vm3, %v9971_v55  ;;  %v6541_v52 = vsel %vm4395_vm7, %v6535_v36, %v6539_v19  ;;  %v6543_v9 = vsel %vm4395_vm7, %v14469_v18, %v6535_v36  ;;  %v6657_v19 = vsel %vm4515_vm8, %v6650_v21, %v6654_v5 }
 0xc93   :  { %v6549_v48 = vmul.f32 %v6543_v9, %v15930_v3  ;;  %v6550_v51 = vmul.f32 %v6541_v52, %v15931_v1  ;;  %v6767_v18 = vpop.permute.xlu0 %6766  ;;  %v6664_v50 = vmul.f32 %v6657_v19, %v15932_v17  ;;  %v15935_v52 = vld [vmem:[#allocation40_spill] sm:$0xff] }
 0xc95   :  { %9983 = vmatpush.msk.msrb.mxu3 %vm3876_vm1, %v6549_v48  ;;  %9986 = vmatpush.msk.msrb.mxu0 %vm3876_vm1, %v6550_v51  ;;  %v15936_v48 = vld [vmem:[#allocation39_spill] sm:$0xff] }
 0xc97   :  { %6585 = vmatpush.msrb.mxu3 %v6546_v33  ;;  %6608 = vmatpush.msrb.mxu0 %v6547_v30 }
 0xc98   :  { %9984 = vmatmul.msk.f32.vlgmr.msrb.gmra.mxu3 %vm3869_vm3, %v9981_v7  ;;  %9987 = vmatmul.msk.f32.vlgmr.msrb.gmra.mxu0 %vm3869_vm3, %v9981_v7 }
 0xc99   :  { %9977 = vmatmul.msk.f32.gmra.mxu1 %vm3869_vm3, %v9971_v55  ;;  %v6656_v49 = vpop.permute.xlu1 %6655 }
 0xc9a   :  { %9995 = vmatmul.msk.f32.vlgmr.msra.gmra.mxu2 %vm3869_vm3, %v9992_v34  ;;  %v6658_v40 = vsel %vm4515_vm8, %v6652_v61, %v6656_v49  ;;  %v6662_v12 = vsel %vm4515_vm8, %v6656_v49, %v6648_v8  ;;  %v6774_v61 = vsel %vm4635_vm9, %v6767_v18, %v6771_v2 }
 0xc9b   :  { %v6667_v14 = vmul.f32 %v6658_v40, %v15932_v17  ;;  %v6668_v23 = vmul.f32 %v6662_v12, %v15933_v29  ;;  %v6763_v13 = vpop.permute.xlu0 %6762  ;;  %v6781_v21 = vmul.f32 %v6774_v61, %v15934_v60 }
 0xc9c   :  { %v6776_v5 = vsel %vm4635_vm9, %v6763_v13, %v6767_v18  ;;  %v6778_v36 = vsel %vm4635_vm9, %v6771_v2, %v6763_v13 }
 0xc9d   :  { %9997 = vmatpush.msk.msra.mxu3 %vm3876_vm1, %v6667_v14  ;;  %10000 = vmatpush.msk.msra.mxu0 %vm3876_vm1, %v6668_v23  ;;  %v6780_v33 = vmul.f32 %v6776_v5, %v15935_v52  ;;  %v6782_v30 = vmul.f32 %v6778_v36, %v15936_v48  ;;  %v10014_v14 = vld [vmem:[%s15863_s7 + $0x1a0] sm:$0xff] }
 0xc9f   :  { %6725 = vmatpush.msra.mxu3 %v6664_v50  ;;  %6748 = vmatpush.msra.mxu0 %v6665_v4 }
 0xca0   :  { %9985 = vmatmul.msk.f32.gmra.mxu3 %vm3869_vm3, %v9982_v46  ;;  %9988 = vmatmul.msk.f32.gmra.mxu0 %vm3869_vm3, %v9982_v46 }
 0xca1   :  { %9990 = vmatmul.msk.f32.vlgmr.msra.gmra.mxu1 %vm3869_vm3, %v9981_v7  ;;  %v6773_v8 = vpop.permute.xlu1 %6772 }
 0xca2   :  { %9996 = vmatmul.msk.f32.gmra.mxu2 %vm3869_vm3, %v9993_v16  ;;  %v6775_v11 = vsel %vm4635_vm9, %v6769_v26, %v6773_v8 }
 0xca3   :  { %v6784_v42 = vmul.f32 %v6775_v11, %v15934_v60  ;;  %v6880_v7 = vpop.permute.xlu0 %6879  ;;  %v15939_v11 = vld [vmem:[#allocation42_spill] sm:$0xff] }
 0xca5   :  { %10008 = vmatpush.msk.msrb.mxu2 %vm3876_vm1, %v6784_v42 }
 0xca7   :  { %6842 = vmatpush.msrb.mxu2 %v6781_v21 }
 0xca8   :  { %9998 = vmatmul.msk.f32.vlgmr.msra.gmra.mxu3 %vm3869_vm3, %v9992_v34  ;;  %10001 = vmatmul.msk.f32.vlgmr.msra.gmra.mxu0 %vm3869_vm3, %v9992_v34  ;;  %v10004_v34 = vld [vmem:[%s15863_s7 + $0x198] sm:$0xf] }
 0xca9   :  { %9991 = vmatmul.msk.f32.gmra.mxu1 %vm3869_vm3, %v9982_v46  ;;  %v6765_v55 = vpop.permute.xlu1 %6764 }
 0xcaa   :  { %10009 = vmatmul.msk.f32.vlgmr.msrb.gmra.mxu2 %vm3869_vm3, %v10003_v6  ;;  %v6777_v39 = vsel %vm4635_vm9, %v6765_v55, %v6769_v26  ;;  %v6779_v24 = vsel %vm4635_vm9, %v6773_v8, %v6765_v55  ;;  %v6888_v26 = vpop.permute.xlu2 %6887  ;;  %v15938_v8 = vld [vmem:[#allocation44_spill] sm:$0xff] }
 0xcab   :  { %v6783_v9 = vmul.f32 %v6777_v39, %v15935_v52  ;;  %v6785_v51 = vmul.f32 %v6779_v24, %v15936_v48  ;;  %v6895_v49 = vsel %vm4755_vm10, %v6888_v26, %v6880_v7  ;;  %v6884_v23 = vpop.permute.xlu0 %6883 }
 0xcac   :  { %v6899_v12 = vmul.f32 %v6895_v49, %v15937_v41  ;;  %v6891_v50 = vsel %vm4755_vm10, %v6884_v23, %v6888_v26  ;;  %v6893_v4 = vsel %vm4755_vm10, %v6880_v7, %v6884_v23 }
 0xcad   :  { %10005 = vmatpush.msk.msrb.mxu1 %vm3876_vm1, %v6783_v9  ;;  %10011 = vmatpush.msk.msrb.mxu3 %vm3876_vm1, %v6785_v51  ;;  %v6897_v42 = vmul.f32 %v6893_v4, %v15938_v8  ;;  %v6898_v21 = vmul.f32 %v6891_v50, %v15939_v11 }
 0xcaf   :  { %6819 = vmatpush.msrb.mxu1 %v6780_v33  ;;  %6865 = vmatpush.msrb.mxu3 %v6782_v30 }
 0xcb0   :  { %9999 = vmatmul.msk.f32.gmra.mxu3 %vm3869_vm3, %v9993_v16  ;;  %10002 = vmatmul.msk.f32.gmra.mxu0 %vm3869_vm3, %v9993_v16 }
 0xcb1   :  { %10006 = vmatmul.msk.f32.vlgmr.msrb.gmra.mxu1 %vm3869_vm3, %v10003_v6  ;;  %v6890_v18 = vpop.permute.xlu1 %6889 }
 0xcb2   :  { %10010 = vmatmul.msk.f32.gmra.mxu2 %vm3869_vm3, %v10004_v34  ;;  %v6896_v19 = vsel %vm4755_vm10, %v6890_v18, %v6882_v25 }
 0xcb3   :  { %v6902_v40 = vmul.f32 %v6896_v19, %v15937_v41 }
 0xcb5   :  { %10022 = vmatpush.msk.msra.mxu2 %vm3876_vm1, %v6902_v40 }
 0xcb7   :  { %6982 = vmatpush.msra.mxu2 %v6899_v12 }
 0xcb8   :  { %10012 = vmatmul.msk.f32.vlgmr.msrb.gmra.mxu3 %vm3869_vm3, %v10003_v6  ;;  %v10015_v6 = vld [vmem:[%s15863_s7 + $0x1a8] sm:$0xf] }
 0xcb9   :  { %10007 = vmatmul.msk.f32.gmra.mxu1 %vm3869_vm3, %v10004_v34  ;;  %v6886_v2 = vpop.permute.xlu1 %6885 }
 0xcba   :  { %10023 = vmatmul.msk.f32.vlgmr.msra.gmra.mxu2 %vm3869_vm3, %v10014_v14  ;;  %v6892_v46 = vsel %vm4755_vm10, %v6886_v2, %v6890_v18  ;;  %v6894_v16 = vsel %vm4755_vm10, %v6882_v25, %v6886_v2  ;;  %v10026_v25 = vld [vmem:[%s15887_s10 + $0x28] sm:$0xf] }
 0xcbb   :  { %v6900_v61 = vmul.f32 %v6894_v16, %v15938_v8  ;;  %v6901_v13 = vmul.f32 %v6892_v46, %v15939_v11  ;;  %7006 = vperm.xlu2 %10281, %v10026_v25  }
 0xcbd   :  { %10016 = vmatpush.msk.msrb.mxu0 %vm3876_vm1, %v6900_v61  ;;  %10019 = vmatpush.msk.msra.mxu1 %vm3876_vm1, %v6901_v13 }
 0xcbf   :  { %6936 = vmatpush.msrb.mxu0 %v6897_v42  ;;  %6959 = vmatpush.msra.mxu1 %v6898_v21 }
 0xcc0   :  { %10013 = vmatmul.msk.f32.gmra.mxu3 %vm3869_vm3, %v10004_v34  ;;  %10017 = vmatmul.msk.f32.vlgmr.msrb.gmra.mxu0 %vm3869_vm3, %v10014_v14 }
 0xcc1   :  { %10020 = vmatmul.msk.f32.vlgmr.msra.gmra.mxu1 %vm3869_vm3, %v10014_v14 }
 0xcc2   :  { %10024 = vmatmul.msk.f32.gmra.mxu2 %vm3869_vm3, %v10015_v6 }
 0xcc8   :  { %10018 = vmatmul.msk.f32.gmra.mxu0 %vm3869_vm3, %v10015_v6 }
 0xcc9   :  { %10021 = vmatmul.msk.f32.gmra.mxu1 %vm3869_vm3, %v10015_v6 }
 0xccb   :  { %v14689_v5 = vpop.f32.mrf.mxu2 }
 0xcd3   :  { %v14691_v24 = vpop.f32.mrf.mxu2  ;;  %v6143_v51 = vpop.f32.mrf.mxu3 }
 0xcd5   :  { %v6059_v55 = vpop.f32.mrf.mxu0  ;;  %v6082_v36 = vpop.f32.mrf.mxu1 }
 0xcd6   :  { %v6144_v3 = vadd.f32 %v6143_v51, %v6059_v55 }
 0xcdd   :  { %v6062_v39 = vpop.f32.mrf.mxu0  ;;  %v6085_v9 = vpop.f32.mrf.mxu1 }
 0xcde   :  { %v6146_v34 = vpop.f32.mrf.mxu3 }
 0xcdf   :  { %v6147_v58 = vadd.f32 %v6146_v34, %v6062_v39 }
 0xce5   :  { %v6166_v33 = vpop.f32.mrf.mxu0  ;;  %v6189_v7 = vpop.f32.mrf.mxu1 }
 0xce6   :  { %v6167_v57 = vadd.f32 %v6166_v33, %v6082_v36 }
 0xce9   :  { %v6254_v30 = vpop.f32.mrf.mxu2 }
 0xcea   :  { %v6306_v28 = vadd.f32 %v6254_v30, %v6144_v3 }
 0xced   :  { %v6169_v26 = vpop.f32.mrf.mxu0 }
 0xcee   :  { %v14693_v49 = vpop.f32.mrf.mxu1  ;;  %v6170_v38 = vadd.f32 %v6169_v26, %v6085_v9 }
 0xcf1   :  { %v6257_v18 = vpop.f32.mrf.mxu2 }
 0xcf2   :  { %v6309_v31 = vadd.f32 %v6257_v18, %v6147_v58  ;;  %v6193_v58 = vadd.f32 %v14693_v49, %v14691_v24 }
 0xcf3   :  { %v6277_v19 = vpop.f32.mrf.mxu3 }
 0xcf4   :  { %v6307_v15 = vadd.f32 %v6277_v19, %v6167_v57 }
 0xcf5   :  { %v14695_v40 = vpop.f32.mrf.mxu0 }
 0xcfb   :  { %v6280_v2 = vpop.f32.mrf.mxu3 }
 0xcfc   :  { %v6394_v12 = vpop.f32.mrf.mxu2  ;;  %v6310_v10 = vadd.f32 %v6280_v2, %v6170_v38 }
 0xcfd   :  { %v14697_v14 = vpop.f32.mrf.mxu0  ;;  %v6371_v23 = vpop.f32.mrf.mxu1  ;;  %v6424_v35 = vadd.f32 %v6394_v12, %v6307_v15 }
 0xcfe   :  { %v6423_v0 = vadd.f32 %v6371_v23, %v6306_v28 }
 0xd04   :  { %v6397_v50 = vpop.f32.mrf.mxu2  ;;  %v6417_v16 = vpop.f32.mrf.mxu3 }
 0xd05   :  { %v6470_v46 = vpop.f32.mrf.mxu0  ;;  %v6427_v3 = vadd.f32 %v6397_v50, %v6310_v10 }
 0xd06   :  { %v6374_v4 = vpop.f32.mrf.mxu1  ;;  %v6522_v22 = vadd.f32 %v6470_v46, %v6423_v0 }
 0xd07   :  { %v6426_v51 = vadd.f32 %v6374_v4, %v6309_v31 }
 0xd0c   :  { %v14701_v21 = vpop.f32.mrf.mxu3 }
 0xd0d   :  { %v14699_v61 = vpop.f32.mrf.mxu2  ;;  %v6473_v13 = vpop.f32.mrf.mxu0 }
 0xd0e   :  { %v6493_v42 = vpop.f32.mrf.mxu1  ;;  %v6525_v57 = vadd.f32 %v6473_v13, %v6426_v51 }
 0xd0f   :  { %v6523_v63 = vadd.f32 %v6493_v42, %v6424_v35  ;;  %v6190_v35 = vadd.f32 %v6189_v7, %v14689_v5 }
 0xd11   :  { %v6308_v10 = vadd.f32 %v14695_v40, %v6190_v35 }
 0xd15   :  { %v14703_v6 = vpop.f32.mrf.mxu2  ;;  %v6610_v41 = vpop.f32.mrf.mxu0 }
 0xd16   :  { %v6496_v25 = vpop.f32.mrf.mxu1  ;;  %v6640_v37 = vadd.f32 %v6610_v41, %v6523_v63  ;;  %v7002_v63 = vpop.permute.xlu1 %7001  ;;  %v6425_v41 = vadd.f32 %v6417_v16, %v6308_v10 }
 0xd17   :  { %v6526_v15 = vadd.f32 %v6496_v25, %v6427_v3  ;;  %v15940_v3 = vld [vmem:[#allocation45_spill] sm:$0xff] }
 0xd1b   :  { %v6587_v8 = vpop.f32.mrf.mxu3 }
 0xd1c   :  { %v6639_v47 = vadd.f32 %v6587_v8, %v6522_v22 }
 0xd1d   :  { %v6704_v11 = vpop.f32.mrf.mxu2  ;;  %v6613_v52 = vpop.f32.mrf.mxu0 }
 0xd1e   :  { %v14705_v48 = vpop.f32.mrf.mxu1  ;;  %v6756_v36 = vadd.f32 %v6704_v11, %v6639_v47  ;;  %v6643_v38 = vadd.f32 %v6613_v52, %v6526_v15  ;;  %v6524_v52 = vadd.f32 %v14699_v61, %v6425_v41 }
 0xd20   :  { %v6641_v23 = vadd.f32 %v14705_v48, %v6524_v52 }
 0xd23   :  { %v6590_v60 = vpop.f32.mrf.mxu3 }
 0xd24   :  { %v6642_v30 = vadd.f32 %v6590_v60, %v6525_v57 }
 0xd25   :  { %v6707_v29 = vpop.f32.mrf.mxu2  ;;  %v14709_v45 = vpop.f32.mrf.mxu0 }
 0xd26   :  { %v14707_v17 = vpop.f32.mrf.mxu1  ;;  %v6759_v11 = vadd.f32 %v6707_v29, %v6642_v30  ;;  %v7007_v29 = vpop.permute.xlu2 %7006 }
 0xd2b   :  { %v6727_v59 = vpop.f32.mrf.mxu3 }
 0xd2c   :  { %v6757_v55 = vadd.f32 %v6727_v59, %v6640_v37  ;;  %v7022_v37 = vstv %s10027_s16  ;;  %v6311_v59 = vadd.f32 %v14697_v14, %v6193_v58 }
 0xd2d   :  { %v6844_v43 = vpop.f32.mrf.mxu2  ;;  %v6753_v62 = vpop.f32.mrf.mxu0 }
 0xd2e   :  { %v6821_v1 = vpop.f32.mrf.mxu1  ;;  %v6874_v0 = vadd.f32 %v6844_v43, %v6757_v55  ;;  %v6428_v9 = vadd.f32 %v14701_v21, %v6311_v59  ;;  %v15944_v59 = vld [vmem:[#allocation22_spill] sm:$0xff] }
 0xd2f   :  { %v6873_v28 = vadd.f32 %v6821_v1, %v6756_v36 }
 0xd30   :  { %v6527_v26 = vadd.f32 %v14703_v6, %v6428_v9 }
 0xd32   :  { %v6644_v2 = vadd.f32 %v14707_v17, %v6527_v26  ;;  %v15946_v26 = vld [vmem:[#allocation19_spill] sm:$0xff] }
 0xd33   :  { %v6730_v20 = vpop.f32.mrf.mxu3 }
 0xd34   :  { %v6760_v43 = vadd.f32 %v6730_v20, %v6643_v38  ;;  %v6761_v4 = vadd.f32 %v6753_v62, %v6644_v2 }
 0xd35   :  { %v6847_v53 = vpop.f32.mrf.mxu2 }
 0xd36   :  { %v6824_v44 = vpop.f32.mrf.mxu1  ;;  %v6877_v18 = vadd.f32 %v6847_v53, %v6760_v43 }
 0xd37   :  { %v6876_v24 = vadd.f32 %v6824_v44, %v6759_v11  ;;  %v10128_v11 = vld [vmem:[%s15887_s10 + $0x38] sm:$0xf] }
 0xd3b   :  { %v6867_v39 = vpop.f32.mrf.mxu3 }
 0xd3d   :  { %v6938_v33 = vpop.f32.mrf.mxu0  ;;  %v6984_v5 = vpop.f32.mrf.mxu2 }
 0xd3e   :  { %v6990_v22 = vadd.f32 %v6938_v33, %v6873_v28  ;;  %v6961_v8 = vpop.f32.mrf.mxu1  ;;  %v15941_v28 = vld [vmem:[#allocation46_spill] sm:$0xff] }
 0xd3f   :  { %v6991_v31 = vadd.f32 %v6961_v8, %v6874_v0 }
 0xd40   :  { %v7009_v47 = vadd.f32 %v7002_v63, %v6990_v22 }
 0xd41   :  { %v7010_v1 = vadd.f32 %v7002_v63, %v6991_v31 }
 0xd42   :  { %vm7016_vm11 = vcmp.ge.f32.partialorder %v7009_v47, 0.0  ;;  %v7023_v60 = vmul.f32 %v7022_v37, %v7009_v47 }
 0xd43   :  { %vm7017_vm12 = vcmp.ge.f32.partialorder %v7010_v1, 0.0  ;;  %v7024_v7 = vmul.f32 %v7022_v37, %v7010_v1  ;;  %v6870_v53 = vpop.f32.mrf.mxu3 }
 0xd44   :  { %v7029_v34 = vsel %vm7016_vm11, %v7009_v47, %v7023_v60  ;;  %v6878_v61 = vadd.f32 %v6870_v53, %v6761_v4 }
 0xd45   :  { %v14720_v49 = vadd.f32 %v7029_v34, %v14289_v56  ;;  %v7030_v20 = vsel %vm7017_vm12, %v7010_v1, %v7024_v7  ;;  %v6941_v19 = vpop.f32.mrf.mxu0  ;;  %v6758_v56 = vadd.f32 %v14709_v45, %v6641_v23  ;;  %v6987_v17 = vpop.f32.mrf.mxu2  ;;  %v15945_v1 = vld [vmem:[#allocation21_spill] sm:$0xff] }
 0xd46   :  { %v14723_v40 = vadd.f32 %v7030_v20, %v14309_v27  ;;  %v6993_v12 = vadd.f32 %v6941_v19, %v6876_v24  ;;  %v6964_v14 = vpop.f32.mrf.mxu1  ;;  %v6995_v55 = vadd.f32 %v6987_v17, %v6878_v61  ;;  %v15947_v20 = vld [vmem:[#allocation26_spill] sm:$0xff] }
 0xd47   :  { %v6994_v44 = vadd.f32 %v6964_v14, %v6877_v18  ;;  %7068 = vrot.lane.b32.xlu1 %v14720_v49, %s10754_s8  ;;  %v6875_v16 = vadd.f32 %v6867_v39, %v6758_v56 }
 0xd48   :  { %v7012_v50 = vadd.f32 %v7007_v29, %v6993_v12  ;;  %7045 = vrot.lane.b32.xlu0 %v14723_v40, %s10762_s18  ;;  %v7014_v45 = vadd.f32 %v7007_v29, %v6995_v55  ;;  %v10127_v12 = vld [vmem:[%s15887_s10 + $0x30] sm:$0xff] }
 0xd49   :  { %v7013_v27 = vadd.f32 %v7007_v29, %v6994_v44  ;;  %v6992_v25 = vadd.f32 %v6984_v5, %v6875_v16  ;;  %v10030_v29 = vld [vmem:[%s15863_s7 + $0x1c0] sm:$0xff] }
 0xd4a   :  { %vm7019_vm13 = vcmp.ge.f32.partialorder %v7012_v50, 0.0  ;;  %v7026_v46 = vmul.f32 %v7022_v37, %v7012_v50  ;;  %v7028_v36 = vmul.f32 %v7022_v37, %v7014_v45  ;;  %vm7021_vm0 = vcmp.ge.f32.partialorder %v7014_v45, 0.0  ;;  %v15948_v16 = vld [vmem:[#allocation17_spill] sm:$0xff] }
 0xd4b   :  { %vm7020_vm14 = vcmp.ge.f32.partialorder %v7013_v27, 0.0  ;;  %v7027_v48 = vmul.f32 %v7022_v37, %v7013_v27  ;;  %v7011_v62 = vadd.f32 %v7002_v63, %v6992_v25  ;;  %v15943_v63 = vld [vmem:[#allocation18_spill] sm:$0xff] }
 0xd4c   :  { %v7032_v13 = vsel %vm7019_vm13, %v7012_v50, %v7026_v46  ;;  %v10031_v46 = vld [vmem:[%s15863_s7 + $0x1c8] sm:$0xf] }
 0xd4d   :  { %v7033_v42 = vsel %vm7020_vm14, %v7013_v27, %v7027_v48  ;;  %v14733_v21 = vadd.f32 %v7032_v13, %v14303_v54  ;;  %v7025_v51 = vmul.f32 %v7022_v37, %v7011_v62  ;;  %vm7018_vm15 = vcmp.ge.f32.partialorder %v7011_v62, 0.0  ;;  %v15949_v13 = vld [vmem:[#allocation23_spill] sm:$0xff] }
 0xd4e   :  { %v14736_v6 = vadd.f32 %v7033_v42, %v14318_v32  ;;  %v7034_v32 = vsel %vm7021_vm0, %v7014_v45, %v7028_v36 }
 0xd4f   :  { %7041 = vrot.lane.b32.xlu1 %v14720_v49, %s10762_s18  ;;  %v7031_v54 = vsel %vm7018_vm15, %v7011_v62, %v7025_v51  ;;  %v14754_v15 = vadd.f32 %v7034_v32, %v15941_v28  ;;  %v10028_v28 = vld [vmem:[%s15863_s7 + $0x1b0] sm:$0xff] }
 0xd50   :  { %7070 = vrot.lane.b32.xlu0 %v14733_v21, %s10754_s8  ;;  %7074 = vrot.lane.b32.xlu2 %v14736_v6, %s10754_s8  ;;  %v14751_v57 = vadd.f32 %v7031_v54, %v15940_v3 }
 0xd57   :  { %7072 = vrot.lane.b32.xlu1 %v14723_v40, %s10754_s8 }
 0xd58   :  { %7043 = vrot.lane.b32.xlu0 %v14733_v21, %s10762_s18  ;;  %7047 = vrot.lane.b32.xlu2 %v14736_v6, %s10762_s18 }
 0xd5f   :  { %7263 = vrot.lane.b32.xlu1 %v14720_v49, %s10763_s22 }
 0xd60   :  { %7076 = vrot.lane.b32.xlu0 %v14751_v57, %s10754_s8  ;;  %7078 = vrot.lane.b32.xlu2 %v14754_v15, %s10754_s8 }
 0xd67   :  { %7049 = vrot.lane.b32.xlu1 %v14751_v57, %s10762_s18 }
 0xd68   :  { %7265 = vrot.lane.b32.xlu0 %v14733_v21, %s10763_s22  ;;  %7269 = vrot.lane.b32.xlu2 %v14736_v6, %s10763_s22 }
 0xd6f   :  { %7267 = vrot.lane.b32.xlu1 %v14723_v40, %s10763_s22 }
 0xd70   :  { %7271 = vrot.lane.b32.xlu0 %v14751_v57, %s10763_s22  ;;  %7051 = vrot.lane.b32.xlu2 %v14754_v15, %s10762_s18 }
 0xd77   :  { %7380 = vrot.lane.b32.xlu1 %v14720_v49, %s10764_s23 }
 0xd78   :  { %7382 = vrot.lane.b32.xlu0 %v14733_v21, %s10764_s23  ;;  %7273 = vrot.lane.b32.xlu2 %v14754_v15, %s10763_s22 }
 0xd7f   :  { %7384 = vrot.lane.b32.xlu1 %v14723_v40, %s10764_s23 }
 0xd80   :  { %7388 = vrot.lane.b32.xlu0 %v14751_v57, %s10764_s23  ;;  %7386 = vrot.lane.b32.xlu2 %v14736_v6, %s10764_s23 }
 0xd87   :  { %7598 = vrot.lane.b32.xlu1 %v14733_v21, %s10765_s26 }
 0xd88   :  { %7602 = vrot.lane.b32.xlu0 %v14736_v6, %s10765_s26  ;;  %7390 = vrot.lane.b32.xlu2 %v14754_v15, %s10764_s23 }
 0xd8f   :  { %7596 = vrot.lane.b32.xlu1 %v14720_v49, %s10765_s26 }
 0xd90   :  { %7600 = vrot.lane.b32.xlu0 %v14723_v40, %s10765_s26  ;;  %7604 = vrot.lane.b32.xlu2 %v14751_v57, %s10765_s26 }
 0xd97   :  { %7713 = vrot.lane.b32.xlu1 %v14720_v49, %s10766_s28 }
 0xd98   :  { %7715 = vrot.lane.b32.xlu0 %v14733_v21, %s10766_s28  ;;  %7719 = vrot.lane.b32.xlu2 %v14736_v6, %s10766_s28 }
 0xd9f   :  { %7721 = vrot.lane.b32.xlu1 %v14751_v57, %s10766_s28 }
 0xda0   :  { %7717 = vrot.lane.b32.xlu0 %v14723_v40, %s10766_s28  ;;  %7606 = vrot.lane.b32.xlu2 %v14754_v15, %s10765_s26 }
 0xda7   :  { %7830 = vrot.lane.b32.xlu1 %v14720_v49, %s10760_s20 }
 0xda8   :  { %7832 = vrot.lane.b32.xlu0 %v14733_v21, %s10760_s20  ;;  %7836 = vrot.lane.b32.xlu2 %v14736_v6, %s10760_s20 }
 0xdaa   :  { %v7075_v0 = vpop.permute.xlu2 %7074 }
 0xdaf   :  { %7838 = vrot.lane.b32.xlu1 %v14751_v57, %s10760_s20 }
 0xdb0   :  { %7834 = vrot.lane.b32.xlu0 %v14723_v40, %s10760_s20  ;;  %7723 = vrot.lane.b32.xlu2 %v14754_v15, %s10766_s28 }
 0xdb2   :  { %v7048_v33 = vpop.permute.xlu2 %7047 }
 0xdb7   :  { %7947 = vrot.lane.b32.xlu1 %v14720_v49, %s10767_s2 }
 0xdb8   :  { %7949 = vrot.lane.b32.xlu0 %v14733_v21, %s10767_s2  ;;  %7840 = vrot.lane.b32.xlu2 %v14754_v15, %s10760_s20 }
 0xdb9   :  { %v7069_v35 = vpop.permute.xlu1 %7068 }
 0xdba   :  { %v7046_v30 = vpop.permute.xlu0 %7045  ;;  %v7079_v39 = vpop.permute.xlu2 %7078 }
 0xdbb   :  { %v7081_v8 = vsel %vm3847_vm2, %v7075_v0, %v7079_v39 }
 0xdbc   :  { %v7091_v58 = vmul.f32 %v7081_v8, %v15943_v63 }
 0xdbe   :  { %10038 = vmatpush.msk.msrb.mxu1 %vm3876_vm1, %v7091_v58 }
 0xdbf   :  { %7955 = vrot.lane.b32.xlu1 %v14751_v57, %s10767_s2 }
 0xdc0   :  { %7951 = vrot.lane.b32.xlu0 %v14723_v40, %s10767_s2  ;;  %7953 = vrot.lane.b32.xlu2 %v14736_v6, %s10767_s2 }
 0xdc1   :  { %v7042_v38 = vpop.permute.xlu1 %7041 }
 0xdc2   :  { %v7071_v37 = vpop.permute.xlu0 %7070  ;;  %v7270_v31 = vpop.permute.xlu2 %7269  ;;  %v7055_v27 = vsel %vm3819_vm5, %v7042_v38, %v7046_v30 }
 0xdc3   :  { %v7083_v10 = vsel %vm3847_vm2, %v7071_v37, %v7075_v0  ;;  %v7085_v47 = vsel %vm3847_vm2, %v7079_v39, %v7071_v37  ;;  %v7060_v17 = vmul.f32 %v7055_v27, %v15948_v16  ;;  %v15950_v0 = vld [vmem:[#allocation24_spill] sm:$0xff] }
 0xdc4   :  { %v7089_v43 = vmul.f32 %v7085_v47, %v15944_v59  ;;  %v7090_v41 = vmul.f32 %v7083_v10, %v15945_v1 }
 0xdc6   :  { %10032 = vmatpush.msk.msra.mxu3 %vm3876_vm1, %v7089_v43  ;;  %10035 = vmatpush.msk.msra.mxu0 %vm3876_vm1, %v7090_v41 }
 0xdc8   :  { %8074 = vperm.xlu0 %10280, %v10128_v11   ;;  %7957 = vrot.lane.b32.xlu2 %v14754_v15, %s10767_s2  ;;  %v15952_v11 = vld [vmem:[#allocation28_spill] sm:$0xff] }
 0xdc9   :  { %v7073_v60 = vpop.permute.xlu1 %7072 }
 0xdca   :  { %v7082_v5 = vsel %vm3847_vm2, %v7069_v35, %v7073_v60  ;;  %v7044_v9 = vpop.permute.xlu0 %7043  ;;  %v7052_v7 = vpop.permute.xlu2 %7051 }
 0xdcb   :  { %v7087_v52 = vmul.f32 %v7082_v5, %v15945_v1  ;;  %v7054_v24 = vsel %vm3819_vm5, %v7048_v33, %v7052_v7  ;;  %v7058_v34 = vsel %vm3819_vm5, %v7052_v7, %v7044_v9  ;;  %v7056_v44 = vsel %vm3819_vm5, %v7044_v9, %v7048_v33  ;;  %v10029_v5 = vld [vmem:[%s15863_s7 + $0x1b8] sm:$0xf]  ;;  %v10050_v9 = vld [vmem:[%s15863_s7 + $0x1d0] sm:$0xff] }
 0xdcc   :  { %v7062_v18 = vmul.f32 %v7058_v34, %v15946_v26  ;;  %v7064_v19 = vmul.f32 %v7054_v24, %v15947_v20  ;;  %v7063_v61 = vmul.f32 %v7056_v44, %v15948_v16  ;;  %v15953_v7 = vld [vmem:[#allocation32_spill] sm:$0xff] }
 0xdcd   :  { %7148 = vmatpush.msra.mxu0 %v7087_v52  ;;  %v7500_v52 = vmul.f32 %v14733_v21, %v15953_v7  ;;  %v7497_v24 = vmul.f32 %v14720_v49, %v15953_v7 }
 0xdce   :  { %10041 = vmatpush.msk.msrb.mxu2 %vm3876_vm1, %v7062_v18  ;;  %10036 = vmatmul.msk.f32.vlgmr.msra.gmra.mxu0 %vm3869_vm3, %v10030_v29 }
 0xdcf   :  { %10047 = vmatpush.msk.msrb.mxu0 %vm3876_vm1, %v7064_v19 }
 0xdd0   :  { %8069 = vperm.xlu2 %10281, %v10127_v12  }
 0xdd1   :  { %v7264_v14 = vpop.permute.xlu1 %7263 }
 0xdd2   :  { %v7077_v23 = vpop.permute.xlu0 %7076  ;;  %v7274_v2 = vpop.permute.xlu2 %7273 }
 0xdd3   :  { %v7080_v53 = vsel %vm3847_vm2, %v7073_v60, %v7077_v23  ;;  %v7084_v50 = vsel %vm3847_vm2, %v7077_v23, %v7069_v35  ;;  %v7276_v48 = vsel %vm4047_vm4, %v7270_v31, %v7274_v2  ;;  %v15951_v35 = vld [vmem:[#allocation25_spill] sm:$0xff] }
 0xdd4   :  { %v7086_v56 = vmul.f32 %v7084_v50, %v15944_v59  ;;  %v7088_v4 = vmul.f32 %v7080_v53, %v15943_v63  ;;  %v7286_v42 = vmul.f32 %v7276_v48, %v15949_v13  ;;  %v10051_v53 = vld [vmem:[%s15863_s7 + $0x1d8] sm:$0xf] }
 0xdd6   :  { %7125 = vmatpush.msra.mxu3 %v7086_v56  ;;  %7171 = vmatpush.msrb.mxu1 %v7088_v4 }
 0xdd7   :  { %10033 = vmatmul.msk.f32.vlgmr.msra.gmra.mxu3 %vm3869_vm3, %v10030_v29  ;;  %10039 = vmatmul.msk.f32.vlgmr.msrb.gmra.mxu1 %vm3869_vm3, %v10030_v29 }
 0xdd8   :  { %10044 = vmatpush.msk.msrb.mxu3 %vm3876_vm1, %v7063_v61  ;;  %10037 = vmatmul.msk.f32.gmra.mxu0 %vm3869_vm3, %v10031_v46 }
 0xdd9   :  { %v7050_v25 = vpop.permute.xlu1 %7049 }
 0xdda   :  { %7232 = vmatpush.msrb.mxu3 %v7060_v17  ;;  %v7053_v55 = vsel %vm3819_vm5, %v7046_v30, %v7050_v25  ;;  %v7057_v62 = vsel %vm3819_vm5, %v7050_v25, %v7042_v38  ;;  %v7266_v45 = vpop.permute.xlu0 %7265  ;;  %v7387_v51 = vpop.permute.xlu2 %7386  ;;  %v10061_v25 = vld [vmem:[%s15863_s7 + $0x1e0] sm:$0xff] }
 0xddb   :  { %v7059_v36 = vmul.f32 %v7057_v62, %v15946_v26  ;;  %v7061_v54 = vmul.f32 %v7053_v55, %v15947_v20  ;;  %v7278_v32 = vsel %vm4047_vm4, %v7266_v45, %v7270_v31  ;;  %v7280_v3 = vsel %vm4047_vm4, %v7274_v2, %v7266_v45  ;;  %v15955_v2 = vld [vmem:[#allocation27_spill] sm:$0xff]  ;;  %v15956_v55 = vld [vmem:[#allocation30_spill] sm:$0xff]  ;;  %v15957_v45 = vld [vmem:[#allocation33_spill] sm:$0xff] }
 0xddc   :  { %10058 = vmatpush.msk.msra.mxu3 %vm3876_vm1, %v7286_v42  ;;  %v7284_v33 = vmul.f32 %v7280_v3, %v15950_v0  ;;  %v7285_v30 = vmul.f32 %v7278_v32, %v15951_v35  ;;  %v7501_v62 = vmul.f32 %v14736_v6, %v15956_v55 }
 0xddd   :  { %7209 = vmatpush.msrb.mxu2 %v7059_v36  ;;  %7255 = vmatpush.msrb.mxu0 %v7061_v54  ;;  %v7498_v36 = vmul.f32 %v14723_v40, %v15956_v55  ;;  %v7499_v54 = vmul.f32 %v14751_v57, %v15957_v45 }
 0xdde   :  { %10052 = vmatpush.msk.msra.mxu1 %vm3876_vm1, %v7284_v33  ;;  %10042 = vmatmul.msk.f32.vlgmr.msrb.gmra.mxu2 %vm3869_vm3, %v10028_v28 }
 0xddf   :  { %10034 = vmatmul.msk.f32.gmra.mxu3 %vm3869_vm3, %v10031_v46  ;;  %10040 = vmatmul.msk.f32.gmra.mxu1 %vm3869_vm3, %v10031_v46 }
 0xde0   :  { %10055 = vmatpush.msk.msra.mxu2 %vm3876_vm1, %v7285_v30  ;;  %10048 = vmatmul.msk.f32.vlgmr.msrb.gmra.mxu0 %vm3869_vm3, %v10028_v28 }
 0xde1   :  { %v7268_v39 = vpop.permute.xlu1 %7267 }
 0xde2   :  { %v7277_v8 = vsel %vm4047_vm4, %v7264_v14, %v7268_v39  ;;  %v7272_v58 = vpop.permute.xlu0 %7271  ;;  %v7391_v38 = vpop.permute.xlu2 %7390 }
 0xde3   :  { %v7282_v37 = vmul.f32 %v7277_v8, %v15951_v35  ;;  %v7275_v31 = vsel %vm4047_vm4, %v7268_v39, %v7272_v58  ;;  %v7279_v10 = vsel %vm4047_vm4, %v7272_v58, %v7264_v14  ;;  %v7393_v47 = vsel %vm4167_vm6, %v7387_v51, %v7391_v38  ;;  %v15954_v14 = vld [vmem:[#allocation29_spill] sm:$0xff]  ;;  %v15958_v8 = vld [vmem:[#allocation31_spill] sm:$0xff] }
 0xde4   :  { %v7281_v43 = vmul.f32 %v7279_v10, %v15950_v0  ;;  %v7283_v41 = vmul.f32 %v7275_v31, %v15949_v13  ;;  %v7403_v60 = vmul.f32 %v7393_v47, %v15952_v11  ;;  %v15960_v31 = vld [vmem:[#allocation36_spill] sm:$0xff]  ;;  %v10062_v47 = vld [vmem:[%s15863_s7 + $0x1e8] sm:$0xf] }
 0xde5   :  { %7343 = vmatpush.msra.mxu2 %v7282_v37 }
 0xde6   :  { %7320 = vmatpush.msra.mxu1 %v7281_v43  ;;  %7366 = vmatpush.msra.mxu3 %v7283_v41 }
 0xde7   :  { %10043 = vmatmul.msk.f32.gmra.mxu2 %vm3869_vm3, %v10029_v5  ;;  %10045 = vmatmul.msk.f32.vlgmr.msrb.gmra.mxu3 %vm3869_vm3, %v10028_v28 }
 0xde8   :  { %10053 = vmatmul.msk.f32.vlgmr.msra.gmra.mxu1 %vm3869_vm3, %v10050_v9  ;;  %10069 = vmatpush.msk.msrb.mxu2 %vm3876_vm1, %v7403_v60 }
 0xde9   :  { %10074 = vmatpush.msk.msrb.mxu3 %vm3876_vm1, %v7500_v52  ;;  %v7381_v34 = vpop.permute.xlu1 %7380  ;;  %10049 = vmatmul.msk.f32.gmra.mxu0 %vm3869_vm3, %v10029_v5 }
 0xdea   :  { %v7383_v18 = vpop.permute.xlu0 %7382  ;;  %v7605_v19 = vpop.permute.xlu2 %7604 }
 0xdeb   :  { %7536 = vmatpush.msrb.mxu3 %v7497_v24  ;;  %v7395_v29 = vsel %vm4167_vm6, %v7383_v18, %v7387_v51  ;;  %v7397_v12 = vsel %vm4167_vm6, %v7391_v38, %v7383_v18  ;;  %v7502_v51 = vmul.f32 %v14754_v15, %v15957_v45  ;;  %v15959_v38 = vld [vmem:[#allocation37_spill] sm:$0xff] }
 0xdec   :  { %v7401_v23 = vmul.f32 %v7397_v12, %v15954_v14  ;;  %v7402_v44 = vmul.f32 %v7395_v29, %v15955_v2  ;;  %v10072_v29 = vld [vmem:[%s15863_s7 + $0x1f0] sm:$0xff] }
 0xdee   :  { %10063 = vmatpush.msk.msra.mxu0 %vm3876_vm1, %v7401_v23  ;;  %10066 = vmatpush.msk.msrb.mxu1 %vm3876_vm1, %v7402_v44 }
 0xdef   :  { %10046 = vmatmul.msk.f32.gmra.mxu3 %vm3869_vm3, %v10029_v5  ;;  %10056 = vmatmul.msk.f32.vlgmr.msra.gmra.mxu2 %vm3869_vm3, %v10050_v9 }
 0xdf0   :  { %10054 = vmatmul.msk.f32.gmra.mxu1 %vm3869_vm3, %v10051_v53 }
 0xdf1   :  { %v7385_v50 = vpop.permute.xlu1 %7384 }
 0xdf2   :  { %v7394_v56 = vsel %vm4167_vm6, %v7381_v34, %v7385_v50  ;;  %v7389_v4 = vpop.permute.xlu0 %7388  ;;  %v7720_v27 = vpop.permute.xlu2 %7719 }
 0xdf3   :  { %v7399_v46 = vmul.f32 %v7394_v56, %v15955_v2  ;;  %v7392_v61 = vsel %vm4167_vm6, %v7385_v50, %v7389_v4  ;;  %v7396_v48 = vsel %vm4167_vm6, %v7389_v4, %v7381_v34  ;;  %v15961_v56 = vld [vmem:[#allocation34_spill] sm:$0xff] }
 0xdf4   :  { %v7398_v17 = vmul.f32 %v7396_v48, %v15954_v14  ;;  %v7400_v42 = vmul.f32 %v7392_v61, %v15952_v11  ;;  %v15963_v48 = vld [vmem:[#allocation41_spill] sm:$0xff] }
 0xdf5   :  { %7460 = vmatpush.msrb.mxu1 %v7399_v46  ;;  %v15962_v46 = vld [vmem:[#allocation35_spill] sm:$0xff] }
 0xdf6   :  { %7437 = vmatpush.msra.mxu0 %v7398_v17  ;;  %7483 = vmatpush.msrb.mxu2 %v7400_v42  ;;  %v10073_v42 = vld [vmem:[%s15863_s7 + $0x1f8] sm:$0xf] }
 0xdf7   :  { %10057 = vmatmul.msk.f32.gmra.mxu2 %vm3869_vm3, %v10051_v53  ;;  %10059 = vmatmul.msk.f32.vlgmr.msra.gmra.mxu3 %vm3869_vm3, %v10050_v9 }
 0xdf8   :  { %10064 = vmatmul.msk.f32.vlgmr.msra.gmra.mxu0 %vm3869_vm3, %v10061_v25  ;;  %10067 = vmatmul.msk.f32.vlgmr.msrb.gmra.mxu1 %vm3869_vm3, %v10061_v25 }
 0xdf9   :  { %10077 = vmatpush.msk.msrb.mxu0 %vm3876_vm1, %v7501_v62  ;;  %10080 = vmatpush.msk.msra.mxu1 %vm3876_vm1, %v7502_v51  ;;  %v7599_v32 = vpop.permute.xlu1 %7598 }
 0xdfa   :  { %v7603_v3 = vpop.permute.xlu0 %7602  ;;  %v7607_v28 = vpop.permute.xlu2 %7606 }
 0xdfb   :  { %7559 = vmatpush.msrb.mxu0 %v7498_v36  ;;  %7582 = vmatpush.msra.mxu1 %v7499_v54  ;;  %v7611_v33 = vsel %vm4395_vm7, %v7599_v32, %v7603_v3  ;;  %v7609_v30 = vsel %vm4395_vm7, %v7603_v3, %v7607_v28  ;;  %v7613_v39 = vsel %vm4395_vm7, %v7607_v28, %v7599_v32 }
 0xdfc   :  { %v7617_v58 = vmul.f32 %v7611_v33, %v15958_v8  ;;  %v7618_v37 = vmul.f32 %v7609_v30, %v15959_v38  ;;  %v7619_v10 = vmul.f32 %v7613_v39, %v15960_v31  ;;  %v15964_v39 = vld [vmem:[#allocation38_spill] sm:$0xff] }
 0xdfe   :  { %10085 = vmatpush.msk.msra.mxu2 %vm3876_vm1, %v7617_v58  ;;  %10088 = vmatpush.msk.msra.mxu3 %vm3876_vm1, %v7618_v37  ;;  %v10084_v37 = vld [vmem:[%s15863_s7 + $0x208] sm:$0xf] }
 0xdff   :  { %10091 = vmatpush.msk.msra.mxu0 %vm3876_vm1, %v7619_v10  ;;  %10060 = vmatmul.msk.f32.gmra.mxu3 %vm3869_vm3, %v10051_v53  ;;  %v10094_v10 = vld [vmem:[%s15863_s7 + $0x210] sm:$0xff] }
 0xe00   :  { %10065 = vmatmul.msk.f32.gmra.mxu0 %vm3869_vm3, %v10062_v47  ;;  %10068 = vmatmul.msk.f32.gmra.mxu1 %vm3869_vm3, %v10062_v47 }
 0xe01   :  { %10070 = vmatmul.msk.f32.vlgmr.msrb.gmra.mxu2 %vm3869_vm3, %v10061_v25  ;;  %v7597_v43 = vpop.permute.xlu1 %7596  ;;  %v10083_v25 = vld [vmem:[%s15863_s7 + $0x200] sm:$0xff] }
 0xe02   :  { %v7612_v41 = vsel %vm4395_vm7, %v7605_v19, %v7597_v43  ;;  %v7601_v60 = vpop.permute.xlu0 %7600  ;;  %v7837_v5 = vpop.permute.xlu2 %7836 }
 0xe03   :  { %v7616_v9 = vmul.f32 %v7612_v41, %v15960_v31  ;;  %v7608_v52 = vsel %vm4395_vm7, %v7601_v60, %v7605_v19  ;;  %v7610_v24 = vsel %vm4395_vm7, %v7597_v43, %v7601_v60 }
 0xe04   :  { %v7614_v34 = vmul.f32 %v7610_v24, %v15958_v8  ;;  %v7615_v18 = vmul.f32 %v7608_v52, %v15959_v38  ;;  %v15965_v52 = vld [vmem:[#allocation40_spill] sm:$0xff] }
 0xe05   :  { %7699 = vmatpush.msra.mxu0 %v7616_v9 }
 0xe06   :  { %7653 = vmatpush.msra.mxu2 %v7614_v34  ;;  %7676 = vmatpush.msra.mxu3 %v7615_v18  ;;  %v15966_v34 = vld [vmem:[#allocation39_spill] sm:$0xff] }
 0xe07   :  { %10075 = vmatmul.msk.f32.vlgmr.msrb.gmra.mxu3 %vm3869_vm3, %v10072_v29 }
 0xe08   :  { %10078 = vmatmul.msk.f32.vlgmr.msrb.gmra.mxu0 %vm3869_vm3, %v10072_v29  ;;  %10081 = vmatmul.msk.f32.vlgmr.msra.gmra.mxu1 %vm3869_vm3, %v10072_v29  ;;  %v10095_v29 = vld [vmem:[%s15863_s7 + $0x218] sm:$0xf] }
 0xe09   :  { %10071 = vmatmul.msk.f32.gmra.mxu2 %vm3869_vm3, %v10062_v47  ;;  %v7714_v19 = vpop.permute.xlu1 %7713 }
 0xe0a   :  { %v7716_v12 = vpop.permute.xlu0 %7715  ;;  %v7724_v23 = vpop.permute.xlu2 %7723 }
 0xe0b   :  { %v7728_v44 = vsel %vm4515_vm8, %v7716_v12, %v7720_v27  ;;  %v7726_v53 = vsel %vm4515_vm8, %v7720_v27, %v7724_v23  ;;  %v7730_v50 = vsel %vm4515_vm8, %v7724_v23, %v7716_v12 }
 0xe0c   :  { %v7734_v4 = vmul.f32 %v7728_v44, %v15961_v56  ;;  %v7735_v61 = vmul.f32 %v7726_v53, %v15962_v46  ;;  %v7736_v17 = vmul.f32 %v7730_v50, %v15963_v48 }
 0xe0e   :  { %10096 = vmatpush.msk.msrb.mxu1 %vm3876_vm1, %v7734_v4  ;;  %10099 = vmatpush.msk.msrb.mxu2 %vm3876_vm1, %v7735_v61 }
 0xe0f   :  { %10102 = vmatpush.msk.msrb.mxu3 %vm3876_vm1, %v7736_v17 }
 0xe10   :  { %10076 = vmatmul.msk.f32.gmra.mxu3 %vm3869_vm3, %v10073_v42  ;;  %10079 = vmatmul.msk.f32.gmra.mxu0 %vm3869_vm3, %v10073_v42 }
 0xe11   :  { %10082 = vmatmul.msk.f32.gmra.mxu1 %vm3869_vm3, %v10073_v42  ;;  %10086 = vmatmul.msk.f32.vlgmr.msra.gmra.mxu2 %vm3869_vm3, %v10083_v25  ;;  %v7722_v27 = vpop.permute.xlu1 %7721  ;;  %v15967_v42 = vld [vmem:[#allocation42_spill] sm:$0xff] }
 0xe12   :  { %v7729_v62 = vsel %vm4515_vm8, %v7722_v27, %v7714_v19  ;;  %v7718_v51 = vpop.permute.xlu0 %7717  ;;  %v7841_v36 = vpop.permute.xlu2 %7840 }
 0xe13   :  { %v7733_v54 = vmul.f32 %v7729_v62, %v15963_v48  ;;  %v7725_v32 = vsel %vm4515_vm8, %v7718_v51, %v7722_v27  ;;  %v7727_v3 = vsel %vm4515_vm8, %v7714_v19, %v7718_v51  ;;  %v7843_v28 = vsel %vm4635_vm9, %v7837_v5, %v7841_v36  ;;  %v10105_v27 = vld [vmem:[%s15863_s7 + $0x220] sm:$0xff] }
 0xe14   :  { %v7731_v33 = vmul.f32 %v7727_v3, %v15961_v56  ;;  %v7732_v30 = vmul.f32 %v7725_v32, %v15962_v46  ;;  %v7852_v58 = vmul.f32 %v7843_v28, %v15964_v39  ;;  %v15968_v32 = vld [vmem:[#allocation44_spill] sm:$0xff]  ;;  %v15969_v28 = vld [vmem:[#allocation43_spill] sm:$0xff] }
 0xe15   :  { %7816 = vmatpush.msrb.mxu3 %v7733_v54 }
 0xe16   :  { %7770 = vmatpush.msrb.mxu1 %v7731_v33  ;;  %7793 = vmatpush.msrb.mxu2 %v7732_v30  ;;  %v10106_v30 = vld [vmem:[%s15863_s7 + $0x228] sm:$0xf] }
 0xe18   :  { %10110 = vmatpush.msk.msra.mxu1 %vm3876_vm1, %v7852_v58  ;;  %10089 = vmatmul.msk.f32.vlgmr.msra.gmra.mxu3 %vm3869_vm3, %v10083_v25 }
 0xe19   :  { %10092 = vmatmul.msk.f32.vlgmr.msra.gmra.mxu0 %vm3869_vm3, %v10083_v25  ;;  %10087 = vmatmul.msk.f32.gmra.mxu2 %vm3869_vm3, %v10084_v37  ;;  %v7831_v47 = vpop.permute.xlu1 %7830 }
 0xe1a   :  { %10097 = vmatmul.msk.f32.vlgmr.msrb.gmra.mxu1 %vm3869_vm3, %v10094_v10  ;;  %v7833_v43 = vpop.permute.xlu0 %7832  ;;  %v7954_v41 = vpop.permute.xlu2 %7953 }
 0xe1b   :  { %v7845_v60 = vsel %vm4635_vm9, %v7833_v43, %v7837_v5  ;;  %v7847_v9 = vsel %vm4635_vm9, %v7841_v36, %v7833_v43 }
 0xe1c   :  { %v7851_v24 = vmul.f32 %v7845_v60, %v15965_v52  ;;  %v7853_v18 = vmul.f32 %v7847_v9, %v15966_v34 }
 0xe1e   :  { %10107 = vmatpush.msk.msrb.mxu0 %vm3876_vm1, %v7851_v24  ;;  %10113 = vmatpush.msk.msra.mxu2 %vm3876_vm1, %v7853_v18  ;;  %v10116_v24 = vld [vmem:[%s15863_s7 + $0x230] sm:$0xff]  ;;  %v10117_v18 = vld [vmem:[%s15863_s7 + $0x238] sm:$0xf] }
 0xe20   :  { %10090 = vmatmul.msk.f32.gmra.mxu3 %vm3869_vm3, %v10084_v37 }
 0xe21   :  { %10093 = vmatmul.msk.f32.gmra.mxu0 %vm3869_vm3, %v10084_v37  ;;  %10100 = vmatmul.msk.f32.vlgmr.msrb.gmra.mxu2 %vm3869_vm3, %v10094_v10  ;;  %v7839_v5 = vpop.permute.xlu1 %7838 }
 0xe22   :  { %10098 = vmatmul.msk.f32.gmra.mxu1 %vm3869_vm3, %v10095_v29  ;;  %v7846_v19 = vsel %vm4635_vm9, %v7839_v5, %v7831_v47  ;;  %v7835_v12 = vpop.permute.xlu0 %7834  ;;  %v7958_v23 = vpop.permute.xlu2 %7957 }
 0xe23   :  { %v7850_v44 = vmul.f32 %v7846_v19, %v15966_v34  ;;  %v7842_v53 = vsel %vm4635_vm9, %v7835_v12, %v7839_v5  ;;  %v7844_v50 = vsel %vm4635_vm9, %v7831_v47, %v7835_v12  ;;  %v7960_v4 = vsel %vm4755_vm10, %v7954_v41, %v7958_v23 }
 0xe24   :  { %v7848_v61 = vmul.f32 %v7844_v50, %v15965_v52  ;;  %v7849_v17 = vmul.f32 %v7842_v53, %v15964_v39  ;;  %v7969_v25 = vmul.f32 %v7960_v4, %v15967_v42 }
 0xe25   :  { %7933 = vmatpush.msra.mxu2 %v7850_v44 }
 0xe26   :  { %7887 = vmatpush.msrb.mxu0 %v7848_v61  ;;  %7910 = vmatpush.msra.mxu1 %v7849_v17 }
 0xe28   :  { %10121 = vmatpush.msk.msra.mxu0 %vm3876_vm1, %v7969_v25  ;;  %10103 = vmatmul.msk.f32.vlgmr.msrb.gmra.mxu3 %vm3869_vm3, %v10094_v10 }
 0xe29   :  { %10108 = vmatmul.msk.f32.vlgmr.msrb.gmra.mxu0 %vm3869_vm3, %v10105_v27  ;;  %10101 = vmatmul.msk.f32.gmra.mxu2 %vm3869_vm3, %v10095_v29  ;;  %v7948_v62 = vpop.permute.xlu1 %7947 }
 0xe2a   :  { %10111 = vmatmul.msk.f32.vlgmr.msra.gmra.mxu1 %vm3869_vm3, %v10105_v27  ;;  %v7950_v51 = vpop.permute.xlu0 %7949 }
 0xe2b   :  { %v7962_v36 = vsel %vm4755_vm10, %v7950_v51, %v7954_v41  ;;  %v7964_v54 = vsel %vm4755_vm10, %v7958_v23, %v7950_v51 }
 0xe2c   :  { %v7968_v3 = vmul.f32 %v7962_v36, %v15968_v32  ;;  %v7970_v33 = vmul.f32 %v7964_v54, %v15969_v28 }
 0xe2e   :  { %10118 = vmatpush.msk.msra.mxu3 %vm3876_vm1, %v7968_v3  ;;  %10124 = vmatpush.msk.msrb.mxu1 %vm3876_vm1, %v7970_v33 }
 0xe30   :  { %10104 = vmatmul.msk.f32.gmra.mxu3 %vm3869_vm3, %v10095_v29 }
 0xe31   :  { %10109 = vmatmul.msk.f32.gmra.mxu0 %vm3869_vm3, %v10106_v30  ;;  %10114 = vmatmul.msk.f32.vlgmr.msra.gmra.mxu2 %vm3869_vm3, %v10105_v27  ;;  %v7956_v58 = vpop.permute.xlu1 %7955 }
 0xe32   :  { %10112 = vmatmul.msk.f32.gmra.mxu1 %vm3869_vm3, %v10106_v30  ;;  %v7963_v37 = vsel %vm4755_vm10, %v7956_v58, %v7948_v62  ;;  %v7952_v10 = vpop.permute.xlu0 %7951 }
 0xe33   :  { %v7967_v47 = vmul.f32 %v7963_v37, %v15969_v28  ;;  %v7959_v43 = vsel %vm4755_vm10, %v7952_v10, %v7956_v58  ;;  %v7961_v41 = vsel %vm4755_vm10, %v7948_v62, %v7952_v10 }
 0xe34   :  { %v7965_v60 = vmul.f32 %v7961_v41, %v15968_v32  ;;  %v7966_v9 = vmul.f32 %v7959_v43, %v15967_v42 }
 0xe35   :  { %8050 = vmatpush.msrb.mxu1 %v7967_v47 }
 0xe36   :  { %8004 = vmatpush.msra.mxu3 %v7965_v60  ;;  %8027 = vmatpush.msra.mxu0 %v7966_v9 }
 0xe38   :  { %10119 = vmatmul.msk.f32.vlgmr.msra.gmra.mxu3 %vm3869_vm3, %v10116_v24 }
 0xe39   :  { %10122 = vmatmul.msk.f32.vlgmr.msra.gmra.mxu0 %vm3869_vm3, %v10116_v24  ;;  %10115 = vmatmul.msk.f32.gmra.mxu2 %vm3869_vm3, %v10106_v30 }
 0xe3a   :  { %10125 = vmatmul.msk.f32.vlgmr.msrb.gmra.mxu1 %vm3869_vm3, %v10116_v24 }
 0xe40   :  { %10120 = vmatmul.msk.f32.gmra.mxu3 %vm3869_vm3, %v10117_v18 }
 0xe41   :  { %10123 = vmatmul.msk.f32.gmra.mxu0 %vm3869_vm3, %v10117_v18 }
 0xe42   :  { %10126 = vmatmul.msk.f32.gmra.mxu1 %vm3869_vm3, %v10117_v18 }
 0xe4b   :  { %v7150_v29 = vpop.f32.mrf.mxu0 }
 0xe54   :  { %v7173_v5 = vpop.f32.mrf.mxu1 }
 0xe55   :  { %v7153_v19 = vpop.f32.mrf.mxu0 }
 0xe5a   :  { %v7127_v12 = vpop.f32.mrf.mxu3 }
 0xe5c   :  { %v7176_v23 = vpop.f32.mrf.mxu1 }
 0xe5d   :  { %v7257_v50 = vpop.f32.mrf.mxu0 }
 0xe5e   :  { %v7258_v11 = vadd.f32 %v7257_v50, %v7173_v5 }
 0xe61   :  { %v7211_v44 = vpop.f32.mrf.mxu2 }
 0xe62   :  { %v7130_v53 = vpop.f32.mrf.mxu3  ;;  %v7212_v35 = vadd.f32 %v7211_v44, %v7127_v12 }
 0xe65   :  { %v7322_v4 = vpop.f32.mrf.mxu1 }
 0xe66   :  { %v7260_v25 = vpop.f32.mrf.mxu0 }
 0xe67   :  { %v7261_v1 = vadd.f32 %v7260_v25, %v7176_v23 }
 0xe6a   :  { %v7214_v61 = vpop.f32.mrf.mxu2  ;;  %v7234_v17 = vpop.f32.mrf.mxu3 }
 0xe6b   :  { %v7235_v48 = vadd.f32 %v7234_v17, %v7150_v29  ;;  %v7374_v29 = vadd.f32 %v7322_v4, %v7212_v35 }
 0xe6d   :  { %v7325_v27 = vpop.f32.mrf.mxu1 }
 0xe72   :  { %v7237_v62 = vpop.f32.mrf.mxu3  ;;  %v7345_v51 = vpop.f32.mrf.mxu2 }
 0xe73   :  { %v7375_v31 = vadd.f32 %v7345_v51, %v7235_v48  ;;  %v7238_v13 = vadd.f32 %v7237_v62, %v7153_v19  ;;  %v7215_v48 = vadd.f32 %v7214_v61, %v7130_v53 }
 0xe75   :  { %v7439_v36 = vpop.f32.mrf.mxu0  ;;  %v7462_v54 = vpop.f32.mrf.mxu1 }
 0xe76   :  { %v7492_v55 = vadd.f32 %v7462_v54, %v7375_v31 }
 0xe7a   :  { %v7348_v3 = vpop.f32.mrf.mxu2  ;;  %v7368_v33 = vpop.f32.mrf.mxu3 }
 0xe7b   :  { %v7376_v2 = vadd.f32 %v7368_v33, %v7258_v11  ;;  %v7378_v20 = vadd.f32 %v7348_v3, %v7238_v13  ;;  %v7491_v11 = vadd.f32 %v7439_v36, %v7374_v29  ;;  %v7377_v13 = vadd.f32 %v7325_v27, %v7215_v48 }
 0xe7d   :  { %v7442_v30 = vpop.f32.mrf.mxu0  ;;  %v7465_v58 = vpop.f32.mrf.mxu1 }
 0xe7e   :  { %v7495_v31 = vadd.f32 %v7465_v58, %v7378_v20 }
 0xe82   :  { %v7371_v37 = vpop.f32.mrf.mxu3 }
 0xe83   :  { %v7379_v51 = vadd.f32 %v7371_v37, %v7261_v1 }
 0xe84   :  { %v7485_v10 = vpop.f32.mrf.mxu2 }
 0xe85   :  { %v7561_v47 = vpop.f32.mrf.mxu0  ;;  %v7584_v43 = vpop.f32.mrf.mxu1  ;;  %v7493_v7 = vadd.f32 %v7485_v10, %v7376_v2 }
 0xe86   :  { %v7591_v16 = vadd.f32 %v7561_v47, %v7492_v55 }
 0xe87   :  { %v7592_v22 = vadd.f32 %v7584_v43, %v7493_v7 }
 0xe8a   :  { %v7538_v41 = vpop.f32.mrf.mxu3 }
 0xe8b   :  { %v7590_v19 = vadd.f32 %v7538_v41, %v7491_v11 }
 0xe8c   :  { %v7488_v60 = vpop.f32.mrf.mxu2 }
 0xe8d   :  { %v7564_v9 = vpop.f32.mrf.mxu0  ;;  %v7496_v2 = vadd.f32 %v7488_v60, %v7379_v51 }
 0xe8e   :  { %v7587_v24 = vpop.f32.mrf.mxu1  ;;  %v7594_v55 = vadd.f32 %v7564_v9, %v7495_v31 }
 0xe8f   :  { %v7595_v1 = vadd.f32 %v7587_v24, %v7496_v2 }
 0xe93   :  { %v7541_v18 = vpop.f32.mrf.mxu3 }
 0xe94   :  { %v7655_v28 = vpop.f32.mrf.mxu2 }
 0xe95   :  { %v7707_v23 = vadd.f32 %v7655_v28, %v7590_v19 }
 0xe96   :  { %v7701_v32 = vpop.f32.mrf.mxu0 }
 0xe97   :  { %v7772_v42 = vpop.f32.mrf.mxu1  ;;  %v7709_v5 = vadd.f32 %v7701_v32, %v7592_v22  ;;  %v8090_v22 = vstv %s10129_s0 }
 0xe98   :  { %v7824_v61 = vadd.f32 %v7772_v42, %v7707_v23  ;;  %v8075_v42 = vpop.permute.xlu0 %8074 }
 0xe9b   :  { %v7678_v34 = vpop.f32.mrf.mxu3 }
 0xe9c   :  { %v7658_v39 = vpop.f32.mrf.mxu2  ;;  %v7708_v63 = vadd.f32 %v7678_v34, %v7591_v16 }
 0xe9e   :  { %v7704_v52 = vpop.f32.mrf.mxu0 }
 0xe9f   :  { %v15093_v46 = vpop.f32.mrf.mxu1  ;;  %v7712_v4 = vadd.f32 %v7704_v52, %v7595_v1  ;;  %v15971_v1 = vld [vmem:[#allocation21_spill] sm:$0xff] }
 0xea3   :  { %v7681_v56 = vpop.f32.mrf.mxu3 }
 0xea4   :  { %v7795_v38 = vpop.f32.mrf.mxu2  ;;  %v7711_v7 = vadd.f32 %v7681_v56, %v7594_v55 }
 0xea5   :  { %v7825_v17 = vadd.f32 %v7795_v38, %v7708_v63  ;;  %v8070_v63 = vpop.permute.xlu2 %8069  ;;  %v7494_v38 = vadd.f32 %v7442_v30, %v7377_v13 }
 0xea6   :  { %v7889_v8 = vpop.f32.mrf.mxu0 }
 0xea7   :  { %v7912_v45 = vpop.f32.mrf.mxu1  ;;  %v7941_v28 = vadd.f32 %v7889_v8, %v7824_v61  ;;  %v15973_v61 = vld [vmem:[#allocation18_spill] sm:$0xff] }
 0xea8   :  { %v7942_v44 = vadd.f32 %v7912_v45, %v7825_v17 }
 0xeab   :  { %v7818_v14 = vpop.f32.mrf.mxu3 }
 0xeac   :  { %v7798_v26 = vpop.f32.mrf.mxu2  ;;  %v7826_v50 = vadd.f32 %v7818_v14, %v7709_v5  ;;  %v7593_v14 = vadd.f32 %v7541_v18, %v7494_v38 }
 0xead   :  { %v7828_v20 = vadd.f32 %v7798_v26, %v7711_v7 }
 0xeae   :  { %v7892_v0 = vpop.f32.mrf.mxu0  ;;  %v7710_v27 = vadd.f32 %v7658_v39, %v7593_v14  ;;  %v15972_v14 = vld [vmem:[#allocation22_spill] sm:$0xff] }
 0xeaf   :  { %v7915_v59 = vpop.f32.mrf.mxu1 }
 0xeb0   :  { %v7945_v56 = vadd.f32 %v7915_v59, %v7828_v20  ;;  %v7827_v41 = vadd.f32 %v15093_v46, %v7710_v27  ;;  %v10230_v27 = vld [vmem:[%s15887_s10 + $0x48] sm:$0xf] }
 0xeb3   :  { %v7821_v12 = vpop.f32.mrf.mxu3 }
 0xeb4   :  { %v7935_v62 = vpop.f32.mrf.mxu2  ;;  %v7829_v54 = vadd.f32 %v7821_v12, %v7712_v4 }
 0xeb5   :  { %v7943_v16 = vadd.f32 %v7935_v62, %v7826_v50 }
 0xeb6   :  { %v8029_v34 = vpop.f32.mrf.mxu0 }
 0xeb7   :  { %v8059_v25 = vadd.f32 %v8029_v34, %v7942_v44  ;;  %v8052_v35 = vpop.f32.mrf.mxu1 }
 0xeb8   :  { %v8060_v32 = vadd.f32 %v8052_v35, %v7943_v16  ;;  %v10229_v16 = vld [vmem:[%s15887_s10 + $0x40] sm:$0xff] }
 0xeb9   :  { %v8078_v53 = vadd.f32 %v8070_v63, %v8059_v25 }
 0xeba   :  { %v8079_v36 = vadd.f32 %v8070_v63, %v8060_v32 }
 0xebb   :  { %vm8085_vm11 = vcmp.ge.f32.partialorder %v8078_v53, 0.0  ;;  %v8092_v45 = vmul.f32 %v8090_v22, %v8078_v53  ;;  %v8006_v3 = vpop.f32.mrf.mxu3 }
 0xebc   :  { %v7938_v58 = vpop.f32.mrf.mxu2  ;;  %v8093_v26 = vmul.f32 %v8090_v22, %v8079_v36  ;;  %v8058_v47 = vadd.f32 %v8006_v3, %v7941_v28  ;;  %vm8086_vm12 = vcmp.ge.f32.partialorder %v8079_v36, 0.0  ;;  %v10132_v28 = vld [vmem:[%s15863_s7 + $0x250] sm:$0xff] }
 0xebd   :  { %v8098_v33 = vsel %vm8085_vm11, %v8078_v53, %v8092_v45  ;;  %v7946_v37 = vadd.f32 %v7938_v58, %v7829_v54 }
 0xebe   :  { %v15096_v30 = vadd.f32 %v8098_v33, %v14723_v40  ;;  %v8032_v10 = vpop.f32.mrf.mxu0  ;;  %v7944_v40 = vadd.f32 %v7892_v0, %v7827_v41  ;;  %v8099_v8 = vsel %vm8086_vm12, %v8079_v36, %v8093_v26  ;;  %v8077_v60 = vadd.f32 %v8070_v63, %v8058_v47 }
 0xebf   :  { %v8062_v43 = vadd.f32 %v8032_v10, %v7945_v56  ;;  %v8055_v52 = vpop.f32.mrf.mxu1  ;;  %v15104_v46 = vadd.f32 %v8099_v8, %v14751_v57  ;;  %v15974_v10 = vld [vmem:[#allocation26_spill] sm:$0xff] }
 0xec0   :  { %v8063_v39 = vadd.f32 %v8055_v52, %v7946_v37  ;;  %8113 = vrot.lane.b32.xlu2 %v15096_v30, %s10762_s18  ;;  %8140 = vrot.lane.b32.xlu1 %v15096_v30, %s10754_s8  ;;  %v8091_v51 = vmul.f32 %v8090_v22, %v8077_v60  ;;  %vm8084_vm14 = vcmp.ge.f32.partialorder %v8077_v60, 0.0  ;;  %v10133_v52 = vld [vmem:[%s15863_s7 + $0x258] sm:$0xf] }
 0xec1   :  { %v8081_v59 = vadd.f32 %v8075_v42, %v8062_v43 }
 0xec2   :  { %v8082_v24 = vadd.f32 %v8075_v42, %v8063_v39  ;;  %v8097_v57 = vsel %vm8084_vm14, %v8077_v60, %v8091_v51 }
 0xec3   :  { %vm8088_vm13 = vcmp.ge.f32.partialorder %v8081_v59, 0.0  ;;  %v8095_v9 = vmul.f32 %v8090_v22, %v8081_v59  ;;  %v8009_v18 = vpop.f32.mrf.mxu3  ;;  %v15116_v2 = vadd.f32 %v8097_v57, %v14720_v49  ;;  %v15977_v57 = vld [vmem:[#allocation17_spill] sm:$0xff] }
 0xec4   :  { %v8061_v17 = vadd.f32 %v8009_v18, %v7944_v40  ;;  %v8096_v11 = vmul.f32 %v8090_v22, %v8082_v24  ;;  %vm8089_vm15 = vcmp.ge.f32.partialorder %v8082_v24, 0.0 }
 0xec5   :  { %v8101_v29 = vsel %vm8088_vm13, %v8081_v59, %v8095_v9  ;;  %v10130_v59 = vld [vmem:[%s15863_s7 + $0x240] sm:$0xff] }
 0xec6   :  { %v15107_v48 = vadd.f32 %v8101_v29, %v14736_v6  ;;  %v8080_v5 = vadd.f32 %v8075_v42, %v8061_v17  ;;  %v8102_v6 = vsel %vm8089_vm15, %v8082_v24, %v8096_v11  ;;  %v15975_v29 = vld [vmem:[#allocation24_spill] sm:$0xff]  ;;  %v15976_v11 = vld [vmem:[#allocation19_spill] sm:$0xff] }
 0xec7   :  { %v15122_v12 = vadd.f32 %v8102_v6, %v14754_v15 }
 0xec8   :  { %8144 = vrot.lane.b32.xlu2 %v15104_v46, %s10754_s8  ;;  %8115 = vrot.lane.b32.xlu1 %v15107_v48, %s10762_s18  ;;  %vm8087_vm0 = vcmp.ge.f32.partialorder %v8080_v5, 0.0  ;;  %v8094_v0 = vmul.f32 %v8090_v22, %v8080_v5 }
 0xec9   :  { %8142 = vrot.lane.b32.xlu0 %v15107_v48, %s10754_s8 }
 0xeca   :  { %v8100_v31 = vsel %vm8087_vm0, %v8080_v5, %v8094_v0 }
 0xecb   :  { %v15119_v50 = vadd.f32 %v8100_v31, %v14733_v21 }
 0xed0   :  { %8136 = vrot.lane.b32.xlu2 %v15116_v2, %s10754_s8  ;;  %8138 = vrot.lane.b32.xlu1 %v15119_v50, %s10754_s8 }
 0xed1   :  { %8146 = vrot.lane.b32.xlu0 %v15122_v12, %s10754_s8 }
 0xed8   :  { %8109 = vrot.lane.b32.xlu2 %v15116_v2, %s10762_s18  ;;  %8117 = vrot.lane.b32.xlu1 %v15104_v46, %s10762_s18 }
 0xed9   :  { %8119 = vrot.lane.b32.xlu0 %v15122_v12, %s10762_s18 }
 0xee0   :  { %8331 = vrot.lane.b32.xlu2 %v15116_v2, %s10763_s22  ;;  %8339 = vrot.lane.b32.xlu1 %v15104_v46, %s10763_s22 }
 0xee1   :  { %8341 = vrot.lane.b32.xlu0 %v15122_v12, %s10763_s22 }
 0xee8   :  { %8458 = vrot.lane.b32.xlu2 %v15122_v12, %s10764_s23  ;;  %8333 = vrot.lane.b32.xlu1 %v15119_v50, %s10763_s22 }
 0xee9   :  { %8111 = vrot.lane.b32.xlu0 %v15119_v50, %s10762_s18 }
 0xef0   :  { %8337 = vrot.lane.b32.xlu2 %v15107_v48, %s10763_s22  ;;  %8448 = vrot.lane.b32.xlu1 %v15116_v2, %s10764_s23 }
 0xef1   :  { %8456 = vrot.lane.b32.xlu0 %v15104_v46, %s10764_s23 }
 0xef8   :  { %8452 = vrot.lane.b32.xlu2 %v15096_v30, %s10764_s23  ;;  %8335 = vrot.lane.b32.xlu1 %v15096_v30, %s10763_s22 }
 0xef9   :  { %8450 = vrot.lane.b32.xlu0 %v15119_v50, %s10764_s23 }
 0xf00   :  { %8664 = vrot.lane.b32.xlu2 %v15116_v2, %s10765_s26  ;;  %8672 = vrot.lane.b32.xlu1 %v15104_v46, %s10765_s26 }
 0xf01   :  { %8454 = vrot.lane.b32.xlu0 %v15107_v48, %s10764_s23 }
 0xf08   :  { %8668 = vrot.lane.b32.xlu2 %v15096_v30, %s10765_s26  ;;  %8785 = vrot.lane.b32.xlu1 %v15096_v30, %s10766_s28 }
 0xf09   :  { %8674 = vrot.lane.b32.xlu0 %v15122_v12, %s10765_s26 }
 0xf10   :  { %8781 = vrot.lane.b32.xlu2 %v15116_v2, %s10766_s28  ;;  %8666 = vrot.lane.b32.xlu1 %v15119_v50, %s10765_s26 }
 0xf11   :  { %8670 = vrot.lane.b32.xlu0 %v15107_v48, %s10765_s26 }
 0xf18   :  { %8904 = vrot.lane.b32.xlu2 %v15107_v48, %s10760_s20  ;;  %8783 = vrot.lane.b32.xlu1 %v15119_v50, %s10766_s28 }
 0xf19   :  { %8787 = vrot.lane.b32.xlu0 %v15107_v48, %s10766_s28 }
 0xf1a   :  { %v15184_v49 = vpop.permute.xlu2 %8113 }
 0xf20   :  { %8791 = vrot.lane.b32.xlu2 %v15122_v12, %s10766_s28  ;;  %8898 = vrot.lane.b32.xlu1 %v15116_v2, %s10760_s20 }
 0xf21   :  { %8902 = vrot.lane.b32.xlu0 %v15096_v30, %s10760_s20 }
 0xf22   :  { %v8145_v21 = vpop.permute.xlu2 %8144 }
 0xf28   :  { %8906 = vrot.lane.b32.xlu2 %v15104_v46, %s10760_s20  ;;  %8789 = vrot.lane.b32.xlu1 %v15104_v46, %s10766_s28 }
 0xf29   :  { %8900 = vrot.lane.b32.xlu0 %v15119_v50, %s10760_s20 }
 0xf2a   :  { %v8137_v15 = vpop.permute.xlu2 %8136 }
 0xf2b   :  { %v8152_v63 = vsel %vm3847_vm2, %v8145_v21, %v8137_v15 }
 0xf2c   :  { %v8154_v54 = vmul.f32 %v8152_v63, %v15972_v14 }
 0xf30   :  { %9019 = vrot.lane.b32.xlu2 %v15096_v30, %s10767_s2  ;;  %9021 = vrot.lane.b32.xlu1 %v15107_v48, %s10767_s2 }
 0xf31   :  { %8908 = vrot.lane.b32.xlu0 %v15122_v12, %s10760_s20 }
 0xf32   :  { %v8110_v19 = vpop.permute.xlu2 %8109  ;;  %v8141_v55 = vpop.permute.xlu1 %8140 }
 0xf33   :  { %v8150_v7 = vsel %vm3847_vm2, %v8137_v15, %v8141_v55  ;;  %v8148_v53 = vsel %vm3847_vm2, %v8141_v55, %v8145_v21  ;;  %v8123_v8 = vsel %vm3819_vm5, %v8110_v19, %v15184_v49  ;;  %v15978_v55 = vld [vmem:[#allocation23_spill] sm:$0xff] }
 0xf34   :  { %v8155_v36 = vmul.f32 %v8150_v7, %v15971_v1  ;;  %v8156_v3 = vmul.f32 %v8148_v53, %v15973_v61  ;;  %v8128_v15 = vmul.f32 %v8123_v8, %v15977_v57  ;;  %v15984_v8 = vld [vmem:[#allocation28_spill] sm:$0xff] }
 0xf38   :  { %9015 = vrot.lane.b32.xlu2 %v15116_v2, %s10767_s2  ;;  %9023 = vrot.lane.b32.xlu1 %v15104_v46, %s10767_s2 }
 0xf39   :  { %9025 = vrot.lane.b32.xlu0 %v15122_v12, %s10767_s2 }
 0xf3a   :  { %v15210_v44 = vpop.permute.xlu2 %8331  ;;  %v8116_v62 = vpop.permute.xlu1 %8115 }
 0xf3b   :  { %v8143_v13 = vpop.permute.xlu0 %8142 }
 0xf40   :  { %9137 = vperm.xlu1 %10279, %v10229_v16  }
 0xf41   :  { %9017 = vrot.lane.b32.xlu0 %v15119_v50, %s10767_s2 }
 0xf42   :  { %v8139_v34 = vpop.permute.xlu1 %8138  ;;  %v15221_v38 = vpop.permute.xlu2 %8458 }
 0xf43   :  { %v8151_v25 = vsel %vm3847_vm2, %v8139_v34, %v8143_v13  ;;  %v8147_v35 = vpop.permute.xlu0 %8146 }
 0xf44   :  { %v8158_v22 = vmul.f32 %v8151_v25, %v15971_v1  ;;  %v8149_v32 = vsel %vm3847_vm2, %v8143_v13, %v8147_v35  ;;  %v8153_v20 = vsel %vm3847_vm2, %v8147_v35, %v8139_v34  ;;  %v15979_v13 = vld [vmem:[#allocation25_spill] sm:$0xff]  ;;  %v10131_v34 = vld [vmem:[%s15863_s7 + $0x248] sm:$0xf] }
 0xf45   :  { %v8157_v4 = vmul.f32 %v8153_v20, %v15972_v14  ;;  %v8159_v45 = vmul.f32 %v8149_v32, %v15973_v61  ;;  %v10152_v35 = vld [vmem:[%s15863_s7 + $0x260] sm:$0xff] }
 0xf46   :  { %10137 = vmatpush.msk.msrb.mxu3 %vm3876_vm1, %v8158_v22  ;;  %v10153_v22 = vld [vmem:[%s15863_s7 + $0x268] sm:$0xf] }
 0xf47   :  { %10134 = vmatpush.msk.msrb.mxu2 %vm3876_vm1, %v8157_v4  ;;  %10140 = vmatpush.msk.msrb.mxu0 %vm3876_vm1, %v8159_v45 }
 0xf48   :  { %8216 = vmatpush.msrb.mxu3 %v8155_v36 }
 0xf49   :  { %9142 = vperm.xlu0 %10280, %v10230_v27   ;;  %8193 = vmatpush.msrb.mxu2 %v8154_v54  ;;  %v15980_v27 = vld [vmem:[#allocation29_spill] sm:$0xff] }
 0xf4a   :  { %8239 = vmatpush.msrb.mxu0 %v8156_v3  ;;  %v8118_v56 = vpop.permute.xlu1 %8117  ;;  %10135 = vmatmul.msk.f32.vlgmr.msrb.gmra.mxu2 %vm3869_vm3, %v10132_v28  ;;  %v8338_v47 = vpop.permute.xlu2 %8337  ;;  %v15981_v3 = vld [vmem:[#allocation32_spill] sm:$0xff] }
 0xf4b   :  { %v8120_v33 = vpop.permute.xlu0 %8119  ;;  %10138 = vmatmul.msk.f32.vlgmr.msrb.gmra.mxu3 %vm3869_vm3, %v10132_v28  ;;  %10141 = vmatmul.msk.f32.vlgmr.msrb.gmra.mxu0 %vm3869_vm3, %v10132_v28  ;;  %v8121_v58 = vsel %vm3819_vm5, %v15184_v49, %v8118_v56  ;;  %v8125_v18 = vsel %vm3819_vm5, %v8118_v56, %v8110_v19  ;;  %v8568_v28 = vmul.f32 %v15119_v50, %v15981_v3 }
 0xf4c   :  { %v8122_v37 = vsel %vm3819_vm5, %v8116_v62, %v8120_v33  ;;  %v8129_v43 = vmul.f32 %v8121_v58, %v15974_v10  ;;  %v8127_v19 = vmul.f32 %v8125_v18, %v15976_v11  ;;  %v8565_v56 = vmul.f32 %v15116_v2, %v15981_v3  ;;  %v15982_v58 = vld [vmem:[#allocation30_spill] sm:$0xff]  ;;  %v15985_v18 = vld [vmem:[#allocation33_spill] sm:$0xff] }
 0xf4d   :  { %v8132_v26 = vmul.f32 %v8122_v37, %v15974_v10  ;;  %v8569_v37 = vmul.f32 %v15107_v48, %v15982_v58 }
 0xf4f   :  { %10149 = vmatpush.msk.msra.mxu3 %vm3876_vm1, %v8132_v26 }
 0xf51   :  { %8323 = vmatpush.msra.mxu3 %v8129_v43 }
 0xf52   :  { %v8340_v42 = vpop.permute.xlu1 %8339  ;;  %10136 = vmatmul.msk.f32.gmra.mxu2 %vm3869_vm3, %v10133_v52  ;;  %v15255_v39 = vpop.permute.xlu2 %8452 }
 0xf53   :  { %v8342_v41 = vpop.permute.xlu0 %8341  ;;  %10139 = vmatmul.msk.f32.gmra.mxu3 %vm3869_vm3, %v10133_v52  ;;  %10142 = vmatmul.msk.f32.gmra.mxu0 %vm3869_vm3, %v10133_v52  ;;  %v8347_v60 = vsel %vm4047_vm4, %v8340_v42, %v15210_v44 }
 0xf54   :  { %v8349_v6 = vmul.f32 %v8347_v60, %v15975_v29  ;;  %v8344_v49 = vsel %vm4047_vm4, %v8338_v47, %v8342_v41 }
 0xf5a   :  { %v8334_v40 = vpop.permute.xlu1 %8333  ;;  %v15289_v7 = vpop.permute.xlu2 %8664 }
 0xf5b   :  { %v8348_v9 = vsel %vm4047_vm4, %v8342_v41, %v8334_v40  ;;  %v8112_v24 = vpop.permute.xlu0 %8111  ;;  %10150 = vmatmul.msk.f32.vlgmr.msra.gmra.mxu3 %vm3869_vm3, %v10130_v59  ;;  %v8346_v21 = vsel %vm4047_vm4, %v8334_v40, %v8338_v47  ;;  %v8566_v47 = vmul.f32 %v15096_v30, %v15982_v58 }
 0xf5c   :  { %v8352_v17 = vmul.f32 %v8348_v9, %v15975_v29  ;;  %v8124_v51 = vsel %vm3819_vm5, %v8112_v24, %v8116_v62  ;;  %v8126_v5 = vsel %vm3819_vm5, %v8120_v33, %v8112_v24  ;;  %v8354_v62 = vmul.f32 %v8344_v49, %v15978_v55  ;;  %v10163_v33 = vld [vmem:[%s15863_s7 + $0x270] sm:$0xff] }
 0xf5d   :  { %v8130_v0 = vmul.f32 %v8126_v5, %v15976_v11  ;;  %v8131_v31 = vmul.f32 %v8124_v51, %v15977_v57  ;;  %v8353_v16 = vmul.f32 %v8346_v21, %v15979_v13  ;;  %v8570_v29 = vmul.f32 %v15122_v12, %v15985_v18  ;;  %v10174_v11 = vld [vmem:[%s15863_s7 + $0x280] sm:$0xff] }
 0xf5e   :  { %10154 = vmatpush.msk.msra.mxu0 %vm3876_vm1, %v8352_v17  ;;  %v8567_v5 = vmul.f32 %v15104_v46, %v15985_v18  ;;  %v10207_v18 = vld [vmem:[%s15863_s7 + $0x2b0] sm:$0xff] }
 0xf5f   :  { %10143 = vmatpush.msk.msra.mxu1 %vm3876_vm1, %v8130_v0  ;;  %10146 = vmatpush.msk.msra.mxu2 %vm3876_vm1, %v8131_v31 }
 0xf60   :  { %8388 = vmatpush.msra.mxu0 %v8349_v6 }
 0xf61   :  { %8277 = vmatpush.msra.mxu1 %v8127_v19  ;;  %8300 = vmatpush.msra.mxu2 %v8128_v15  ;;  %v15986_v19 = vld [vmem:[#allocation36_spill] sm:$0xff] }
 0xf62   :  { %10144 = vmatmul.msk.f32.vlgmr.msra.gmra.mxu1 %vm3869_vm3, %v10130_v59  ;;  %10147 = vmatmul.msk.f32.vlgmr.msra.gmra.mxu2 %vm3869_vm3, %v10130_v59  ;;  %v8449_v25 = vpop.permute.xlu1 %8448  ;;  %v8669_v14 = vpop.permute.xlu2 %8668  ;;  %v15983_v59 = vld [vmem:[#allocation27_spill] sm:$0xff] }
 0xf63   :  { %10157 = vmatpush.msk.msrb.mxu1 %vm3876_vm1, %v8353_v16  ;;  %10160 = vmatpush.msk.msrb.mxu2 %vm3876_vm1, %v8354_v62  ;;  %v8457_v63 = vpop.permute.xlu0 %8456  ;;  %v8462_v43 = vsel %vm4167_vm6, %v8449_v25, %v15255_v39  ;;  %v8678_v31 = vsel %vm4395_vm7, %v15289_v7, %v8669_v14  ;;  %v15987_v16 = vld [vmem:[#allocation31_spill] sm:$0xff] }
 0xf64   :  { %10151 = vmatmul.msk.f32.gmra.mxu3 %vm3869_vm3, %v10131_v34  ;;  %10155 = vmatmul.msk.f32.vlgmr.msra.gmra.mxu0 %vm3869_vm3, %v10152_v35  ;;  %v8464_v4 = vsel %vm4167_vm6, %v8457_v63, %v8449_v25  ;;  %v8460_v52 = vsel %vm4167_vm6, %v15255_v39, %v8457_v63  ;;  %v8467_v24 = vmul.f32 %v8462_v43, %v15983_v59 }
 0xf65   :  { %v8468_v39 = vmul.f32 %v8460_v52, %v15984_v8  ;;  %v8682_v63 = vmul.f32 %v8678_v31, %v15987_v16  ;;  %v15993_v31 = vld [vmem:[#allocation38_spill] sm:$0xff] }
 0xf6a   :  { %10145 = vmatmul.msk.f32.gmra.mxu1 %vm3869_vm3, %v10131_v34  ;;  %10148 = vmatmul.msk.f32.gmra.mxu2 %vm3869_vm3, %v10131_v34  ;;  %v8336_v1 = vpop.permute.xlu1 %8335  ;;  %v15344_v9 = vpop.permute.xlu2 %8781 }
 0xf6b   :  { %v8343_v32 = vsel %vm4047_vm4, %v8336_v1, %v8340_v42  ;;  %v8345_v20 = vsel %vm4047_vm4, %v15210_v44, %v8336_v1  ;;  %v8451_v53 = vpop.permute.xlu0 %8450  ;;  %v8466_v44 = vmul.f32 %v8464_v4, %v15980_v27 }
 0xf6c   :  { %v8350_v61 = vmul.f32 %v8345_v20, %v15979_v13  ;;  %v8351_v45 = vmul.f32 %v8343_v32, %v15978_v55  ;;  %v8465_v36 = vsel %vm4167_vm6, %v15221_v38, %v8451_v53  ;;  %10156 = vmatmul.msk.f32.gmra.mxu0 %vm3869_vm3, %v10153_v22 }
 0xf6d   :  { %v8469_v54 = vmul.f32 %v8465_v36, %v15980_v27 }
 0xf6e   :  { %8411 = vmatpush.msrb.mxu1 %v8350_v61  ;;  %8434 = vmatpush.msrb.mxu2 %v8351_v45  ;;  %v15989_v61 = vld [vmem:[#allocation41_spill] sm:$0xff] }
 0xf6f   :  { %10165 = vmatpush.msk.msrb.mxu3 %vm3876_vm1, %v8469_v54  ;;  %v15990_v54 = vld [vmem:[#allocation34_spill] sm:$0xff] }
 0xf70   :  { %10176 = vmatpush.msk.msra.mxu2 %vm3876_vm1, %v8568_v28  ;;  %v15991_v28 = vld [vmem:[#allocation35_spill] sm:$0xff] }
 0xf71   :  { %8505 = vmatpush.msrb.mxu3 %v8466_v44 }
 0xf72   :  { %8604 = vmatpush.msra.mxu2 %v8565_v56  ;;  %10158 = vmatmul.msk.f32.vlgmr.msrb.gmra.mxu1 %vm3869_vm3, %v10152_v35  ;;  %v8673_v10 = vpop.permute.xlu1 %8672  ;;  %v15363_v0 = vpop.permute.xlu2 %8904 }
 0xf73   :  { %10161 = vmatmul.msk.f32.vlgmr.msrb.gmra.mxu2 %vm3869_vm3, %v10152_v35  ;;  %10166 = vmatmul.msk.f32.vlgmr.msrb.gmra.mxu3 %vm3869_vm3, %v10163_v33  ;;  %v8455_v26 = vpop.permute.xlu0 %8454  ;;  %v8680_v6 = vsel %vm4395_vm7, %v8673_v10, %v15289_v7  ;;  %v8676_v15 = vsel %vm4395_vm7, %v8669_v14, %v8673_v10  ;;  %v15988_v7 = vld [vmem:[#allocation37_spill] sm:$0xff]  ;;  %v10186_v10 = vld [vmem:[%s15863_s7 + $0x298] sm:$0xf] }
 0xf74   :  { %10179 = vmatpush.msk.msra.mxu3 %vm3876_vm1, %v8569_v37  ;;  %v8461_v42 = vsel %vm4167_vm6, %v8455_v26, %v15221_v38  ;;  %v8463_v41 = vsel %vm4167_vm6, %v8451_v53, %v8455_v26  ;;  %v10164_v38 = vld [vmem:[%s15863_s7 + $0x278] sm:$0xf]  ;;  %v8684_v35 = vmul.f32 %v8680_v6, %v15986_v19  ;;  %v8683_v1 = vmul.f32 %v8676_v15, %v15988_v7  ;;  %v10196_v26 = vld [vmem:[%s15863_s7 + $0x2a0] sm:$0xff] }
 0xf75   :  { %v8470_v40 = vmul.f32 %v8463_v41, %v15983_v59  ;;  %v8471_v60 = vmul.f32 %v8461_v42, %v15984_v8 }
 0xf76   :  { %8627 = vmatpush.msra.mxu3 %v8566_v47 }
 0xf77   :  { %10168 = vmatpush.msk.msrb.mxu0 %vm3876_vm1, %v8470_v40  ;;  %10171 = vmatpush.msk.msra.mxu1 %vm3876_vm1, %v8471_v60 }
 0xf79   :  { %8528 = vmatpush.msrb.mxu0 %v8467_v24  ;;  %8551 = vmatpush.msra.mxu1 %v8468_v39  ;;  %v15992_v24 = vld [vmem:[#allocation40_spill] sm:$0xff] }
 0xf7a   :  { %10159 = vmatmul.msk.f32.gmra.mxu1 %vm3869_vm3, %v10153_v22  ;;  %v15355_v17 = vpop.permute.xlu1 %8785  ;;  %10169 = vmatmul.msk.f32.vlgmr.msrb.gmra.mxu0 %vm3869_vm3, %v10163_v33  ;;  %v8792_v32 = vpop.permute.xlu2 %8791 }
 0xf7b   :  { %10162 = vmatmul.msk.f32.gmra.mxu2 %vm3869_vm3, %v10153_v22  ;;  %10167 = vmatmul.msk.f32.gmra.mxu3 %vm3869_vm3, %v10164_v38  ;;  %v8675_v51 = vpop.permute.xlu0 %8674  ;;  %v10175_v22 = vld [vmem:[%s15863_s7 + $0x288] sm:$0xf]  ;;  %v8795_v4 = vsel %vm4515_vm8, %v15344_v9, %v15355_v17 }
 0xf7c   :  { %10182 = vmatpush.msk.msra.mxu0 %vm3876_vm1, %v8570_v29  ;;  %v8799_v56 = vmul.f32 %v8795_v4, %v15990_v54  ;;  %v15996_v4 = vld [vmem:[#allocation44_spill] sm:$0xff] }
 0xf7e   :  { %8650 = vmatpush.msra.mxu0 %v8567_v5 }
 0xf82   :  { %10172 = vmatmul.msk.f32.vlgmr.msra.gmra.mxu1 %vm3869_vm3, %v10163_v33  ;;  %v8667_v57 = vpop.permute.xlu1 %8666  ;;  %10170 = vmatmul.msk.f32.gmra.mxu0 %vm3869_vm3, %v10164_v38  ;;  %v10185_v33 = vld [vmem:[%s15863_s7 + $0x290] sm:$0xff]  ;;  %v8907_v60 = vpop.permute.xlu2 %8906 }
 0xf83   :  { %10177 = vmatmul.msk.f32.vlgmr.msra.gmra.mxu2 %vm3869_vm3, %v10174_v11  ;;  %10180 = vmatmul.msk.f32.vlgmr.msra.gmra.mxu3 %vm3869_vm3, %v10174_v11  ;;  %v8681_v49 = vsel %vm4395_vm7, %v8675_v51, %v8667_v57  ;;  %v8671_v21 = vpop.permute.xlu0 %8670 }
 0xf84   :  { %v8687_v55 = vmul.f32 %v8681_v49, %v15986_v19  ;;  %v8677_v62 = vsel %vm4395_vm7, %v8671_v21, %v8675_v51  ;;  %v8679_v13 = vsel %vm4395_vm7, %v8667_v57, %v8671_v21  ;;  %v15994_v49 = vld [vmem:[#allocation39_spill] sm:$0xff]  ;;  %vm9298_vm7 = vcmask 244736  }
 0xf85   :  { %v8685_v34 = vmul.f32 %v8679_v13, %v15987_v16  ;;  %v8686_v25 = vmul.f32 %v8677_v62, %v15988_v7  ;;  %v10208_v62 = vld [vmem:[%s15863_s7 + $0x2b8] sm:$0xf]  ;;  %v15995_v7 = vld [vmem:[#allocation42_spill] sm:$0xff] }
 0xf86   :  { %10193 = vmatpush.msk.msrb.mxu3 %vm3876_vm1, %v8687_v55 }
 0xf87   :  { %10187 = vmatpush.msk.msrb.mxu1 %vm3876_vm1, %v8685_v34  ;;  %10190 = vmatpush.msk.msrb.mxu2 %vm3876_vm1, %v8686_v25 }
 0xf88   :  { %8767 = vmatpush.msrb.mxu3 %v8684_v35 }
 0xf89   :  { %8721 = vmatpush.msrb.mxu1 %v8682_v63  ;;  %8744 = vmatpush.msrb.mxu2 %v8683_v1  ;;  %v10218_v63 = vld [vmem:[%s15863_s7 + $0x2c0] sm:$0xff] }
 0xf8a   :  { %10173 = vmatmul.msk.f32.gmra.mxu1 %vm3869_vm3, %v10164_v38  ;;  %v8784_v20 = vpop.permute.xlu1 %8783  ;;  %10183 = vmatmul.msk.f32.vlgmr.msra.gmra.mxu0 %vm3869_vm3, %v10174_v11  ;;  %v9020_v15 = vpop.permute.xlu2 %9019 }
 0xf8b   :  { %10178 = vmatmul.msk.f32.gmra.mxu2 %vm3869_vm3, %v10175_v22  ;;  %10181 = vmatmul.msk.f32.gmra.mxu3 %vm3869_vm3, %v10175_v22  ;;  %v8798_v53 = vsel %vm4515_vm8, %v8792_v32, %v8784_v20  ;;  %v8788_v14 = vpop.permute.xlu0 %8787 }
 0xf8c   :  { %v8804_v45 = vmul.f32 %v8798_v53, %v15989_v61  ;;  %v8794_v36 = vsel %vm4515_vm8, %v8788_v14, %v8792_v32  ;;  %v8796_v27 = vsel %vm4515_vm8, %v8784_v20, %v8788_v14 }
 0xf8d   :  { %v8802_v3 = vmul.f32 %v8796_v27, %v15990_v54  ;;  %v8803_v44 = vmul.f32 %v8794_v36, %v15991_v28 }
 0xf8e   :  { %10204 = vmatpush.msk.msra.mxu2 %vm3876_vm1, %v8804_v45  ;;  %v15997_v45 = vld [vmem:[#allocation43_spill] sm:$0xff] }
 0xf8f   :  { %10198 = vmatpush.msk.msrb.mxu0 %vm3876_vm1, %v8802_v3  ;;  %10201 = vmatpush.msk.msra.mxu1 %vm3876_vm1, %v8803_v44  ;;  %v10219_v3 = vld [vmem:[%s15863_s7 + $0x2c8] sm:$0xf] }
 0xf91   :  { %8838 = vmatpush.msrb.mxu0 %v8799_v56 }
 0xf92   :  { %10188 = vmatmul.msk.f32.vlgmr.msrb.gmra.mxu1 %vm3869_vm3, %v10185_v33  ;;  %v8899_v58 = vpop.permute.xlu1 %8898  ;;  %10184 = vmatmul.msk.f32.gmra.mxu0 %vm3869_vm3, %v10175_v22  ;;  %v9016_v1 = vpop.permute.xlu2 %9015 }
 0xf93   :  { %10191 = vmatmul.msk.f32.vlgmr.msrb.gmra.mxu2 %vm3869_vm3, %v10185_v33  ;;  %10194 = vmatmul.msk.f32.vlgmr.msrb.gmra.mxu3 %vm3869_vm3, %v10185_v33  ;;  %v8903_v37 = vpop.permute.xlu0 %8902  ;;  %v8914_v51 = vsel %vm4635_vm9, %v8907_v60, %v8899_v58  ;;  %v9029_v32 = vsel %vm4755_vm10, %v9016_v1, %v9020_v15 }
 0xf94   :  { %v8912_v41 = vsel %vm4635_vm9, %v8899_v58, %v8903_v37  ;;  %v8910_v5 = vsel %vm4635_vm9, %v8903_v37, %v8907_v60  ;;  %v8918_v19 = vmul.f32 %v8914_v51, %v15994_v49  ;;  %v9033_v27 = vmul.f32 %v9029_v32, %v15996_v4  ;;  %v9202_v32 = vld [vmem:[%s10907_s25 + $0xc8] sm:$0xff] }
 0xf95   :  { %v8916_v38 = vmul.f32 %v8912_v41, %v15992_v24  ;;  %v8917_v55 = vmul.f32 %v8910_v5, %v15993_v31 }
 0xf9a   :  { %10189 = vmatmul.msk.f32.gmra.mxu1 %vm3869_vm3, %v10186_v10  ;;  %v8790_v47 = vpop.permute.xlu1 %8789  ;;  %10199 = vmatmul.msk.f32.vlgmr.msrb.gmra.mxu0 %vm3869_vm3, %v10196_v26 }
 0xf9b   :  { %10192 = vmatmul.msk.f32.gmra.mxu2 %vm3869_vm3, %v10186_v10  ;;  %10195 = vmatmul.msk.f32.gmra.mxu3 %vm3869_vm3, %v10186_v10  ;;  %v8793_v43 = vsel %vm4515_vm8, %v15355_v17, %v8790_v47  ;;  %v8797_v52 = vsel %vm4515_vm8, %v8790_v47, %v15344_v9  ;;  %v8901_v42 = vpop.permute.xlu0 %8900  ;;  %v10197_v9 = vld [vmem:[%s15863_s7 + $0x2a8] sm:$0xf]  ;;  %vm9300_vm8 = vcmask 240640  }
 0xf9c   :  { %v8800_v59 = vmul.f32 %v8793_v43, %v15991_v28  ;;  %v8801_v40 = vmul.f32 %v8797_v52, %v15989_v61  ;;  %v8913_v8 = vsel %vm4635_vm9, %v8901_v42, %v15363_v0 }
 0xf9d   :  { %v8919_v39 = vmul.f32 %v8913_v8, %v15992_v24 }
 0xf9e   :  { %8861 = vmatpush.msra.mxu1 %v8800_v59  ;;  %8884 = vmatpush.msra.mxu2 %v8801_v40 }
 0xf9f   :  { %10209 = vmatpush.msk.msra.mxu3 %vm3876_vm1, %v8919_v39 }
 0xfa1   :  { %8955 = vmatpush.msra.mxu3 %v8916_v38 }
 0xfa2   :  { %10202 = vmatmul.msk.f32.vlgmr.msra.gmra.mxu1 %vm3869_vm3, %v10196_v26  ;;  %v9022_v29 = vpop.permute.xlu1 %9021  ;;  %10200 = vmatmul.msk.f32.gmra.mxu0 %vm3869_vm3, %v10197_v9 }
 0xfa3   :  { %10205 = vmatmul.msk.f32.vlgmr.msra.gmra.mxu2 %vm3869_vm3, %v10196_v26  ;;  %10210 = vmatmul.msk.f32.vlgmr.msra.gmra.mxu3 %vm3869_vm3, %v10207_v18  ;;  %v8909_v17 = vpop.permute.xlu0 %8908 }
 0xfa4   :  { %v8911_v11 = vsel %vm4635_vm9, %v15363_v0, %v8909_v17  ;;  %v8915_v57 = vsel %vm4635_vm9, %v8909_v17, %v8901_v42 }
 0xfa5   :  { %v8920_v6 = vmul.f32 %v8911_v11, %v15993_v31  ;;  %v8921_v21 = vmul.f32 %v8915_v57, %v15994_v49  ;;  %v9208_v31 = vld [vmem:[%s10907_s25 + $0xf8] sm:$0xff] }
 0xfa6   :  { %v9224_v49 = vld [vmem:[%s10907_s25 + $0x178] sm:$0xff] }
 0xfa7   :  { %10212 = vmatpush.msk.msra.mxu0 %vm3876_vm1, %v8920_v6  ;;  %10215 = vmatpush.msk.msrb.mxu1 %vm3876_vm1, %v8921_v21  ;;  %v9207_v6 = vld [vmem:[%s10907_s25 + $0xf0] sm:$0xff] }
 0xfa8   :  { %v9223_v21 = vld [vmem:[%s10907_s25 + $0x170] sm:$0xff] }
 0xfa9   :  { %8978 = vmatpush.msra.mxu0 %v8917_v55  ;;  %9001 = vmatpush.msrb.mxu1 %v8918_v19 }
 0xfaa   :  { %10203 = vmatmul.msk.f32.gmra.mxu1 %vm3869_vm3, %v10197_v9  ;;  %v9024_v0 = vpop.permute.xlu1 %9023  ;;  %10213 = vmatmul.msk.f32.vlgmr.msra.gmra.mxu0 %vm3869_vm3, %v10207_v18 }
 0xfab   :  { %10206 = vmatmul.msk.f32.gmra.mxu2 %vm3869_vm3, %v10197_v9  ;;  %10211 = vmatmul.msk.f32.gmra.mxu3 %vm3869_vm3, %v10208_v62  ;;  %v9026_v13 = vpop.permute.xlu0 %9025  ;;  %v9027_v16 = vsel %vm4755_vm10, %v9020_v15, %v9024_v0  ;;  %v9031_v20 = vsel %vm4755_vm10, %v9024_v0, %v9016_v1  ;;  %v9206_v15 = vld [vmem:[%s10907_s25 + $0xe8] sm:$0xff]  ;;  %v9205_v0 = vld [vmem:[%s10907_s25 + $0xe0] sm:$0xff]  ;;  %v9220_v1 = vld [vmem:[%s10907_s25 + $0x158] sm:$0xff] }
 0xfac   :  { %v9028_v34 = vsel %vm4755_vm10, %v9022_v29, %v9026_v13  ;;  %v9034_v35 = vmul.f32 %v9027_v16, %v15995_v7  ;;  %v9035_v54 = vmul.f32 %v9031_v20, %v15997_v45  ;;  %v9219_v20 = vld [vmem:[%s10907_s25 + $0x150] sm:$0xff] }
 0xfad   :  { %v9037_v25 = vmul.f32 %v9028_v34, %v15995_v7  ;;  %v9192_v34 = vld [vmem:[%s10907_s25 + $0x78] sm:$0xff] }
 0xfae   :  { %v9204_v7 = vld [vmem:[%s10907_s25 + $0xd8] sm:$0xff]  ;;  %9229 = vmatpush.msra.mxu1 %v9192_v34 }
 0xfaf   :  { %10223 = vmatpush.msk.msrb.mxu3 %vm3876_vm1, %v9037_v25  ;;  %v9221_v25 = vld [vmem:[%s10907_s25 + $0x160] sm:$0xff]  ;;  %v9212_v34 = vld [vmem:[%s10907_s25 + $0x118] sm:$0xff] }
 0xfb1   :  { %9095 = vmatpush.msrb.mxu3 %v9034_v35  ;;  %v9191_v35 = vld [vmem:[%s10907_s25 + $0x70] sm:$0xff] }
 0xfb2   :  { %10216 = vmatmul.msk.f32.vlgmr.msrb.gmra.mxu1 %vm3869_vm3, %v10207_v18  ;;  %10214 = vmatmul.msk.f32.gmra.mxu0 %vm3869_vm3, %v10208_v62 }
 0xfb3   :  { %10224 = vmatmul.msk.f32.vlgmr.msrb.gmra.mxu3 %vm3869_vm3, %v10218_v63  ;;  %v9018_v22 = vpop.permute.xlu0 %9017  ;;  %9230 = vmatpush.msra.mxu1 %v9191_v35  ;;  %v9211_v35 = vld [vmem:[%s10907_s25 + $0x110] sm:$0xff] }
 0xfb4   :  { %v9030_v53 = vsel %vm4755_vm10, %v9018_v22, %v9022_v29  ;;  %v9032_v14 = vsel %vm4755_vm10, %v9026_v13, %v9018_v22  ;;  %9275 = vmatpush.msra.mxu3 %v9224_v49  ;;  %v9222_v13 = vld [vmem:[%s10907_s25 + $0x168] sm:$0xff]  ;;  %v9184_v49 = vld [vmem:[%s10907_s25 + $0x38] sm:$0xff] }
 0xfb5   :  { %v9036_v61 = vmul.f32 %v9030_v53, %v15996_v4  ;;  %v9038_v36 = vmul.f32 %v9032_v14, %v15997_v45  ;;  %v9190_v22 = vld [vmem:[%s10907_s25 + $0x68] sm:$0xff]  ;;  %v9201_v45 = vld [vmem:[%s10907_s25 + $0xc0] sm:$0xff] }
 0xfb6   :  { %9276 = vmatpush.msra.mxu3 %v9223_v21  ;;  %9231 = vmatpush.msra.mxu1 %v9190_v22  ;;  %v9196_v21 = vld [vmem:[%s10907_s25 + $0x98] sm:$0xff]  ;;  %v9181_v22 = vld [vmem:[%s10907_s25 + $0x20] sm:$0xff] }
 0xfb7   :  { %10220 = vmatpush.msk.msrb.mxu2 %vm3876_vm1, %v9036_v61  ;;  %10226 = vmatpush.msk.msrb.mxu0 %vm3876_vm1, %v9038_v36  ;;  %v9189_v61 = vld [vmem:[%s10907_s25 + $0x60] sm:$0xff]  ;;  %v9218_v36 = vld [vmem:[%s10907_s25 + $0x148] sm:$0xff] }
 0xfb8   :  { %9277 = vmatpush.msra.mxu3 %v9222_v13  ;;  %9232 = vmatpush.msra.mxu1 %v9189_v61  ;;  %v9195_v13 = vld [vmem:[%s10907_s25 + $0x90] sm:$0xff] }
 0xfb9   :  { %9072 = vmatpush.msrb.mxu2 %v9033_v27  ;;  %9118 = vmatpush.msrb.mxu0 %v9035_v54  ;;  %v9188_v54 = vld [vmem:[%s10907_s25 + $0x58] sm:$0xff] }
 0xfba   :  { %10217 = vmatmul.msk.f32.gmra.mxu1 %vm3869_vm3, %v10208_v62  ;;  %10221 = vmatmul.msk.f32.vlgmr.msrb.gmra.mxu2 %vm3869_vm3, %v10218_v63 }
 0xfbb   :  { %10225 = vmatmul.msk.f32.gmra.mxu3 %vm3869_vm3, %v10219_v3  ;;  %10227 = vmatmul.msk.f32.vlgmr.msrb.gmra.mxu0 %vm3869_vm3, %v10218_v63  ;;  %v9203_v63 = vld [vmem:[%s10907_s25 + $0xd0] sm:$0xff] }
 0xfbc   :  { %9252 = vmatpush.msra.mxu2 %v9208_v31  ;;  %9278 = vmatpush.msra.mxu3 %v9221_v25  ;;  %v9214_v31 = vld [vmem:[%s10907_s25 + $0x128] sm:$0xff] }
 0xfbd   :  { %9233 = vmatpush.msra.mxu1 %v9188_v54  ;;  %v9194_v25 = vld [vmem:[%s10907_s25 + $0x88] sm:$0xff]  ;;  %v9209_v54 = vld [vmem:[%s10907_s25 + $0x100] sm:$0xff] }
 0xfbe   :  { %9253 = vmatpush.msra.mxu2 %v9207_v6  ;;  %9279 = vmatpush.msra.mxu3 %v9220_v1 }
 0xfc0   :  { %9254 = vmatpush.msra.mxu2 %v9206_v15  ;;  %9280 = vmatpush.msra.mxu3 %v9219_v20  ;;  %v9213_v15 = vld [vmem:[%s10907_s25 + $0x120] sm:$0xff]  ;;  %v9210_v20 = vld [vmem:[%s10907_s25 + $0x108] sm:$0xff] }
 0xfc2   :  { %10222 = vmatmul.msk.f32.gmra.mxu2 %vm3869_vm3, %v10219_v3  ;;  %9281 = vmatpush.msra.mxu3 %v9218_v36  ;;  %v9180_v36 = vld [vmem:[%s10907_s25 + $0x18] sm:$0xff] }
 0xfc3   :  { %10228 = vmatmul.msk.f32.gmra.mxu0 %vm3869_vm3, %v10219_v3  ;;  %9255 = vmatpush.msra.mxu2 %v9205_v0  ;;  %v9200_v3 = vld [vmem:[%s10907_s25 + $0xb8] sm:$0xff]  ;;  %v9183_v0 = vld [vmem:[%s10907_s25 + $0x30] sm:$0xff] }
 0xfc5   :  { %9256 = vmatpush.msra.mxu2 %v9204_v7  ;;  %v9182_v7 = vld [vmem:[%s10907_s25 + $0x28] sm:$0xff] }
 0xfc7   :  { %9257 = vmatpush.msra.mxu2 %v9203_v63 }
 0xfc8   :  { %v8241_v28 = vpop.f32.mrf.mxu0 }
 0xfc9   :  { %9258 = vmatpush.msra.mxu2 %v9202_v32  ;;  %v9193_v32 = vld [vmem:[%s10907_s25 + $0x80] sm:$0xff] }
 0xfcb   :  { %9259 = vmatpush.msra.mxu2 %v9201_v45 }
 0xfcd   :  { %v8195_v44 = vpop.f32.mrf.mxu2  ;;  %9260 = vmatpush.msra.mxu2 %v9200_v3  ;;  %v9179_v3 = vld [vmem:[%s10907_s25 + $0x10] sm:$0xff] }
 0xfce   :  { %v15499_v23 = vpop.f32.mrf.mxu3 }
 0xfd0   :  { %v8244_v33 = vpop.f32.mrf.mxu0 }
 0xfd5   :  { %v8198_v58 = vpop.f32.mrf.mxu2 }
 0xfd6   :  { %v15501_v56 = vpop.f32.mrf.mxu3 }
 0xfde   :  { %v8325_v37 = vpop.f32.mrf.mxu3 }
 0xfdf   :  { %v8279_v10 = vpop.f32.mrf.mxu1  ;;  %v15503_v26 = vadd.f32 %v8325_v37, %v8241_v28  ;;  %v9217_v28 = vld [vmem:[%s10907_s25 + $0x140] sm:$0xff]  ;;  %v9186_v37 = vld [vmem:[%s10907_s25 + $0x48] sm:$0xff] }
 0xfe0   :  { %v8280_v47 = vadd.f32 %v8279_v10, %v8195_v44  ;;  %v9187_v44 = vld [vmem:[%s10907_s25 + $0x50] sm:$0xff]  ;;  %9282 = vmatpush.msra.mxu3 %v9217_v28  ;;  %v9198_v10 = vld [vmem:[%s10907_s25 + $0xa8] sm:$0xff] }
 0xfe1   :  { %v8390_v43 = vpop.f32.mrf.mxu0  ;;  %9234 = vmatpush.msra.mxu1 %v9187_v44  ;;  %v9178_v28 = vld [vmem:[%s10907_s25 + $0x8] sm:$0xff] }
 0xfe2   :  { %v15505_v52 = vadd.f32 %v8390_v43, %v8280_v47  ;;  %v9215_v47 = vld [vmem:[%s10907_s25 + $0x130] sm:$0xff] }
 0xfe3   :  { %9235 = vmatpush.msra.mxu1 %v9186_v37 }
 0xfe5   :  { %v15507_v42 = vpop.f32.mrf.mxu2 }
 0xfe7   :  { %v8282_v41 = vpop.f32.mrf.mxu1  ;;  %v8328_v59 = vpop.f32.mrf.mxu3 }
 0xfe8   :  { %v8283_v40 = vadd.f32 %v8282_v41, %v8198_v58  ;;  %v15509_v8 = vadd.f32 %v8328_v59, %v8244_v33  ;;  %v9199_v33 = vld [vmem:[%s10907_s25 + $0xb0] sm:$0xff]  ;;  %v9216_v58 = vld [vmem:[%s10907_s25 + $0x138] sm:$0xff] }
 0xfe9   :  { %v8393_v60 = vpop.f32.mrf.mxu0  ;;  %9261 = vmatpush.msra.mxu2 %v9199_v33  ;;  %9283 = vmatpush.msra.mxu3 %v9216_v58  ;;  %v9177_v33 = vld [vmem:[%s10907_s25] sm:$0xff] }
 0xfea   :  { %v15511_v24 = vadd.f32 %v8393_v60, %v8283_v40  ;;  %v9185_v40 = vld [vmem:[%s10907_s25 + $0x40] sm:$0xff] }
 0xfeb   :  { %9262 = vmatpush.msra.mxu2 %v9198_v10  ;;  %9284 = vmatpush.msra.mxu3 %v9215_v47  ;;  %v9197_v60 = vld [vmem:[%s10907_s25 + $0xa0] sm:$0xff]  ;;  %v8303_v10 = vadd.f32 %v15507_v42, %v15499_v23  ;;  %s10231_s25 = sld [smem:[#allocation2 + $0x4]] }
 0xfec   :  { %9236 = vmatpush.msra.mxu1 %v9185_v40 }
 0xfed   :  { %v15513_v39 = vpop.f32.mrf.mxu2  ;;  %9263 = vmatpush.msra.mxu2 %v9197_v60  ;;  %9285 = vmatpush.msra.mxu3 %v9214_v31 }
 0xfee   :  { %9237 = vmatpush.msra.mxu1 %v9184_v49 }
 0xfef   :  { %v15515_v38 = vpop.f32.mrf.mxu1  ;;  %9264 = vmatpush.msra.mxu2 %v9196_v21  ;;  %9286 = vmatpush.msra.mxu3 %v9213_v15 }
 0xff0   :  { %9238 = vmatpush.msra.mxu1 %v9183_v0  ;;  %v8443_v47 = vadd.f32 %v15515_v38, %v8303_v10 }
 0xff1   :  { %9265 = vmatpush.msra.mxu2 %v9195_v13  ;;  %9287 = vmatpush.msra.mxu3 %v9212_v34  ;;  %v8306_v13 = vadd.f32 %v15513_v39, %v15501_v56 }
 0xff2   :  { %9239 = vmatpush.msra.mxu1 %v9182_v7 }
 0xff3   :  { %9266 = vmatpush.msra.mxu2 %v9194_v25  ;;  %9288 = vmatpush.msra.mxu3 %v9211_v35 }
 0xff4   :  { %9240 = vmatpush.msra.mxu1 %v9181_v22 }
 0xff5   :  { %9267 = vmatpush.msra.mxu2 %v9193_v32  ;;  %9289 = vmatpush.msra.mxu3 %v9210_v20 }
 0xff6   :  { %v15517_v9 = vpop.f32.mrf.mxu2  ;;  %v15519_v18 = vpop.f32.mrf.mxu3  ;;  %9241 = vmatpush.msra.mxu1 %v9180_v36 }
 0xff7   :  { %v15521_v29 = vpop.f32.mrf.mxu1  ;;  %v15523_v17 = vpop.f32.mrf.mxu0  ;;  %9290 = vmatpush.msra.mxu3 %v9209_v54  ;;  %v8444_v60 = vadd.f32 %v15517_v9, %v15503_v26 }
 0xff8   :  { %9242 = vmatpush.msra.mxu1 %v9179_v3  ;;  %v8560_v31 = vadd.f32 %v15523_v17, %v8443_v47  ;;  %v8446_v26 = vadd.f32 %v15521_v29, %v8306_v13 }
 0xffa   :  { %9243 = vmatpush.msra.mxu1 %v9178_v28 }
 0xffc   :  { %9244 = vmatpush.msra.mxu1 %v9177_v33 }
 0xffe   :  { %v15525_v51 = vpop.f32.mrf.mxu2  ;;  %v15527_v5 = vpop.f32.mrf.mxu3 }
 0xfff   :  { %v15529_v11 = vpop.f32.mrf.mxu1  ;;  %v15531_v57 = vpop.f32.mrf.mxu0  ;;  %v8562_v54 = vadd.f32 %v15527_v5, %v15511_v24 }
0x1000   :  { %v8561_v21 = vadd.f32 %v15529_v11, %v8444_v60  ;;  %v8559_v11 = vadd.f32 %v15519_v18, %v15505_v52  ;;  %v8563_v34 = vadd.f32 %v15531_v57, %v8446_v26 }
0x1006   :  { %v15538_v19 = vpop.f32.mrf.mxu2  ;;  %v15540_v55 = vpop.f32.mrf.mxu3 }
0x1007   :  { %v15542_v62 = vpop.f32.mrf.mxu1  ;;  %v15546_v16 = vpop.f32.mrf.mxu0  ;;  %v8659_v15 = vadd.f32 %v15540_v55, %v8560_v31  ;;  %v8447_v55 = vadd.f32 %v15525_v51, %v15509_v8  ;;  %v9158_v8 = vstv %s10231_s25 }
0x1008   :  { %v8660_v23 = vadd.f32 %v15546_v16, %v8561_v21  ;;  %v8658_v16 = vadd.f32 %v15538_v19, %v8559_v11  ;;  %v9143_v31 = vpop.permute.xlu0 %9142 }
0x100e   :  { %v15557_v53 = vpop.f32.mrf.mxu2  ;;  %v15559_v14 = vpop.f32.mrf.mxu3 }
0x100f   :  { %v15561_v4 = vpop.f32.mrf.mxu1  ;;  %v15566_v27 = vpop.f32.mrf.mxu0  ;;  %v8662_v29 = vadd.f32 %v15559_v14, %v8563_v34  ;;  %v8661_v10 = vadd.f32 %v15557_v53, %v8562_v54 }
0x1010   :  { %v8775_v18 = vadd.f32 %v15561_v4, %v8658_v16 }
0x1016   :  { %v15577_v43 = vpop.f32.mrf.mxu3  ;;  %v15579_v41 = vpop.f32.mrf.mxu2 }
0x1017   :  { %v15581_v59 = vpop.f32.mrf.mxu1  ;;  %v15586_v6 = vpop.f32.mrf.mxu0  ;;  %v8776_v42 = vadd.f32 %v15579_v41, %v8659_v15  ;;  %v8777_v9 = vadd.f32 %v15577_v43, %v8660_v23  ;;  %v8564_v41 = vadd.f32 %v15542_v62, %v8447_v55 }
0x1018   :  { %v8892_v20 = vadd.f32 %v15586_v6, %v8775_v18  ;;  %v8778_v24 = vadd.f32 %v15581_v59, %v8661_v10 }
0x1019   :  { %v8663_v52 = vadd.f32 %v15566_v27, %v8564_v41 }
0x101e   :  { %v15597_v63 = vpop.f32.mrf.mxu3  ;;  %v8749_v45 = vpop.f32.mrf.mxu2 }
0x101f   :  { %v8863_v1 = vpop.f32.mrf.mxu1  ;;  %v15602_v61 = vpop.f32.mrf.mxu0  ;;  %v8779_v57 = vadd.f32 %v8749_v45, %v8662_v29  ;;  %v8780_v19 = vadd.f32 %v15597_v63, %v8663_v52 }
0x1020   :  { %v8893_v17 = vadd.f32 %v8863_v1, %v8776_v42  ;;  %v9138_v1 = vpop.permute.xlu1 %9137  ;;  %v8895_v13 = vadd.f32 %v15602_v61, %v8778_v24 }
0x1026   :  { %v8957_v44 = vpop.f32.mrf.mxu3  ;;  %v8886_v40 = vpop.f32.mrf.mxu2 }
0x1027   :  { %v8866_v58 = vpop.f32.mrf.mxu1  ;;  %v8980_v37 = vpop.f32.mrf.mxu0  ;;  %v8894_v7 = vadd.f32 %v8886_v40, %v8777_v9  ;;  %v9009_v3 = vadd.f32 %v8957_v44, %v8892_v20 }
0x1028   :  { %v9010_v56 = vadd.f32 %v8980_v37, %v8893_v17  ;;  %v8896_v62 = vadd.f32 %v8866_v58, %v8779_v57 }
0x102e   :  { %v15615_v49 = vpop.f32.mrf.mxu3  ;;  %v8889_v39 = vpop.f32.mrf.mxu2 }
0x102f   :  { %v8983_v0 = vpop.f32.mrf.mxu0  ;;  %v9003_v38 = vpop.f32.mrf.mxu1  ;;  %v8897_v27 = vadd.f32 %v8889_v39, %v8780_v19  ;;  %v9012_v42 = vadd.f32 %v15615_v49, %v8895_v13 }
0x1030   :  { %v9011_v43 = vadd.f32 %v9003_v38, %v8894_v7  ;;  %v9013_v4 = vadd.f32 %v8983_v0, %v8896_v62 }
0x1036   :  { %v9097_v25 = vpop.f32.mrf.mxu3 }
0x1037   :  { %v9127_v35 = vadd.f32 %v9097_v25, %v9010_v56  ;;  %v9006_v28 = vpop.f32.mrf.mxu1  ;;  %v10301_v56 = vld [vmem:[%s10912_s21] ss:$0 sm:$0xff] }
0x1038   :  { %v9120_v51 = vpop.f32.mrf.mxu0  ;;  %v9014_v47 = vadd.f32 %v9006_v28, %v8897_v27 }
0x1039   :  { %v9146_v22 = vadd.f32 %v9138_v1, %v9127_v35  ;;  %v9128_v32 = vadd.f32 %v9120_v51, %v9011_v43 }
0x103b   :  { %vm9153_vm1 = vcmp.ge.f32.partialorder %v9146_v22, 0.0  ;;  %v9160_v36 = vmul.f32 %v9158_v8, %v9146_v22  ;;  %v9147_v14 = vadd.f32 %v9138_v1, %v9128_v32 }
0x103d   :  { %v9166_v33 = vsel %vm9153_vm1, %v9146_v22, %v9160_v36  ;;  %vm9154_vm2 = vcmp.ge.f32.partialorder %v9147_v14, 0.0  ;;  %v9161_v45 = vmul.f32 %v9158_v8, %v9147_v14  ;;  %v9074_v37 = vpop.f32.mrf.mxu2 }
0x103e   :  { %v9172_v6 = vadd.f32 %v9166_v33, %v15096_v30  ;;  %v9126_v63 = vadd.f32 %v9074_v37, %v9009_v3  ;;  %v9100_v58 = vpop.f32.mrf.mxu3 }
0x103f   :  { %v9167_v40 = vsel %vm9154_vm2, %v9147_v14, %v9161_v45  ;;  %v9130_v60 = vadd.f32 %v9100_v58, %v9013_v4 }
0x1040   :  { %v9173_v5 = vadd.f32 %v9167_v40, %v15104_v46  ;;  %v9145_v44 = vadd.f32 %v9138_v1, %v9126_v63  ;;  %v9123_v21 = vpop.f32.mrf.mxu0  ;;  %9268 = vmatmul.f32.vlgmr.msra.gmra.mxu2 %v9172_v6 }
0x1041   :  { %v9149_v15 = vadd.f32 %v9143_v31, %v9130_v60  ;;  %v9131_v0 = vadd.f32 %v9123_v21, %v9014_v47 }
0x1042   :  { %vm9152_vm3 = vcmp.ge.f32.partialorder %v9145_v44, 0.0  ;;  %v9159_v53 = vmul.f32 %v9158_v8, %v9145_v44  ;;  %9291 = vmatmul.f32.vlgmr.msra.gmra.mxu3 %v9173_v5 }
0x1043   :  { %vm9156_vm4 = vcmp.ge.f32.partialorder %v9149_v15, 0.0  ;;  %v9163_v30 = vmul.f32 %v9158_v8, %v9149_v15  ;;  %v9150_v23 = vadd.f32 %v9143_v31, %v9131_v0 }
0x1044   :  { %v9165_v38 = vsel %vm9152_vm3, %v9145_v44, %v9159_v53 }
0x1045   :  { %v9171_v59 = vadd.f32 %v9165_v38, %v15116_v2  ;;  %vm9157_vm5 = vcmp.ge.f32.partialorder %v9150_v23, 0.0  ;;  %v9164_v46 = vmul.f32 %v9158_v8, %v9150_v23  ;;  %v9077_v26 = vpop.f32.mrf.mxu2  ;;  %v9169_v9 = vsel %vm9156_vm4, %v9149_v15, %v9163_v30 }
0x1046   :  { %v9129_v17 = vadd.f32 %v9077_v26, %v9012_v42  ;;  %v9175_v11 = vadd.f32 %v9169_v9, %v15107_v48 }
0x1047   :  { %9245 = vmatmul.f32.vlgmr.msra.gmra.mxu1 %v9171_v59  ;;  %v9170_v61 = vsel %vm9157_vm5, %v9150_v23, %v9164_v46 }
0x1048   :  { %v9148_v55 = vadd.f32 %v9143_v31, %v9129_v17  ;;  %9271 = vmatmul.f32.gmra.mxu2 %v9175_v11  ;;  %v9176_v34 = vadd.f32 %v9170_v61, %v15122_v12 }
0x104a   :  { %vm9155_vm6 = vcmp.ge.f32.partialorder %v9148_v55, 0.0  ;;  %v9162_v49 = vmul.f32 %v9158_v8, %v9148_v55  ;;  %9294 = vmatmul.f32.gmra.mxu3 %v9176_v34 }
0x104c   :  { %v9168_v7 = vsel %vm9155_vm6, %v9148_v55, %v9162_v49 }
0x104d   :  { %v9174_v2 = vadd.f32 %v9168_v7, %v15119_v50 }
0x104f   :  { %9248 = vmatmul.f32.gmra.mxu1 %v9174_v2 }
0x10c3   :  { %v9269_v39 = vpop.f32.mrf.mxu2 }
0x10c4   :  { %v9246_v16 = vpop.f32.mrf.mxu1 }
0x10c5   :  { %v9247_v41 = vadd.f32 %v10301_v56, %v9246_v16  ;;  %v9292_v48 = vpop.f32.mrf.mxu3 }
0x10c7   :  { %v9270_v25 = vadd.f32 %v9269_v39, %v9247_v41 }
0x10c9   :  { %v9293_v29 = vadd.f32 %v9292_v48, %v9270_v25 }
0x10cb   :  { %9299 = vst.msk [vmem:[%s10920_s27] sm:$0xff] %vm9298_vm7, %v9293_v29  ;;  %v9272_v12 = vpop.f32.mrf.mxu2 }
0x10cc   :  { %v9249_v43 = vpop.f32.mrf.mxu1 }
0x10cd   :  { %v9250_v35 = vadd.f32 %v10301_v56, %v9249_v43  ;;  %v9295_v52 = vpop.f32.mrf.mxu3 }
0x10cf   :  { %v9273_v1 = vadd.f32 %v9272_v12, %v9250_v35 }
0x10d1   :  { %v9296_v18 = vadd.f32 %v9295_v52, %v9273_v1 }
0x10d3   :  { %9301 = vst.msk [vmem:[%s10920_s27 + $0x8] sm:$0xf] %vm9300_vm8, %v9296_v18 }
0x10d4   :  { %9306 = vsyncpa [#allocation3], 1 }

</bundles_post_ra>
